<compile_context>
chip_gen: v5e
topology: v5e:2x2
jax: 0.10.0
libtpu: 0.0.40
codegen_flags: <defaults>
</compile_context>

<pallas_src>
import functools

import jax
import jax.numpy as jnp
from jax import lax
from jax.experimental import pallas as pl
from jax.experimental.pallas import tpu as pltpu

INPUT_DIM = 32
LATENT_DIM = 64
BATCH = 256          # fills the MXU M dimension (256 on v6e/v7x)
PAD = 128            # lane-aligned padded width for input / latent / output
BN_EPS = 1e-5

ENC_DIMS = (512, 256, 128)
DEC_DIMS = (128, 256, 512)

# ---------------------------------------------------------------------------
# Packed vector slab layout: gammas, betas and the only biases that survive BN
# cancellation.  All offsets / sizes are multiples of 128 -> lane aligned.
# ---------------------------------------------------------------------------
_VEC_FIELDS = (
    ("g1", 512), ("be1", 512),
    ("g2", 256), ("be2", 256),
    ("g3", 128), ("be3", 128),
    ("b_ml", 2 * LATENT_DIM),      # [fc_mean bias | fc_log_var bias]
    ("dg1", 128), ("dbe1", 128),
    ("dg2", 256), ("dbe2", 256),
    ("dg3", 512), ("dbe3", 512),
    ("db4", PAD),                  # decoder fc4 bias, zero-padded to 128
)
VEC_OFF = {}
_off = 0
for _name, _size in _VEC_FIELDS:
    VEC_OFF[_name] = (_off, _size)
    _off += _size
VEC_TOTAL = _off                   # 3840


# ---------------------------------------------------------------------------
# Kernel
# ---------------------------------------------------------------------------
def _vec(vec_ref, name):
    off, size = VEC_OFF[name]
    return vec_ref[:, off:off + size]          # (1, size) f32, static slice


def _bn_relu(h, gamma, beta):
    """Training-mode BatchNorm1d (batch stats, biased var) fused with ReLU.

    Single reduction pass (mean & E[h^2]) + one FMA pass over the activation.
    """
    mu = jnp.mean(h, axis=0, keepdims=True)
    m2 = jnp.mean(h * h, axis=0, keepdims=True)
    var = jnp.maximum(m2 - mu * mu, 0.0)
    scale = gamma * lax.rsqrt(var + BN_EPS)
    shift = beta - mu * scale
    return jnp.maximum(h * scale + shift, 0.0)


def _mm(h_f32, w_ref):
    # bf16 x bf16 matmul with f32 accumulation (native MXU rate on all gens).
    return jnp.dot(h_f32.astype(jnp.bfloat16), w_ref[...],
                   preferred_element_type=jnp.float32)


def vae_kernel(x_ref, eps_ref, vec_ref,
               w1, w2, w3, wml, dw1, dw2, dw3, dw4,
               recon_ref, ml_ref):
    # ---- Encoder ----
    # (linear biases before BN are dropped: training-mode batch-mean
    #  subtraction cancels them exactly)
    h = _bn_relu(_mm(x_ref[...], w1), _vec(vec_ref, "g1"), _vec(vec_ref, "be1"))
    h = _bn_relu(_mm(h, w2), _vec(vec_ref, "g2"), _vec(vec_ref, "be2"))
    h = _bn_relu(_mm(h, w3), _vec(vec_ref, "g3"), _vec(vec_ref, "be3"))
    # TODO(synk): Dropout(0.3) applied as identity (eval-mode semantics).

    # fc_mean and fc_log_var fused into one 128-lane matmul: ml = [mean | logvar]
    ml = _mm(h, wml) + _vec(vec_ref, "b_ml")
    ml_ref[...] = ml

    # ---- Reparameterize (kept 128-lane dense) ----
    # roll by 64 on a 128-lane vector swaps halves: [mean|logvar] -> [logvar|mean]
    swapped = pltpu.roll(ml, shift=LATENT_DIM, axis=1)
    std_full = jnp.exp(0.5 * swapped)          # lanes [0,64) = exp(0.5*logvar) = std
    # eps is zero in lanes [64,128): lanes [0,64) of z_full = mean + eps*std;
    # the upper lanes hold logvar "garbage" that dw1's zero rows ignore.
    z_full = ml + eps_ref[...] * std_full

    # ---- Decoder ----
    d = _bn_relu(_mm(z_full, dw1), _vec(vec_ref, "dg1"), _vec(vec_ref, "dbe1"))
    d = _bn_relu(_mm(d, dw2), _vec(vec_ref, "dg2"), _vec(vec_ref, "dbe2"))
    d = _bn_relu(_mm(d, dw3), _vec(vec_ref, "dg3"), _vec(vec_ref, "dbe3"))
    # TODO(synk): Dropout(0.3) applied as identity (see above).
    logits = _mm(d, dw4) + _vec(vec_ref, "db4")

    # sigmoid via EUP exp + approximate EUP reciprocal (no VALU divide);
    # clamp to preserve the exact [0, 1] contract of sigmoid.
    recon = pl.reciprocal(1.0 + jnp.exp(-logits), approx=True)
    recon_ref[...] = jnp.clip(recon, 0.0, 1.0)


# ---------------------------------------------------------------------------
# Parameters (PyTorch-equivalent shapes/init) and packing for the kernel
# ---------------------------------------------------------------------------
def init_params(key, input_dim, latent_dim):
    """f32 parameters matching the PyTorch module; weights stored (in, out)."""
    def linear(k, fan_in, fan_out):
        kw, kb = jax.random.split(k)
        bound = 1.0 / jnp.sqrt(float(fan_in))
        w = jax.random.uniform(kw, (fan_in, fan_out), jnp.float32, -bound, bound)
        b = jax.random.uniform(kb, (1, fan_out), jnp.float32, -bound, bound)
        return w, b

    def bn(n):
        return jnp.ones((1, n), jnp.float32), jnp.zeros((1, n), jnp.float32)

    keys = jax.random.split(key, 9)
    p = {}
    enc_in = (input_dim,) + ENC_DIMS[:-1]
    for i, (k, fi, fo) in enumerate(zip(keys[:3], enc_in, ENC_DIMS), start=1):
        p[f"w{i}"], p[f"b{i}"] = linear(k, fi, fo)
        p[f"g{i}"], p[f"be{i}"] = bn(fo)
    p["wm"], p["bm"] = linear(keys[3], ENC_DIMS[-1], latent_dim)
    p["wl"], p["bl"] = linear(keys[4], ENC_DIMS[-1], latent_dim)
    dec_in = (latent_dim,) + DEC_DIMS[:-1]
    for i, (k, fi, fo) in enumerate(zip(keys[5:8], dec_in, DEC_DIMS), start=1):
        p[f"dw{i}"], p[f"db{i}"] = linear(k, fi, fo)
        p[f"dg{i}"], p[f"dbe{i}"] = bn(fo)
    p["dw4"], p["db4"] = linear(keys[8], DEC_DIMS[-1], input_dim)
    return p


def pack_params(p):
    """Pack / pad / cast parameters into the kernel's 9 input arrays."""
    def pad_rows(w, rows):
        return jnp.pad(w, ((0, rows - w.shape[0]), (0, 0)))

    def pad_cols(w, cols):
        return jnp.pad(w, ((0, 0), (0, cols - w.shape[1])))

    bf16 = lambda a: a.astype(jnp.bfloat16)

    w1 = bf16(pad_rows(p["w1"], PAD))                        # (128, 512)
    w2 = bf16(p["w2"])                                       # (512, 256)
    w3 = bf16(p["w3"])                                       # (256, 128)
    wml = bf16(jnp.concatenate([p["wm"], p["wl"]], axis=1))  # (128, 128)
    dw1 = bf16(pad_rows(p["dw1"], PAD))                      # (128, 128), rows 64.. zero
    dw2 = bf16(p["dw2"])                                     # (128, 256)
    dw3 = bf16(p["dw3"])                                     # (256, 512)
    dw4 = bf16(pad_cols(p["dw4"], PAD))                      # (512, 128), cols 32.. zero

    pieces = {
        "g1": p["g1"], "be1": p["be1"],
        "g2": p["g2"], "be2": p["be2"],
        "g3": p["g3"], "be3": p["be3"],
        "b_ml": jnp.concatenate([p["bm"], p["bl"]], axis=1),
        "dg1": p["dg1"], "dbe1": p["dbe1"],
        "dg2": p["dg2"], "dbe2": p["dbe2"],
        "dg3": p["dg3"], "dbe3": p["dbe3"],
        "db4": pad_cols(p["db4"], PAD),
    }
    vec = jnp.concatenate([pieces[name] for name, _ in _VEC_FIELDS], axis=1)
    assert vec.shape == (1, VEC_TOTAL)
    return (vec, w1, w2, w3, wml, dw1, dw2, dw3, dw4)


# ---------------------------------------------------------------------------
# Wrapper
# ---------------------------------------------------------------------------
@functools.partial(jax.jit, static_argnames=("input_dim", "latent_dim"))
def vae_forward(x, eps, packed, *, input_dim, latent_dim):
    batch = x.shape[0]
    x_pad = jnp.pad(x, ((0, 0), (0, PAD - input_dim)))
    eps_pad = jnp.pad(eps, ((0, 0), (0, PAD - latent_dim)))

    vmem = pl.BlockSpec(memory_space=pltpu.MemorySpace.VMEM)
    args = (x_pad, eps_pad, *packed)
    recon_pad, ml = pl.pallas_call(
        vae_kernel,
        out_shape=(
            jax.ShapeDtypeStruct((batch, PAD), jnp.float32),  # padded reconstruction
            jax.ShapeDtypeStruct((batch, PAD), jnp.float32),  # [mean | log_var]
        ),
        in_specs=[vmem] * len(args),
        out_specs=(vmem, vmem),
        compiler_params=pltpu.CompilerParams(vmem_limit_bytes=16 * 1024 * 1024),
    )(*args)

    recon = recon_pad[:, :input_dim]
    mean = ml[:, :latent_dim]
    log_var = ml[:, latent_dim:2 * latent_dim]
    return recon, mean, log_var


# ---------------------------------------------------------------------------
# Pure-JAX reference (same bf16-matmul / f32-BN precision regime)
# ---------------------------------------------------------------------------
def vae_reference(x, eps, p):
    def lin(h, w, b):
        return jnp.dot(h.astype(jnp.bfloat16), w.astype(jnp.bfloat16),
                       preferred_element_type=jnp.float32) + b

    def bn_relu(h, g, be):
        mu = jnp.mean(h, axis=0, keepdims=True)
        var = jnp.mean((h - mu) ** 2, axis=0, keepdims=True)
        return jnp.maximum((h - mu) * lax.rsqrt(var + BN_EPS) * g + be, 0.0)

    h = bn_relu(lin(x, p["w1"], p["b1"]), p["g1"], p["be1"])
    h = bn_relu(lin(h, p["w2"], p["b2"]), p["g2"], p["be2"])
    h = bn_relu(lin(h, p["w3"], p["b3"]), p["g3"], p["be3"])
    mean = lin(h, p["wm"], p["bm"])
    log_var = lin(h, p["wl"], p["bl"])
    z = mean + eps * jnp.exp(0.5 * log_var)
    d = bn_relu(lin(z, p["dw1"], p["db1"]), p["dg1"], p["dbe1"])
    d = bn_relu(lin(d, p["dw2"], p["db2"]), p["dg2"], p["dbe2"])
    d = bn_relu(lin(d, p["dw3"], p["db3"]), p["dg3"], p["dbe3"])
    recon = jax.nn.sigmoid(lin(d, p["dw4"], p["db4"]))
    return recon, mean, log_var


if __name__ == "__main__":
    key = jax.random.PRNGKey(0)
    k_x, k_eps, k_param = jax.random.split(key, 3)

    x = jax.random.normal(k_x, (BATCH, INPUT_DIM), jnp.float32)
    eps = jax.random.normal(k_eps, (BATCH, LATENT_DIM), jnp.float32)
    params = init_params(k_param, INPUT_DIM, LATENT_DIM)
    packed = pack_params(params)

    recon, mean, log_var = vae_forward(
        x, eps, packed, input_dim=INPUT_DIM, latent_dim=LATENT_DIM
    )
    jax.block_until_ready((recon, mean, log_var))

    assert recon.shape == (BATCH, INPUT_DIM)
    assert mean.shape == (BATCH, LATENT_DIM)
    assert log_var.shape == (BATCH, LATENT_DIM)
    assert bool(jnp.all(jnp.isfinite(recon)))
    assert bool(jnp.all((recon >= 0.0) & (recon <= 1.0)))

    # Loose numerical check against the pure-JAX reference (tolerance covers
    # BN fusion, bias-cancellation, padding and approx-reciprocal sigmoid).
    r_ref, m_ref, lv_ref = vae_reference(x, eps, params)
    assert float(jnp.max(jnp.abs(recon - r_ref))) < 5e-2
    assert bool(jnp.allclose(mean, m_ref, rtol=5e-2, atol=5e-2))
    assert bool(jnp.allclose(log_var, lv_ref, rtol=5e-2, atol=5e-2))

    print("KERNEL_OK")
</pallas_src>

<mosaic_0001>
module attributes {stable_mosaic.version = 11 : i64} {
  func.func @vae_kernel(%arg0: memref<256x128xf32, #tpu.memory_space<vmem>>, %arg1: memref<256x128xf32, #tpu.memory_space<vmem>>, %arg2: memref<1x3840xf32, #tpu.memory_space<vmem>>, %arg3: memref<128x512xbf16, #tpu.memory_space<vmem>>, %arg4: memref<512x256xbf16, #tpu.memory_space<vmem>>, %arg5: memref<256x128xbf16, #tpu.memory_space<vmem>>, %arg6: memref<128x128xbf16, #tpu.memory_space<vmem>>, %arg7: memref<128x128xbf16, #tpu.memory_space<vmem>>, %arg8: memref<128x256xbf16, #tpu.memory_space<vmem>>, %arg9: memref<256x512xbf16, #tpu.memory_space<vmem>>, %arg10: memref<512x128xbf16, #tpu.memory_space<vmem>>, %arg11: memref<256x128xf32, #tpu.memory_space<vmem>>, %arg12: memref<256x128xf32, #tpu.memory_space<vmem>>) attributes {dimension_semantics = [], scalar_prefetch = 0 : i64, scratch_operands = 0 : i64, tpu.core_type = #tpu.core_type<tc>} {
    %c0 = arith.constant 0 : index
    %c0_0 = arith.constant 0 : index
    %0 = vector.load %arg0[%c0, %c0_0] : memref<256x128xf32, #tpu.memory_space<vmem>>, vector<256x128xf32>
    %1 = arith.truncf %0 : vector<256x128xf32> to vector<256x128xbf16>
    %c0_1 = arith.constant 0 : index
    %c0_2 = arith.constant 0 : index
    %2 = vector.load %arg3[%c0_1, %c0_2] : memref<128x512xbf16, #tpu.memory_space<vmem>>, vector<128x512xbf16>
    %cst = arith.constant dense<0.000000e+00> : vector<256x512xf32>
    %3 = tpu.matmul %1, %2, %cst {dimension_numbers = #tpu.dot_dimension_numbers<[1], [0], [0], [1], [0, 0, 1, 1], [], []>} : vector<256x128xbf16>, vector<128x512xbf16>, vector<256x512xf32> -> vector<256x512xf32>
    %c0_3 = arith.constant 0 : index
    %c0_4 = arith.constant 0 : index
    %4 = vector.load %arg2[%c0_3, %c0_4] : memref<1x3840xf32, #tpu.memory_space<vmem>>, vector<1x512xf32>
    %c0_5 = arith.constant 0 : index
    %c512 = arith.constant 512 : index
    %5 = vector.load %arg2[%c0_5, %c512] : memref<1x3840xf32, #tpu.memory_space<vmem>>, vector<1x512xf32>
    %cst_6 = arith.constant dense<0.000000e+00> : vector<512xf32>
    %6 = vector.multi_reduction <add>, %3, %cst_6 [0] : vector<256x512xf32> to vector<512xf32>
    %7 = vector.shape_cast %6 : vector<512xf32> to vector<1x512xf32>
    %cst_7 = arith.constant 2.560000e+02 : f32
    %8 = vector.broadcast %cst_7 : f32 to vector<1x512xf32>
    %9 = arith.divf %7, %8 : vector<1x512xf32>
    %10 = arith.mulf %3, %3 : vector<256x512xf32>
    %cst_8 = arith.constant dense<0.000000e+00> : vector<512xf32>
    %11 = vector.multi_reduction <add>, %10, %cst_8 [0] : vector<256x512xf32> to vector<512xf32>
    %12 = vector.shape_cast %11 : vector<512xf32> to vector<1x512xf32>
    %cst_9 = arith.constant 2.560000e+02 : f32
    %13 = vector.broadcast %cst_9 : f32 to vector<1x512xf32>
    %14 = arith.divf %12, %13 : vector<1x512xf32>
    %15 = arith.mulf %9, %9 : vector<1x512xf32>
    %16 = arith.subf %14, %15 : vector<1x512xf32>
    %cst_10 = arith.constant 0.000000e+00 : f32
    %17 = vector.broadcast %cst_10 : f32 to vector<1x512xf32>
    %18 = arith.maximumf %16, %17 : vector<1x512xf32>
    %cst_11 = arith.constant 9.99999974E-6 : f32
    %19 = vector.broadcast %cst_11 : f32 to vector<1x512xf32>
    %20 = arith.addf %18, %19 : vector<1x512xf32>
    %21 = math.rsqrt %20 : vector<1x512xf32>
    %22 = arith.mulf %4, %21 : vector<1x512xf32>
    %23 = arith.mulf %9, %22 : vector<1x512xf32>
    %24 = arith.subf %5, %23 : vector<1x512xf32>
    %25 = vector.broadcast %22 : vector<1x512xf32> to vector<256x512xf32>
    %26 = arith.mulf %3, %25 : vector<256x512xf32>
    %27 = vector.broadcast %24 : vector<1x512xf32> to vector<256x512xf32>
    %28 = arith.addf %26, %27 : vector<256x512xf32>
    %cst_12 = arith.constant 0.000000e+00 : f32
    %29 = vector.broadcast %cst_12 : f32 to vector<256x512xf32>
    %30 = arith.maximumf %28, %29 : vector<256x512xf32>
    %31 = arith.truncf %30 : vector<256x512xf32> to vector<256x512xbf16>
    %c0_13 = arith.constant 0 : index
    %c0_14 = arith.constant 0 : index
    %32 = vector.load %arg4[%c0_13, %c0_14] : memref<512x256xbf16, #tpu.memory_space<vmem>>, vector<512x256xbf16>
    %cst_15 = arith.constant dense<0.000000e+00> : vector<256x256xf32>
    %33 = tpu.matmul %31, %32, %cst_15 {dimension_numbers = #tpu.dot_dimension_numbers<[1], [0], [0], [1], [0, 0, 1, 1], [], []>} : vector<256x512xbf16>, vector<512x256xbf16>, vector<256x256xf32> -> vector<256x256xf32>
    %c0_16 = arith.constant 0 : index
    %c1024 = arith.constant 1024 : index
    %34 = vector.load %arg2[%c0_16, %c1024] : memref<1x3840xf32, #tpu.memory_space<vmem>>, vector<1x256xf32>
    %c0_17 = arith.constant 0 : index
    %c1280 = arith.constant 1280 : index
    %35 = vector.load %arg2[%c0_17, %c1280] : memref<1x3840xf32, #tpu.memory_space<vmem>>, vector<1x256xf32>
    %cst_18 = arith.constant dense<0.000000e+00> : vector<256xf32>
    %36 = vector.multi_reduction <add>, %33, %cst_18 [0] : vector<256x256xf32> to vector<256xf32>
    %37 = vector.shape_cast %36 : vector<256xf32> to vector<1x256xf32>
    %cst_19 = arith.constant 2.560000e+02 : f32
    %38 = vector.broadcast %cst_19 : f32 to vector<1x256xf32>
    %39 = arith.divf %37, %38 : vector<1x256xf32>
    %40 = arith.mulf %33, %33 : vector<256x256xf32>
    %cst_20 = arith.constant dense<0.000000e+00> : vector<256xf32>
    %41 = vector.multi_reduction <add>, %40, %cst_20 [0] : vector<256x256xf32> to vector<256xf32>
    %42 = vector.shape_cast %41 : vector<256xf32> to vector<1x256xf32>
    %cst_21 = arith.constant 2.560000e+02 : f32
    %43 = vector.broadcast %cst_21 : f32 to vector<1x256xf32>
    %44 = arith.divf %42, %43 : vector<1x256xf32>
    %45 = arith.mulf %39, %39 : vector<1x256xf32>
    %46 = arith.subf %44, %45 : vector<1x256xf32>
    %cst_22 = arith.constant 0.000000e+00 : f32
    %47 = vector.broadcast %cst_22 : f32 to vector<1x256xf32>
    %48 = arith.maximumf %46, %47 : vector<1x256xf32>
    %cst_23 = arith.constant 9.99999974E-6 : f32
    %49 = vector.broadcast %cst_23 : f32 to vector<1x256xf32>
    %50 = arith.addf %48, %49 : vector<1x256xf32>
    %51 = math.rsqrt %50 : vector<1x256xf32>
    %52 = arith.mulf %34, %51 : vector<1x256xf32>
    %53 = arith.mulf %39, %52 : vector<1x256xf32>
    %54 = arith.subf %35, %53 : vector<1x256xf32>
    %55 = vector.broadcast %52 : vector<1x256xf32> to vector<256x256xf32>
    %56 = arith.mulf %33, %55 : vector<256x256xf32>
    %57 = vector.broadcast %54 : vector<1x256xf32> to vector<256x256xf32>
    %58 = arith.addf %56, %57 : vector<256x256xf32>
    %cst_24 = arith.constant 0.000000e+00 : f32
    %59 = vector.broadcast %cst_24 : f32 to vector<256x256xf32>
    %60 = arith.maximumf %58, %59 : vector<256x256xf32>
    %61 = arith.truncf %60 : vector<256x256xf32> to vector<256x256xbf16>
    %c0_25 = arith.constant 0 : index
    %c0_26 = arith.constant 0 : index
    %62 = vector.load %arg5[%c0_25, %c0_26] : memref<256x128xbf16, #tpu.memory_space<vmem>>, vector<256x128xbf16>
    %cst_27 = arith.constant dense<0.000000e+00> : vector<256x128xf32>
    %63 = tpu.matmul %61, %62, %cst_27 {dimension_numbers = #tpu.dot_dimension_numbers<[1], [0], [0], [1], [0, 0, 1, 1], [], []>} : vector<256x256xbf16>, vector<256x128xbf16>, vector<256x128xf32> -> vector<256x128xf32>
    %c0_28 = arith.constant 0 : index
    %c1536 = arith.constant 1536 : index
    %64 = vector.load %arg2[%c0_28, %c1536] : memref<1x3840xf32, #tpu.memory_space<vmem>>, vector<1x128xf32>
    %c0_29 = arith.constant 0 : index
    %c1664 = arith.constant 1664 : index
    %65 = vector.load %arg2[%c0_29, %c1664] : memref<1x3840xf32, #tpu.memory_space<vmem>>, vector<1x128xf32>
    %cst_30 = arith.constant dense<0.000000e+00> : vector<128xf32>
    %66 = vector.multi_reduction <add>, %63, %cst_30 [0] : vector<256x128xf32> to vector<128xf32>
    %67 = vector.shape_cast %66 : vector<128xf32> to vector<1x128xf32>
    %cst_31 = arith.constant 2.560000e+02 : f32
    %68 = vector.broadcast %cst_31 : f32 to vector<1x128xf32>
    %69 = arith.divf %67, %68 : vector<1x128xf32>
    %70 = arith.mulf %63, %63 : vector<256x128xf32>
    %cst_32 = arith.constant dense<0.000000e+00> : vector<128xf32>
    %71 = vector.multi_reduction <add>, %70, %cst_32 [0] : vector<256x128xf32> to vector<128xf32>
    %72 = vector.shape_cast %71 : vector<128xf32> to vector<1x128xf32>
    %cst_33 = arith.constant 2.560000e+02 : f32
    %73 = vector.broadcast %cst_33 : f32 to vector<1x128xf32>
    %74 = arith.divf %72, %73 : vector<1x128xf32>
    %75 = arith.mulf %69, %69 : vector<1x128xf32>
    %76 = arith.subf %74, %75 : vector<1x128xf32>
    %cst_34 = arith.constant 0.000000e+00 : f32
    %77 = vector.broadcast %cst_34 : f32 to vector<1x128xf32>
    %78 = arith.maximumf %76, %77 : vector<1x128xf32>
    %cst_35 = arith.constant 9.99999974E-6 : f32
    %79 = vector.broadcast %cst_35 : f32 to vector<1x128xf32>
    %80 = arith.addf %78, %79 : vector<1x128xf32>
    %81 = math.rsqrt %80 : vector<1x128xf32>
    %82 = arith.mulf %64, %81 : vector<1x128xf32>
    %83 = arith.mulf %69, %82 : vector<1x128xf32>
    %84 = arith.subf %65, %83 : vector<1x128xf32>
    %85 = vector.broadcast %82 : vector<1x128xf32> to vector<256x128xf32>
    %86 = arith.mulf %63, %85 : vector<256x128xf32>
    %87 = vector.broadcast %84 : vector<1x128xf32> to vector<256x128xf32>
    %88 = arith.addf %86, %87 : vector<256x128xf32>
    %cst_36 = arith.constant 0.000000e+00 : f32
    %89 = vector.broadcast %cst_36 : f32 to vector<256x128xf32>
    %90 = arith.maximumf %88, %89 : vector<256x128xf32>
    %91 = arith.truncf %90 : vector<256x128xf32> to vector<256x128xbf16>
    %c0_37 = arith.constant 0 : index
    %c0_38 = arith.constant 0 : index
    %92 = vector.load %arg6[%c0_37, %c0_38] : memref<128x128xbf16, #tpu.memory_space<vmem>>, vector<128x128xbf16>
    %cst_39 = arith.constant dense<0.000000e+00> : vector<256x128xf32>
    %93 = tpu.matmul %91, %92, %cst_39 {dimension_numbers = #tpu.dot_dimension_numbers<[1], [0], [0], [1], [0, 0, 1, 1], [], []>} : vector<256x128xbf16>, vector<128x128xbf16>, vector<256x128xf32> -> vector<256x128xf32>
    %c0_40 = arith.constant 0 : index
    %c1792 = arith.constant 1792 : index
    %94 = vector.load %arg2[%c0_40, %c1792] : memref<1x3840xf32, #tpu.memory_space<vmem>>, vector<1x128xf32>
    %95 = vector.broadcast %94 : vector<1x128xf32> to vector<256x128xf32>
    %96 = arith.addf %93, %95 : vector<256x128xf32>
    %c0_41 = arith.constant 0 : index
    %c0_42 = arith.constant 0 : index
    %97 = vector.load %arg12[%c0_41, %c0_42] : memref<256x128xf32, #tpu.memory_space<vmem>>, vector<256x128xf32>
    tpu.vector_store %arg12[%c0_41, %c0_42], %96 {strides = array<i32>} : memref<256x128xf32, #tpu.memory_space<vmem>>, vector<256x128xf32>,
    %c64_i32 = arith.constant 64 : i32
    %98 = tpu.dynamic_rotate %96 by %c64_i32 dim 1 : vector<256x128xf32>, i32 -> vector<256x128xf32>
    %cst_43 = arith.constant 5.000000e-01 : f32
    %99 = vector.broadcast %cst_43 : f32 to vector<256x128xf32>
    %100 = arith.mulf %99, %98 : vector<256x128xf32>
    %101 = math.exp %100 : vector<256x128xf32>
    %c0_44 = arith.constant 0 : index
    %c0_45 = arith.constant 0 : index
    %102 = vector.load %arg1[%c0_44, %c0_45] : memref<256x128xf32, #tpu.memory_space<vmem>>, vector<256x128xf32>
    %103 = arith.mulf %102, %101 : vector<256x128xf32>
    %104 = arith.addf %96, %103 : vector<256x128xf32>
    %105 = arith.truncf %104 : vector<256x128xf32> to vector<256x128xbf16>
    %c0_46 = arith.constant 0 : index
    %c0_47 = arith.constant 0 : index
    %106 = vector.load %arg7[%c0_46, %c0_47] : memref<128x128xbf16, #tpu.memory_space<vmem>>, vector<128x128xbf16>
    %cst_48 = arith.constant dense<0.000000e+00> : vector<256x128xf32>
    %107 = tpu.matmul %105, %106, %cst_48 {dimension_numbers = #tpu.dot_dimension_numbers<[1], [0], [0], [1], [0, 0, 1, 1], [], []>} : vector<256x128xbf16>, vector<128x128xbf16>, vector<256x128xf32> -> vector<256x128xf32>
    %c0_49 = arith.constant 0 : index
    %c1920 = arith.constant 1920 : index
    %108 = vector.load %arg2[%c0_49, %c1920] : memref<1x3840xf32, #tpu.memory_space<vmem>>, vector<1x128xf32>
    %c0_50 = arith.constant 0 : index
    %c2048 = arith.constant 2048 : index
    %109 = vector.load %arg2[%c0_50, %c2048] : memref<1x3840xf32, #tpu.memory_space<vmem>>, vector<1x128xf32>
    %cst_51 = arith.constant dense<0.000000e+00> : vector<128xf32>
    %110 = vector.multi_reduction <add>, %107, %cst_51 [0] : vector<256x128xf32> to vector<128xf32>
    %111 = vector.shape_cast %110 : vector<128xf32> to vector<1x128xf32>
    %cst_52 = arith.constant 2.560000e+02 : f32
    %112 = vector.broadcast %cst_52 : f32 to vector<1x128xf32>
    %113 = arith.divf %111, %112 : vector<1x128xf32>
    %114 = arith.mulf %107, %107 : vector<256x128xf32>
    %cst_53 = arith.constant dense<0.000000e+00> : vector<128xf32>
    %115 = vector.multi_reduction <add>, %114, %cst_53 [0] : vector<256x128xf32> to vector<128xf32>
    %116 = vector.shape_cast %115 : vector<128xf32> to vector<1x128xf32>
    %cst_54 = arith.constant 2.560000e+02 : f32
    %117 = vector.broadcast %cst_54 : f32 to vector<1x128xf32>
    %118 = arith.divf %116, %117 : vector<1x128xf32>
    %119 = arith.mulf %113, %113 : vector<1x128xf32>
    %120 = arith.subf %118, %119 : vector<1x128xf32>
    %cst_55 = arith.constant 0.000000e+00 : f32
    %121 = vector.broadcast %cst_55 : f32 to vector<1x128xf32>
    %122 = arith.maximumf %120, %121 : vector<1x128xf32>
    %cst_56 = arith.constant 9.99999974E-6 : f32
    %123 = vector.broadcast %cst_56 : f32 to vector<1x128xf32>
    %124 = arith.addf %122, %123 : vector<1x128xf32>
    %125 = math.rsqrt %124 : vector<1x128xf32>
    %126 = arith.mulf %108, %125 : vector<1x128xf32>
    %127 = arith.mulf %113, %126 : vector<1x128xf32>
    %128 = arith.subf %109, %127 : vector<1x128xf32>
    %129 = vector.broadcast %126 : vector<1x128xf32> to vector<256x128xf32>
    %130 = arith.mulf %107, %129 : vector<256x128xf32>
    %131 = vector.broadcast %128 : vector<1x128xf32> to vector<256x128xf32>
    %132 = arith.addf %130, %131 : vector<256x128xf32>
    %cst_57 = arith.constant 0.000000e+00 : f32
    %133 = vector.broadcast %cst_57 : f32 to vector<256x128xf32>
    %134 = arith.maximumf %132, %133 : vector<256x128xf32>
    %135 = arith.truncf %134 : vector<256x128xf32> to vector<256x128xbf16>
    %c0_58 = arith.constant 0 : index
    %c0_59 = arith.constant 0 : index
    %136 = vector.load %arg8[%c0_58, %c0_59] : memref<128x256xbf16, #tpu.memory_space<vmem>>, vector<128x256xbf16>
    %cst_60 = arith.constant dense<0.000000e+00> : vector<256x256xf32>
    %137 = tpu.matmul %135, %136, %cst_60 {dimension_numbers = #tpu.dot_dimension_numbers<[1], [0], [0], [1], [0, 0, 1, 1], [], []>} : vector<256x128xbf16>, vector<128x256xbf16>, vector<256x256xf32> -> vector<256x256xf32>
    %c0_61 = arith.constant 0 : index
    %c2176 = arith.constant 2176 : index
    %138 = vector.load %arg2[%c0_61, %c2176] : memref<1x3840xf32, #tpu.memory_space<vmem>>, vector<1x256xf32>
    %c0_62 = arith.constant 0 : index
    %c2432 = arith.constant 2432 : index
    %139 = vector.load %arg2[%c0_62, %c2432] : memref<1x3840xf32, #tpu.memory_space<vmem>>, vector<1x256xf32>
    %cst_63 = arith.constant dense<0.000000e+00> : vector<256xf32>
    %140 = vector.multi_reduction <add>, %137, %cst_63 [0] : vector<256x256xf32> to vector<256xf32>
    %141 = vector.shape_cast %140 : vector<256xf32> to vector<1x256xf32>
    %cst_64 = arith.constant 2.560000e+02 : f32
    %142 = vector.broadcast %cst_64 : f32 to vector<1x256xf32>
    %143 = arith.divf %141, %142 : vector<1x256xf32>
    %144 = arith.mulf %137, %137 : vector<256x256xf32>
    %cst_65 = arith.constant dense<0.000000e+00> : vector<256xf32>
    %145 = vector.multi_reduction <add>, %144, %cst_65 [0] : vector<256x256xf32> to vector<256xf32>
    %146 = vector.shape_cast %145 : vector<256xf32> to vector<1x256xf32>
    %cst_66 = arith.constant 2.560000e+02 : f32
    %147 = vector.broadcast %cst_66 : f32 to vector<1x256xf32>
    %148 = arith.divf %146, %147 : vector<1x256xf32>
    %149 = arith.mulf %143, %143 : vector<1x256xf32>
    %150 = arith.subf %148, %149 : vector<1x256xf32>
    %cst_67 = arith.constant 0.000000e+00 : f32
    %151 = vector.broadcast %cst_67 : f32 to vector<1x256xf32>
    %152 = arith.maximumf %150, %151 : vector<1x256xf32>
    %cst_68 = arith.constant 9.99999974E-6 : f32
    %153 = vector.broadcast %cst_68 : f32 to vector<1x256xf32>
    %154 = arith.addf %152, %153 : vector<1x256xf32>
    %155 = math.rsqrt %154 : vector<1x256xf32>
    %156 = arith.mulf %138, %155 : vector<1x256xf32>
    %157 = arith.mulf %143, %156 : vector<1x256xf32>
    %158 = arith.subf %139, %157 : vector<1x256xf32>
    %159 = vector.broadcast %156 : vector<1x256xf32> to vector<256x256xf32>
    %160 = arith.mulf %137, %159 : vector<256x256xf32>
    %161 = vector.broadcast %158 : vector<1x256xf32> to vector<256x256xf32>
    %162 = arith.addf %160, %161 : vector<256x256xf32>
    %cst_69 = arith.constant 0.000000e+00 : f32
    %163 = vector.broadcast %cst_69 : f32 to vector<256x256xf32>
    %164 = arith.maximumf %162, %163 : vector<256x256xf32>
    %165 = arith.truncf %164 : vector<256x256xf32> to vector<256x256xbf16>
    %c0_70 = arith.constant 0 : index
    %c0_71 = arith.constant 0 : index
    %166 = vector.load %arg9[%c0_70, %c0_71] : memref<256x512xbf16, #tpu.memory_space<vmem>>, vector<256x512xbf16>
    %cst_72 = arith.constant dense<0.000000e+00> : vector<256x512xf32>
    %167 = tpu.matmul %165, %166, %cst_72 {dimension_numbers = #tpu.dot_dimension_numbers<[1], [0], [0], [1], [0, 0, 1, 1], [], []>} : vector<256x256xbf16>, vector<256x512xbf16>, vector<256x512xf32> -> vector<256x512xf32>
    %c0_73 = arith.constant 0 : index
    %c2688 = arith.constant 2688 : index
    %168 = vector.load %arg2[%c0_73, %c2688] : memref<1x3840xf32, #tpu.memory_space<vmem>>, vector<1x512xf32>
    %c0_74 = arith.constant 0 : index
    %c3200 = arith.constant 3200 : index
    %169 = vector.load %arg2[%c0_74, %c3200] : memref<1x3840xf32, #tpu.memory_space<vmem>>, vector<1x512xf32>
    %cst_75 = arith.constant dense<0.000000e+00> : vector<512xf32>
    %170 = vector.multi_reduction <add>, %167, %cst_75 [0] : vector<256x512xf32> to vector<512xf32>
    %171 = vector.shape_cast %170 : vector<512xf32> to vector<1x512xf32>
    %cst_76 = arith.constant 2.560000e+02 : f32
    %172 = vector.broadcast %cst_76 : f32 to vector<1x512xf32>
    %173 = arith.divf %171, %172 : vector<1x512xf32>
    %174 = arith.mulf %167, %167 : vector<256x512xf32>
    %cst_77 = arith.constant dense<0.000000e+00> : vector<512xf32>
    %175 = vector.multi_reduction <add>, %174, %cst_77 [0] : vector<256x512xf32> to vector<512xf32>
    %176 = vector.shape_cast %175 : vector<512xf32> to vector<1x512xf32>
    %cst_78 = arith.constant 2.560000e+02 : f32
    %177 = vector.broadcast %cst_78 : f32 to vector<1x512xf32>
    %178 = arith.divf %176, %177 : vector<1x512xf32>
    %179 = arith.mulf %173, %173 : vector<1x512xf32>
    %180 = arith.subf %178, %179 : vector<1x512xf32>
    %cst_79 = arith.constant 0.000000e+00 : f32
    %181 = vector.broadcast %cst_79 : f32 to vector<1x512xf32>
    %182 = arith.maximumf %180, %181 : vector<1x512xf32>
    %cst_80 = arith.constant 9.99999974E-6 : f32
    %183 = vector.broadcast %cst_80 : f32 to vector<1x512xf32>
    %184 = arith.addf %182, %183 : vector<1x512xf32>
    %185 = math.rsqrt %184 : vector<1x512xf32>
    %186 = arith.mulf %168, %185 : vector<1x512xf32>
    %187 = arith.mulf %173, %186 : vector<1x512xf32>
    %188 = arith.subf %169, %187 : vector<1x512xf32>
    %189 = vector.broadcast %186 : vector<1x512xf32> to vector<256x512xf32>
    %190 = arith.mulf %167, %189 : vector<256x512xf32>
    %191 = vector.broadcast %188 : vector<1x512xf32> to vector<256x512xf32>
    %192 = arith.addf %190, %191 : vector<256x512xf32>
    %cst_81 = arith.constant 0.000000e+00 : f32
    %193 = vector.broadcast %cst_81 : f32 to vector<256x512xf32>
    %194 = arith.maximumf %192, %193 : vector<256x512xf32>
    %195 = arith.truncf %194 : vector<256x512xf32> to vector<256x512xbf16>
    %c0_82 = arith.constant 0 : index
    %c0_83 = arith.constant 0 : index
    %196 = vector.load %arg10[%c0_82, %c0_83] : memref<512x128xbf16, #tpu.memory_space<vmem>>, vector<512x128xbf16>
    %cst_84 = arith.constant dense<0.000000e+00> : vector<256x128xf32>
    %197 = tpu.matmul %195, %196, %cst_84 {dimension_numbers = #tpu.dot_dimension_numbers<[1], [0], [0], [1], [0, 0, 1, 1], [], []>} : vector<256x512xbf16>, vector<512x128xbf16>, vector<256x128xf32> -> vector<256x128xf32>
    %c0_85 = arith.constant 0 : index
    %c3712 = arith.constant 3712 : index
    %198 = vector.load %arg2[%c0_85, %c3712] : memref<1x3840xf32, #tpu.memory_space<vmem>>, vector<1x128xf32>
    %199 = vector.broadcast %198 : vector<1x128xf32> to vector<256x128xf32>
    %200 = arith.addf %197, %199 : vector<256x128xf32>
    %cst_86 = arith.constant 0.000000e+00 : f32
    %201 = vector.broadcast %cst_86 : f32 to vector<256x128xf32>
    %202 = arith.subf %201, %200 : vector<256x128xf32>
    %203 = math.exp %202 : vector<256x128xf32>
    %cst_87 = arith.constant 1.000000e+00 : f32
    %204 = vector.broadcast %cst_87 : f32 to vector<256x128xf32>
    %205 = arith.addf %204, %203 : vector<256x128xf32>
    %206 = tpu.reciprocal %205 {approx = true} : vector<256x128xf32> -> vector<256x128xf32>
    %cst_88 = arith.constant 0.000000e+00 : f32
    %cst_89 = arith.constant 1.000000e+00 : f32
    %207 = vector.broadcast %cst_88 : f32 to vector<256x128xf32>
    %208 = arith.maximumf %207, %206 : vector<256x128xf32>
    %209 = vector.broadcast %cst_89 : f32 to vector<256x128xf32>
    %210 = arith.minimumf %209, %208 : vector<256x128xf32>
    %c0_90 = arith.constant 0 : index
    %c0_91 = arith.constant 0 : index
    %211 = vector.load %arg11[%c0_90, %c0_91] : memref<256x128xf32, #tpu.memory_space<vmem>>, vector<256x128xf32>
    tpu.vector_store %arg11[%c0_90, %c0_91], %210 {strides = array<i32>} : memref<256x128xf32, #tpu.memory_space<vmem>>, vector<256x128xf32>,
    return
  }
}

</mosaic_0001>

<bundles_post_ra>
// kernel: vae_forward.1
= control target key start
LH: loop header
LB: loop body
LE: loop exit
PB: predicated region body
PF: predicated region fallthrough
CT: control target
= control target key end

     0   :  { %18 = vsyncpa [#allocation3], 0  ;;  %s17118_s0 = inlined_call_operand.vmem [shape: f32[256,128], index: 0, kind: input, shape index: {}]   ;;  %s17119_s1 = inlined_call_operand.vmem [shape: f32[256,128], index: 1, kind: input, shape index: {}]   ;;  %s17120_s2 = inlined_call_operand.hbm [shape: f32[1,3840], index: 2, kind: input, shape index: {}]   ;;  %s17121_s3 = inlined_call_operand.vmem [shape: bf16[128,512], index: 3, kind: input, shape index: {}]   ;;  %s17122_s4 = inlined_call_operand.vmem [shape: bf16[512,256], index: 4, kind: input, shape index: {}]   ;;  %s17123_s5 = inlined_call_operand.hbm [shape: bf16[256,128], index: 5, kind: input, shape index: {}]   ;;  %s17124_s6 = inlined_call_operand.vmem [shape: bf16[128,128], index: 6, kind: input, shape index: {}]   ;;  %s17125_s7 = inlined_call_operand.hbm [shape: bf16[128,128], index: 7, kind: input, shape index: {}]   ;;  %s17126_s8 = inlined_call_operand.hbm [shape: bf16[128,256], index: 8, kind: input, shape index: {}]   ;;  %s17127_s9 = inlined_call_operand.vmem [shape: bf16[256,512], index: 9, kind: input, shape index: {}]   ;;  %s17128_s10 = inlined_call_operand.vmem [shape: bf16[512,128], index: 10, kind: input, shape index: {}]   ;;  %s17129_s11 = inlined_call_operand.vmem [shape: f32[256,128], index: 11, kind: output, shape index: {0}]   ;;  %s17130_s12 = inlined_call_operand.vmem [shape: f32[256,128], index: 12, kind: output, shape index: {1}]  }
   0x1   :  { %19 = vsyncpa [#allocation5], 0  ;;  %s44_s23 = sshll.u32 %s17123_s5, 4  ;;  %s45_s23 = int_to_ptr.hbm [resolvable:$true] %s44_s23 }
   0x2   :  { %20 = vsyncpa [#allocation8], 0  ;;  %s9974_s24 = smov [#allocation4]   ;;  %s30_s28 = sshll.u32 %s17120_s2, 4  ;;  %s31_s28 = int_to_ptr.hbm [resolvable:$true] %s30_s28 }
   0x3   :  { %s46_s25 = sshll.u32 %s9974_s24, 4  ;;  %s9975_s29 = smov 64   ;;  %s47_s25 = int_to_ptr.vmem [resolvable:$true] %s46_s25 }
   0x4   :  { %s9976_s30 = smov 4   ;;  %s9977_s13 = smov [#allocation2]  }
   0x5   :  { %52 = dma.hbm_to_vmem [thread:$0]  %s45_s23, 2048, %s47_s25, [#allocation5], %s9975_s29, %s9975_s29, %s9976_s30  }
   0x6   :  { %s32_s14 = sshll.u32 %s9977_s13, 4  ;;  %s59_s5 = sshll.u32 %s17125_s7, 4  ;;  %s33_s14 = int_to_ptr.vmem [resolvable:$true] %s32_s14  ;;  %s60_s5 = int_to_ptr.hbm [resolvable:$true] %s59_s5 }
   0x7   :  { %35 = dma.hbm_to_vmem [thread:$0]  %s31_s28, 480, %s33_s14, [#allocation3]  }
   0x8   :  { %s72_s19 = sshll.u32 %s17126_s8, 4  ;;  %s9978_s2 = smov [#allocation6]   ;;  %s73_s19 = int_to_ptr.hbm [resolvable:$true] %s72_s19 }
   0x9   :  { %s61_s20 = sshll.u32 %s9978_s2, 4  ;;  %s9979_s21 = smov [#allocation7]   ;;  %s62_s20 = int_to_ptr.vmem [resolvable:$true] %s61_s20 }
   0xa   :  { %67 = dma.hbm_to_vmem [thread:$0]  %s60_s5, 1024, %s62_s20, [#allocation5], %s9975_s29, %s9975_s29, %s9976_s30  }
   0xb   :  { %s74_s22 = sshll.u32 %s9979_s21, 4  ;;  %s9980_s23 = smov 128   ;;  %s75_s22 = int_to_ptr.vmem [resolvable:$true] %s74_s22 }
   0xc   :  { %s9981_s24 = smov 8  }
   0xd   :  { %80 = dma.hbm_to_vmem [thread:$0]  %s73_s19, 2048, %s75_s22, [#allocation8], %s9980_s23, %s9980_s23, %s9981_s24  }
   0xe   :  { %9968 = dma.done.wait [#allocation3], 480  }
   0xf   :  { %9969 = vsyncadd [#allocation3], 4294966816 }
  0x10   :  { %9970 = dma.done.wait [#allocation5], 3072  }
  0x11   :  { %9971 = vsyncadd [#allocation5], 4294964224 }
  0x12   :  { %9972 = dma.done.wait [#allocation8], 2048  }
  0x13   :  { %9973 = vsyncadd [#allocation8], 4294965248  ;;  %v8536_v0 = vld [vmem:[%s17121_s3 + $0xe0] sm:$0xf]  ;;  %v9412_v1 = vld [vmem:[%s17121_s3 + $0xec] sm:$0xf0] }
  0x14   :  { %v9410_v2 = vld [vmem:[%s17121_s3 + $0xe4] sm:$0xf]  ;;  %v8537_v3 = vor.u32 %v9412_v1, %v8536_v0  ;;  %v8538_v4 = vld [vmem:[%s17121_s3 + $0xf0] sm:$0xf0]  ;;  %v8520_v5 = vld [vmem:[%s17121_s3 + $0xc0] sm:$0xf] }
  0x15   :  { %v9408_v6 = vld [vmem:[%s17121_s3 + $0xcc] sm:$0xf0]  ;;  %v8541_v7 = vor.u32 %v9410_v2, %v8538_v4  ;;  %v9406_v8 = vld [vmem:[%s17121_s3 + $0xc4] sm:$0xf]  ;;  %v8522_v9 = vld [vmem:[%s17121_s3 + $0xd0] sm:$0xf0] }
  0x16   :  { %341 = vmatpush.bf16.msra.mxu0 %v8537_v3  ;;  %9622 = vmatpush.bf16.msra.mxu2 %v8537_v3  ;;  %v8521_v10 = vor.u32 %v9408_v6, %v8520_v5  ;;  %v8525_v11 = vor.u32 %v9406_v8, %v8522_v9  ;;  %v8504_v12 = vld [vmem:[%s17121_s3 + $0xa0] sm:$0xf]  ;;  %v9404_v13 = vld [vmem:[%s17121_s3 + $0xac] sm:$0xf0]  ;;  %v9402_v14 = vld [vmem:[%s17121_s3 + $0xa4] sm:$0xf] }
  0x17   :  { %430 = vmatpush.bf16.msra.mxu1 %v8541_v7  ;;  %9630 = vmatpush.bf16.msra.mxu3 %v8541_v7  ;;  %v8506_v15 = vld [vmem:[%s17121_s3 + $0xb0] sm:$0xf0]  ;;  %v8505_v16 = vor.u32 %v9404_v13, %v8504_v12  ;;  %v8488_v18 = vld [vmem:[%s17121_s3 + $0x80] sm:$0xf]  ;;  %v9400_v19 = vld [vmem:[%s17121_s3 + $0x8c] sm:$0xf0] }
  0x18   :  { %v8509_v17 = vor.u32 %v9402_v14, %v8506_v15  ;;  %v9398_v20 = vld [vmem:[%s17121_s3 + $0x84] sm:$0xf]  ;;  %v8490_v21 = vld [vmem:[%s17121_s3 + $0x90] sm:$0xf0]  ;;  %v8489_v22 = vor.u32 %v9400_v19, %v8488_v18  ;;  %v8472_v24 = vld [vmem:[%s17121_s3 + $0x60] sm:$0xf] }
  0x19   :  { %v8493_v23 = vor.u32 %v9398_v20, %v8490_v21  ;;  %v9396_v25 = vld [vmem:[%s17121_s3 + $0x6c] sm:$0xf0]  ;;  %v9394_v26 = vld [vmem:[%s17121_s3 + $0x64] sm:$0xf]  ;;  %v8474_v27 = vld [vmem:[%s17121_s3 + $0x70] sm:$0xf0] }
  0x1a   :  { %342 = vmatpush.bf16.msra.mxu0 %v8521_v10  ;;  %9623 = vmatpush.bf16.msra.mxu2 %v8521_v10  ;;  %v8473_v28 = vor.u32 %v9396_v25, %v8472_v24  ;;  %v8477_v29 = vor.u32 %v9394_v26, %v8474_v27  ;;  %v8456_v30 = vld [vmem:[%s17121_s3 + $0x40] sm:$0xf]  ;;  %v9392_v31 = vld [vmem:[%s17121_s3 + $0x4c] sm:$0xf0]  ;;  %v9390_v32 = vld [vmem:[%s17121_s3 + $0x44] sm:$0xf] }
  0x1b   :  { %431 = vmatpush.bf16.msra.mxu1 %v8525_v11  ;;  %9631 = vmatpush.bf16.msra.mxu3 %v8525_v11  ;;  %v8458_v33 = vld [vmem:[%s17121_s3 + $0x50] sm:$0xf0]  ;;  %v8457_v34 = vor.u32 %v9392_v31, %v8456_v30  ;;  %v8440_v36 = vld [vmem:[%s17121_s3 + $0x20] sm:$0xf]  ;;  %v9388_v37 = vld [vmem:[%s17121_s3 + $0x2c] sm:$0xf0] }
  0x1c   :  { %v8461_v35 = vor.u32 %v9390_v32, %v8458_v33  ;;  %v9386_v38 = vld [vmem:[%s17121_s3 + $0x24] sm:$0xf]  ;;  %v8442_v39 = vld [vmem:[%s17121_s3 + $0x30] sm:$0xf0]  ;;  %v8441_v40 = vor.u32 %v9388_v37, %v8440_v36  ;;  %v8424_v42 = vld [vmem:[%s17121_s3] sm:$0xf] }
  0x1d   :  { %v8445_v41 = vor.u32 %v9386_v38, %v8442_v39  ;;  %v9384_v43 = vld [vmem:[%s17121_s3 + $0xc] sm:$0xf0]  ;;  %v9382_v44 = vld [vmem:[%s17121_s3 + $0x4] sm:$0xf]  ;;  %v8426_v45 = vld [vmem:[%s17121_s3 + $0x10] sm:$0xf0] }
  0x1e   :  { %343 = vmatpush.bf16.msra.mxu0 %v8505_v16  ;;  %9624 = vmatpush.bf16.msra.mxu2 %v8505_v16  ;;  %v101_v46 = vld [vmem:[%s17118_s0] sm:$0xff]  ;;  %v8544_v47 = vld [vmem:[%s17121_s3 + $0xe8] sm:$0xf]  ;;  %v9413_v48 = vld [vmem:[%s17121_s3 + $0xf4] sm:$0xf0]  ;;  %v8425_v51 = vor.u32 %v9384_v43, %v8424_v42  ;;  %v8429_v55 = vor.u32 %v9382_v44, %v8426_v45  ;;  %vm1203_vm11 = vcmask 1042434  }
  0x1f   :  { %432 = vmatpush.bf16.msra.mxu1 %v8509_v17  ;;  %9632 = vmatpush.bf16.msra.mxu3 %v8509_v17  ;;  %v9411_v49 = vld [vmem:[%s17121_s3 + $0xec] sm:$0xf]  ;;  %v8546_v50 = vld [vmem:[%s17121_s3 + $0xf8] sm:$0xf0]  ;;  %v117_v53 = vld [vmem:[%s17118_s0 + $0x80] sm:$0xff]  ;;  %v8545_v56 = vor.u32 %v9413_v48, %v8544_v47  ;;  %vm1201_vm13 = vcmask 1040384  }
  0x20   :  { %v102_v52 = vld [vmem:[%s17118_s0 + $0x8] sm:$0xff]  ;;  %v8549_v57 = vor.u32 %v9411_v49, %v8546_v50  ;;  %v9409_v61 = vld [vmem:[%s17121_s3 + $0xd4] sm:$0xf0]  ;;  %v8530_v63 = vld [vmem:[%s17121_s3 + $0xd8] sm:$0xf0]  ;;  %vm1205_vm15 = vcmask 1041408  }
  0x21   :  { %v118_v54 = vld [vmem:[%s17118_s0 + $0x88] sm:$0xff]  ;;  %v10187_v59 = vpack.c.bf16 %v102_v52, %v101_v46  ;;  %v9405_v3 = vld [vmem:[%s17121_s3 + $0xb4] sm:$0xf0]  ;;  %v8514_v5 = vld [vmem:[%s17121_s3 + $0xb8] sm:$0xf0] }
  0x22   :  { %344 = vmatpush.bf16.msra.mxu0 %v8489_v22  ;;  %9625 = vmatpush.bf16.msra.mxu2 %v8489_v22  ;;  %v8528_v58 = vld [vmem:[%s17121_s3 + $0xc8] sm:$0xf]  ;;  %v10189_v60 = vpack.c.bf16 %v118_v54, %v117_v53  ;;  %v9407_v62 = vld [vmem:[%s17121_s3 + $0xcc] sm:$0xf]  ;;  %v103_v8 = vld [vmem:[%s17118_s0 + $0x10] sm:$0xff] }
  0x23   :  { %433 = vmatpush.bf16.msra.mxu1 %v8493_v23  ;;  %9633 = vmatpush.bf16.msra.mxu3 %v8493_v23  ;;  %v8529_v0 = vor.u32 %v9409_v61, %v8528_v58  ;;  %v8533_v1 = vor.u32 %v9407_v62, %v8530_v63  ;;  %v8512_v2 = vld [vmem:[%s17121_s3 + $0xa8] sm:$0xf]  ;;  %v9403_v4 = vld [vmem:[%s17121_s3 + $0xac] sm:$0xf]  ;;  %v104_v9 = vld [vmem:[%s17118_s0 + $0x18] sm:$0xff] }
  0x24   :  { %v8513_v6 = vor.u32 %v9405_v3, %v8512_v2  ;;  %v8517_v7 = vor.u32 %v9403_v4, %v8514_v5  ;;  %v119_v10 = vld [vmem:[%s17118_s0 + $0x90] sm:$0xff]  ;;  %v120_v11 = vld [vmem:[%s17118_s0 + $0x98] sm:$0xff]  ;;  %v10228_v12 = vpack.c.bf16 %v104_v9, %v103_v8  ;;  %v8496_v14 = vld [vmem:[%s17121_s3 + $0x88] sm:$0xf] }
  0x25   :  { %v10230_v13 = vpack.c.bf16 %v120_v11, %v119_v10  ;;  %v9401_v15 = vld [vmem:[%s17121_s3 + $0x94] sm:$0xf0]  ;;  %v9399_v16 = vld [vmem:[%s17121_s3 + $0x8c] sm:$0xf]  ;;  %v8498_v18 = vld [vmem:[%s17121_s3 + $0x98] sm:$0xf0] }
  0x26   :  { %345 = vmatpush.bf16.msra.mxu0 %v8473_v28  ;;  %9626 = vmatpush.bf16.msra.mxu2 %v8473_v28  ;;  %v8497_v17 = vor.u32 %v9401_v15, %v8496_v14  ;;  %v8501_v19 = vor.u32 %v9399_v16, %v8498_v18  ;;  %v105_v20 = vld [vmem:[%s17118_s0 + $0x20] sm:$0xff]  ;;  %v106_v21 = vld [vmem:[%s17118_s0 + $0x28] sm:$0xff]  ;;  %v9397_v27 = vld [vmem:[%s17121_s3 + $0x74] sm:$0xf0] }
  0x27   :  { %434 = vmatpush.bf16.msra.mxu1 %v8477_v29  ;;  %9634 = vmatpush.bf16.msra.mxu3 %v8477_v29  ;;  %v121_v22 = vld [vmem:[%s17118_s0 + $0xa0] sm:$0xff]  ;;  %v122_v23 = vld [vmem:[%s17118_s0 + $0xa8] sm:$0xff]  ;;  %v10260_v24 = vpack.c.bf16 %v106_v21, %v105_v20  ;;  %v8482_v30 = vld [vmem:[%s17121_s3 + $0x78] sm:$0xf0] }
  0x28   :  { %v10262_v25 = vpack.c.bf16 %v122_v23, %v121_v22  ;;  %v8480_v26 = vld [vmem:[%s17121_s3 + $0x68] sm:$0xf]  ;;  %v9395_v28 = vld [vmem:[%s17121_s3 + $0x6c] sm:$0xf]  ;;  %v107_v32 = vld [vmem:[%s17118_s0 + $0x30] sm:$0xff] }
  0x29   :  { %v8481_v29 = vor.u32 %v9397_v27, %v8480_v26  ;;  %v8485_v31 = vor.u32 %v9395_v28, %v8482_v30  ;;  %v108_v33 = vld [vmem:[%s17118_s0 + $0x38] sm:$0xff]  ;;  %v8464_v38 = vld [vmem:[%s17121_s3 + $0x48] sm:$0xf]  ;;  %v109_v44 = vld [vmem:[%s17118_s0 + $0x40] sm:$0xff] }
  0x2a   :  { %346 = vmatpush.bf16.msra.mxu0 %v8457_v34  ;;  %9627 = vmatpush.bf16.msra.mxu2 %v8457_v34  ;;  %v123_v34 = vld [vmem:[%s17118_s0 + $0xb0] sm:$0xff]  ;;  %v10292_v36 = vpack.c.bf16 %v108_v33, %v107_v32  ;;  %v9393_v39 = vld [vmem:[%s17121_s3 + $0x54] sm:$0xf0]  ;;  %v8466_v42 = vld [vmem:[%s17121_s3 + $0x58] sm:$0xf0] }
  0x2b   :  { %435 = vmatpush.bf16.msra.mxu1 %v8461_v35  ;;  %9635 = vmatpush.bf16.msra.mxu3 %v8461_v35  ;;  %v124_v35 = vld [vmem:[%s17118_s0 + $0xb8] sm:$0xff]  ;;  %v110_v45 = vld [vmem:[%s17118_s0 + $0x48] sm:$0xff]  ;;  %v125_v46 = vld [vmem:[%s17118_s0 + $0xc0] sm:$0xff] }
  0x2c   :  { %v10294_v37 = vpack.c.bf16 %v124_v35, %v123_v34  ;;  %v126_v47 = vld [vmem:[%s17118_s0 + $0xc8] sm:$0xff]  ;;  %v10324_v48 = vpack.c.bf16 %v110_v45, %v109_v44  ;;  %v8450_v54 = vld [vmem:[%s17121_s3 + $0x38] sm:$0xf0]  ;;  %v127_v58 = vld [vmem:[%s17118_s0 + $0xd0] sm:$0xff] }
  0x2d   :  { %v10326_v49 = vpack.c.bf16 %v126_v47, %v125_v46  ;;  %v8448_v50 = vld [vmem:[%s17121_s3 + $0x28] sm:$0xf]  ;;  %v9387_v52 = vld [vmem:[%s17121_s3 + $0x2c] sm:$0xf]  ;;  %v128_v61 = vld [vmem:[%s17118_s0 + $0xd8] sm:$0xff] }
  0x2e   :  { %347 = vmatpush.bf16.msra.mxu0 %v8441_v40  ;;  %9628 = vmatpush.bf16.msra.mxu2 %v8441_v40  ;;  %v9391_v40 = vld [vmem:[%s17121_s3 + $0x4c] sm:$0xf]  ;;  %v10358_v63 = vpack.c.bf16 %v128_v61, %v127_v58  ;;  %v8434_v4 = vld [vmem:[%s17121_s3 + $0x18] sm:$0xf0]  ;;  %v129_v8 = vld [vmem:[%s17118_s0 + $0xe0] sm:$0xff] }
  0x2f   :  { %436 = vmatpush.bf16.msra.mxu1 %v8445_v41  ;;  %9636 = vmatpush.bf16.msra.mxu3 %v8445_v41  ;;  %v8465_v41 = vor.u32 %v9393_v39, %v8464_v38  ;;  %v8469_v43 = vor.u32 %v9391_v40, %v8466_v42  ;;  %v9383_v2 = vld [vmem:[%s17121_s3 + $0xc] sm:$0xf]  ;;  %v115_v14 = vld [vmem:[%s17118_s0 + $0x70] sm:$0xff]  ;;  %v116_v15 = vld [vmem:[%s17118_s0 + $0x78] sm:$0xff] }
  0x30   :  { %v8437_v5 = vor.u32 %v9383_v2, %v8434_v4  ;;  %v130_v9 = vld [vmem:[%s17118_s0 + $0xe8] sm:$0xff]  ;;  %v131_v16 = vld [vmem:[%s17118_s0 + $0xf0] sm:$0xff]  ;;  %v140_v18 = vpack.c.bf16 %v116_v15, %v115_v14 }
  0x31   :  { %v10388_v11 = vpack.c.bf16 %v130_v9, %v129_v8  ;;  %v8800_v8 = vld [vmem:[%s17122_s4 + $0x1f0] sm:$0xf] }
  0x32   :  { %348 = vmatpush.bf16.msra.mxu0 %v8425_v51  ;;  %9629 = vmatpush.bf16.msra.mxu2 %v8425_v51  ;;  %v9389_v51 = vld [vmem:[%s17121_s3 + $0x34] sm:$0xf0] }
  0x33   :  { %437 = vmatpush.bf16.msra.mxu1 %v8429_v55  ;;  %9637 = vmatpush.bf16.msra.mxu3 %v8429_v55  ;;  %v8449_v53 = vor.u32 %v9389_v51, %v8448_v50  ;;  %v8453_v55 = vor.u32 %v9387_v52, %v8450_v54 }
  0x35   :  { %349 = vmatmul.bf16.vlgmr.msra.gmra.mxu0 %v10187_v59  ;;  %389 = vmatmul.bf16.vlgmr.msra.gmra.mxu2 %v10189_v60 }
  0x36   :  { %519 = vmatpush.bf16.msrb.mxu2 %v8545_v56  ;;  %438 = vmatmul.bf16.vlgmr.msra.gmra.mxu1 %v10187_v59  ;;  %v111_v56 = vld [vmem:[%s17118_s0 + $0x50] sm:$0xff] }
  0x37   :  { %608 = vmatpush.bf16.msrb.mxu3 %v8549_v57  ;;  %v112_v57 = vld [vmem:[%s17118_s0 + $0x58] sm:$0xff] }
  0x38   :  { %478 = vmatmul.bf16.vlgmr.msra.gmra.mxu3 %v10189_v60  ;;  %v10356_v62 = vpack.c.bf16 %v112_v57, %v111_v56 }
  0x3a   :  { %520 = vmatpush.bf16.msrb.mxu2 %v8529_v0  ;;  %v8432_v0 = vld [vmem:[%s17121_s3 + $0x8] sm:$0xf] }
  0x3b   :  { %609 = vmatpush.bf16.msrb.mxu3 %v8533_v1  ;;  %v9385_v1 = vld [vmem:[%s17121_s3 + $0x14] sm:$0xf0] }
  0x3c   :  { %v8433_v3 = vor.u32 %v9385_v1, %v8432_v0 }
  0x3e   :  { %521 = vmatpush.bf16.msrb.mxu2 %v8513_v6  ;;  %v113_v6 = vld [vmem:[%s17118_s0 + $0x60] sm:$0xff] }
  0x3f   :  { %610 = vmatpush.bf16.msrb.mxu3 %v8517_v7  ;;  %v114_v7 = vld [vmem:[%s17118_s0 + $0x68] sm:$0xff] }
  0x40   :  { %v139_v10 = vpack.c.bf16 %v114_v7, %v113_v6 }
  0x42   :  { %522 = vmatpush.bf16.msrb.mxu2 %v8497_v17  ;;  %v132_v17 = vld [vmem:[%s17118_s0 + $0xf8] sm:$0xff] }
  0x43   :  { %611 = vmatpush.bf16.msrb.mxu3 %v8501_v19  ;;  %v10404_v19 = vpack.c.bf16 %v132_v17, %v131_v16 }
  0x45   :  { %354 = vmatmul.bf16.gmra.mxu0 %v10228_v12  ;;  %394 = vmatmul.bf16.gmra.mxu2 %v10230_v13 }
  0x46   :  { %443 = vmatmul.bf16.gmra.mxu1 %v10228_v12  ;;  %523 = vmatpush.bf16.msrb.mxu2 %v8481_v29 }
  0x47   :  { %612 = vmatpush.bf16.msrb.mxu3 %v8485_v31 }
  0x48   :  { %483 = vmatmul.bf16.gmra.mxu3 %v10230_v13 }
  0x4a   :  { %524 = vmatpush.bf16.msrb.mxu2 %v8465_v41 }
  0x4b   :  { %613 = vmatpush.bf16.msrb.mxu3 %v8469_v43 }
  0x4e   :  { %525 = vmatpush.bf16.msrb.mxu2 %v8449_v53 }
  0x4f   :  { %614 = vmatpush.bf16.msrb.mxu3 %v8453_v55 }
  0x52   :  { %526 = vmatpush.bf16.msrb.mxu2 %v8433_v3 }
  0x53   :  { %615 = vmatpush.bf16.msrb.mxu3 %v8437_v5  ;;  %v9461_v5 = vld [vmem:[%s17122_s4 + $0x174] sm:$0xf0] }
  0x55   :  { %359 = vmatmul.bf16.gmra.mxu0 %v10260_v24  ;;  %399 = vmatmul.bf16.gmra.mxu2 %v10262_v25 }
  0x56   :  { %448 = vmatmul.bf16.gmra.mxu1 %v10260_v24 }
  0x58   :  { %488 = vmatmul.bf16.gmra.mxu3 %v10262_v25 }
  0x65   :  { %364 = vmatmul.bf16.gmra.mxu0 %v10292_v36  ;;  %404 = vmatmul.bf16.gmra.mxu2 %v10294_v37 }
  0x66   :  { %453 = vmatmul.bf16.gmra.mxu1 %v10292_v36 }
  0x68   :  { %493 = vmatmul.bf16.gmra.mxu3 %v10294_v37 }
  0x75   :  { %369 = vmatmul.bf16.gmra.mxu0 %v10324_v48  ;;  %409 = vmatmul.bf16.gmra.mxu2 %v10326_v49 }
  0x76   :  { %458 = vmatmul.bf16.gmra.mxu1 %v10324_v48 }
  0x78   :  { %498 = vmatmul.bf16.gmra.mxu3 %v10326_v49 }
  0x85   :  { %374 = vmatmul.bf16.gmra.mxu0 %v10356_v62  ;;  %414 = vmatmul.bf16.gmra.mxu2 %v10358_v63 }
  0x86   :  { %463 = vmatmul.bf16.gmra.mxu1 %v10356_v62 }
  0x88   :  { %503 = vmatmul.bf16.gmra.mxu3 %v10358_v63 }
  0x95   :  { %379 = vmatmul.bf16.gmra.mxu0 %v139_v10  ;;  %419 = vmatmul.bf16.gmra.mxu2 %v10388_v11 }
  0x96   :  { %468 = vmatmul.bf16.gmra.mxu1 %v139_v10 }
  0x98   :  { %508 = vmatmul.bf16.gmra.mxu3 %v10388_v11 }
  0xa5   :  { %384 = vmatmul.bf16.gmra.mxu0 %v140_v18  ;;  %424 = vmatmul.bf16.gmra.mxu2 %v10404_v19 }
  0xa6   :  { %473 = vmatmul.bf16.gmra.mxu1 %v140_v18 }
  0xa8   :  { %513 = vmatmul.bf16.gmra.mxu3 %v10404_v19 }
  0xb2   :  { %v10496_v58 = vpop.f32.mrf.mxu0 }
  0xb3   :  { %v10490_v55 = vpop.f32.mrf.mxu1  ;;  %17597 = vst [vmem:[#allocation49_spill] sm:$0xff] %v10496_v58 }
  0xb4   :  { %17594 = vst [vmem:[#allocation46_spill] sm:$0xff] %v10490_v55 }
  0xb5   :  { %527 = vmatmul.bf16.vlgmr.msrb.gmra.mxu2 %v10187_v59 }
  0xb8   :  { %616 = vmatmul.bf16.vlgmr.msrb.gmra.mxu3 %v10187_v59  ;;  %v10410_v20 = vpop.f32.mrf.mxu2 }
  0xb9   :  { %17560 = vst [vmem:[#allocation12_spill] sm:$0xff] %v10410_v20 }
  0xba   :  { %v10506_v0 = vpop.f32.mrf.mxu0 }
  0xbb   :  { %v10412_v21 = vpop.f32.mrf.mxu3  ;;  %17601 = vst [vmem:[#allocation53_spill] sm:$0xff] %v10506_v0 }
  0xbc   :  { %17561 = vst [vmem:[#allocation13_spill] sm:$0xff] %v10412_v21 }
  0xc0   :  { %v10414_v22 = vpop.f32.mrf.mxu2 }
  0xc1   :  { %17562 = vst [vmem:[#allocation14_spill] sm:$0xff] %v10414_v22 }
  0xc2   :  { %v10524_v6 = vpop.f32.mrf.mxu0 }
  0xc3   :  { %v10416_v23 = vpop.f32.mrf.mxu3  ;;  %17606 = vst [vmem:[#allocation58_spill] sm:$0xff] %v10524_v6 }
  0xc4   :  { %17563 = vst [vmem:[#allocation15_spill] sm:$0xff] %v10416_v23 }
  0xc5   :  { %532 = vmatmul.bf16.gmra.mxu2 %v10228_v12 }
  0xc8   :  { %621 = vmatmul.bf16.gmra.mxu3 %v10228_v12  ;;  %v10420_v26 = vpop.f32.mrf.mxu2 }
  0xc9   :  { %17564 = vst [vmem:[#allocation16_spill] sm:$0xff] %v10420_v26 }
  0xca   :  { %v10540_v17 = vpop.f32.mrf.mxu0 }
  0xcb   :  { %v10422_v27 = vpop.f32.mrf.mxu3  ;;  %17611 = vst [vmem:[#allocation63_spill] sm:$0xff] %v10540_v17 }
  0xcc   :  { %17565 = vst [vmem:[#allocation17_spill] sm:$0xff] %v10422_v27 }
  0xd0   :  { %v10424_v28 = vpop.f32.mrf.mxu2 }
  0xd1   :  { %17566 = vst [vmem:[#allocation18_spill] sm:$0xff] %v10424_v28 }
  0xd3   :  { %v10426_v29 = vpop.f32.mrf.mxu3 }
  0xd4   :  { %17567 = vst [vmem:[#allocation19_spill] sm:$0xff] %v10426_v29 }
  0xd5   :  { %537 = vmatmul.bf16.gmra.mxu2 %v10260_v24 }
  0xd8   :  { %626 = vmatmul.bf16.gmra.mxu3 %v10260_v24  ;;  %v10430_v59 = vpop.f32.mrf.mxu2 }
  0xd9   :  { %17568 = vst [vmem:[#allocation20_spill] sm:$0xff] %v10430_v59 }
  0xdb   :  { %v10432_v30 = vpop.f32.mrf.mxu3 }
  0xdc   :  { %17569 = vst [vmem:[#allocation21_spill] sm:$0xff] %v10432_v30 }
  0xe0   :  { %v10434_v31 = vpop.f32.mrf.mxu2 }
  0xe1   :  { %17570 = vst [vmem:[#allocation22_spill] sm:$0xff] %v10434_v31 }
  0xe3   :  { %v10436_v32 = vpop.f32.mrf.mxu3 }
  0xe4   :  { %17571 = vst [vmem:[#allocation23_spill] sm:$0xff] %v10436_v32 }
  0xe5   :  { %542 = vmatmul.bf16.gmra.mxu2 %v10292_v36 }
  0xe8   :  { %631 = vmatmul.bf16.gmra.mxu3 %v10292_v36  ;;  %v10440_v12 = vpop.f32.mrf.mxu2 }
  0xe9   :  { %17572 = vst [vmem:[#allocation24_spill] sm:$0xff] %v10440_v12 }
  0xeb   :  { %v10442_v33 = vpop.f32.mrf.mxu3 }
  0xec   :  { %17573 = vst [vmem:[#allocation25_spill] sm:$0xff] %v10442_v33 }
  0xf0   :  { %v10444_v34 = vpop.f32.mrf.mxu2 }
  0xf1   :  { %17574 = vst [vmem:[#allocation26_spill] sm:$0xff] %v10444_v34 }
  0xf3   :  { %v10446_v35 = vpop.f32.mrf.mxu3 }
  0xf4   :  { %17575 = vst [vmem:[#allocation27_spill] sm:$0xff] %v10446_v35 }
  0xf5   :  { %547 = vmatmul.bf16.gmra.mxu2 %v10324_v48 }
  0xf8   :  { %636 = vmatmul.bf16.gmra.mxu3 %v10324_v48  ;;  %v10450_v24 = vpop.f32.mrf.mxu2 }
  0xf9   :  { %17576 = vst [vmem:[#allocation28_spill] sm:$0xff] %v10450_v24 }
  0xfb   :  { %v10452_v38 = vpop.f32.mrf.mxu3 }
  0xfc   :  { %17577 = vst [vmem:[#allocation29_spill] sm:$0xff] %v10452_v38 }
 0x100   :  { %v10454_v39 = vpop.f32.mrf.mxu2 }
 0x101   :  { %17578 = vst [vmem:[#allocation30_spill] sm:$0xff] %v10454_v39 }
 0x103   :  { %v10456_v40 = vpop.f32.mrf.mxu3 }
 0x104   :  { %17579 = vst [vmem:[#allocation31_spill] sm:$0xff] %v10456_v40 }
 0x105   :  { %552 = vmatmul.bf16.gmra.mxu2 %v10356_v62 }
 0x108   :  { %641 = vmatmul.bf16.gmra.mxu3 %v10356_v62  ;;  %v10460_v36 = vpop.f32.mrf.mxu2 }
 0x109   :  { %17580 = vst [vmem:[#allocation32_spill] sm:$0xff] %v10460_v36 }
 0x10b   :  { %v10462_v41 = vpop.f32.mrf.mxu3 }
 0x10c   :  { %17581 = vst [vmem:[#allocation33_spill] sm:$0xff] %v10462_v41 }
 0x110   :  { %v10464_v42 = vpop.f32.mrf.mxu2 }
 0x111   :  { %17582 = vst [vmem:[#allocation34_spill] sm:$0xff] %v10464_v42 }
 0x113   :  { %v10466_v43 = vpop.f32.mrf.mxu3 }
 0x114   :  { %17583 = vst [vmem:[#allocation35_spill] sm:$0xff] %v10466_v43 }
 0x115   :  { %557 = vmatmul.bf16.gmra.mxu2 %v139_v10 }
 0x118   :  { %646 = vmatmul.bf16.gmra.mxu3 %v139_v10  ;;  %v10468_v44 = vpop.f32.mrf.mxu2 }
 0x119   :  { %17584 = vst [vmem:[#allocation36_spill] sm:$0xff] %v10468_v44 }
 0x11b   :  { %v10470_v45 = vpop.f32.mrf.mxu3 }
 0x11c   :  { %17585 = vst [vmem:[#allocation37_spill] sm:$0xff] %v10470_v45 }
 0x120   :  { %v10472_v46 = vpop.f32.mrf.mxu2 }
 0x121   :  { %17586 = vst [vmem:[#allocation38_spill] sm:$0xff] %v10472_v46 }
 0x123   :  { %v10474_v47 = vpop.f32.mrf.mxu3 }
 0x124   :  { %17587 = vst [vmem:[#allocation39_spill] sm:$0xff] %v10474_v47 }
 0x125   :  { %562 = vmatmul.bf16.gmra.mxu2 %v140_v18 }
 0x128   :  { %651 = vmatmul.bf16.gmra.mxu3 %v140_v18  ;;  %v10476_v48 = vpop.f32.mrf.mxu2 }
 0x129   :  { %17588 = vst [vmem:[#allocation40_spill] sm:$0xff] %v10476_v48 }
 0x12b   :  { %v10478_v50 = vpop.f32.mrf.mxu3 }
 0x12c   :  { %17589 = vst [vmem:[#allocation41_spill] sm:$0xff] %v10478_v50 }
 0x130   :  { %v10480_v51 = vpop.f32.mrf.mxu2 }
 0x131   :  { %17590 = vst [vmem:[#allocation42_spill] sm:$0xff] %v10480_v51  ;;  %v866_v51 = vmul.f32 %v10524_v6, %v10524_v6 }
 0x133   :  { %v10482_v52 = vpop.f32.mrf.mxu3 }
 0x134   :  { %17591 = vst [vmem:[#allocation43_spill] sm:$0xff] %v10482_v52 }
 0x135   :  { %567 = vmatmul.bf16.gmra.mxu2 %v10189_v60 }
 0x138   :  { %656 = vmatmul.bf16.gmra.mxu3 %v10189_v60  ;;  %v10486_v53 = vpop.f32.mrf.mxu2  ;;  %v10504_v60 = vpop.f32.mrf.mxu1 }
 0x139   :  { %17592 = vst [vmem:[#allocation44_spill] sm:$0xff] %v10486_v53 }
 0x13a   :  { %17600 = vst [vmem:[#allocation52_spill] sm:$0xff] %v10504_v60 }
 0x13b   :  { %v10488_v54 = vpop.f32.mrf.mxu3 }
 0x13c   :  { %17593 = vst [vmem:[#allocation45_spill] sm:$0xff] %v10488_v54 }
 0x140   :  { %v10492_v56 = vpop.f32.mrf.mxu2  ;;  %v10512_v3 = vpop.f32.mrf.mxu1 }
 0x141   :  { %17595 = vst [vmem:[#allocation47_spill] sm:$0xff] %v10492_v56 }
 0x142   :  { %17604 = vst [vmem:[#allocation56_spill] sm:$0xff] %v10512_v3 }
 0x143   :  { %v10494_v57 = vpop.f32.mrf.mxu3 }
 0x144   :  { %17596 = vst [vmem:[#allocation48_spill] sm:$0xff] %v10494_v57 }
 0x145   :  { %572 = vmatmul.bf16.gmra.mxu2 %v10230_v13 }
 0x148   :  { %661 = vmatmul.bf16.gmra.mxu3 %v10230_v13  ;;  %v10500_v61 = vpop.f32.mrf.mxu2  ;;  %v8736_v13 = vld [vmem:[%s17122_s4 + $0x170] sm:$0xf]  ;;  %v10534_v14 = vpop.f32.mrf.mxu1 }
 0x149   :  { %17598 = vst [vmem:[#allocation50_spill] sm:$0xff] %v10500_v61  ;;  %v8737_v9 = vor.u32 %v9461_v5, %v8736_v13  ;;  %v10550_v5 = vpop.f32.mrf.mxu0 }
 0x14a   :  { %17608 = vst [vmem:[#allocation60_spill] sm:$0xff] %v10534_v14 }
 0x14b   :  { %v10502_v62 = vpop.f32.mrf.mxu3  ;;  %2253 = vmatpush.bf16.msra.mxu2 %v8737_v9  ;;  %17615 = vst [vmem:[#allocation67_spill] sm:$0xff] %v10550_v5 }
 0x14c   :  { %17599 = vst [vmem:[#allocation51_spill] sm:$0xff] %v10502_v62 }
 0x150   :  { %v10508_v1 = vpop.f32.mrf.mxu2  ;;  %v10544_v18 = vpop.f32.mrf.mxu1 }
 0x151   :  { %17602 = vst [vmem:[#allocation54_spill] sm:$0xff] %v10508_v1  ;;  %v9473_v1 = vld [vmem:[%s17122_s4 + $0x1d4] sm:$0xf0] }
 0x152   :  { %17612 = vst [vmem:[#allocation64_spill] sm:$0xff] %v10544_v18 }
 0x153   :  { %v10510_v2 = vpop.f32.mrf.mxu3 }
 0x154   :  { %17603 = vst [vmem:[#allocation55_spill] sm:$0xff] %v10510_v2 }
 0x155   :  { %577 = vmatmul.bf16.gmra.mxu2 %v10262_v25 }
 0x158   :  { %666 = vmatmul.bf16.gmra.mxu3 %v10262_v25  ;;  %v10516_v4 = vpop.f32.mrf.mxu2  ;;  %v9477_v25 = vld [vmem:[%s17122_s4 + $0x1f4] sm:$0xf0]  ;;  %v10556_v9 = vpop.f32.mrf.mxu1 }
 0x159   :  { %17605 = vst [vmem:[#allocation57_spill] sm:$0xff] %v10516_v4  ;;  %v8801_v10 = vor.u32 %v9477_v25, %v8800_v8 }
 0x15a   :  { %17618 = vst [vmem:[#allocation70_spill] sm:$0xff] %v10556_v9 }
 0x15b   :  { %v10526_v7 = vpop.f32.mrf.mxu3  ;;  %2342 = vmatpush.bf16.msra.mxu3 %v8801_v10  ;;  %v8728_v10 = vld [vmem:[%s17122_s4 + $0x160] sm:$0xf] }
 0x15c   :  { %17607 = vst [vmem:[#allocation59_spill] sm:$0xff] %v10526_v7 }
 0x160   :  { %v10536_v15 = vpop.f32.mrf.mxu2 }
 0x161   :  { %17609 = vst [vmem:[#allocation61_spill] sm:$0xff] %v10536_v15 }
 0x163   :  { %v10538_v16 = vpop.f32.mrf.mxu3 }
 0x164   :  { %17610 = vst [vmem:[#allocation62_spill] sm:$0xff] %v10538_v16 }
 0x165   :  { %582 = vmatmul.bf16.gmra.mxu2 %v10294_v37 }
 0x168   :  { %671 = vmatmul.bf16.gmra.mxu3 %v10294_v37  ;;  %v10546_v7 = vpop.f32.mrf.mxu2  ;;  %v9459_v37 = vld [vmem:[%s17122_s4 + $0x164] sm:$0xf0] }
 0x169   :  { %17613 = vst [vmem:[#allocation65_spill] sm:$0xff] %v10546_v7  ;;  %v8729_v16 = vor.u32 %v9459_v37, %v8728_v10  ;;  %v10578_v10 = vpop.f32.mrf.mxu1 }
 0x16a   :  { %17622 = vst [vmem:[#allocation74_spill] sm:$0xff] %v10578_v10 }
 0x16b   :  { %v10548_v13 = vpop.f32.mrf.mxu3  ;;  %2254 = vmatpush.bf16.msra.mxu2 %v8729_v16 }
 0x16c   :  { %17614 = vst [vmem:[#allocation66_spill] sm:$0xff] %v10548_v13  ;;  %v10572_v13 = vpop.f32.mrf.mxu0 }
 0x16d   :  { %17619 = vst [vmem:[#allocation71_spill] sm:$0xff] %v10572_v13 }
 0x170   :  { %v10552_v8 = vpop.f32.mrf.mxu2 }
 0x171   :  { %17616 = vst [vmem:[#allocation68_spill] sm:$0xff] %v10552_v8  ;;  %v9475_v8 = vld [vmem:[%s17122_s4 + $0x1e4] sm:$0xf0]  ;;  %v10587_v2 = vpop.f32.mrf.mxu1 }
 0x172   :  { %17626 = vst [vmem:[#allocation78_spill] sm:$0xff] %v10587_v2 }
 0x173   :  { %v10554_v25 = vpop.f32.mrf.mxu3 }
 0x174   :  { %17617 = vst [vmem:[#allocation69_spill] sm:$0xff] %v10554_v25  ;;  %v8792_v25 = vld [vmem:[%s17122_s4 + $0x1e0] sm:$0xf]  ;;  %v10582_v16 = vpop.f32.mrf.mxu0 }
 0x175   :  { %587 = vmatmul.bf16.gmra.mxu2 %v10326_v49  ;;  %v8793_v7 = vor.u32 %v9475_v8, %v8792_v25  ;;  %17624 = vst [vmem:[#allocation76_spill] sm:$0xff] %v10582_v16 }
 0x177   :  { %2343 = vmatpush.bf16.msra.mxu3 %v8793_v7 }
 0x178   :  { %676 = vmatmul.bf16.gmra.mxu3 %v10326_v49  ;;  %v10574_v15 = vpop.f32.mrf.mxu2 }
 0x179   :  { %17620 = vst [vmem:[#allocation72_spill] sm:$0xff] %v10574_v15  ;;  %v10596_v7 = vpop.f32.mrf.mxu1 }
 0x17a   :  { %17630 = vst [vmem:[#allocation82_spill] sm:$0xff] %v10596_v7 }
 0x17b   :  { %v10576_v4 = vpop.f32.mrf.mxu3 }
 0x17c   :  { %17621 = vst [vmem:[#allocation73_spill] sm:$0xff] %v10576_v4  ;;  %v10594_v4 = vpop.f32.mrf.mxu0 }
 0x17d   :  { %17629 = vst [vmem:[#allocation81_spill] sm:$0xff] %v10594_v4 }
 0x180   :  { %v10580_v49 = vpop.f32.mrf.mxu2 }
 0x181   :  { %17623 = vst [vmem:[#allocation75_spill] sm:$0xff] %v10580_v49  ;;  %v10622_v61 = vpop.f32.mrf.mxu1 }
 0x182   :  { %17636 = vst [vmem:[#allocation88_spill] sm:$0xff] %v10622_v61 }
 0x183   :  { %v10584_v37 = vpop.f32.mrf.mxu3 }
 0x184   :  { %17625 = vst [vmem:[#allocation77_spill] sm:$0xff] %v10584_v37  ;;  %v8720_v37 = vld [vmem:[%s17122_s4 + $0x150] sm:$0xf]  ;;  %v10614_v62 = vpop.f32.mrf.mxu0 }
 0x185   :  { %592 = vmatmul.bf16.gmra.mxu2 %v10358_v63  ;;  %17633 = vst [vmem:[#allocation85_spill] sm:$0xff] %v10614_v62 }
 0x188   :  { %681 = vmatmul.bf16.gmra.mxu3 %v10358_v63  ;;  %v10590_v8 = vpop.f32.mrf.mxu2  ;;  %v9457_v63 = vld [vmem:[%s17122_s4 + $0x154] sm:$0xf0] }
 0x189   :  { %17627 = vst [vmem:[#allocation79_spill] sm:$0xff] %v10590_v8  ;;  %v8721_v8 = vor.u32 %v9457_v63, %v8720_v37 }
 0x18b   :  { %v10592_v25 = vpop.f32.mrf.mxu3  ;;  %2255 = vmatpush.bf16.msra.mxu2 %v8721_v8  ;;  %v10636_v8 = vpop.f32.mrf.mxu1 }
 0x18c   :  { %17628 = vst [vmem:[#allocation80_spill] sm:$0xff] %v10592_v25  ;;  %v8784_v25 = vld [vmem:[%s17122_s4 + $0x1d0] sm:$0xf]  ;;  %v10624_v37 = vpop.f32.mrf.mxu0 }
 0x18d   :  { %17637 = vst [vmem:[#allocation89_spill] sm:$0xff] %v10624_v37 }
 0x18e   :  { %17640 = vst [vmem:[#allocation92_spill] sm:$0xff] %v10636_v8 }
 0x190   :  { %v10598_v15 = vpop.f32.mrf.mxu2 }
 0x191   :  { %17631 = vst [vmem:[#allocation83_spill] sm:$0xff] %v10598_v15  ;;  %v8785_v15 = vor.u32 %v9473_v1, %v8784_v25  ;;  %v736_v1 = vadd.f32 %v10504_v60, %v10490_v55 }
 0x193   :  { %v10600_v49 = vpop.f32.mrf.mxu3  ;;  %2344 = vmatpush.bf16.msra.mxu3 %v8785_v15  ;;  %v863_v15 = vmul.f32 %v10504_v60, %v10504_v60  ;;  %v867_v60 = vmul.f32 %v10512_v3, %v10512_v3 }
 0x194   :  { %17632 = vst [vmem:[#allocation84_spill] sm:$0xff] %v10600_v49  ;;  %v10652_v53 = vpop.f32.mrf.mxu0 }
 0x195   :  { %597 = vmatmul.bf16.gmra.mxu2 %v10388_v11  ;;  %17642 = vst [vmem:[#allocation94_spill] sm:$0xff] %v10652_v53 }
 0x198   :  { %686 = vmatmul.bf16.gmra.mxu3 %v10388_v11  ;;  %v10618_v49 = vpop.f32.mrf.mxu2  ;;  %v859_v11 = vmul.f32 %v10490_v55, %v10490_v55 }
 0x199   :  { %17634 = vst [vmem:[#allocation86_spill] sm:$0xff] %v10618_v49  ;;  %v862_v49 = vmul.f32 %v10506_v0, %v10506_v0 }
 0x19a   :  { %v1023_v55 = vadd.f32 %v863_v15, %v859_v11 }
 0x19b   :  { %v10620_v54 = vpop.f32.mrf.mxu3 }
 0x19c   :  { %17635 = vst [vmem:[#allocation87_spill] sm:$0xff] %v10620_v54  ;;  %v737_v54 = vadd.f32 %v736_v1, %v10512_v3 }
 0x19e   :  { %v738_v1 = vadd.f32 %v737_v54, %v10534_v14  ;;  %v870_v54 = vmul.f32 %v10540_v17, %v10540_v17 }
 0x1a0   :  { %v10626_v63 = vpop.f32.mrf.mxu2  ;;  %v739_v11 = vadd.f32 %v738_v1, %v10544_v18 }
 0x1a1   :  { %17638 = vst [vmem:[#allocation90_spill] sm:$0xff] %v10626_v63  ;;  %v858_v63 = vmul.f32 %v10496_v58, %v10496_v58 }
 0x1a3   :  { %v10630_v25 = vpop.f32.mrf.mxu3 }
 0x1a4   :  { %17639 = vst [vmem:[#allocation91_spill] sm:$0xff] %v10630_v25  ;;  %v699_v25 = vadd.f32 %v10506_v0, %v10496_v58  ;;  %v986_v0 = vadd.f32 %v862_v49, %v858_v63  ;;  %v1024_v58 = vadd.f32 %v1023_v55, %v867_v60  ;;  %v740_v55 = vadd.f32 %v739_v11, %v10556_v9  ;;  %v8776_v63 = vld [vmem:[%s17122_s4 + $0x1c0] sm:$0xf] }
 0x1a5   :  { %602 = vmatmul.bf16.gmra.mxu2 %v10404_v19 }
 0x1a6   :  { %v700_v52 = vadd.f32 %v699_v25, %v10524_v6  ;;  %v987_v15 = vadd.f32 %v986_v0, %v866_v51  ;;  %v875_v25 = vmul.f32 %v10544_v18, %v10544_v18  ;;  %v874_v51 = vmul.f32 %v10550_v5, %v10550_v5 }
 0x1a7   :  { %v741_v18 = vadd.f32 %v740_v55, %v10578_v10 }
 0x1a8   :  { %691 = vmatmul.bf16.gmra.mxu3 %v10404_v19  ;;  %v10649_v57 = vpop.f32.mrf.mxu2  ;;  %v871_v19 = vmul.f32 %v10534_v14, %v10534_v14  ;;  %v701_v3 = vadd.f32 %v700_v52, %v10540_v17  ;;  %v988_v0 = vadd.f32 %v987_v15, %v870_v54  ;;  %v8712_v52 = vld [vmem:[%s17122_s4 + $0x140] sm:$0xf]  ;;  %v9471_v15 = vld [vmem:[%s17122_s4 + $0x1c4] sm:$0xf0]  ;;  %v878_v14 = vmul.f32 %v10572_v13, %v10572_v13 }
 0x1a9   :  { %17641 = vst [vmem:[#allocation93_spill] sm:$0xff] %v10649_v57  ;;  %v10665_v57 = vpop.f32.mrf.mxu1  ;;  %v8777_v54 = vor.u32 %v9471_v15, %v8776_v63  ;;  %v742_v63 = vadd.f32 %v741_v18, %v10587_v2  ;;  %v886_v18 = vmul.f32 %v10594_v4, %v10594_v4 }
 0x1aa   :  { %17644 = vst [vmem:[#allocation96_spill] sm:$0xff] %v10665_v57  ;;  %v702_v49 = vadd.f32 %v701_v3, %v10550_v5  ;;  %v879_v3 = vmul.f32 %v10556_v9, %v10556_v9  ;;  %v989_v5 = vadd.f32 %v988_v0, %v874_v51  ;;  %v882_v51 = vmul.f32 %v10582_v16, %v10582_v16 }
 0x1ab   :  { %v10654_v56 = vpop.f32.mrf.mxu3  ;;  %2345 = vmatpush.bf16.msra.mxu3 %v8777_v54 }
 0x1ac   :  { %17643 = vst [vmem:[#allocation95_spill] sm:$0xff] %v10654_v56  ;;  %v1025_v56 = vadd.f32 %v1024_v58, %v871_v19  ;;  %v9455_v58 = vld [vmem:[%s17122_s4 + $0x144] sm:$0xf0]  ;;  %v10688_v19 = vpop.f32.mrf.mxu0  ;;  %v990_v0 = vadd.f32 %v989_v5, %v878_v14 }
 0x1ad   :  { %17645 = vst [vmem:[#allocation97_spill] sm:$0xff] %v10688_v19  ;;  %v8713_v11 = vor.u32 %v9455_v58, %v8712_v52 }
 0x1ae   :  { %v1026_v1 = vadd.f32 %v1025_v56, %v875_v25  ;;  %v703_v56 = vadd.f32 %v702_v49, %v10572_v13  ;;  %v883_v25 = vmul.f32 %v10578_v10, %v10578_v10  ;;  %v991_v54 = vadd.f32 %v990_v0, %v882_v51 }
 0x1af   :  { %2256 = vmatpush.bf16.msra.mxu2 %v8713_v11  ;;  %v887_v11 = vmul.f32 %v10587_v2, %v10587_v2 }
 0x1b0   :  { %v10669_v6 = vpop.f32.mrf.mxu2  ;;  %v1027_v9 = vadd.f32 %v1026_v1, %v879_v3  ;;  %v704_v55 = vadd.f32 %v703_v56, %v10582_v16  ;;  %v743_v1 = vadd.f32 %v742_v63, %v10596_v7  ;;  %v891_v56 = vmul.f32 %v10596_v7, %v10596_v7 }
 0x1b1   :  { %v10699_v52 = vpop.f32.mrf.mxu1  ;;  %v992_v63 = vadd.f32 %v991_v54, %v886_v18 }
 0x1b2   :  { %17646 = vst [vmem:[#allocation98_spill] sm:$0xff] %v10699_v52  ;;  %v1028_v49 = vadd.f32 %v1027_v9, %v883_v25  ;;  %v705_v10 = vadd.f32 %v704_v55, %v10594_v4  ;;  %v744_v14 = vadd.f32 %v743_v1, %v10622_v61  ;;  %v890_v25 = vmul.f32 %v10614_v62, %v10614_v62 }
 0x1b3   :  { %v10672_v60 = vpop.f32.mrf.mxu3  ;;  %v895_v55 = vmul.f32 %v10622_v61, %v10622_v61  ;;  %v894_v1 = vmul.f32 %v10624_v37, %v10624_v37 }
 0x1b4   :  { %v10712_v3 = vpop.f32.mrf.mxu0  ;;  %v1029_v13 = vadd.f32 %v1028_v49, %v887_v11  ;;  %v706_v9 = vadd.f32 %v705_v10, %v10614_v62  ;;  %v745_v49 = vadd.f32 %v744_v14, %v10636_v8  ;;  %v993_v11 = vadd.f32 %v992_v63, %v890_v25 }
 0x1b5   :  { %17647 = vst [vmem:[#allocation99_spill] sm:$0xff] %v10712_v3  ;;  %v899_v10 = vmul.f32 %v10636_v8, %v10636_v8  ;;  %v898_v14 = vmul.f32 %v10652_v53, %v10652_v53 }
 0x1b6   :  { %v1030_v0 = vadd.f32 %v1029_v13, %v891_v56  ;;  %v707_v7 = vadd.f32 %v706_v9, %v10624_v37  ;;  %v746_v13 = vadd.f32 %v745_v49, %v10665_v57  ;;  %v994_v25 = vadd.f32 %v993_v11, %v894_v1 }
 0x1b7   :  { %v903_v9 = vmul.f32 %v10665_v57, %v10665_v57  ;;  %v902_v49 = vmul.f32 %v10688_v19, %v10688_v19 }
 0x1b8   :  { %v10701_v58 = vpop.f32.mrf.mxu2  ;;  %v1031_v2 = vadd.f32 %v1030_v0, %v895_v55  ;;  %v708_v56 = vadd.f32 %v707_v7, %v10652_v53  ;;  %v747_v0 = vadd.f32 %v746_v13, %v10699_v52  ;;  %v995_v55 = vadd.f32 %v994_v25, %v898_v14  ;;  %v9453_v25 = vld [vmem:[%s17122_s4 + $0x134] sm:$0xf0] }
 0x1b9   :  { %v10727_v51 = vpop.f32.mrf.mxu1  ;;  %v907_v7 = vmul.f32 %v10699_v52, %v10699_v52  ;;  %v906_v13 = vmul.f32 %v10712_v3, %v10712_v3  ;;  %v9429_v52 = vld [vmem:[%s17122_s4 + $0x74] sm:$0xf0] }
 0x1ba   :  { %17649 = vst [vmem:[#allocation101_spill] sm:$0xff] %v10727_v51  ;;  %v1032_v63 = vadd.f32 %v1031_v2, %v899_v10  ;;  %v709_v61 = vadd.f32 %v708_v56, %v10688_v19  ;;  %v748_v11 = vadd.f32 %v747_v0, %v10727_v51  ;;  %v996_v14 = vadd.f32 %v995_v55, %v902_v49  ;;  %v8704_v56 = vld [vmem:[%s17122_s4 + $0x130] sm:$0xf]  ;;  %v9469_v55 = vld [vmem:[%s17122_s4 + $0x1b4] sm:$0xf0] }
 0x1bb   :  { %v10704_v15 = vpop.f32.mrf.mxu3  ;;  %v8705_v0 = vor.u32 %v9453_v25, %v8704_v56  ;;  %v8608_v49 = vld [vmem:[%s17122_s4 + $0x70] sm:$0xf] }
 0x1bc   :  { %v10737_v62 = vpop.f32.mrf.mxu0  ;;  %v1033_v37 = vadd.f32 %v1032_v63, %v903_v9  ;;  %v710_v10 = vadd.f32 %v709_v61, %v10712_v3  ;;  %v8768_v63 = vld [vmem:[%s17122_s4 + $0x1b0] sm:$0xf]  ;;  %v911_v61 = vmul.f32 %v10727_v51, %v10727_v51  ;;  %v8609_v57 = vor.u32 %v9429_v52, %v8608_v49 }
 0x1bd   :  { %17650 = vst [vmem:[#allocation102_spill] sm:$0xff] %v10737_v62  ;;  %v8769_v3 = vor.u32 %v9469_v55, %v8768_v63  ;;  %2257 = vmatpush.bf16.msra.mxu2 %v8705_v0  ;;  %v997_v51 = vadd.f32 %v996_v14, %v906_v13  ;;  %v910_v19 = vmul.f32 %v10737_v62, %v10737_v62 }
 0x1be   :  { %v1034_v9 = vadd.f32 %v1033_v37, %v907_v7  ;;  %v8672_v37 = vld [vmem:[%s17122_s4 + $0xf0] sm:$0xf]  ;;  %v9445_v7 = vld [vmem:[%s17122_s4 + $0xf4] sm:$0xf0]  ;;  %v711_v4 = vadd.f32 %v710_v10, %v10737_v62  ;;  %2075 = vmatpush.bf16.msrb.mxu0 %v8609_v57 }
 0x1bf   :  { %v8673_v25 = vor.u32 %v9445_v7, %v8672_v37  ;;  %2346 = vmatpush.bf16.msra.mxu3 %v8769_v3  ;;  %v998_v14 = vadd.f32 %v997_v51, %v910_v19  ;;  %v923_v19 = vmul.f32 %v10412_v21, %v10412_v21 }
 0x1c0   :  { %v10719_v16 = vpop.f32.mrf.mxu2  ;;  %v1035_v55 = vadd.f32 %v1034_v9, %v911_v61 }
 0x1c1   :  { %v10749_v8 = vpop.f32.mrf.mxu1  ;;  %2164 = vmatpush.bf16.msrb.mxu1 %v8673_v25 }
 0x1c2   :  { %17653 = vst [vmem:[#allocation105_spill] sm:$0xff] %v10749_v8  ;;  %v749_v56 = vadd.f32 %v748_v11, %v10749_v8  ;;  %v915_v52 = vmul.f32 %v10749_v8, %v10749_v8  ;;  %v10907_v8 = vmul.f32 %v10456_v40, %v10456_v40 }
 0x1c3   :  { %v10722_v5 = vpop.f32.mrf.mxu3 }
 0x1c4   :  { %17648 = vst [vmem:[#allocation100_spill] sm:$0xff] %v10722_v5  ;;  %v10759_v2 = vpop.f32.mrf.mxu0  ;;  %v1036_v37 = vadd.f32 %v1035_v55, %v915_v52 }
 0x1c5   :  { %17655 = vst [vmem:[#allocation107_spill] sm:$0xff] %v10759_v2  ;;  %v712_v13 = vadd.f32 %v711_v4, %v10759_v2  ;;  %v914_v10 = vmul.f32 %v10759_v2, %v10759_v2  ;;  %v10911_v2 = vmul.f32 %v10460_v36, %v10460_v36 }
 0x1c7   :  { %v999_v61 = vadd.f32 %v998_v14, %v914_v10  ;;  %v9427_v10 = vld [vmem:[%s17122_s4 + $0x64] sm:$0xf0]  ;;  %v8664_v14 = vld [vmem:[%s17122_s4 + $0xe0] sm:$0xf] }
 0x1c8   :  { %v10739_v54 = vpop.f32.mrf.mxu2 }
 0x1c9   :  { %17651 = vst [vmem:[#allocation103_spill] sm:$0xff] %v10739_v54  ;;  %v10797_v63 = vpop.f32.mrf.mxu1 }
 0x1ca   :  { %17657 = vst [vmem:[#allocation109_spill] sm:$0xff] %v10797_v63  ;;  %v750_v11 = vadd.f32 %v749_v56, %v10797_v63  ;;  %v919_v57 = vmul.f32 %v10797_v63, %v10797_v63 }
 0x1cb   :  { %v10742_v18 = vpop.f32.mrf.mxu3 }
 0x1cc   :  { %17652 = vst [vmem:[#allocation104_spill] sm:$0xff] %v10742_v18  ;;  %v10809_v3 = vpop.f32.mrf.mxu0  ;;  %v751_v9 = vadd.f32 %v750_v11, %v10412_v21  ;;  %v1037_v25 = vadd.f32 %v1036_v37, %v919_v57  ;;  %v9982_v11 = vmov 256.0  }
 0x1cd   :  { %17660 = vst [vmem:[#allocation112_spill] sm:$0xff] %v10809_v3  ;;  %v713_v7 = vadd.f32 %v712_v13, %v10809_v3  ;;  %v918_v56 = vmul.f32 %v10809_v3, %v10809_v3  ;;  %9649 = vrcp.f32 %v9982_v11  ;;  %v8600_v13 = vld [vmem:[%s17122_s4 + $0x60] sm:$0xf] }
 0x1ce   :  { %v752_v51 = vadd.f32 %v751_v9, %v10416_v23  ;;  %v1038_v37 = vadd.f32 %v1037_v25, %v923_v19  ;;  %v8601_v57 = vor.u32 %v9427_v10, %v8600_v13  ;;  %v9443_v9 = vld [vmem:[%s17122_s4 + $0xe4] sm:$0xf0]  ;;  %v926_v13 = vmul.f32 %v10414_v22, %v10414_v22 }
 0x1cf   :  { %v714_v55 = vadd.f32 %v713_v7, %v10410_v20  ;;  %v1000_v63 = vadd.f32 %v999_v61, %v918_v56  ;;  %v922_v61 = vmul.f32 %v10410_v20, %v10410_v20  ;;  %v8665_v7 = vor.u32 %v9443_v9, %v8664_v14 }
 0x1d0   :  { %v10757_v53 = vpop.f32.mrf.mxu2  ;;  %v927_v56 = vmul.f32 %v10416_v23, %v10416_v23  ;;  %v753_v11 = vadd.f32 %v752_v51, %v10422_v27  ;;  %2076 = vmatpush.bf16.msrb.mxu0 %v8601_v57  ;;  %v930_v10 = vmul.f32 %v10420_v26, %v10420_v26  ;;  %v931_v9 = vmul.f32 %v10422_v27, %v10422_v27 }
 0x1d1   :  { %17654 = vst [vmem:[#allocation106_spill] sm:$0xff] %v10757_v53  ;;  %v715_v21 = vadd.f32 %v714_v55, %v10414_v22  ;;  %v1001_v3 = vadd.f32 %v1000_v63, %v922_v61  ;;  %2165 = vmatpush.bf16.msrb.mxu1 %v8665_v7  ;;  %v934_v51 = vmul.f32 %v10424_v28, %v10424_v28 }
 0x1d2   :  { %v1039_v25 = vadd.f32 %v1038_v37, %v927_v56  ;;  %v935_v63 = vmul.f32 %v10426_v29, %v10426_v29  ;;  %v754_v55 = vadd.f32 %v753_v11, %v10426_v29  ;;  %v10862_v57 = vmul.f32 %v10430_v59, %v10430_v59 }
 0x1d3   :  { %v10762_v1 = vpop.f32.mrf.mxu3  ;;  %v10843_v19 = vpop.eup %9649  ;;  %v939_v61 = vmul.f32 %v10432_v30, %v10432_v30  ;;  %v716_v7 = vadd.f32 %v715_v21, %v10420_v26  ;;  %v1002_v56 = vadd.f32 %v1001_v3, %v926_v13  ;;  %v10869_v27 = vmul.f32 %v10434_v31, %v10434_v31 }
 0x1d4   :  { %17656 = vst [vmem:[#allocation108_spill] sm:$0xff] %v10762_v1  ;;  %v10873_v23 = vmul.f32 %v10436_v32, %v10436_v32  ;;  %v1040_v11 = vadd.f32 %v1039_v25, %v931_v9  ;;  %v848_v29 = vmul.f32 256.0, %v10843_v19  ;;  %v10878_v22 = vmul.f32 %v10440_v12, %v10440_v12  ;;  %v17682_v1 = vld [vmem:[#allocation50_spill] sm:$0xff] }
 0x1d5   :  { %17663 = vst [vmem:[#allocation115_spill] sm:$0xff] %v10843_v19  ;;  %v10882_v20 = vmul.f32 %v10442_v33, %v10442_v33  ;;  %v10886_v21 = vmul.f32 %v10444_v34, %v10444_v34  ;;  %v10890_v3 = vmul.f32 %v10446_v35, %v10446_v35  ;;  %v10894_v25 = vmul.f32 %v10450_v24, %v10450_v24 }
 0x1d6   :  { %v10898_v13 = vmul.f32 %v10452_v38, %v10452_v38  ;;  %v10902_v9 = vmul.f32 %v10454_v39, %v10454_v39  ;;  %v755_v26 = vadd.f32 %v754_v55, %v10432_v30  ;;  %v717_v62 = vadd.f32 %v716_v7, %v10424_v28 }
 0x1d7   :  { %v1003_v17 = vadd.f32 %v1002_v56, %v930_v10  ;;  %v1041_v55 = vadd.f32 %v1040_v11, %v935_v63  ;;  %v849_v30 = vsub.f32 1.0, %v848_v29  ;;  %v10932_v10 = vmul.f32 %v10470_v45, %v10470_v45 }
 0x1d8   :  { %v10801_v49 = vpop.f32.mrf.mxu2  ;;  %v10936_v7 = vmul.f32 %v10472_v46, %v10472_v46  ;;  %v10942_v29 = vmul.f32 %v10474_v47, %v10474_v47  ;;  %v10946_v63 = vmul.f32 %v10476_v48, %v10476_v48  ;;  %v10950_v11 = vmul.f32 %v10478_v50, %v10478_v50  ;;  %v9441_v48 = vld [vmem:[%s17122_s4 + $0xd4] sm:$0xf0] }
 0x1d9   :  { %17658 = vst [vmem:[#allocation110_spill] sm:$0xff] %v10801_v49  ;;  %v756_v28 = vadd.f32 %v755_v26, %v10436_v32  ;;  %v17676_v49 = vld [vmem:[#allocation43_spill] sm:$0xff]  ;;  %v9451_v26 = vld [vmem:[%s17122_s4 + $0x124] sm:$0xf0]  ;;  %v868_v50 = vmul.f32 %v17682_v1, %v17682_v1 }
 0x1da   :  { %17668 = vst [vmem:[#allocation120_spill] sm:$0xff] %v10936_v7  ;;  %v718_v7 = vadd.f32 %v717_v62, %v10430_v59  ;;  %v8760_v62 = vld [vmem:[%s17122_s4 + $0x1a0] sm:$0xf]  ;;  %v17679_v32 = vld [vmem:[#allocation47_spill] sm:$0xff] }
 0x1db   :  { %v10804_v0 = vpop.f32.mrf.mxu3  ;;  %17670 = vst [vmem:[#allocation122_spill] sm:$0xff] %v10942_v29  ;;  %v10962_v29 = vmul.f32 %v17676_v49, %v17676_v49  ;;  %v864_v59 = vmul.f32 %v17679_v32, %v17679_v32 }
 0x1dc   :  { %17659 = vst [vmem:[#allocation111_spill] sm:$0xff] %v10804_v0  ;;  %v1004_v0 = vadd.f32 %v1003_v17, %v934_v51  ;;  %v1042_v17 = vadd.f32 %v1041_v55, %v939_v61  ;;  %v10974_v51 = vmul.f32 %v10843_v19, %v849_v30  ;;  %v17680_v61 = vld [vmem:[#allocation44_spill] sm:$0xff] }
 0x1dd   :  { %17671 = vst [vmem:[#allocation123_spill] sm:$0xff] %v10946_v63  ;;  %v8696_v63 = vld [vmem:[%s17122_s4 + $0x120] sm:$0xf]  ;;  %v860_v30 = vmul.f32 %v17680_v61, %v17680_v61  ;;  %v773_v49 = vadd.f32 %v17679_v32, %v17680_v61  ;;  %v17685_v61 = vld [vmem:[#allocation54_spill] sm:$0xff] }
 0x1de   :  { %17672 = vst [vmem:[#allocation124_spill] sm:$0xff] %v10950_v11  ;;  %v17681_v55 = vld [vmem:[#allocation48_spill] sm:$0xff]  ;;  %v757_v11 = vadd.f32 %v756_v28, %v10442_v33  ;;  %v1005_v28 = vadd.f32 %v1004_v0, %v10862_v57 }
 0x1df   :  { %17677 = vst [vmem:[#allocation127_spill] sm:$0xff] %v10962_v29  ;;  %v8592_v29 = vld [vmem:[%s17122_s4 + $0x50] sm:$0xf]  ;;  %v865_v19 = vmul.f32 %v17681_v55, %v17681_v55  ;;  %v774_v33 = vadd.f32 %v773_v49, %v17682_v1  ;;  %v1060_v32 = vadd.f32 %v864_v59, %v860_v30  ;;  %v17687_v59 = vld [vmem:[#allocation57_spill] sm:$0xff] }
 0x1e0   :  { %v10817_v4 = vpop.f32.mrf.mxu2  ;;  %17678 = vst [vmem:[#allocation128_spill] sm:$0xff] %v10974_v51  ;;  %v876_v57 = vmul.f32 %v17687_v59, %v17687_v59 }
 0x1e1   :  { %17661 = vst [vmem:[#allocation113_spill] sm:$0xff] %v10817_v4  ;;  %v10928_v4 = vmul.f32 %v10468_v44, %v10468_v44  ;;  %v1061_v0 = vadd.f32 %v1060_v32, %v868_v50  ;;  %v775_v49 = vadd.f32 %v774_v33, %v17685_v61  ;;  %v17690_v50 = vld [vmem:[#allocation61_spill] sm:$0xff] }
 0x1e2   :  { %v880_v33 = vmul.f32 %v17690_v50, %v17690_v50 }
 0x1e3   :  { %v10822_v52 = vpop.f32.mrf.mxu3  ;;  %17667 = vst [vmem:[#allocation119_spill] sm:$0xff] %v10928_v4 }
 0x1e4   :  { %17662 = vst [vmem:[#allocation114_spill] sm:$0xff] %v10822_v52  ;;  %v10924_v52 = vmul.f32 %v10466_v43, %v10466_v43 }
 0x1e8   :  { %v10849_v14 = vpop.f32.mrf.mxu2 }
 0x1e9   :  { %17664 = vst [vmem:[#allocation116_spill] sm:$0xff] %v10849_v14  ;;  %v10920_v14 = vmul.f32 %v10464_v42, %v10464_v42 }
 0x1eb   :  { %v10858_v37 = vpop.f32.mrf.mxu3  ;;  %17666 = vst [vmem:[#allocation118_spill] sm:$0xff] %v10920_v14 }
 0x1ec   :  { %17665 = vst [vmem:[#allocation117_spill] sm:$0xff] %v10858_v37  ;;  %v10916_v37 = vmul.f32 %v10462_v41, %v10462_v41 }
 0x1f0   :  { %v10938_v56 = vpop.f32.mrf.mxu2 }
 0x1f1   :  { %17669 = vst [vmem:[#allocation121_spill] sm:$0xff] %v10938_v56  ;;  %v17674_v56 = vld [vmem:[#allocation42_spill] sm:$0xff] }
 0x1f2   :  { %v10958_v46 = vmul.f32 %v17674_v56, %v17674_v56  ;;  %v9467_v56 = vld [vmem:[%s17122_s4 + $0x1a4] sm:$0xf0] }
 0x1f3   :  { %v10953_v4 = vpop.f32.mrf.mxu3  ;;  %v8761_v51 = vor.u32 %v9467_v56, %v8760_v62  ;;  %v17683_v56 = vld [vmem:[#allocation45_spill] sm:$0xff]  ;;  %v17684_v62 = vld [vmem:[#allocation51_spill] sm:$0xff] }
 0x1f4   :  { %17673 = vst [vmem:[#allocation125_spill] sm:$0xff] %v10953_v4  ;;  %v9425_v4 = vld [vmem:[%s17122_s4 + $0x54] sm:$0xf0]  ;;  %v869_v14 = vmul.f32 %v17684_v62, %v17684_v62 }
 0x1f5   :  { %17675 = vst [vmem:[#allocation126_spill] sm:$0xff] %v10958_v46  ;;  %v8697_v46 = vor.u32 %v9451_v26, %v8696_v63  ;;  %v8593_v63 = vor.u32 %v9425_v4, %v8592_v29  ;;  %v8656_v26 = vld [vmem:[%s17122_s4 + $0xd0] sm:$0xf]  ;;  %v861_v4 = vmul.f32 %v17683_v56, %v17683_v56  ;;  %v810_v29 = vadd.f32 %v17681_v55, %v17683_v56  ;;  %v17686_v55 = vld [vmem:[#allocation55_spill] sm:$0xff] }
 0x1f6   :  { %v8657_v53 = vor.u32 %v9441_v48, %v8656_v26  ;;  %2347 = vmatpush.bf16.msra.mxu3 %v8761_v51  ;;  %v719_v48 = vadd.f32 %v718_v7, %v10434_v31  ;;  %v873_v56 = vmul.f32 %v17686_v55, %v17686_v55  ;;  %v1043_v51 = vadd.f32 %v1042_v17, %v10873_v23 }
 0x1f7   :  { %2258 = vmatpush.bf16.msra.mxu2 %v8697_v46  ;;  %2077 = vmatpush.bf16.msrb.mxu0 %v8593_v63  ;;  %v872_v46 = vmul.f32 %v17685_v61, %v17685_v61  ;;  %v811_v26 = vadd.f32 %v810_v29, %v17684_v62  ;;  %v1097_v18 = vadd.f32 %v865_v19, %v861_v4  ;;  %v17689_v63 = vld [vmem:[#allocation59_spill] sm:$0xff] }
 0x1f8   :  { %2166 = vmatpush.bf16.msrb.mxu1 %v8657_v53  ;;  %v11016_v44 = vpop.f32.mrf.mxu2  ;;  %v758_v53 = vadd.f32 %v757_v11, %v10446_v35  ;;  %v877_v4 = vmul.f32 %v17689_v63, %v17689_v63  ;;  %v1006_v29 = vadd.f32 %v1005_v28, %v10869_v27  ;;  %v776_v23 = vadd.f32 %v775_v49, %v17687_v59  ;;  %v17691_v11 = vld [vmem:[#allocation62_spill] sm:$0xff]  ;;  %v17692_v27 = vld [vmem:[#allocation65_spill] sm:$0xff] }
 0x1f9   :  { %v1098_v7 = vadd.f32 %v1097_v18, %v869_v14  ;;  %v812_v19 = vadd.f32 %v811_v26, %v17686_v55  ;;  %v1062_v32 = vadd.f32 %v1061_v0, %v872_v46  ;;  %v720_v17 = vadd.f32 %v719_v48, %v10440_v12  ;;  %v17693_v48 = vld [vmem:[#allocation66_spill] sm:$0xff] }
 0x1fa   :  { %v881_v18 = vmul.f32 %v17691_v11, %v17691_v11  ;;  %v1044_v14 = vadd.f32 %v1043_v51, %v10882_v20  ;;  %v777_v35 = vadd.f32 %v776_v23, %v17690_v50  ;;  %v884_v28 = vmul.f32 %v17692_v27, %v17692_v27  ;;  %v17694_v20 = vld [vmem:[#allocation68_spill] sm:$0xff] }
 0x1fb   :  { %v11022_v30 = vpop.f32.mrf.mxu3  ;;  %v813_v31 = vadd.f32 %v812_v19, %v17689_v63  ;;  %v1099_v61 = vadd.f32 %v1098_v7, %v873_v56  ;;  %v1063_v26 = vadd.f32 %v1062_v32, %v876_v57  ;;  %v759_v46 = vadd.f32 %v758_v53, %v10452_v38  ;;  %v17695_v53 = vld [vmem:[#allocation69_spill] sm:$0xff] }
 0x1fc   :  { %17688 = vst [vmem:[#allocation50_spill] sm:$0xff] %v11022_v30  ;;  %v885_v19 = vmul.f32 %v17693_v48, %v17693_v48  ;;  %v1007_v56 = vadd.f32 %v1006_v29, %v10878_v22  ;;  %v778_v7 = vadd.f32 %v777_v35, %v17692_v27  ;;  %v888_v51 = vmul.f32 %v17694_v20, %v17694_v20  ;;  %v17696_v35 = vld [vmem:[#allocation72_spill] sm:$0xff] }
 0x1fd   :  { %v1100_v0 = vadd.f32 %v1099_v61, %v877_v4  ;;  %v814_v49 = vadd.f32 %v813_v31, %v17691_v11  ;;  %v1064_v12 = vadd.f32 %v1063_v26, %v880_v33  ;;  %v721_v57 = vadd.f32 %v720_v17, %v10444_v34 }
 0x1fe   :  { %v889_v61 = vmul.f32 %v17695_v53, %v17695_v53  ;;  %v1045_v4 = vadd.f32 %v1044_v14, %v10890_v3  ;;  %v779_v22 = vadd.f32 %v778_v7, %v17694_v20  ;;  %v892_v29 = vmul.f32 %v17696_v35, %v17696_v35  ;;  %v8584_v3 = vld [vmem:[%s17122_s4 + $0x40] sm:$0xf] }
 0x1ff   :  { %v815_v23 = vadd.f32 %v814_v49, %v17693_v48  ;;  %v1101_v32 = vadd.f32 %v1100_v0, %v881_v18  ;;  %v1065_v38 = vadd.f32 %v1064_v12, %v884_v28  ;;  %v760_v17 = vadd.f32 %v759_v46, %v10456_v40  ;;  %v17698_v0 = vld [vmem:[#allocation73_spill] sm:$0xff]  ;;  %v8648_v14 = vld [vmem:[%s17122_s4 + $0xc0] sm:$0xf] }
 0x200   :  { %v11052_v31 = vpop.f32.mrf.mxu2  ;;  %v893_v49 = vmul.f32 %v17698_v0, %v17698_v0  ;;  %v9423_v12 = vld [vmem:[%s17122_s4 + $0x44] sm:$0xf0]  ;;  %v780_v28 = vadd.f32 %v779_v22, %v17696_v35  ;;  %v1046_v27 = vadd.f32 %v1045_v4, %v10898_v13 }
 0x201   :  { %v1102_v26 = vadd.f32 %v1101_v32, %v885_v19  ;;  %v816_v18 = vadd.f32 %v815_v23, %v17695_v53  ;;  %v1066_v46 = vadd.f32 %v1065_v38, %v888_v51  ;;  %v17699_v19 = vld [vmem:[#allocation75_spill] sm:$0xff]  ;;  %v8585_v23 = vor.u32 %v9423_v12, %v8584_v3  ;;  %v9439_v32 = vld [vmem:[%s17122_s4 + $0xc4] sm:$0xf0] }
 0x202   :  { %v896_v7 = vmul.f32 %v17699_v19, %v17699_v19  ;;  %v17700_v53 = vld [vmem:[#allocation77_spill] sm:$0xff]  ;;  %v8649_v48 = vor.u32 %v9439_v32, %v8648_v14  ;;  %v781_v38 = vadd.f32 %v780_v28, %v17699_v19  ;;  %v17701_v51 = vld [vmem:[#allocation79_spill] sm:$0xff]  ;;  %v722_v3 = vadd.f32 %v721_v57, %v10450_v24 }
 0x203   :  { %v11058_v33 = vpop.f32.mrf.mxu3  ;;  %v817_v40 = vadd.f32 %v816_v18, %v17698_v0  ;;  %v1103_v34 = vadd.f32 %v1102_v26, %v889_v61  ;;  %v897_v20 = vmul.f32 %v17700_v53, %v17700_v53  ;;  %v1067_v11 = vadd.f32 %v1066_v46, %v892_v29  ;;  %2078 = vmatpush.bf16.msrb.mxu0 %v8585_v23  ;;  %v17702_v18 = vld [vmem:[#allocation80_spill] sm:$0xff]  ;;  %v17703_v29 = vld [vmem:[#allocation83_spill] sm:$0xff] }
 0x204   :  { %17697 = vst [vmem:[#allocation51_spill] sm:$0xff] %v11058_v33  ;;  %v900_v22 = vmul.f32 %v17701_v51, %v17701_v51  ;;  %v901_v61 = vmul.f32 %v17702_v18, %v17702_v18  ;;  %2167 = vmatpush.bf16.msrb.mxu1 %v8649_v48  ;;  %v1008_v26 = vadd.f32 %v1007_v56, %v10886_v21  ;;  %v17706_v56 = vld [vmem:[#allocation86_spill] sm:$0xff] }
 0x205   :  { %v1104_v12 = vadd.f32 %v1103_v34, %v893_v49  ;;  %v818_v35 = vadd.f32 %v817_v40, %v17700_v53  ;;  %v782_v13 = vadd.f32 %v781_v38, %v17701_v51  ;;  %v1068_v4 = vadd.f32 %v1067_v11, %v896_v7  ;;  %v17704_v34 = vld [vmem:[#allocation84_spill] sm:$0xff] }
 0x206   :  { %v904_v14 = vmul.f32 %v17703_v29, %v17703_v29  ;;  %v761_v28 = vadd.f32 %v760_v17, %v10462_v41  ;;  %v905_v40 = vmul.f32 %v17704_v34, %v17704_v34  ;;  %v1047_v48 = vadd.f32 %v1046_v27, %v10907_v8 }
 0x207   :  { %v819_v46 = vadd.f32 %v818_v35, %v17702_v18  ;;  %v1105_v57 = vadd.f32 %v1104_v12, %v897_v20  ;;  %v1069_v23 = vadd.f32 %v1068_v4, %v900_v22  ;;  %v783_v21 = vadd.f32 %v782_v13, %v17703_v29  ;;  %v17708_v35 = vld [vmem:[#allocation87_spill] sm:$0xff]  ;;  %v17709_v22 = vld [vmem:[#allocation90_spill] sm:$0xff] }
 0x208   :  { %v11098_v49 = vpop.f32.mrf.mxu2  ;;  %v908_v11 = vmul.f32 %v17706_v56, %v17706_v56  ;;  %v723_v17 = vadd.f32 %v722_v3, %v10454_v39  ;;  %v909_v38 = vmul.f32 %v17708_v35, %v17708_v35  ;;  %v1009_v12 = vadd.f32 %v1008_v26, %v10894_v25  ;;  %v17710_v3 = vld [vmem:[#allocation91_spill] sm:$0xff]  ;;  %v17711_v25 = vld [vmem:[#allocation93_spill] sm:$0xff] }
 0x209   :  { %17705 = vst [vmem:[#allocation55_spill] sm:$0xff] %v11098_v49  ;;  %v1106_v32 = vadd.f32 %v1105_v57, %v901_v61  ;;  %v820_v20 = vadd.f32 %v819_v46, %v17704_v34  ;;  %v784_v8 = vadd.f32 %v783_v21, %v17706_v56  ;;  %v1070_v27 = vadd.f32 %v1069_v23, %v904_v14 }
 0x20a   :  { %v912_v13 = vmul.f32 %v17709_v22, %v17709_v22  ;;  %v762_v4 = vadd.f32 %v761_v28, %v10466_v43  ;;  %v913_v61 = vmul.f32 %v17710_v3, %v17710_v3  ;;  %v1048_v46 = vadd.f32 %v1047_v48, %v10916_v37  ;;  %v17712_v28 = vld [vmem:[#allocation95_spill] sm:$0xff] }
 0x20b   :  { %v11104_v7 = vpop.f32.mrf.mxu3  ;;  %v821_v41 = vadd.f32 %v820_v20, %v17708_v35  ;;  %v1107_v24 = vadd.f32 %v1106_v32, %v905_v40  ;;  %v1071_v57 = vadd.f32 %v1070_v27, %v908_v11  ;;  %v785_v39 = vadd.f32 %v784_v8, %v17709_v22 }
 0x20c   :  { %17707 = vst [vmem:[#allocation57_spill] sm:$0xff] %v11104_v7  ;;  %v916_v26 = vmul.f32 %v17711_v25, %v17711_v25  ;;  %v724_v14 = vadd.f32 %v723_v17, %v10460_v36  ;;  %v917_v20 = vmul.f32 %v17712_v28, %v17712_v28  ;;  %v1010_v40 = vadd.f32 %v1009_v12, %v10902_v9  ;;  %v17727_v36 = vld [vmem:[#allocation119_spill] sm:$0xff] }
 0x20d   :  { %v1108_v23 = vadd.f32 %v1107_v24, %v909_v38  ;;  %v822_v21 = vadd.f32 %v821_v41, %v17710_v3  ;;  %v786_v32 = vadd.f32 %v785_v39, %v17711_v25  ;;  %v1072_v43 = vadd.f32 %v1071_v57, %v912_v13 }
 0x20e   :  { %v920_v37 = vmul.f32 %v10669_v6, %v10669_v6  ;;  %v763_v48 = vadd.f32 %v762_v4, %v10470_v45  ;;  %v921_v24 = vmul.f32 %v10672_v60, %v10672_v60  ;;  %v1049_v17 = vadd.f32 %v1048_v46, %v10924_v52 }
 0x20f   :  { %v823_v11 = vadd.f32 %v822_v21, %v17712_v28  ;;  %v1109_v8 = vadd.f32 %v1108_v23, %v913_v61  ;;  %v1073_v38 = vadd.f32 %v1072_v43, %v916_v26  ;;  %v787_v9 = vadd.f32 %v786_v32, %v10669_v6 }
 0x210   :  { %v11134_v41 = vpop.f32.mrf.mxu2  ;;  %v924_v39 = vmul.f32 %v10701_v58, %v10701_v58  ;;  %v725_v27 = vadd.f32 %v724_v14, %v10464_v42  ;;  %v925_v61 = vmul.f32 %v10704_v15, %v10704_v15  ;;  %v1011_v57 = vadd.f32 %v1010_v40, %v10911_v2  ;;  %v17715_v40 = vld [vmem:[#allocation36_spill] sm:$0xff] }
 0x211   :  { %17713 = vst [vmem:[#allocation59_spill] sm:$0xff] %v11134_v41  ;;  %v1110_v13 = vadd.f32 %v1109_v8, %v917_v20  ;;  %v824_v4 = vadd.f32 %v823_v11, %v10672_v60  ;;  %v788_v52 = vadd.f32 %v787_v9, %v10701_v58  ;;  %v1074_v43 = vadd.f32 %v1073_v38, %v920_v37 }
 0x212   :  { %v928_v46 = vmul.f32 %v10719_v16, %v10719_v16  ;;  %v764_v26 = vadd.f32 %v763_v48, %v10474_v47  ;;  %v929_v14 = vmul.f32 %v10722_v5, %v10722_v5  ;;  %v1050_v20 = vadd.f32 %v1049_v17, %v10932_v10  ;;  %v17716_v48 = vld [vmem:[#allocation104_spill] sm:$0xff]  ;;  %v17718_v10 = vld [vmem:[#allocation106_spill] sm:$0xff] }
 0x213   :  { %v11140_v12 = vpop.f32.mrf.mxu3  ;;  %v825_v23 = vadd.f32 %v824_v4, %v10704_v15  ;;  %v1111_v21 = vadd.f32 %v1110_v13, %v921_v24  ;;  %v1075_v32 = vadd.f32 %v1074_v43, %v924_v39  ;;  %v789_v11 = vadd.f32 %v788_v52, %v10719_v16  ;;  %v17717_v24 = vld [vmem:[#allocation118_spill] sm:$0xff]  ;;  %v17719_v39 = vld [vmem:[#allocation41_spill] sm:$0xff] }
 0x214   :  { %17714 = vst [vmem:[#allocation61_spill] sm:$0xff] %v11140_v12  ;;  %v932_v2 = vmul.f32 %v10739_v54, %v10739_v54  ;;  %v726_v37 = vadd.f32 %v725_v27, %v17715_v40  ;;  %v933_v9 = vmul.f32 %v17716_v48, %v17716_v48  ;;  %v1012_v13 = vadd.f32 %v1011_v57, %v17717_v24  ;;  %v17720_v27 = vld [vmem:[#allocation108_spill] sm:$0xff]  ;;  %v17725_v24 = vld [vmem:[#allocation38_spill] sm:$0xff] }
 0x215   :  { %v1112_v8 = vadd.f32 %v1111_v21, %v925_v61  ;;  %v826_v38 = vadd.f32 %v825_v23, %v10722_v5  ;;  %v790_v4 = vadd.f32 %v789_v11, %v10739_v54  ;;  %v1076_v47 = vadd.f32 %v1075_v32, %v928_v46  ;;  %v17722_v21 = vld [vmem:[#allocation122_spill] sm:$0xff] }
 0x216   :  { %v936_v17 = vmul.f32 %v17718_v10, %v17718_v10  ;;  %v765_v52 = vadd.f32 %v764_v26, %v17719_v39  ;;  %v937_v61 = vmul.f32 %v17720_v27, %v17720_v27  ;;  %v1051_v40 = vadd.f32 %v1050_v20, %v17722_v21  ;;  %v17723_v11 = vld [vmem:[#allocation110_spill] sm:$0xff]  ;;  %v17729_v21 = vld [vmem:[#allocation43_spill] sm:$0xff] }
 0x217   :  { %v827_v43 = vadd.f32 %v826_v38, %v17716_v48  ;;  %v1113_v45 = vadd.f32 %v1112_v8, %v929_v14  ;;  %v1077_v42 = vadd.f32 %v1076_v47, %v932_v2  ;;  %v791_v57 = vadd.f32 %v790_v4, %v17718_v10  ;;  %v17726_v8 = vld [vmem:[#allocation111_spill] sm:$0xff]  ;;  %v17728_v2 = vld [vmem:[#allocation113_spill] sm:$0xff] }
 0x218   :  { %v11170_v23 = vpop.f32.mrf.mxu2  ;;  %v940_v46 = vmul.f32 %v17723_v11, %v17723_v11  ;;  %v727_v26 = vadd.f32 %v726_v37, %v17725_v24  ;;  %v941_v38 = vmul.f32 %v17726_v8, %v17726_v8  ;;  %v1013_v48 = vadd.f32 %v1012_v13, %v17727_v36  ;;  %v17730_v37 = vld [vmem:[#allocation114_spill] sm:$0xff]  ;;  %v17732_v36 = vld [vmem:[#allocation116_spill] sm:$0xff] }
 0x219   :  { %17721 = vst [vmem:[#allocation73_spill] sm:$0xff] %v11170_v23  ;;  %v1114_v39 = vadd.f32 %v1113_v45, %v933_v9  ;;  %v828_v14 = vadd.f32 %v827_v43, %v17720_v27  ;;  %v792_v20 = vadd.f32 %v791_v57, %v17723_v11  ;;  %v1078_v47 = vadd.f32 %v1077_v42, %v936_v17  ;;  %v17731_v9 = vld [vmem:[#allocation124_spill] sm:$0xff] }
 0x21a   :  { %v944_v4 = vmul.f32 %v17728_v2, %v17728_v2  ;;  %v766_v10 = vadd.f32 %v765_v52, %v17729_v21  ;;  %v945_v45 = vmul.f32 %v17730_v37, %v17730_v37  ;;  %v1052_v43 = vadd.f32 %v1051_v40, %v17731_v9  ;;  %v17733_v42 = vld [vmem:[#allocation40_spill] sm:$0xff]  ;;  %v17734_v52 = vld [vmem:[#allocation117_spill] sm:$0xff] }
 0x21b   :  { %v11176_v32 = vpop.f32.mrf.mxu3  ;;  %v829_v54 = vadd.f32 %v828_v14, %v17726_v8  ;;  %v1115_v5 = vadd.f32 %v1114_v39, %v937_v61  ;;  %v1079_v24 = vadd.f32 %v1078_v47, %v940_v46  ;;  %v793_v27 = vadd.f32 %v792_v20, %v17728_v2  ;;  %v17735_v39 = vld [vmem:[#allocation120_spill] sm:$0xff]  ;;  %v17736_v40 = vld [vmem:[#allocation121_spill] sm:$0xff] }
 0x21c   :  { %17724 = vst [vmem:[#allocation75_spill] sm:$0xff] %v11176_v32  ;;  %v948_v13 = vmul.f32 %v17732_v36, %v17732_v36  ;;  %v728_v17 = vadd.f32 %v727_v26, %v17733_v42  ;;  %v949_v14 = vmul.f32 %v17734_v52, %v17734_v52  ;;  %v1014_v61 = vadd.f32 %v1013_v48, %v17735_v39  ;;  %v17737_v2 = vld [vmem:[#allocation125_spill] sm:$0xff] }
 0x21d   :  { %v1116_v57 = vadd.f32 %v1115_v5, %v941_v38  ;;  %v830_v11 = vadd.f32 %v829_v54, %v17730_v37  ;;  %v794_v21 = vadd.f32 %v793_v27, %v17732_v36  ;;  %v1080_v8 = vadd.f32 %v1079_v24, %v944_v4  ;;  %v17739_v54 = vld [vmem:[#allocation127_spill] sm:$0xff]  ;;  %v17741_v4 = vld [vmem:[#allocation42_spill] sm:$0xff] }
 0x21e   :  { %v952_v46 = vmul.f32 %v17736_v40, %v17736_v40  ;;  %v767_v20 = vrot.slane %v766_v10, 4  ;;  %v953_v5 = vmul.f32 %v17737_v2, %v17737_v2  ;;  %v1053_v38 = vadd.f32 %v1052_v43, %v17739_v54 }
 0x21f   :  { %v831_v47 = vadd.f32 %v830_v11, %v17734_v52  ;;  %v1117_v9 = vadd.f32 %v1116_v57, %v945_v45  ;;  %v1081_v42 = vadd.f32 %v1080_v8, %v948_v13  ;;  %v795_v48 = vadd.f32 %v794_v21, %v17736_v40  ;;  %v17742_v57 = vld [vmem:[#allocation123_spill] sm:$0xff] }
 0x220   :  { %v11205_v26 = vpop.f32.mrf.mxu2  ;;  %v956_v27 = vmul.f32 %v11016_v44, %v11016_v44  ;;  %v729_v39 = vadd.f32 %v728_v17, %v17741_v4  ;;  %v957_v45 = vmul.f32 %v11022_v30, %v11022_v30  ;;  %v1015_v52 = vadd.f32 %v1014_v61, %v17742_v57 }
 0x221   :  { %17738 = vst [vmem:[#allocation77_spill] sm:$0xff] %v11205_v26  ;;  %v1118_v36 = vadd.f32 %v1117_v9, %v949_v14  ;;  %v832_v11 = vadd.f32 %v831_v47, %v17737_v2  ;;  %v796_v43 = vadd.f32 %v795_v48, %v11016_v44  ;;  %v1082_v8 = vadd.f32 %v1081_v42, %v952_v46  ;;  %v17743_v46 = vld [vmem:[#allocation126_spill] sm:$0xff] }
 0x222   :  { %v960_v21 = vmul.f32 %v11052_v31, %v11052_v31  ;;  %v768_v13 = vadd.f32 %v767_v20, %v766_v10  ;;  %v961_v17 = vmul.f32 %v11058_v33, %v11058_v33  ;;  %v1054_v14 = vrot.slane %v1053_v38, 4 }
 0x223   :  { %v11211_v24 = vpop.f32.mrf.mxu3  ;;  %v833_v54 = vadd.f32 %v832_v11, %v11022_v30  ;;  %v1119_v40 = vadd.f32 %v1118_v36, %v953_v5  ;;  %v1083_v47 = vadd.f32 %v1082_v8, %v956_v27  ;;  %v797_v9 = vadd.f32 %v796_v43, %v11052_v31 }
 0x224   :  { %17740 = vst [vmem:[#allocation79_spill] sm:$0xff] %v11211_v24  ;;  %v964_v61 = vmul.f32 %v11098_v49, %v11098_v49  ;;  %v730_v57 = vrot.slane %v729_v39, 4  ;;  %v965_v10 = vmul.f32 %v11104_v7, %v11104_v7  ;;  %v1016_v20 = vadd.f32 %v1015_v52, %v17743_v46 }
 0x225   :  { %v1120_v48 = vadd.f32 %v1119_v40, %v957_v45  ;;  %v834_v42 = vadd.f32 %v833_v54, %v11058_v33  ;;  %v798_v36 = vadd.f32 %v797_v9, %v11098_v49  ;;  %v1084_v5 = vadd.f32 %v1083_v47, %v960_v21 }
 0x226   :  { %v968_v27 = vmul.f32 %v11134_v41, %v11134_v41  ;;  %v769_v11 = vrot.slane %v768_v13, 2  ;;  %v969_v40 = vmul.f32 %v11140_v12, %v11140_v12  ;;  %v1055_v54 = vadd.f32 %v1054_v14, %v1053_v38 }
 0x227   :  { %v835_v43 = vadd.f32 %v834_v42, %v11104_v7  ;;  %v1121_v8 = vadd.f32 %v1120_v48, %v961_v17  ;;  %v1085_v4 = vadd.f32 %v1084_v5, %v964_v61  ;;  %v799_v33 = vadd.f32 %v798_v36, %v11134_v41  ;;  %v9460_v41 = vld [vmem:[%s17122_s4 + $0x174] sm:$0xf] }
 0x228   :  { %v11237_v45 = vpop.f32.mrf.mxu2  ;;  %v972_v52 = vmul.f32 %v11170_v23, %v11170_v23  ;;  %v731_v47 = vadd.f32 %v730_v57, %v729_v39  ;;  %v973_v17 = vmul.f32 %v11176_v32, %v11176_v32  ;;  %v1017_v48 = vrot.slane %v1016_v20, 4 }
 0x229   :  { %17744 = vst [vmem:[#allocation80_spill] sm:$0xff] %v11237_v45  ;;  %v1122_v9 = vadd.f32 %v1121_v8, %v965_v10  ;;  %v836_v46 = vadd.f32 %v835_v43, %v11140_v12  ;;  %v800_v42 = vadd.f32 %v799_v33, %v11170_v23  ;;  %v1086_v7 = vadd.f32 %v1085_v4, %v968_v27 }
 0x22a   :  { %v976_v38 = vmul.f32 %v11205_v26, %v11205_v26  ;;  %v770_v14 = vadd.f32 %v769_v11, %v768_v13  ;;  %v977_v39 = vmul.f32 %v11211_v24, %v11211_v24  ;;  %v1056_v57 = vrot.slane %v1055_v54, 2 }
 0x22b   :  { %v11242_v21 = vpop.f32.mrf.mxu3  ;;  %v837_v61 = vadd.f32 %v836_v46, %v11176_v32  ;;  %v1123_v36 = vadd.f32 %v1122_v9, %v969_v40  ;;  %v1087_v10 = vadd.f32 %v1086_v7, %v972_v52  ;;  %v801_v5 = vadd.f32 %v800_v42, %v11205_v26  ;;  %v17746_v9 = vld [vmem:[#allocation128_spill] sm:$0xff]  ;;  %v17747_v46 = vld [vmem:[#allocation115_spill] sm:$0xff] }
 0x22c   :  { %17745 = vst [vmem:[#allocation83_spill] sm:$0xff] %v11242_v21  ;;  %v980_v43 = vmul.f32 %v11237_v45, %v11237_v45  ;;  %v981_v4 = vmul.f32 %v11242_v21, %v11242_v21  ;;  %v732_v13 = vrot.slane %v731_v47, 2  ;;  %v1018_v27 = vadd.f32 %v1017_v48, %v1016_v20 }
 0x22d   :  { %v1124_v8 = vadd.f32 %v1123_v36, %v973_v17  ;;  %v838_v33 = vadd.f32 %v837_v61, %v11211_v24  ;;  %v802_v11 = vadd.f32 %v801_v5, %v11237_v45  ;;  %v1088_v40 = vadd.f32 %v1087_v10, %v976_v38 }
 0x22e   :  { %v851_v32 = vadd.f32 %v17747_v46, %v17746_v9  ;;  %v771_v7 = vrot.slane %v770_v14, 1  ;;  %v1057_v17 = vadd.f32 %v1056_v57, %v1055_v54  ;;  %vm852_vm0 = vweird.f32 %v17747_v46 }
 0x22f   :  { %v839_v52 = vadd.f32 %v838_v33, %v11242_v21  ;;  %v1125_v42 = vadd.f32 %v1124_v8, %v977_v39  ;;  %v1089_v36 = vadd.f32 %v1088_v40, %v980_v43  ;;  %v733_v39 = vadd.f32 %v732_v13, %v731_v47 }
 0x230   :  { %v11263_v26 = vpop.f32.mrf.mxu2  ;;  %v1019_v5 = vrot.slane %v1018_v27, 2  ;;  %v772_v33 = vadd.f32 %v771_v7, %v770_v14  ;;  %v11275_v21 = vsel %vm852_vm0, %v17747_v46, %v851_v32 }
 0x231   :  { %17748 = vst [vmem:[#allocation84_spill] sm:$0xff] %v11263_v26  ;;  %v803_v61 = vadd.f32 %v802_v11, %v11263_v26  ;;  %v984_v24 = vmul.f32 %v11263_v26, %v11263_v26  ;;  %v1126_v48 = vadd.f32 %v1125_v42, %v981_v4  ;;  %v1058_v11 = vrot.slane %v1057_v17, 1 }
 0x232   :  { %17750 = vst [vmem:[#allocation87_spill] sm:$0xff] %v11275_v21  ;;  %v734_v42 = vrot.slane %v733_v39, 1  ;;  %v11278_v13 = vmul.f32 %v11275_v21, %v772_v33 }
 0x233   :  { %v11268_v20 = vpop.f32.mrf.mxu3  ;;  %v804_v8 = vrot.slane %v803_v61, 4  ;;  %v1090_v54 = vadd.f32 %v1089_v36, %v984_v24  ;;  %v1059_v24 = vadd.f32 %v1058_v11, %v1057_v17 }
 0x234   :  { %17749 = vst [vmem:[#allocation86_spill] sm:$0xff] %v11268_v20  ;;  %v840_v38 = vadd.f32 %v839_v52, %v11268_v20  ;;  %v985_v10 = vmul.f32 %v11268_v20, %v11268_v20  ;;  %v1020_v52 = vadd.f32 %v1019_v5, %v1018_v27  ;;  %v1139_v5 = vmul.f32 %v11278_v13, %v11278_v13 }
 0x235   :  { %v805_v40 = vadd.f32 %v804_v8, %v803_v61  ;;  %v1091_v9 = vrot.slane %v1090_v54, 4  ;;  %v1135_v27 = vmul.f32 %v1059_v24, %v11275_v21 }
 0x236   :  { %v841_v57 = vrot.slane %v840_v38, 4  ;;  %v1127_v43 = vadd.f32 %v1126_v48, %v985_v10  ;;  %v735_v48 = vadd.f32 %v734_v42, %v733_v39  ;;  %v1021_v10 = vrot.slane %v1020_v52, 1 }
 0x237   :  { %v806_v45 = vrot.slane %v805_v40, 2  ;;  %v1092_v23 = vadd.f32 %v1091_v9, %v1090_v54  ;;  %v1143_v11 = vsub.f32 %v1135_v27, %v1139_v5 }
 0x238   :  { %v842_v26 = vadd.f32 %v841_v57, %v840_v38  ;;  %v1128_v4 = vrot.slane %v1127_v43, 4 }
 0x239   :  { %v807_v36 = vadd.f32 %v806_v45, %v805_v40  ;;  %v1093_v14 = vrot.slane %v1092_v23, 2  ;;  %v11284_v45 = vmul.f32 %v11275_v21, %v735_v48 }
 0x23a   :  { %v843_v20 = vrot.slane %v842_v26, 2  ;;  %v1129_v47 = vadd.f32 %v1128_v4, %v1127_v43 }
 0x23b   :  { %v808_v32 = vrot.slane %v807_v36, 1  ;;  %v1094_v46 = vadd.f32 %v1093_v14, %v1092_v23  ;;  %v1147_v14 = vmax.f32 %v1143_v11, 0.0 }
 0x23c   :  { %v844_v7 = vadd.f32 %v843_v20, %v842_v26  ;;  %v1130_v61 = vrot.slane %v1129_v47, 2  ;;  %v1022_v26 = vadd.f32 %v1021_v10, %v1020_v52 }
 0x23d   :  { %v809_v54 = vadd.f32 %v808_v32, %v807_v36  ;;  %v1095_v57 = vrot.slane %v1094_v46, 1 }
 0x23e   :  { %v845_v38 = vrot.slane %v844_v7, 1  ;;  %v1131_v8 = vadd.f32 %v1130_v61, %v1129_v47  ;;  %v1134_v52 = vmul.f32 %v1022_v26, %v11275_v21  ;;  %v1138_v47 = vmul.f32 %v11284_v45, %v11284_v45 }
 0x23f   :  { %v11287_v17 = vmul.f32 %v11275_v21, %v809_v54  ;;  %v1096_v20 = vadd.f32 %v1095_v57, %v1094_v46  ;;  %v1151_v46 = vadd.f32 1e-05, %v1147_v14 }
 0x240   :  { %v846_v43 = vadd.f32 %v845_v38, %v844_v7  ;;  %v1132_v33 = vrot.slane %v1131_v8, 1  ;;  %v1142_v48 = vsub.f32 %v1134_v52, %v1138_v47 }
 0x241   :  { %v1136_v40 = vmul.f32 %v1096_v20, %v11275_v21  ;;  %v1140_v9 = vmul.f32 %v11287_v17, %v11287_v17  ;;  %vm1170_vm8 = vweird.f32 %v1151_v46 }
 0x242   :  { %v11290_v23 = vmul.f32 %v11275_v21, %v846_v43  ;;  %v1133_v39 = vadd.f32 %v1132_v33, %v1131_v8  ;;  %v1146_v38 = vmax.f32 %v1142_v48, 0.0 }
 0x243   :  { %v1144_v24 = vsub.f32 %v1136_v40, %v1140_v9 }
 0x244   :  { %v1137_v4 = vmul.f32 %v1133_v39, %v11275_v21  ;;  %v1141_v42 = vmul.f32 %v11290_v23, %v11290_v23  ;;  %v1150_v8 = vadd.f32 1e-05, %v1146_v38 }
 0x245   :  { %v1148_v7 = vmax.f32 %v1144_v24, 0.0 }
 0x246   :  { %v1145_v36 = vsub.f32 %v1137_v4, %v1141_v42  ;;  %vm1160_vm12 = vweird.f32 %v1150_v8 }
 0x247   :  { %v1152_v10 = vadd.f32 1e-05, %v1148_v7 }
 0x248   :  { %v1149_v61 = vmax.f32 %v1145_v36, 0.0 }
 0x249   :  { %9651 = vrsqrt.f32 %v1152_v10  ;;  %vm1180_vm3 = vweird.f32 %v1152_v10 }
 0x24a   :  { %v1153_v32 = vadd.f32 1e-05, %v1149_v61 }
 0x24c   :  { %9653 = vrsqrt.f32 %v1153_v32  ;;  %vm1190_vm6 = vweird.f32 %v1153_v32 }
 0x24d   :  { %9655 = vrsqrt.f32 %v1151_v46 }
 0x24e   :  { %9657 = vrsqrt.f32 %v1150_v8 }
 0x24f   :  { %v9652_v27 = vpop.eup %9651 }
 0x250   :  { %v1175_v57 = vmul.f32 %v9652_v27, %v1152_v10  ;;  %vm1181_vm1 = vweird.f32 %v9652_v27 }
 0x251   :  { %vm1182_vm5 = vmor %vm1180_vm3, %vm1181_vm1 }
 0x252   :  { %v9654_v5 = vpop.eup %9653  ;;  %v1176_v26 = vmul.f32 %v9652_v27, %v1175_v57 }
 0x253   :  { %v9656_v54 = vpop.eup %9655  ;;  %v1185_v43 = vmul.f32 %v9654_v5, %v1153_v32  ;;  %vm1191_vm2 = vweird.f32 %v9654_v5 }
 0x254   :  { %v1165_v33 = vmul.f32 %v9656_v54, %v1151_v46  ;;  %v9658_v39 = vpop.eup %9657  ;;  %v1177_v9 = vmul.f32 0.5, %v1176_v26  ;;  %vm1171_vm4 = vweird.f32 %v9656_v54  ;;  %vm1192_vm7 = vmor %vm1190_vm6, %vm1191_vm2  ;;  %v697_v46 = vld [vmem:[#allocation2] sm:$0xf] }
 0x255   :  { %v1186_v20 = vmul.f32 %v9654_v5, %v1185_v43  ;;  %v1155_v40 = vmul.f32 %v9658_v39, %v1150_v8  ;;  %vm1172_vm9 = vmor %vm1170_vm8, %vm1171_vm4  ;;  %vm1161_vm10 = vweird.f32 %v9658_v39 }
 0x256   :  { %v1166_v11 = vmul.f32 %v9656_v54, %v1165_v33  ;;  %v1178_v47 = vsub.f32 1.5, %v1177_v9  ;;  %vm1162_vm14 = vmor %vm1160_vm12, %vm1161_vm10 }
 0x257   :  { %v1187_v4 = vmul.f32 0.5, %v1186_v20  ;;  %v1156_v52 = vmul.f32 %v9658_v39, %v1155_v40 }
 0x258   :  { %v1167_v42 = vmul.f32 0.5, %v1166_v11  ;;  %v1179_v7 = vmul.f32 %v9652_v27, %v1178_v47 }
 0x259   :  { %v1188_v24 = vsub.f32 1.5, %v1187_v4  ;;  %v1157_v14 = vmul.f32 0.5, %v1156_v52 }
 0x25a   :  { %v1168_v36 = vsub.f32 1.5, %v1167_v42  ;;  %v1183_v57 = vsel %vm1182_vm5, %v9652_v27, %v1179_v7 }
 0x25b   :  { %v1189_v61 = vmul.f32 %v9654_v5, %v1188_v24  ;;  %v1158_v38 = vsub.f32 1.5, %v1157_v14  ;;  %v1199_v26 = vrot.slane %v1183_v57, 6 }
 0x25c   :  { %v1169_v48 = vmul.f32 %v9656_v54, %v1168_v36 }
 0x25d   :  { %v1193_v43 = vsel %vm1192_vm7, %v9654_v5, %v1189_v61  ;;  %v1159_v11 = vmul.f32 %v9658_v39, %v1158_v38  ;;  %v8688_v61 = vld [vmem:[%s17122_s4 + $0x110] sm:$0xf]  ;;  %v698_v38 = vld [vmem:[#allocation2 + $0x4] sm:$0xf] }
 0x25e   :  { %v1173_v33 = vsel %vm1172_vm9, %v9656_v54, %v1169_v48  ;;  %v1200_v20 = vrot.slane %v1193_v43, 5 }
 0x25f   :  { %v1198_v40 = vrot.slane %v1173_v33, 7  ;;  %v1163_v32 = vsel %vm1162_vm14, %v9658_v39, %v1159_v11  ;;  %v17752_v11 = vld [vmem:[#allocation47_spill] sm:$0xff] }
 0x260   :  { %v1204_v10 = vsel %vm1203_vm11, %v1199_v26, %v1200_v20  ;;  %v17751_v26 = vld [vmem:[#allocation44_spill] sm:$0xff] }
 0x261   :  { %v1202_v9 = vsel %vm1201_vm13, %v1163_v32, %v1198_v40 }
 0x262   :  { %v1206_v27 = vsel %vm1205_vm15, %v1202_v9, %v1204_v10  ;;  %v17753_v9 = vld [vmem:[#allocation45_spill] sm:$0xff] }
 0x263   :  { %v1208_v5 = vmul.f32 %v1206_v27, %v697_v46  ;;  %v17754_v27 = vld [vmem:[#allocation48_spill] sm:$0xff] }
 0x265   :  { %v11304_v54 = vperm.slane %v1208_v5, 1  ;;  %v11306_v4 = vperm.slane %v1208_v5, 2  ;;  %v11308_v42 = vperm.slane %v1208_v5, 3  ;;  %v11316_v47 = vperm.slane %v1208_v5, 0 }
 0x267   :  { %v1219_v8 = vmul.f32 %v11304_v54, %v11278_v13  ;;  %v1220_v52 = vmul.f32 %v11306_v4, %v11287_v17  ;;  %v1221_v39 = vmul.f32 %v11308_v42, %v11290_v23  ;;  %v1218_v7 = vmul.f32 %v11316_v47, %v11284_v45  ;;  %v9449_v13 = vld [vmem:[%s17122_s4 + $0x114] sm:$0xf0] }
 0x268   :  { %v8689_v48 = vor.u32 %v9449_v13, %v8688_v61  ;;  %v1236_v20 = vmul.f32 %v11306_v4, %v17751_v26  ;;  %v1240_v40 = vmul.f32 %v11306_v4, %v17752_v11  ;;  %v1237_v46 = vmul.f32 %v11308_v42, %v17753_v9  ;;  %v9465_v61 = vld [vmem:[%s17122_s4 + $0x194] sm:$0xf0]  ;;  %v8640_v13 = vld [vmem:[%s17122_s4 + $0xb0] sm:$0xf]  ;;  %v9463_v26 = vld [vmem:[%s17122_s4 + $0x184] sm:$0xf0] }
 0x269   :  { %v1226_v24 = vrot.slane %v1219_v8, 7  ;;  %v1227_v36 = vrot.slane %v1220_v52, 6  ;;  %v1228_v14 = vrot.slane %v1221_v39, 5  ;;  %v1241_v5 = vmul.f32 %v11308_v42, %v17754_v27  ;;  %v8752_v39 = vld [vmem:[%s17122_s4 + $0x190] sm:$0xf] }
 0x26a   :  { %2259 = vmatpush.bf16.msra.mxu2 %v8689_v48  ;;  %v9419_v48 = vld [vmem:[%s17122_s4 + $0x24] sm:$0xf0]  ;;  %v8632_v9 = vld [vmem:[%s17122_s4 + $0xa0] sm:$0xf] }
 0x26b   :  { %v1229_v17 = vsel %vm1201_vm13, %v1218_v7, %v1226_v24  ;;  %v1230_v23 = vsel %vm1203_vm11, %v1227_v36, %v1228_v14  ;;  %v8576_v24 = vld [vmem:[%s17122_s4 + $0x30] sm:$0xf]  ;;  %v9421_v36 = vld [vmem:[%s17122_s4 + $0x34] sm:$0xf0] }
 0x26c   :  { %v1231_v57 = vsel %vm1205_vm15, %v1229_v17, %v1230_v23  ;;  %v9437_v17 = vld [vmem:[%s17122_s4 + $0xb4] sm:$0xf0]  ;;  %v8568_v23 = vld [vmem:[%s17122_s4 + $0x20] sm:$0xf]  ;;  %v8577_v21 = vor.u32 %v9421_v36, %v8576_v24  ;;  %v8802_v24 = vld [vmem:[%s17122_s4 + $0x1f8] sm:$0xf0] }
 0x26d   :  { %v1233_v43 = vsub.f32 %v698_v38, %v1231_v57  ;;  %v8680_v38 = vld [vmem:[%s17122_s4 + $0x100] sm:$0xf]  ;;  %v9447_v57 = vld [vmem:[%s17122_s4 + $0x104] sm:$0xf0]  ;;  %v8641_v12 = vor.u32 %v9437_v17, %v8640_v13  ;;  %v8560_v17 = vld [vmem:[%s17122_s4 + $0x10] sm:$0xf] }
 0x26e   :  { %v17755_v36 = vld [vmem:[#allocation49_spill] sm:$0xff]  ;;  %2079 = vmatpush.bf16.msrb.mxu0 %v8577_v21  ;;  %v8624_v21 = vld [vmem:[%s17122_s4 + $0x90] sm:$0xf] }
 0x26f   :  { %v11329_v33 = vperm.slane %v1233_v43, 2  ;;  %v11331_v45 = vperm.slane %v1233_v43, 3  ;;  %v11337_v10 = vperm.slane %v1233_v43, 0  ;;  %v11339_v32 = vperm.slane %v1233_v43, 1  ;;  %v8744_v43 = vld [vmem:[%s17122_s4 + $0x180] sm:$0xf]  ;;  %2168 = vmatpush.bf16.msrb.mxu1 %v8641_v12 }
 0x270   :  { %v9417_v12 = vld [vmem:[%s17122_s4 + $0x14] sm:$0xf0] }
 0x271   :  { %v1373_v8 = vadd.f32 %v11329_v33, %v1236_v20  ;;  %v1377_v52 = vadd.f32 %v11329_v33, %v1240_v40  ;;  %v1374_v14 = vadd.f32 %v11331_v45, %v1237_v46  ;;  %v1378_v7 = vadd.f32 %v11331_v45, %v1241_v5  ;;  %v9435_v46 = vld [vmem:[%s17122_s4 + $0xa4] sm:$0xf0] }
 0x272   :  { %v8753_v20 = vor.u32 %v9465_v61, %v8752_v39  ;;  %v8681_v39 = vor.u32 %v9447_v57, %v8680_v38  ;;  %v9476_v61 = vld [vmem:[%s17122_s4 + $0x1f4] sm:$0xf]  ;;  %v8633_v13 = vor.u32 %v9435_v46, %v8632_v9 }
 0x273   :  { %v1501_v11 = vmax.f32 %v1373_v8, 0.0  ;;  %v1505_v40 = vmax.f32 %v1377_v52, 0.0  ;;  %v1502_v27 = vmax.f32 %v1374_v14, 0.0  ;;  %v1506_v5 = vmax.f32 %v1378_v7, 0.0  ;;  %v8738_v52 = vld [vmem:[%s17122_s4 + $0x178] sm:$0xf0] }
 0x274   :  { %2348 = vmatpush.bf16.msra.mxu3 %v8753_v20  ;;  %v8745_v8 = vor.u32 %v9463_v26, %v8744_v43  ;;  %v1234_v14 = vmul.f32 %v11316_v47, %v17755_v36  ;;  %v8569_v7 = vor.u32 %v9419_v48, %v8568_v23  ;;  %v17756_v38 = vld [vmem:[#allocation46_spill] sm:$0xff]  ;;  %v17757_v43 = vld [vmem:[#allocation53_spill] sm:$0xff]  ;;  %v17758_v20 = vld [vmem:[#allocation52_spill] sm:$0xff]  ;;  %2260 = vmatpush.bf16.msra.mxu2 %v8681_v39 }
 0x275   :  { %v1235_v57 = vmul.f32 %v11304_v54, %v17756_v38  ;;  %v1238_v26 = vmul.f32 %v11316_v47, %v17757_v43  ;;  %v1239_v49 = vmul.f32 %v11304_v54, %v17758_v20  ;;  %v11414_v30 = vpack.c.bf16 %v1505_v40, %v1501_v11  ;;  %v9433_v23 = vld [vmem:[%s17122_s4 + $0x94] sm:$0xf0]  ;;  %2169 = vmatpush.bf16.msrb.mxu1 %v8633_v13  ;;  %v9444_v13 = vld [vmem:[%s17122_s4 + $0xf4] sm:$0xf] }
 0x276   :  { %v11425_v48 = vpack.c.bf16 %v1506_v5, %v1502_v27  ;;  %v8741_v9 = vor.u32 %v9460_v41, %v8738_v52  ;;  %v8805_v46 = vor.u32 %v9476_v61, %v8802_v24  ;;  %v1371_v11 = vadd.f32 %v11337_v10, %v1234_v14  ;;  %2080 = vmatpush.bf16.msrb.mxu0 %v8569_v7  ;;  %v8552_v27 = vld [vmem:[%s17122_s4] sm:$0xf]  ;;  %v9415_v41 = vld [vmem:[%s17122_s4 + $0x4] sm:$0xf0]  ;;  %v17760_v24 = vld [vmem:[#allocation54_spill] sm:$0xff] }
 0x277   :  { %v1372_v40 = vadd.f32 %v11339_v32, %v1235_v57  ;;  %v1375_v39 = vadd.f32 %v11337_v10, %v1238_v26  ;;  %v1376_v36 = vadd.f32 %v11339_v32, %v1239_v49  ;;  %v8561_v38 = vor.u32 %v9417_v12, %v8560_v17  ;;  %v8616_v5 = vld [vmem:[%s17122_s4 + $0x80] sm:$0xf]  ;;  %v9431_v49 = vld [vmem:[%s17122_s4 + $0x84] sm:$0xf0]  ;;  %2261 = vmatmul.bf16.vlgmr.msra.gmra.mxu2 %v11414_v30  ;;  %v8610_v7 = vld [vmem:[%s17122_s4 + $0x78] sm:$0xf0] }
 0x278   :  { %17759 = vst [vmem:[#allocation90_spill] sm:$0xff] %v11425_v48  ;;  %2349 = vmatpush.bf16.msra.mxu3 %v8745_v8  ;;  %v8625_v43 = vor.u32 %v9433_v23, %v8624_v21  ;;  %v9428_v8 = vld [vmem:[%s17122_s4 + $0x74] sm:$0xf]  ;;  %v1244_v52 = vmul.f32 %v11306_v4, %v17682_v1  ;;  %v1245_v61 = vmul.f32 %v11308_v42, %v17684_v62  ;;  %v8674_v1 = vld [vmem:[%s17122_s4 + $0xf8] sm:$0xf0]  ;;  %v1499_v17 = vmax.f32 %v1371_v11, 0.0 }
 0x279   :  { %v1248_v14 = vmul.f32 %v11306_v4, %v17760_v24  ;;  %2609 = vmatpush.bf16.msrb.mxu2 %v8741_v9  ;;  %v1503_v62 = vmax.f32 %v1375_v39, 0.0  ;;  %v1500_v57 = vmax.f32 %v1372_v40, 0.0  ;;  %v1504_v26 = vmax.f32 %v1376_v36, 0.0 }
 0x27a   :  { %v1249_v20 = vmul.f32 %v11308_v42, %v17686_v55  ;;  %2081 = vmatpush.bf16.msrb.mxu0 %v8561_v38  ;;  %2170 = vmatpush.bf16.msrb.mxu1 %v8625_v43  ;;  %v8553_v12 = vor.u32 %v9415_v41, %v8552_v27  ;;  %v8617_v21 = vor.u32 %v9431_v49, %v8616_v5  ;;  %v9458_v27 = vld [vmem:[%s17122_s4 + $0x164] sm:$0xf]  ;;  %v8730_v41 = vld [vmem:[%s17122_s4 + $0x168] sm:$0xf0] }
 0x27b   :  { %2350 = vmatmul.bf16.vlgmr.msra.gmra.mxu3 %v11425_v48  ;;  %v8613_v23 = vor.u32 %v9428_v8, %v8610_v7  ;;  %v8677_v9 = vor.u32 %v9444_v13, %v8674_v1  ;;  %v1382_v24 = vadd.f32 %v11331_v45, %v1245_v61  ;;  %v1385_v48 = vadd.f32 %v11329_v33, %v1248_v14  ;;  %v9474_v5 = vld [vmem:[%s17122_s4 + $0x1e4] sm:$0xf]  ;;  %v8666_v13 = vld [vmem:[%s17122_s4 + $0xe8] sm:$0xf0] }
 0x27c   :  { %2698 = vmatpush.bf16.msrb.mxu3 %v8805_v46  ;;  %v1381_v46 = vadd.f32 %v11329_v33, %v1244_v52  ;;  %v1386_v11 = vadd.f32 %v11331_v45, %v1249_v20  ;;  %v11469_v39 = vpack.c.bf16 %v1503_v62, %v1499_v17  ;;  %v11471_v40 = vpack.c.bf16 %v1504_v26, %v1500_v57  ;;  %v9426_v8 = vld [vmem:[%s17122_s4 + $0x64] sm:$0xf]  ;;  %v8602_v52 = vld [vmem:[%s17122_s4 + $0x68] sm:$0xf0]  ;;  %v17763_v20 = vld [vmem:[#allocation63_spill] sm:$0xff] }
 0x27d   :  { %v1513_v36 = vmax.f32 %v1385_v48, 0.0  ;;  %v1510_v38 = vmax.f32 %v1382_v24, 0.0  ;;  %v8733_v49 = vor.u32 %v9458_v27, %v8730_v41  ;;  %v8794_v48 = vld [vmem:[%s17122_s4 + $0x1e8] sm:$0xf0]  ;;  %v8605_v14 = vor.u32 %v9426_v8, %v8602_v52  ;;  %v9442_v7 = vld [vmem:[%s17122_s4 + $0xe4] sm:$0xf] }
 0x27e   :  { %2082 = vmatpush.bf16.msrb.mxu0 %v8553_v12  ;;  %2171 = vmatpush.bf16.msrb.mxu1 %v8617_v21  ;;  %v1509_v55 = vmax.f32 %v1381_v46, 0.0  ;;  %v1514_v43 = vmax.f32 %v1386_v11, 0.0  ;;  %v8797_v61 = vor.u32 %v9474_v5, %v8794_v48  ;;  %v17761_v1 = vld [vmem:[#allocation58_spill] sm:$0xff]  ;;  %v17762_v62 = vld [vmem:[#allocation56_spill] sm:$0xff]  ;;  %v8669_v26 = vor.u32 %v9442_v7, %v8666_v13 }
 0x27f   :  { %v1242_v17 = vmul.f32 %v11316_v47, %v17761_v1  ;;  %v1243_v57 = vmul.f32 %v11304_v54, %v17762_v62  ;;  %2610 = vmatpush.bf16.msrb.mxu2 %v8733_v49  ;;  %v1246_v12 = vmul.f32 %v11316_v47, %v17763_v20  ;;  %v17764_v21 = vld [vmem:[#allocation60_spill] sm:$0xff]  ;;  %v1253_v48 = vmul.f32 %v11308_v42, %v17689_v63  ;;  %v17765_v8 = vld [vmem:[#allocation62_spill] sm:$0xff] }
 0x280   :  { %2699 = vmatpush.bf16.msrb.mxu3 %v8797_v61  ;;  %v11509_v46 = vpack.c.bf16 %v1514_v43, %v1510_v38  ;;  %v1257_v52 = vmul.f32 %v11308_v42, %v17765_v8  ;;  %v17767_v20 = vld [vmem:[#allocation64_spill] sm:$0xff] }
 0x281   :  { %2083 = vmatmul.bf16.vlgmr.msrb.gmra.mxu0 %v11469_v39  ;;  %2172 = vmatmul.bf16.vlgmr.msrb.gmra.mxu1 %v11471_v40  ;;  %v1379_v24 = vadd.f32 %v11337_v10, %v1242_v17  ;;  %v1383_v11 = vadd.f32 %v11337_v10, %v1246_v12  ;;  %v1380_v27 = vadd.f32 %v11339_v32, %v1243_v57  ;;  %v17766_v57 = vld [vmem:[#allocation67_spill] sm:$0xff] }
 0x282   :  { %2431 = vmatpush.bf16.msra.mxu0 %v8613_v23  ;;  %2520 = vmatpush.bf16.msra.mxu1 %v8677_v9  ;;  %v1247_v23 = vmul.f32 %v11304_v54, %v17764_v21  ;;  %v11507_v9 = vpack.c.bf16 %v1513_v36, %v1509_v55  ;;  %v1252_v55 = vmul.f32 %v11306_v4, %v17687_v59  ;;  %v17768_v21 = vld [vmem:[#allocation71_spill] sm:$0xff] }
 0x283   :  { %v1256_v36 = vmul.f32 %v11306_v4, %v17690_v50  ;;  %v1507_v38 = vmax.f32 %v1379_v24, 0.0  ;;  %v1511_v43 = vmax.f32 %v1383_v11, 0.0  ;;  %v1508_v5 = vmax.f32 %v1380_v27, 0.0  ;;  %v17769_v24 = vld [vmem:[#allocation70_spill] sm:$0xff] }
 0x284   :  { %v1384_v41 = vadd.f32 %v11339_v32, %v1247_v23  ;;  %v1389_v61 = vadd.f32 %v11329_v33, %v1252_v55  ;;  %v1390_v7 = vadd.f32 %v11331_v45, %v1253_v48  ;;  %v1394_v59 = vadd.f32 %v11331_v45, %v1257_v52  ;;  %v17771_v48 = vld [vmem:[#allocation66_spill] sm:$0xff]  ;;  %v17772_v52 = vld [vmem:[#allocation68_spill] sm:$0xff] }
 0x285   :  { %v11529_v13 = vpack.c.bf16 %v1511_v43, %v1507_v38  ;;  %v1251_v12 = vmul.f32 %v11304_v54, %v17767_v20  ;;  %v1254_v23 = vmul.f32 %v11316_v47, %v17768_v21  ;;  %v1255_v11 = vmul.f32 %v11304_v54, %v17769_v24 }
 0x286   :  { %2432 = vmatpush.bf16.msra.mxu0 %v8605_v14  ;;  %2521 = vmatpush.bf16.msra.mxu1 %v8669_v26  ;;  %v1512_v49 = vmax.f32 %v1384_v41, 0.0  ;;  %v1393_v14 = vadd.f32 %v11329_v33, %v1256_v36  ;;  %v1517_v63 = vmax.f32 %v1389_v61, 0.0  ;;  %v1518_v17 = vmax.f32 %v1390_v7, 0.0 }
 0x287   :  { %2266 = vmatmul.bf16.gmra.mxu2 %v11507_v9  ;;  %v1522_v62 = vmax.f32 %v1394_v59, 0.0  ;;  %v1250_v26 = vmul.f32 %v11316_v47, %v17766_v57  ;;  %v1391_v36 = vadd.f32 %v11337_v10, %v1254_v23  ;;  %v1388_v38 = vadd.f32 %v11339_v32, %v1251_v12 }
 0x288   :  { %v11531_v50 = vpack.c.bf16 %v1512_v49, %v1508_v5  ;;  %v1521_v1 = vmax.f32 %v1393_v14, 0.0  ;;  %v1392_v43 = vadd.f32 %v11339_v32, %v1255_v11  ;;  %v17770_v5 = vld [vmem:[#allocation65_spill] sm:$0xff]  ;;  %v1261_v8 = vmul.f32 %v11308_v42, %v17771_v48  ;;  %v9424_v48 = vld [vmem:[%s17122_s4 + $0x54] sm:$0xf] }
 0x289   :  { %v11545_v41 = vpack.c.bf16 %v1522_v62, %v1518_v17  ;;  %v1387_v55 = vadd.f32 %v11337_v10, %v1250_v26  ;;  %v1260_v49 = vmul.f32 %v11306_v4, %v17770_v5  ;;  %v1264_v61 = vmul.f32 %v11306_v4, %v17772_v52  ;;  %v17773_v14 = vld [vmem:[#allocation69_spill] sm:$0xff] }
 0x28a   :  { %v11543_v27 = vpack.c.bf16 %v1521_v1, %v1517_v63  ;;  %v1265_v7 = vmul.f32 %v11308_v42, %v17773_v14  ;;  %v1519_v63 = vmax.f32 %v1391_v36, 0.0  ;;  %v1516_v1 = vmax.f32 %v1388_v38, 0.0  ;;  %v8722_v36 = vld [vmem:[%s17122_s4 + $0x158] sm:$0xf0]  ;;  %v9472_v38 = vld [vmem:[%s17122_s4 + $0x1d4] sm:$0xf] }
 0x28b   :  { %2355 = vmatmul.bf16.gmra.mxu3 %v11509_v46  ;;  %v1515_v59 = vmax.f32 %v1387_v55, 0.0  ;;  %v1520_v17 = vmax.f32 %v1392_v43, 0.0  ;;  %v1397_v62 = vadd.f32 %v11329_v33, %v1260_v49  ;;  %v1398_v57 = vadd.f32 %v11331_v45, %v1261_v8  ;;  %v9456_v55 = vld [vmem:[%s17122_s4 + $0x154] sm:$0xf]  ;;  %v8786_v49 = vld [vmem:[%s17122_s4 + $0x1d8] sm:$0xf0] }
 0x28c   :  { %v1401_v26 = vadd.f32 %v11329_v33, %v1264_v61  ;;  %v1402_v20 = vadd.f32 %v11331_v45, %v1265_v7  ;;  %v8725_v43 = vor.u32 %v9456_v55, %v8722_v36  ;;  %v8594_v8 = vld [vmem:[%s17122_s4 + $0x58] sm:$0xf0]  ;;  %v8789_v52 = vor.u32 %v9472_v38, %v8786_v49  ;;  %v9440_v14 = vld [vmem:[%s17122_s4 + $0xd4] sm:$0xf] }
 0x28d   :  { %v11565_v12 = vpack.c.bf16 %v1519_v63, %v1515_v59  ;;  %v11567_v21 = vpack.c.bf16 %v1520_v17, %v1516_v1  ;;  %v1525_v23 = vmax.f32 %v1397_v62, 0.0  ;;  %v1526_v11 = vmax.f32 %v1398_v57, 0.0  ;;  %v8658_v7 = vld [vmem:[%s17122_s4 + $0xd8] sm:$0xf0]  ;;  %v17775_v1 = vld [vmem:[#allocation74_spill] sm:$0xff]  ;;  %v17776_v57 = vld [vmem:[#allocation81_spill] sm:$0xff] }
 0x28e   :  { %v1529_v24 = vmax.f32 %v1401_v26, 0.0  ;;  %v1530_v5 = vmax.f32 %v1402_v20, 0.0  ;;  %v8597_v61 = vor.u32 %v9424_v48, %v8594_v8  ;;  %v17774_v59 = vld [vmem:[#allocation76_spill] sm:$0xff]  ;;  %v1259_v17 = vmul.f32 %v11304_v54, %v17775_v1  ;;  %2611 = vmatpush.bf16.msrb.mxu2 %v8725_v43  ;;  %v17777_v20 = vld [vmem:[#allocation78_spill] sm:$0xff]  ;;  %2700 = vmatpush.bf16.msrb.mxu3 %v8789_v52 }
 0x28f   :  { %v1258_v63 = vmul.f32 %v11316_v47, %v17774_v59  ;;  %v8661_v62 = vor.u32 %v9440_v14, %v8658_v7  ;;  %v1262_v26 = vmul.f32 %v11316_v47, %v17776_v57  ;;  %v1263_v55 = vmul.f32 %v11304_v54, %v17777_v20  ;;  %v17778_v14 = vld [vmem:[#allocation72_spill] sm:$0xff] }
 0x290   :  { %v11603_v36 = vpack.c.bf16 %v1529_v24, %v1525_v23  ;;  %2433 = vmatpush.bf16.msra.mxu0 %v8597_v61  ;;  %v11605_v38 = vpack.c.bf16 %v1530_v5, %v1526_v11  ;;  %v1396_v43 = vadd.f32 %v11339_v32, %v1259_v17  ;;  %v1268_v23 = vmul.f32 %v11306_v4, %v17778_v14 }
 0x291   :  { %2088 = vmatmul.bf16.gmra.mxu0 %v11529_v13  ;;  %2177 = vmatmul.bf16.gmra.mxu1 %v11531_v50  ;;  %v1395_v49 = vadd.f32 %v11337_v10, %v1258_v63  ;;  %v1399_v48 = vadd.f32 %v11337_v10, %v1262_v26  ;;  %v1400_v8 = vadd.f32 %v11339_v32, %v1263_v55  ;;  %v17779_v55 = vld [vmem:[#allocation85_spill] sm:$0xff] }
 0x292   :  { %2522 = vmatpush.bf16.msra.mxu1 %v8661_v62  ;;  %v1272_v24 = vmul.f32 %v11306_v4, %v17699_v19  ;;  %v1524_v52 = vmax.f32 %v1396_v43, 0.0  ;;  %v1269_v7 = vmul.f32 %v11308_v42, %v17698_v0  ;;  %v1273_v59 = vmul.f32 %v11308_v42, %v17700_v53 }
 0x293   :  { %v1523_v11 = vmax.f32 %v1395_v49, 0.0  ;;  %v1527_v5 = vmax.f32 %v1399_v48, 0.0  ;;  %v1528_v61 = vmax.f32 %v1400_v8, 0.0  ;;  %v1405_v63 = vadd.f32 %v11329_v33, %v1268_v23  ;;  %v17780_v48 = vld [vmem:[#allocation82_spill] sm:$0xff]  ;;  %v17781_v8 = vld [vmem:[#allocation89_spill] sm:$0xff]  ;;  %v17782_v23 = vld [vmem:[#allocation88_spill] sm:$0xff] }
 0x294   :  { %v1409_v1 = vadd.f32 %v11329_v33, %v1272_v24  ;;  %v1406_v17 = vadd.f32 %v11331_v45, %v1269_v7  ;;  %v1410_v62 = vadd.f32 %v11331_v45, %v1273_v59  ;;  %v1266_v49 = vmul.f32 %v11316_v47, %v17779_v55 }
 0x295   :  { %v11625_v57 = vpack.c.bf16 %v1527_v5, %v1523_v11  ;;  %v11627_v19 = vpack.c.bf16 %v1528_v61, %v1524_v52  ;;  %v1533_v0 = vmax.f32 %v1405_v63, 0.0  ;;  %v1267_v43 = vmul.f32 %v11304_v54, %v17780_v48 }
 0x296   :  { %v1537_v26 = vmax.f32 %v1409_v1, 0.0  ;;  %v1534_v20 = vmax.f32 %v1406_v17, 0.0  ;;  %v1538_v53 = vmax.f32 %v1410_v62, 0.0  ;;  %v1270_v14 = vmul.f32 %v11316_v47, %v17781_v8 }
 0x297   :  { %2271 = vmatmul.bf16.gmra.mxu2 %v11543_v27  ;;  %v1271_v24 = vmul.f32 %v11304_v54, %v17782_v23  ;;  %v1403_v52 = vadd.f32 %v11337_v10, %v1266_v49  ;;  %v1404_v61 = vadd.f32 %v11339_v32, %v1267_v43  ;;  %v1276_v63 = vmul.f32 %v11306_v4, %v17701_v51  ;;  %v9454_v23 = vld [vmem:[%s17122_s4 + $0x144] sm:$0xf] }
 0x298   :  { %v11639_v11 = vpack.c.bf16 %v1537_v26, %v1533_v0  ;;  %v11641_v5 = vpack.c.bf16 %v1538_v53, %v1534_v20  ;;  %v1407_v7 = vadd.f32 %v11337_v10, %v1270_v14  ;;  %v1277_v1 = vmul.f32 %v11308_v42, %v17702_v18 }
 0x299   :  { %v1408_v59 = vadd.f32 %v11339_v32, %v1271_v24  ;;  %v1280_v17 = vmul.f32 %v11306_v4, %v17703_v29  ;;  %v1281_v62 = vmul.f32 %v11308_v42, %v17704_v34  ;;  %v1531_v0 = vmax.f32 %v1403_v52, 0.0  ;;  %v8714_v24 = vld [vmem:[%s17122_s4 + $0x148] sm:$0xf0]  ;;  %v9470_v52 = vld [vmem:[%s17122_s4 + $0x1c4] sm:$0xf] }
 0x29a   :  { %v1535_v26 = vmax.f32 %v1407_v7, 0.0  ;;  %v1532_v20 = vmax.f32 %v1404_v61, 0.0  ;;  %v1413_v55 = vadd.f32 %v11329_v33, %v1276_v63  ;;  %v1414_v49 = vadd.f32 %v11331_v45, %v1277_v1  ;;  %v8778_v7 = vld [vmem:[%s17122_s4 + $0x1c8] sm:$0xf0] }
 0x29b   :  { %2360 = vmatmul.bf16.gmra.mxu3 %v11545_v41  ;;  %v1536_v53 = vmax.f32 %v1408_v59, 0.0  ;;  %v1417_v48 = vadd.f32 %v11329_v33, %v1280_v17  ;;  %v1418_v51 = vadd.f32 %v11331_v45, %v1281_v62  ;;  %v8717_v61 = vor.u32 %v9454_v23, %v8714_v24  ;;  %v9422_v59 = vld [vmem:[%s17122_s4 + $0x44] sm:$0xf]  ;;  %v8586_v63 = vld [vmem:[%s17122_s4 + $0x48] sm:$0xf0] }
 0x29c   :  { %v11661_v43 = vpack.c.bf16 %v1535_v26, %v1531_v0  ;;  %v1541_v29 = vmax.f32 %v1413_v55, 0.0  ;;  %v1542_v14 = vmax.f32 %v1414_v49, 0.0  ;;  %v8781_v1 = vor.u32 %v9470_v52, %v8778_v7  ;;  %v9438_v62 = vld [vmem:[%s17122_s4 + $0xc4] sm:$0xf]  ;;  %v8650_v0 = vld [vmem:[%s17122_s4 + $0xc8] sm:$0xf0] }
 0x29d   :  { %v11663_v18 = vpack.c.bf16 %v1536_v53, %v1532_v20  ;;  %v1545_v8 = vmax.f32 %v1417_v48, 0.0  ;;  %v1546_v34 = vmax.f32 %v1418_v51, 0.0  ;;  %v8589_v17 = vor.u32 %v9422_v59, %v8586_v63  ;;  %v17783_v26 = vld [vmem:[#allocation94_spill] sm:$0xff]  ;;  %v17784_v53 = vld [vmem:[#allocation92_spill] sm:$0xff]  ;;  %2612 = vmatpush.bf16.msrb.mxu2 %v8717_v61  ;;  %v17785_v48 = vld [vmem:[#allocation97_spill] sm:$0xff] }
 0x29e   :  { %v1274_v20 = vmul.f32 %v11316_v47, %v17783_v26  ;;  %v1275_v55 = vmul.f32 %v11304_v54, %v17784_v53  ;;  %v8653_v49 = vor.u32 %v9438_v62, %v8650_v0  ;;  %v1278_v51 = vmul.f32 %v11316_v47, %v17785_v48  ;;  %v17786_v23 = vld [vmem:[#allocation96_spill] sm:$0xff]  ;;  %2701 = vmatpush.bf16.msrb.mxu3 %v8781_v1 }
 0x29f   :  { %v1279_v24 = vmul.f32 %v11304_v54, %v17786_v23  ;;  %v11699_v52 = vpack.c.bf16 %v1545_v8, %v1541_v29  ;;  %2434 = vmatpush.bf16.msra.mxu0 %v8589_v17  ;;  %v11701_v7 = vpack.c.bf16 %v1546_v34, %v1542_v14  ;;  %v1284_v29 = vmul.f32 %v11306_v4, %v17706_v56  ;;  %v17787_v23 = vld [vmem:[#allocation99_spill] sm:$0xff] }
 0x2a0   :  { %2523 = vmatpush.bf16.msra.mxu1 %v8653_v49  ;;  %v1411_v59 = vadd.f32 %v11337_v10, %v1274_v20  ;;  %v1412_v63 = vadd.f32 %v11339_v32, %v1275_v55  ;;  %v1415_v61 = vadd.f32 %v11337_v10, %v1278_v51  ;;  %v1288_v8 = vmul.f32 %v11306_v4, %v17709_v22 }
 0x2a1   :  { %2093 = vmatmul.bf16.gmra.mxu0 %v11565_v12  ;;  %2182 = vmatmul.bf16.gmra.mxu1 %v11567_v21  ;;  %v1416_v62 = vadd.f32 %v11339_v32, %v1279_v24  ;;  %v1285_v0 = vmul.f32 %v11308_v42, %v17708_v35  ;;  %v1289_v26 = vmul.f32 %v11308_v42, %v17710_v3 }
 0x2a2   :  { %v1539_v14 = vmax.f32 %v1411_v59, 0.0  ;;  %v1543_v34 = vmax.f32 %v1415_v61, 0.0  ;;  %v1540_v1 = vmax.f32 %v1412_v63, 0.0  ;;  %v1421_v20 = vadd.f32 %v11329_v33, %v1284_v29  ;;  %v17788_v59 = vld [vmem:[#allocation98_spill] sm:$0xff]  ;;  %v17790_v29 = vld [vmem:[#allocation101_spill] sm:$0xff] }
 0x2a3   :  { %v1544_v17 = vmax.f32 %v1416_v62, 0.0  ;;  %v1425_v53 = vadd.f32 %v11329_v33, %v1288_v8  ;;  %v1422_v55 = vadd.f32 %v11331_v45, %v1285_v0  ;;  %v1426_v56 = vadd.f32 %v11331_v45, %v1289_v26  ;;  %v17789_v61 = vld [vmem:[#allocation102_spill] sm:$0xff] }
 0x2a4   :  { %v11721_v49 = vpack.c.bf16 %v1543_v34, %v1539_v14  ;;  %v1549_v35 = vmax.f32 %v1421_v20, 0.0  ;;  %v1282_v24 = vmul.f32 %v11316_v47, %v17787_v23  ;;  %v1283_v63 = vmul.f32 %v11304_v54, %v17788_v59 }
 0x2a5   :  { %v11723_v22 = vpack.c.bf16 %v1544_v17, %v1540_v1  ;;  %v1553_v48 = vmax.f32 %v1425_v53, 0.0  ;;  %v1550_v51 = vmax.f32 %v1422_v55, 0.0  ;;  %v1554_v3 = vmax.f32 %v1426_v56, 0.0 }
 0x2a6   :  { %v1286_v62 = vmul.f32 %v11316_v47, %v17789_v61  ;;  %v1287_v8 = vmul.f32 %v11304_v54, %v17790_v29  ;;  %v1419_v1 = vadd.f32 %v11337_v10, %v1282_v24  ;;  %v1420_v17 = vadd.f32 %v11339_v32, %v1283_v63  ;;  %v9468_v29 = vld [vmem:[%s17122_s4 + $0x1b4] sm:$0xf] }
 0x2a7   :  { %2276 = vmatmul.bf16.gmra.mxu2 %v11603_v36  ;;  %v11735_v14 = vpack.c.bf16 %v1553_v48, %v1549_v35  ;;  %v11737_v34 = vpack.c.bf16 %v1554_v3, %v1550_v51  ;;  %v1292_v20 = vmul.f32 %v11306_v4, %v17711_v25  ;;  %v1296_v53 = vmul.f32 %v11306_v4, %v10669_v6 }
 0x2a8   :  { %v1423_v0 = vadd.f32 %v11337_v10, %v1286_v62  ;;  %v1424_v26 = vadd.f32 %v11339_v32, %v1287_v8  ;;  %v1547_v55 = vmax.f32 %v1419_v1, 0.0  ;;  %v1548_v35 = vmax.f32 %v1420_v17, 0.0 }
 0x2a9   :  { %v1293_v51 = vmul.f32 %v11308_v42, %v17712_v28  ;;  %v1297_v3 = vmul.f32 %v11308_v42, %v10672_v60  ;;  %v1429_v23 = vadd.f32 %v11329_v33, %v1292_v20  ;;  %v1433_v24 = vadd.f32 %v11329_v33, %v1296_v53  ;;  %v9452_v60 = vld [vmem:[%s17122_s4 + $0x134] sm:$0xf]  ;;  %v8706_v28 = vld [vmem:[%s17122_s4 + $0x138] sm:$0xf0] }
 0x2aa   :  { %v1551_v56 = vmax.f32 %v1423_v0, 0.0  ;;  %v1552_v48 = vmax.f32 %v1424_v26, 0.0  ;;  %v8709_v17 = vor.u32 %v9452_v60, %v8706_v28  ;;  %v8770_v0 = vld [vmem:[%s17122_s4 + $0x1b8] sm:$0xf0] }
 0x2ab   :  { %2365 = vmatmul.bf16.gmra.mxu3 %v11605_v38  ;;  %v1430_v59 = vadd.f32 %v11331_v45, %v1293_v51  ;;  %v1434_v25 = vadd.f32 %v11331_v45, %v1297_v3  ;;  %v1557_v61 = vmax.f32 %v1429_v23, 0.0  ;;  %v1561_v62 = vmax.f32 %v1433_v24, 0.0  ;;  %v17791_v20 = vld [vmem:[#allocation107_spill] sm:$0xff]  ;;  %v17794_v51 = vld [vmem:[#allocation109_spill] sm:$0xff] }
 0x2ac   :  { %v11757_v63 = vpack.c.bf16 %v1551_v56, %v1547_v55  ;;  %v11759_v6 = vpack.c.bf16 %v1552_v48, %v1548_v35  ;;  %v8773_v26 = vor.u32 %v9468_v29, %v8770_v0  ;;  %v1290_v53 = vmul.f32 %v11316_v47, %v17791_v20  ;;  %2613 = vmatpush.bf16.msrb.mxu2 %v8709_v17  ;;  %v17792_v55 = vld [vmem:[#allocation105_spill] sm:$0xff]  ;;  %v17793_v35 = vld [vmem:[#allocation112_spill] sm:$0xff]  ;;  %v9420_v24 = vld [vmem:[%s17122_s4 + $0x34] sm:$0xf] }
 0x2ad   :  { %v1558_v8 = vmax.f32 %v1430_v59, 0.0  ;;  %v1562_v1 = vmax.f32 %v1434_v25, 0.0  ;;  %v1291_v56 = vmul.f32 %v11304_v54, %v17792_v55  ;;  %v1294_v48 = vmul.f32 %v11316_v47, %v17793_v35  ;;  %v8578_v59 = vld [vmem:[%s17122_s4 + $0x38] sm:$0xf0]  ;;  %v9436_v25 = vld [vmem:[%s17122_s4 + $0xb4] sm:$0xf] }
 0x2ae   :  { %v1295_v3 = vmul.f32 %v11304_v54, %v17794_v51  ;;  %v11783_v23 = vpack.c.bf16 %v1561_v62, %v1557_v61  ;;  %2702 = vmatpush.bf16.msrb.mxu3 %v8773_v26  ;;  %v1427_v60 = vadd.f32 %v11337_v10, %v1290_v53  ;;  %v8581_v29 = vor.u32 %v9420_v24, %v8578_v59  ;;  %v8642_v61 = vld [vmem:[%s17122_s4 + $0xb8] sm:$0xf0] }
 0x2af   :  { %v11795_v28 = vpack.c.bf16 %v1562_v1, %v1558_v8  ;;  %v1428_v62 = vadd.f32 %v11339_v32, %v1291_v56  ;;  %v1431_v17 = vadd.f32 %v11337_v10, %v1294_v48  ;;  %v8645_v26 = vor.u32 %v9436_v25, %v8642_v61  ;;  %v17796_v48 = vld [vmem:[#allocation100_spill] sm:$0xff] }
 0x2b0   :  { %v1432_v0 = vadd.f32 %v11339_v32, %v1295_v3  ;;  %2435 = vmatpush.bf16.msra.mxu0 %v8581_v29  ;;  %v1300_v8 = vmul.f32 %v11306_v4, %v10701_v58  ;;  %v1304_v1 = vmul.f32 %v11306_v4, %v10719_v16  ;;  %v1555_v20 = vmax.f32 %v1427_v60, 0.0 }
 0x2b1   :  { %2098 = vmatmul.bf16.gmra.mxu0 %v11625_v57  ;;  %2187 = vmatmul.bf16.gmra.mxu1 %v11627_v19  ;;  %17795 = vst [vmem:[#allocation91_spill] sm:$0xff] %v11795_v28  ;;  %v1559_v53 = vmax.f32 %v1431_v17, 0.0  ;;  %v1556_v55 = vmax.f32 %v1428_v62, 0.0  ;;  %v1301_v35 = vmul.f32 %v11308_v42, %v10704_v15  ;;  %v1305_v51 = vmul.f32 %v11308_v42, %v17796_v48  ;;  %v17799_v62 = vld [vmem:[#allocation12_spill] sm:$0xff] }
 0x2b2   :  { %2524 = vmatpush.bf16.msra.mxu1 %v8645_v26  ;;  %v1560_v56 = vmax.f32 %v1432_v0, 0.0  ;;  %v1437_v3 = vadd.f32 %v11329_v33, %v1300_v8  ;;  %v1441_v24 = vadd.f32 %v11329_v33, %v1304_v1  ;;  %v1298_v17 = vmul.f32 %v11316_v47, %v17799_v62  ;;  %v17800_v0 = vld [vmem:[#allocation13_spill] sm:$0xff]  ;;  %v17801_v8 = vld [vmem:[#allocation14_spill] sm:$0xff] }
 0x2b3   :  { %v1438_v59 = vadd.f32 %v11331_v45, %v1301_v35  ;;  %v1442_v58 = vadd.f32 %v11331_v45, %v1305_v51  ;;  %v11817_v25 = vpack.c.bf16 %v1559_v53, %v1555_v20  ;;  %v1299_v26 = vmul.f32 %v11304_v54, %v17800_v0  ;;  %v17802_v20 = vld [vmem:[#allocation15_spill] sm:$0xff] }
 0x2b4   :  { %v11819_v16 = vpack.c.bf16 %v1560_v56, %v1556_v55  ;;  %v1565_v15 = vmax.f32 %v1437_v3, 0.0  ;;  %v1569_v60 = vmax.f32 %v1441_v24, 0.0  ;;  %v1302_v1 = vmul.f32 %v11316_v47, %v17801_v8  ;;  %v17805_v24 = vld [vmem:[#allocation103_spill] sm:$0xff] }
 0x2b5   :  { %17797 = vst [vmem:[#allocation93_spill] sm:$0xff] %v11817_v25  ;;  %v1566_v29 = vmax.f32 %v1438_v59, 0.0  ;;  %v1570_v61 = vmax.f32 %v1442_v58, 0.0  ;;  %v1303_v53 = vmul.f32 %v11304_v54, %v17802_v20  ;;  %v1435_v35 = vadd.f32 %v11337_v10, %v1298_v17  ;;  %v17806_v58 = vld [vmem:[#allocation106_spill] sm:$0xff] }
 0x2b6   :  { %17798 = vst [vmem:[#allocation95_spill] sm:$0xff] %v11819_v16  ;;  %v11831_v55 = vpack.c.bf16 %v1569_v60, %v1565_v15  ;;  %v1436_v48 = vadd.f32 %v11339_v32, %v1299_v26  ;;  %v1439_v51 = vadd.f32 %v11337_v10, %v1302_v1  ;;  %v1308_v59 = vmul.f32 %v11306_v4, %v17805_v24  ;;  %v17807_v26 = vld [vmem:[#allocation104_spill] sm:$0xff] }
 0x2b7   :  { %2281 = vmatmul.bf16.gmra.mxu2 %v11639_v11  ;;  %v11833_v56 = vpack.c.bf16 %v1570_v61, %v1566_v29  ;;  %v1440_v3 = vadd.f32 %v11339_v32, %v1303_v53  ;;  %v1312_v15 = vmul.f32 %v11306_v4, %v17806_v58  ;;  %v1563_v29 = vmax.f32 %v1435_v35, 0.0  ;;  %v17808_v1 = vld [vmem:[#allocation108_spill] sm:$0xff] }
 0x2b8   :  { %17803 = vst [vmem:[#allocation118_spill] sm:$0xff] %v11831_v55  ;;  %v1567_v61 = vmax.f32 %v1439_v51, 0.0  ;;  %v1564_v62 = vmax.f32 %v1436_v48, 0.0  ;;  %v1309_v8 = vmul.f32 %v11308_v42, %v17807_v26  ;;  %v1313_v20 = vmul.f32 %v11308_v42, %v17808_v1 }
 0x2b9   :  { %17804 = vst [vmem:[#allocation122_spill] sm:$0xff] %v11833_v56  ;;  %v1568_v17 = vmax.f32 %v1440_v3, 0.0  ;;  %v1445_v53 = vadd.f32 %v11329_v33, %v1308_v59 }
 0x2ba   :  { %v1446_v24 = vadd.f32 %v11331_v45, %v1309_v8  ;;  %v1450_v35 = vadd.f32 %v11331_v45, %v1313_v20  ;;  %v11853_v48 = vpack.c.bf16 %v1567_v61, %v1563_v29  ;;  %v8698_v8 = vld [vmem:[%s17122_s4 + $0x128] sm:$0xf0] }
 0x2bb   :  { %2370 = vmatmul.bf16.gmra.mxu3 %v11641_v5  ;;  %v11855_v3 = vpack.c.bf16 %v1568_v17, %v1564_v62 }
 0x2bc   :  { %17809 = vst [vmem:[#allocation119_spill] sm:$0xff] %v11853_v48  ;;  %v1574_v61 = vmax.f32 %v1446_v24, 0.0 }
 0x2bd   :  { %17810 = vst [vmem:[#allocation114_spill] sm:$0xff] %v11855_v3 }
 0x2c1   :  { %2103 = vmatmul.bf16.gmra.mxu0 %v11661_v43  ;;  %2192 = vmatmul.bf16.gmra.mxu1 %v11663_v18 }
 0x2c7   :  { %2286 = vmatmul.bf16.gmra.mxu2 %v11699_v52 }
 0x2cb   :  { %2375 = vmatmul.bf16.gmra.mxu3 %v11701_v7 }
 0x2d1   :  { %2108 = vmatmul.bf16.gmra.mxu0 %v11721_v49  ;;  %2197 = vmatmul.bf16.gmra.mxu1 %v11723_v22 }
 0x2d7   :  { %2291 = vmatmul.bf16.gmra.mxu2 %v11735_v14 }
 0x2db   :  { %2380 = vmatmul.bf16.gmra.mxu3 %v11737_v34 }
 0x2e1   :  { %2113 = vmatmul.bf16.gmra.mxu0 %v11757_v63  ;;  %2202 = vmatmul.bf16.gmra.mxu1 %v11759_v6 }
 0x2e7   :  { %2296 = vmatmul.bf16.gmra.mxu2 %v11783_v23 }
 0x2eb   :  { %2385 = vmatmul.bf16.gmra.mxu3 %v11795_v28  ;;  %v17821_v28 = vld [vmem:[#allocation111_spill] sm:$0xff] }
 0x2f1   :  { %2118 = vmatmul.bf16.gmra.mxu0 %v11817_v25  ;;  %2207 = vmatmul.bf16.gmra.mxu1 %v11819_v16  ;;  %v1573_v16 = vmax.f32 %v1445_v53, 0.0  ;;  %v17812_v53 = vld [vmem:[#allocation16_spill] sm:$0xff] }
 0x2f7   :  { %2301 = vmatmul.bf16.gmra.mxu2 %v11831_v55 }
 0x2fa   :  { %v2262_v60 = vpop.f32.mrf.mxu2 }
 0x2fb   :  { %2390 = vmatmul.bf16.gmra.mxu3 %v11833_v56  ;;  %v1449_v56 = vadd.f32 %v11329_v33, %v1312_v15  ;;  %v9450_v15 = vld [vmem:[%s17122_s4 + $0x124] sm:$0xf] }
 0x2fc   :  { %v8701_v62 = vor.u32 %v9450_v15, %v8698_v8 }
 0x2fd   :  { %v1577_v26 = vmax.f32 %v1449_v56, 0.0  ;;  %v1578_v56 = vmax.f32 %v1450_v35, 0.0  ;;  %v17815_v35 = vld [vmem:[#allocation19_spill] sm:$0xff] }
 0x2fe   :  { %v2351_v0 = vpop.f32.mrf.mxu3  ;;  %v2084_v55 = vpop.f32.mrf.mxu0  ;;  %2614 = vmatpush.bf16.msrb.mxu2 %v8701_v62  ;;  %v1311_v15 = vmul.f32 %v11304_v54, %v17815_v35  ;;  %v17819_v35 = vld [vmem:[#allocation113_spill] sm:$0xff] }
 0x2ff   :  { %v2173_v58 = vpop.f32.mrf.mxu1  ;;  %v11881_v8 = vpack.c.bf16 %v1577_v26, %v1573_v16  ;;  %v9418_v16 = vld [vmem:[%s17122_s4 + $0x24] sm:$0xf] }
 0x300   :  { %v2174_v51 = vadd.f32 %v2173_v58, %v2084_v55  ;;  %v9466_v55 = vld [vmem:[%s17122_s4 + $0x1a4] sm:$0xf]  ;;  %v1306_v58 = vmul.f32 %v11316_v47, %v17812_v53 }
 0x301   :  { %2123 = vmatmul.bf16.gmra.mxu0 %v11853_v48  ;;  %2212 = vmatmul.bf16.gmra.mxu1 %v11855_v3  ;;  %v17814_v48 = vld [vmem:[#allocation18_spill] sm:$0xff]  ;;  %17816 = vst [vmem:[#allocation120_spill] sm:$0xff] %v11881_v8  ;;  %v9434_v26 = vld [vmem:[%s17122_s4 + $0xa4] sm:$0xf] }
 0x302   :  { %v2263_v59 = vadd.f32 %v2262_v60, %v2174_v51  ;;  %v2264_v29 = vpop.f32.mrf.mxu2  ;;  %v8762_v60 = vld [vmem:[%s17122_s4 + $0x1a8] sm:$0xf0]  ;;  %v1310_v24 = vmul.f32 %v11316_v47, %v17814_v48 }
 0x303   :  { %v8765_v20 = vor.u32 %v9466_v55, %v8762_v60  ;;  %v17813_v51 = vld [vmem:[#allocation17_spill] sm:$0xff]  ;;  %v11884_v60 = vpack.c.bf16 %v1578_v56, %v1574_v61 }
 0x304   :  { %v11871_v17 = vadd.f32 %v2351_v0, %v2263_v59  ;;  %v1307_v3 = vmul.f32 %v11304_v54, %v17813_v51  ;;  %v1443_v0 = vadd.f32 %v11337_v10, %v1306_v58  ;;  %v1447_v51 = vadd.f32 %v11337_v10, %v1310_v24  ;;  %v8570_v48 = vld [vmem:[%s17122_s4 + $0x28] sm:$0xf0] }
 0x305   :  { %2703 = vmatpush.bf16.msrb.mxu3 %v8765_v20  ;;  %17817 = vst [vmem:[#allocation125_spill] sm:$0xff] %v11884_v60  ;;  %v8634_v61 = vld [vmem:[%s17122_s4 + $0xa8] sm:$0xf0] }
 0x306   :  { %17811 = vst [vmem:[#allocation124_spill] sm:$0xff] %v11871_v17  ;;  %v2353_v1 = vpop.f32.mrf.mxu3  ;;  %v2086_v59 = vpop.f32.mrf.mxu0  ;;  %v1444_v62 = vadd.f32 %v11339_v32, %v1307_v3  ;;  %v1448_v17 = vadd.f32 %v11339_v32, %v1311_v15  ;;  %v8573_v3 = vor.u32 %v9418_v16, %v8570_v48  ;;  %v8637_v20 = vor.u32 %v9434_v26, %v8634_v61  ;;  %v17818_v58 = vld [vmem:[#allocation110_spill] sm:$0xff] }
 0x307   :  { %v2175_v55 = vpop.f32.mrf.mxu1  ;;  %2306 = vmatmul.bf16.gmra.mxu2 %v11881_v8  ;;  %v1316_v24 = vmul.f32 %v11306_v4, %v17818_v58  ;;  %v1320_v15 = vmul.f32 %v11306_v4, %v17819_v35  ;;  %v1575_v25 = vmax.f32 %v1447_v51, 0.0 }
 0x308   :  { %v2176_v53 = vadd.f32 %v2175_v55, %v2086_v59  ;;  %v1571_v59 = vmax.f32 %v1443_v0, 0.0  ;;  %2436 = vmatpush.bf16.msra.mxu0 %v8573_v3  ;;  %v1576_v16 = vmax.f32 %v1448_v17, 0.0  ;;  %2525 = vmatpush.bf16.msra.mxu1 %v8637_v20 }
 0x309   :  { %v1453_v26 = vadd.f32 %v11329_v33, %v1316_v24  ;;  %v1457_v61 = vadd.f32 %v11329_v33, %v1320_v15 }
 0x30a   :  { %v2265_v56 = vadd.f32 %v2264_v29, %v2176_v53  ;;  %v2267_v55 = vpop.f32.mrf.mxu2  ;;  %v1317_v29 = vmul.f32 %v11308_v42, %v17821_v28  ;;  %v1321_v53 = vmul.f32 %v11308_v42, %v17730_v37  ;;  %v11917_v17 = vpack.c.bf16 %v1575_v25, %v1571_v59  ;;  %v17824_v25 = vld [vmem:[#allocation21_spill] sm:$0xff]  ;;  %v17825_v59 = vld [vmem:[#allocation22_spill] sm:$0xff] }
 0x30b   :  { %2395 = vmatmul.bf16.gmra.mxu3 %v11884_v60  ;;  %v1572_v60 = vmax.f32 %v1444_v62, 0.0  ;;  %v1581_v28 = vmax.f32 %v1453_v26, 0.0  ;;  %v1585_v20 = vmax.f32 %v1457_v61, 0.0 }
 0x30c   :  { %v11907_v8 = vadd.f32 %v2353_v1, %v2265_v56  ;;  %v1454_v0 = vadd.f32 %v11331_v45, %v1317_v29  ;;  %v1458_v51 = vadd.f32 %v11331_v45, %v1321_v53 }
 0x30d   :  { %v11919_v56 = vpack.c.bf16 %v1576_v16, %v1572_v60  ;;  %v1315_v60 = vmul.f32 %v11304_v54, %v17824_v25  ;;  %v1318_v16 = vmul.f32 %v11316_v47, %v17825_v59  ;;  %v11933_v26 = vpack.c.bf16 %v1585_v20, %v1581_v28  ;;  %v17828_v28 = vld [vmem:[#allocation116_spill] sm:$0xff] }
 0x30e   :  { %17820 = vst [vmem:[#allocation127_spill] sm:$0xff] %v11907_v8  ;;  %v2356_v48 = vpop.f32.mrf.mxu3  ;;  %v2089_v3 = vpop.f32.mrf.mxu0  ;;  %v1582_v24 = vmax.f32 %v1454_v0, 0.0  ;;  %v1586_v35 = vmax.f32 %v1458_v51, 0.0  ;;  %v17823_v8 = vld [vmem:[#allocation20_spill] sm:$0xff]  ;;  %v1324_v20 = vmul.f32 %v11306_v4, %v17828_v28 }
 0x30f   :  { %v2178_v1 = vpop.f32.mrf.mxu1  ;;  %v1314_v53 = vmul.f32 %v11316_v47, %v17823_v8  ;;  %v1452_v51 = vadd.f32 %v11339_v32, %v1315_v60 }
 0x310   :  { %v2179_v62 = vadd.f32 %v2178_v1, %v2089_v3  ;;  %v17826_v3 = vld [vmem:[#allocation23_spill] sm:$0xff]  ;;  %v11936_v1 = vpack.c.bf16 %v1586_v35, %v1582_v24 }
 0x311   :  { %2128 = vmatmul.bf16.gmra.mxu0 %v11917_v17  ;;  %2217 = vmatmul.bf16.gmra.mxu1 %v11919_v56  ;;  %v1451_v61 = vadd.f32 %v11337_v10, %v1314_v53  ;;  %v17829_v53 = vld [vmem:[#allocation121_spill] sm:$0xff] }
 0x312   :  { %v2268_v37 = vadd.f32 %v2267_v55, %v2179_v62  ;;  %v2269_v58 = vpop.f32.mrf.mxu2  ;;  %v1319_v55 = vmul.f32 %v11304_v54, %v17826_v3  ;;  %17827 = vst [vmem:[#allocation126_spill] sm:$0xff] %v11936_v1  ;;  %v1455_v62 = vadd.f32 %v11337_v10, %v1318_v16  ;;  %v1328_v59 = vmul.f32 %v11306_v4, %v17829_v53 }
 0x313   :  { %v1579_v24 = vmax.f32 %v1451_v61, 0.0 }
 0x314   :  { %v11923_v15 = vadd.f32 %v2356_v48, %v2268_v37  ;;  %v1456_v37 = vadd.f32 %v11339_v32, %v1319_v55  ;;  %v1583_v60 = vmax.f32 %v1455_v62, 0.0  ;;  %v17831_v55 = vld [vmem:[#allocation117_spill] sm:$0xff]  ;;  %v1465_v28 = vadd.f32 %v11329_v33, %v1328_v59 }
 0x316   :  { %17822 = vst [vmem:[#allocation123_spill] sm:$0xff] %v11923_v15  ;;  %v2358_v29 = vpop.f32.mrf.mxu3  ;;  %v2091_v0 = vpop.f32.mrf.mxu0  ;;  %v1584_v16 = vmax.f32 %v1456_v37, 0.0  ;;  %v1325_v15 = vmul.f32 %v11308_v42, %v17831_v55  ;;  %v1593_v55 = vmax.f32 %v1465_v28, 0.0  ;;  %v17835_v28 = vld [vmem:[#allocation24_spill] sm:$0xff] }
 0x317   :  { %v2180_v48 = vpop.f32.mrf.mxu1  ;;  %2311 = vmatmul.bf16.gmra.mxu2 %v11933_v26 }
 0x318   :  { %v2181_v8 = vadd.f32 %v2180_v48, %v2091_v0  ;;  %v1580_v0 = vmax.f32 %v1452_v51, 0.0  ;;  %v1462_v53 = vadd.f32 %v11331_v45, %v1325_v15  ;;  %v11957_v51 = vpack.c.bf16 %v1583_v60, %v1579_v24  ;;  %v9448_v15 = vld [vmem:[%s17122_s4 + $0x114] sm:$0xf] }
 0x31a   :  { %v2270_v25 = vadd.f32 %v2269_v58, %v2181_v8  ;;  %v2272_v35 = vpop.f32.mrf.mxu2  ;;  %v1329_v58 = vmul.f32 %v11308_v42, %v17737_v2  ;;  %v1461_v8 = vadd.f32 %v11329_v33, %v1324_v20  ;;  %17832 = vst [vmem:[#allocation115_spill] sm:$0xff] %v11957_v51  ;;  %v11959_v37 = vpack.c.bf16 %v1584_v16, %v1580_v0  ;;  %v8690_v20 = vld [vmem:[%s17122_s4 + $0x118] sm:$0xf0] }
 0x31b   :  { %2400 = vmatmul.bf16.gmra.mxu3 %v11936_v1  ;;  %v1590_v24 = vmax.f32 %v1462_v53, 0.0  ;;  %v8693_v0 = vor.u32 %v9448_v15, %v8690_v20 }
 0x31c   :  { %v11947_v3 = vadd.f32 %v2358_v29, %v2270_v25  ;;  %v1466_v29 = vadd.f32 %v11331_v45, %v1329_v58  ;;  %17833 = vst [vmem:[#allocation44_spill] sm:$0xff] %v11959_v37  ;;  %v1589_v25 = vmax.f32 %v1461_v8, 0.0 }
 0x31d   :  { %2615 = vmatpush.bf16.msrb.mxu2 %v8693_v0 }
 0x31e   :  { %17830 = vst [vmem:[#allocation128_spill] sm:$0xff] %v11947_v3  ;;  %v2361_v48 = vpop.f32.mrf.mxu3  ;;  %v2094_v61 = vpop.f32.mrf.mxu0  ;;  %v1594_v60 = vmax.f32 %v1466_v29, 0.0  ;;  %v17838_v29 = vld [vmem:[#allocation27_spill] sm:$0xff]  ;;  %v11985_v20 = vpack.c.bf16 %v1593_v55, %v1589_v25 }
 0x31f   :  { %v2183_v1 = vpop.f32.mrf.mxu1  ;;  %v1327_v15 = vmul.f32 %v11304_v54, %v17838_v29  ;;  %v8562_v25 = vld [vmem:[%s17122_s4 + $0x18] sm:$0xf0]  ;;  %v9432_v55 = vld [vmem:[%s17122_s4 + $0x94] sm:$0xf] }
 0x320   :  { %v2184_v62 = vadd.f32 %v2183_v1, %v2094_v61  ;;  %v9464_v1 = vld [vmem:[%s17122_s4 + $0x194] sm:$0xf]  ;;  %v1322_v61 = vmul.f32 %v11316_v47, %v17835_v28  ;;  %17839 = vst [vmem:[#allocation45_spill] sm:$0xff] %v11985_v20 }
 0x321   :  { %2133 = vmatmul.bf16.gmra.mxu0 %v11957_v51  ;;  %2222 = vmatmul.bf16.gmra.mxu1 %v11959_v37  ;;  %v17837_v37 = vld [vmem:[#allocation26_spill] sm:$0xff]  ;;  %v17847_v51 = vld [vmem:[#allocation28_spill] sm:$0xff] }
 0x322   :  { %v2273_v2 = vadd.f32 %v2272_v35, %v2184_v62  ;;  %v2274_v59 = vpop.f32.mrf.mxu2  ;;  %v8754_v35 = vld [vmem:[%s17122_s4 + $0x198] sm:$0xf0]  ;;  %v17836_v62 = vld [vmem:[#allocation25_spill] sm:$0xff]  ;;  %v1326_v53 = vmul.f32 %v11316_v47, %v17837_v37  ;;  %v9416_v37 = vld [vmem:[%s17122_s4 + $0x14] sm:$0xf] }
 0x323   :  { %v8757_v8 = vor.u32 %v9464_v1, %v8754_v35  ;;  %v1323_v3 = vmul.f32 %v11304_v54, %v17836_v62  ;;  %v11988_v35 = vpack.c.bf16 %v1594_v60, %v1590_v24  ;;  %v8626_v24 = vld [vmem:[%s17122_s4 + $0x98] sm:$0xf0] }
 0x324   :  { %v11975_v16 = vadd.f32 %v2361_v48, %v2273_v2  ;;  %v1459_v48 = vadd.f32 %v11337_v10, %v1322_v61  ;;  %v1463_v62 = vadd.f32 %v11337_v10, %v1326_v53  ;;  %v1332_v61 = vmul.f32 %v11306_v4, %v11016_v44 }
 0x325   :  { %2704 = vmatpush.bf16.msrb.mxu3 %v8757_v8  ;;  %17840 = vst [vmem:[#allocation48_spill] sm:$0xff] %v11988_v35  ;;  %v1460_v0 = vadd.f32 %v11339_v32, %v1323_v3  ;;  %v8565_v3 = vor.u32 %v9416_v37, %v8562_v25  ;;  %v8629_v8 = vor.u32 %v9432_v55, %v8626_v24 }
 0x326   :  { %17834 = vst [vmem:[#allocation47_spill] sm:$0xff] %v11975_v16  ;;  %v2363_v58 = vpop.f32.mrf.mxu3  ;;  %v2096_v2 = vpop.f32.mrf.mxu0  ;;  %v1464_v16 = vadd.f32 %v11339_v32, %v1327_v15  ;;  %v1336_v53 = vmul.f32 %v11306_v4, %v11052_v31  ;;  %v1587_v29 = vmax.f32 %v1459_v48, 0.0  ;;  %v1469_v44 = vadd.f32 %v11329_v33, %v1332_v61 }
 0x327   :  { %v2185_v1 = vpop.f32.mrf.mxu1  ;;  %2316 = vmatmul.bf16.gmra.mxu2 %v11985_v20  ;;  %2437 = vmatpush.bf16.msra.mxu0 %v8565_v3  ;;  %v17842_v20 = vld [vmem:[#allocation50_spill] sm:$0xff] }
 0x328   :  { %v2186_v28 = vadd.f32 %v2185_v1, %v2096_v2  ;;  %v1591_v1 = vmax.f32 %v1463_v62, 0.0  ;;  %v1592_v37 = vmax.f32 %v1464_v16, 0.0  ;;  %2526 = vmatpush.bf16.msra.mxu1 %v8629_v8  ;;  %v1473_v31 = vadd.f32 %v11329_v33, %v1336_v53 }
 0x32a   :  { %v2275_v60 = vadd.f32 %v2274_v59, %v2186_v28  ;;  %v2277_v15 = vpop.f32.mrf.mxu2  ;;  %v1333_v59 = vmul.f32 %v11308_v42, %v17842_v20  ;;  %v17843_v28 = vld [vmem:[#allocation51_spill] sm:$0xff]  ;;  %v12021_v16 = vpack.c.bf16 %v1591_v1, %v1587_v29  ;;  %v1601_v8 = vmax.f32 %v1473_v31, 0.0  ;;  %v17848_v29 = vld [vmem:[#allocation29_spill] sm:$0xff]  ;;  %v17849_v1 = vld [vmem:[#allocation30_spill] sm:$0xff] }
 0x32b   :  { %2405 = vmatmul.bf16.gmra.mxu3 %v11988_v35  ;;  %v1588_v35 = vmax.f32 %v1460_v0, 0.0  ;;  %v1337_v55 = vmul.f32 %v11308_v42, %v17843_v28 }
 0x32c   :  { %v12011_v2 = vadd.f32 %v2363_v58, %v2275_v60  ;;  %v1470_v48 = vadd.f32 %v11331_v45, %v1333_v59  ;;  %17844 = vst [vmem:[#allocation46_spill] sm:$0xff] %v12021_v16  ;;  %v1597_v60 = vmax.f32 %v1469_v44, 0.0 }
 0x32d   :  { %v1474_v62 = vadd.f32 %v11331_v45, %v1337_v55  ;;  %v12023_v24 = vpack.c.bf16 %v1592_v37, %v1588_v35  ;;  %v1330_v55 = vmul.f32 %v11316_v47, %v17847_v51  ;;  %v1331_v35 = vmul.f32 %v11304_v54, %v17848_v29 }
 0x32e   :  { %17841 = vst [vmem:[#allocation49_spill] sm:$0xff] %v12011_v2  ;;  %v2366_v25 = vpop.f32.mrf.mxu3  ;;  %v2099_v3 = vpop.f32.mrf.mxu0  ;;  %v1598_v53 = vmax.f32 %v1470_v48, 0.0  ;;  %v1334_v37 = vmul.f32 %v11316_v47, %v17849_v1  ;;  %v12037_v44 = vpack.c.bf16 %v1601_v8, %v1597_v60  ;;  %v17853_v60 = vld [vmem:[#allocation55_spill] sm:$0xff] }
 0x32f   :  { %v2188_v58 = vpop.f32.mrf.mxu1  ;;  %17845 = vst [vmem:[#allocation53_spill] sm:$0xff] %v12023_v24  ;;  %v1602_v28 = vmax.f32 %v1474_v62, 0.0  ;;  %v1467_v31 = vadd.f32 %v11337_v10, %v1330_v55  ;;  %v1468_v62 = vadd.f32 %v11339_v32, %v1331_v35  ;;  %v1340_v8 = vmul.f32 %v11306_v4, %v17853_v60  ;;  %v17854_v55 = vld [vmem:[#allocation59_spill] sm:$0xff] }
 0x330   :  { %v2189_v0 = vadd.f32 %v2188_v58, %v2099_v3  ;;  %v17850_v3 = vld [vmem:[#allocation31_spill] sm:$0xff]  ;;  %17851 = vst [vmem:[#allocation54_spill] sm:$0xff] %v12037_v44  ;;  %v1344_v1 = vmul.f32 %v11306_v4, %v17854_v55 }
 0x331   :  { %2138 = vmatmul.bf16.gmra.mxu0 %v12021_v16  ;;  %2227 = vmatmul.bf16.gmra.mxu1 %v12023_v24  ;;  %v12040_v58 = vpack.c.bf16 %v1602_v28, %v1598_v53  ;;  %v1595_v53 = vmax.f32 %v1467_v31, 0.0  ;;  %v17870_v24 = vld [vmem:[#allocation75_spill] sm:$0xff]  ;;  %v17873_v16 = vld [vmem:[#allocation36_spill] sm:$0xff] }
 0x332   :  { %v2278_v20 = vadd.f32 %v2277_v15, %v2189_v0  ;;  %v2279_v61 = vpop.f32.mrf.mxu2  ;;  %v1335_v15 = vmul.f32 %v11304_v54, %v17850_v3  ;;  %v1471_v0 = vadd.f32 %v11337_v10, %v1334_v37  ;;  %v1481_v60 = vadd.f32 %v11329_v33, %v1344_v1 }
 0x333   :  { %17852 = vst [vmem:[#allocation58_spill] sm:$0xff] %v12040_v58 }
 0x334   :  { %v12027_v59 = vadd.f32 %v2366_v25, %v2278_v20  ;;  %v1472_v20 = vadd.f32 %v11339_v32, %v1335_v15  ;;  %v1599_v35 = vmax.f32 %v1471_v0, 0.0  ;;  %v17856_v15 = vld [vmem:[#allocation57_spill] sm:$0xff] }
 0x336   :  { %17846 = vst [vmem:[#allocation52_spill] sm:$0xff] %v12027_v59  ;;  %v2368_v2 = vpop.f32.mrf.mxu3  ;;  %v2101_v48 = vpop.f32.mrf.mxu0  ;;  %v1600_v37 = vmax.f32 %v1472_v20, 0.0  ;;  %v1341_v59 = vmul.f32 %v11308_v42, %v17856_v15  ;;  %v1609_v15 = vmax.f32 %v1481_v60, 0.0  ;;  %v17861_v60 = vld [vmem:[#allocation32_spill] sm:$0xff] }
 0x337   :  { %v2190_v25 = vpop.f32.mrf.mxu1  ;;  %2321 = vmatmul.bf16.gmra.mxu2 %v12037_v44  ;;  %v17857_v44 = vld [vmem:[#allocation61_spill] sm:$0xff] }
 0x338   :  { %v2191_v51 = vadd.f32 %v2190_v25, %v2101_v48  ;;  %v1596_v48 = vmax.f32 %v1468_v62, 0.0  ;;  %v1478_v55 = vadd.f32 %v11331_v45, %v1341_v59  ;;  %v12061_v62 = vpack.c.bf16 %v1599_v35, %v1595_v53  ;;  %v9446_v59 = vld [vmem:[%s17122_s4 + $0x104] sm:$0xf] }
 0x33a   :  { %v2280_v29 = vadd.f32 %v2279_v61, %v2191_v51  ;;  %v2282_v28 = vpop.f32.mrf.mxu2  ;;  %v1345_v61 = vmul.f32 %v11308_v42, %v17857_v44  ;;  %v1477_v51 = vadd.f32 %v11329_v33, %v1340_v8  ;;  %17858 = vst [vmem:[#allocation63_spill] sm:$0xff] %v12061_v62  ;;  %v12063_v20 = vpack.c.bf16 %v1600_v37, %v1596_v48  ;;  %v8682_v8 = vld [vmem:[%s17122_s4 + $0x108] sm:$0xf0] }
 0x33b   :  { %2410 = vmatmul.bf16.gmra.mxu3 %v12040_v58  ;;  %v1606_v53 = vmax.f32 %v1478_v55, 0.0  ;;  %v8685_v48 = vor.u32 %v9446_v59, %v8682_v8 }
 0x33c   :  { %v12051_v3 = vadd.f32 %v2368_v2, %v2280_v29  ;;  %v1482_v2 = vadd.f32 %v11331_v45, %v1345_v61  ;;  %17859 = vst [vmem:[#allocation60_spill] sm:$0xff] %v12063_v20  ;;  %v1605_v29 = vmax.f32 %v1477_v51, 0.0 }
 0x33d   :  { %2616 = vmatpush.bf16.msrb.mxu2 %v8685_v48 }
 0x33e   :  { %17855 = vst [vmem:[#allocation56_spill] sm:$0xff] %v12051_v3  ;;  %v2371_v25 = vpop.f32.mrf.mxu3  ;;  %v2104_v31 = vpop.f32.mrf.mxu0  ;;  %v1610_v35 = vmax.f32 %v1482_v2, 0.0  ;;  %v17864_v2 = vld [vmem:[#allocation35_spill] sm:$0xff]  ;;  %v12089_v8 = vpack.c.bf16 %v1609_v15, %v1605_v29  ;;  %v8554_v29 = vld [vmem:[%s17122_s4 + $0x8] sm:$0xf0] }
 0x33f   :  { %v2193_v58 = vpop.f32.mrf.mxu1  ;;  %v1343_v59 = vmul.f32 %v11304_v54, %v17864_v2  ;;  %v9430_v15 = vld [vmem:[%s17122_s4 + $0x84] sm:$0xf] }
 0x340   :  { %v2194_v0 = vadd.f32 %v2193_v58, %v2104_v31  ;;  %v9462_v58 = vld [vmem:[%s17122_s4 + $0x184] sm:$0xf]  ;;  %v1338_v31 = vmul.f32 %v11316_v47, %v17861_v60  ;;  %17865 = vst [vmem:[#allocation67_spill] sm:$0xff] %v12089_v8 }
 0x341   :  { %2143 = vmatmul.bf16.gmra.mxu0 %v12061_v62  ;;  %2232 = vmatmul.bf16.gmra.mxu1 %v12063_v20  ;;  %v17863_v20 = vld [vmem:[#allocation34_spill] sm:$0xff]  ;;  %v17868_v2 = vld [vmem:[#allocation77_spill] sm:$0xff] }
 0x342   :  { %v2283_v44 = vadd.f32 %v2282_v28, %v2194_v0  ;;  %v2284_v1 = vpop.f32.mrf.mxu2  ;;  %v8746_v28 = vld [vmem:[%s17122_s4 + $0x188] sm:$0xf0]  ;;  %v1342_v55 = vmul.f32 %v11316_v47, %v17863_v20  ;;  %v9414_v20 = vld [vmem:[%s17122_s4 + $0x4] sm:$0xf] }
 0x343   :  { %v8749_v51 = vor.u32 %v9462_v58, %v8746_v28  ;;  %v17862_v0 = vld [vmem:[#allocation33_spill] sm:$0xff]  ;;  %v12092_v28 = vpack.c.bf16 %v1610_v35, %v1606_v53 }
 0x344   :  { %v12079_v37 = vadd.f32 %v2371_v25, %v2283_v44  ;;  %v1339_v3 = vmul.f32 %v11304_v54, %v17862_v0  ;;  %v1475_v25 = vadd.f32 %v11337_v10, %v1338_v31  ;;  %v1479_v0 = vadd.f32 %v11337_v10, %v1342_v55  ;;  %v8618_v53 = vld [vmem:[%s17122_s4 + $0x88] sm:$0xf0] }
 0x345   :  { %2705 = vmatpush.bf16.msrb.mxu3 %v8749_v51  ;;  %17866 = vst [vmem:[#allocation64_spill] sm:$0xff] %v12092_v28  ;;  %v8621_v51 = vor.u32 %v9430_v15, %v8618_v53  ;;  %v17867_v31 = vld [vmem:[#allocation73_spill] sm:$0xff] }
 0x346   :  { %17860 = vst [vmem:[#allocation62_spill] sm:$0xff] %v12079_v37  ;;  %v2373_v61 = vpop.f32.mrf.mxu3  ;;  %v2106_v44 = vpop.f32.mrf.mxu0  ;;  %v1476_v48 = vadd.f32 %v11339_v32, %v1339_v3  ;;  %v1480_v37 = vadd.f32 %v11339_v32, %v1343_v59  ;;  %v8557_v3 = vor.u32 %v9414_v20, %v8554_v29  ;;  %v1348_v55 = vmul.f32 %v11306_v4, %v17867_v31 }
 0x347   :  { %v2195_v58 = vpop.f32.mrf.mxu1  ;;  %2326 = vmatmul.bf16.gmra.mxu2 %v12089_v8  ;;  %v1352_v59 = vmul.f32 %v11306_v4, %v17868_v2  ;;  %v1607_v62 = vmax.f32 %v1479_v0, 0.0  ;;  %2527 = vmatpush.bf16.msra.mxu1 %v8621_v51 }
 0x348   :  { %v2196_v60 = vadd.f32 %v2195_v58, %v2106_v44  ;;  %v1603_v44 = vmax.f32 %v1475_v25, 0.0  ;;  %2438 = vmatpush.bf16.msra.mxu0 %v8557_v3  ;;  %v1608_v20 = vmax.f32 %v1480_v37, 0.0  ;;  %v1485_v53 = vadd.f32 %v11329_v33, %v1348_v55 }
 0x349   :  { %v1489_v31 = vadd.f32 %v11329_v33, %v1352_v59 }
 0x34a   :  { %v2285_v35 = vadd.f32 %v2284_v1, %v2196_v60  ;;  %v2287_v58 = vpop.f32.mrf.mxu2  ;;  %v1349_v1 = vmul.f32 %v11308_v42, %v17870_v24  ;;  %v17871_v60 = vld [vmem:[#allocation79_spill] sm:$0xff]  ;;  %v12125_v37 = vpack.c.bf16 %v1607_v62, %v1603_v44  ;;  %v1613_v51 = vmax.f32 %v1485_v53, 0.0  ;;  %v17874_v62 = vld [vmem:[#allocation37_spill] sm:$0xff]  ;;  %v17875_v44 = vld [vmem:[#allocation38_spill] sm:$0xff] }
 0x34b   :  { %2415 = vmatmul.bf16.gmra.mxu3 %v12092_v28  ;;  %v1604_v28 = vmax.f32 %v1476_v48, 0.0  ;;  %v1353_v15 = vmul.f32 %v11308_v42, %v17871_v60  ;;  %v1617_v55 = vmax.f32 %v1489_v31, 0.0 }
 0x34c   :  { %v12115_v8 = vadd.f32 %v2373_v61, %v2285_v35  ;;  %v1486_v25 = vadd.f32 %v11331_v45, %v1349_v1 }
 0x34d   :  { %v1490_v0 = vadd.f32 %v11331_v45, %v1353_v15  ;;  %v12127_v35 = vpack.c.bf16 %v1608_v20, %v1604_v28  ;;  %v1346_v15 = vmul.f32 %v11316_v47, %v17873_v16  ;;  %v1347_v28 = vmul.f32 %v11304_v54, %v17874_v62 }
 0x34e   :  { %17869 = vst [vmem:[#allocation71_spill] sm:$0xff] %v12115_v8  ;;  %v2376_v29 = vpop.f32.mrf.mxu3  ;;  %v2109_v3 = vpop.f32.mrf.mxu0  ;;  %v1614_v59 = vmax.f32 %v1486_v25, 0.0  ;;  %v1350_v20 = vmul.f32 %v11316_v47, %v17875_v44  ;;  %v12141_v53 = vpack.c.bf16 %v1617_v55, %v1613_v51  ;;  %v17878_v51 = vld [vmem:[#allocation80_spill] sm:$0xff] }
 0x34f   :  { %v2198_v61 = vpop.f32.mrf.mxu1  ;;  %v1618_v60 = vmax.f32 %v1490_v0, 0.0  ;;  %v1483_v31 = vadd.f32 %v11337_v10, %v1346_v15  ;;  %v1484_v0 = vadd.f32 %v11339_v32, %v1347_v28  ;;  %v1356_v55 = vmul.f32 %v11306_v4, %v17878_v51  ;;  %v17879_v15 = vld [vmem:[#allocation84_spill] sm:$0xff] }
 0x350   :  { %v2199_v48 = vadd.f32 %v2198_v61, %v2109_v3  ;;  %v17876_v3 = vld [vmem:[#allocation39_spill] sm:$0xff]  ;;  %17877 = vst [vmem:[#allocation65_spill] sm:$0xff] %v12141_v53  ;;  %v1360_v44 = vmul.f32 %v11306_v4, %v17879_v15 }
 0x351   :  { %2148 = vmatmul.bf16.gmra.mxu0 %v12125_v37  ;;  %2237 = vmatmul.bf16.gmra.mxu1 %v12127_v35  ;;  %v12144_v61 = vpack.c.bf16 %v1618_v60, %v1614_v59  ;;  %v1611_v59 = vmax.f32 %v1483_v31, 0.0 }
 0x352   :  { %v2288_v24 = vadd.f32 %v2287_v58, %v2199_v48  ;;  %v2289_v2 = vpop.f32.mrf.mxu2  ;;  %v1351_v58 = vmul.f32 %v11304_v54, %v17876_v3  ;;  %v1487_v48 = vadd.f32 %v11337_v10, %v1350_v20  ;;  %v1497_v51 = vadd.f32 %v11329_v33, %v1360_v44 }
 0x354   :  { %v12131_v1 = vadd.f32 %v2376_v29, %v2288_v24  ;;  %v1488_v24 = vadd.f32 %v11339_v32, %v1351_v58  ;;  %v1615_v28 = vmax.f32 %v1487_v48, 0.0  ;;  %v17881_v58 = vld [vmem:[#allocation86_spill] sm:$0xff] }
 0x356   :  { %17872 = vst [vmem:[#allocation70_spill] sm:$0xff] %v12131_v1  ;;  %v2378_v8 = vpop.f32.mrf.mxu3  ;;  %v2111_v25 = vpop.f32.mrf.mxu0  ;;  %v1616_v20 = vmax.f32 %v1488_v24, 0.0  ;;  %v1361_v1 = vmul.f32 %v11308_v42, %v17881_v58 }
 0x357   :  { %v2200_v29 = vpop.f32.mrf.mxu1  ;;  %2331 = vmatmul.bf16.gmra.mxu2 %v12141_v53  ;;  %v17882_v53 = vld [vmem:[#allocation83_spill] sm:$0xff] }
 0x358   :  { %v2201_v16 = vadd.f32 %v2200_v29, %v2111_v25  ;;  %v1612_v25 = vmax.f32 %v1484_v0, 0.0  ;;  %v12165_v0 = vpack.c.bf16 %v1615_v28, %v1611_v59  ;;  %v17886_v28 = vld [vmem:[#allocation42_spill] sm:$0xff] }
 0x35a   :  { %v2290_v62 = vadd.f32 %v2289_v2, %v2201_v16  ;;  %v2292_v60 = vpop.f32.mrf.mxu2  ;;  %v1357_v2 = vmul.f32 %v11308_v42, %v17882_v53  ;;  %v1493_v16 = vadd.f32 %v11329_v33, %v1356_v55  ;;  %v12167_v24 = vpack.c.bf16 %v1616_v20, %v1612_v25  ;;  %v17887_v20 = vld [vmem:[#allocation43_spill] sm:$0xff] }
 0x35b   :  { %2420 = vmatmul.bf16.gmra.mxu3 %v12144_v61  ;;  %v1358_v25 = vmul.f32 %v11316_v47, %v17886_v28 }
 0x35c   :  { %v12155_v3 = vadd.f32 %v2378_v8, %v2290_v62  ;;  %v1494_v4 = vadd.f32 %v11331_v45, %v1357_v2  ;;  %v1498_v8 = vadd.f32 %v11331_v45, %v1361_v1  ;;  %v1621_v53 = vmax.f32 %v1493_v16, 0.0  ;;  %v17885_v1 = vld [vmem:[#allocation41_spill] sm:$0xff] }
 0x35d   :  { %v1625_v62 = vmax.f32 %v1497_v51, 0.0  ;;  %v1355_v59 = vmul.f32 %v11304_v54, %v17885_v1 }
 0x35e   :  { %17880 = vst [vmem:[#allocation66_spill] sm:$0xff] %v12155_v3  ;;  %v2381_v29 = vpop.f32.mrf.mxu3  ;;  %v2114_v31 = vpop.f32.mrf.mxu0  ;;  %v1622_v33 = vmax.f32 %v1494_v4, 0.0  ;;  %v1626_v44 = vmax.f32 %v1498_v8, 0.0  ;;  %v17884_v3 = vld [vmem:[#allocation40_spill] sm:$0xff]  ;;  %v1495_v8 = vadd.f32 %v11337_v10, %v1358_v25 }
 0x35f   :  { %v2203_v15 = vpop.f32.mrf.mxu1  ;;  %v1354_v45 = vmul.f32 %v11316_v47, %v17884_v3  ;;  %v12181_v16 = vpack.c.bf16 %v1625_v62, %v1621_v53 }
 0x360   :  { %v2204_v48 = vadd.f32 %v2203_v15, %v2114_v31  ;;  %v12184_v31 = vpack.c.bf16 %v1626_v44, %v1622_v33  ;;  %v1492_v15 = vadd.f32 %v11339_v32, %v1355_v59  ;;  %v1623_v62 = vmax.f32 %v1495_v8, 0.0 }
 0x361   :  { %2153 = vmatmul.bf16.gmra.mxu0 %v12165_v0  ;;  %2242 = vmatmul.bf16.gmra.mxu1 %v12167_v24  ;;  %v1491_v51 = vadd.f32 %v11337_v10, %v1354_v45 }
 0x362   :  { %v2293_v42 = vadd.f32 %v2292_v60, %v2204_v48  ;;  %v2294_v55 = vpop.f32.mrf.mxu2  ;;  %v1359_v60 = vmul.f32 %v11304_v54, %v17887_v20  ;;  %v1620_v45 = vmax.f32 %v1492_v15, 0.0 }
 0x363   :  { %v1619_v47 = vmax.f32 %v1491_v51, 0.0 }
 0x364   :  { %v12171_v58 = vadd.f32 %v2381_v29, %v2293_v42  ;;  %v1496_v48 = vadd.f32 %v11339_v32, %v1359_v60 }
 0x365   :  { %v12193_v20 = vpack.c.bf16 %v1623_v62, %v1619_v47 }
 0x366   :  { %17883 = vst [vmem:[#allocation68_spill] sm:$0xff] %v12171_v58  ;;  %v2383_v2 = vpop.f32.mrf.mxu3  ;;  %v2116_v4 = vpop.f32.mrf.mxu0  ;;  %v1624_v33 = vmax.f32 %v1496_v48, 0.0 }
 0x367   :  { %v2205_v29 = vpop.f32.mrf.mxu1  ;;  %2336 = vmatmul.bf16.gmra.mxu2 %v12181_v16 }
 0x368   :  { %v2206_v3 = vadd.f32 %v2205_v29, %v2116_v4  ;;  %v12195_v10 = vpack.c.bf16 %v1624_v33, %v1620_v45  ;;  %v17890_v29 = vld [vmem:[#allocation90_spill] sm:$0xff] }
 0x36a   :  { %v2295_v54 = vadd.f32 %v2294_v55, %v2206_v3  ;;  %v2297_v42 = vpop.f32.mrf.mxu2 }
 0x36b   :  { %2425 = vmatmul.bf16.gmra.mxu3 %v12184_v31 }
 0x36c   :  { %v12191_v53 = vadd.f32 %v2383_v2, %v2295_v54 }
 0x36e   :  { %17888 = vst [vmem:[#allocation69_spill] sm:$0xff] %v12191_v53  ;;  %v2386_v44 = vpop.f32.mrf.mxu3  ;;  %v2119_v1 = vpop.f32.mrf.mxu0 }
 0x36f   :  { %v2208_v59 = vpop.f32.mrf.mxu1 }
 0x370   :  { %v2209_v28 = vadd.f32 %v2208_v59, %v2119_v1 }
 0x371   :  { %2158 = vmatmul.bf16.gmra.mxu0 %v12193_v20  ;;  %2247 = vmatmul.bf16.gmra.mxu1 %v12195_v10 }
 0x372   :  { %v2298_v32 = vadd.f32 %v2297_v42, %v2209_v28  ;;  %v2299_v55 = vpop.f32.mrf.mxu2 }
 0x374   :  { %v12199_v25 = vadd.f32 %v2386_v44, %v2298_v32 }
 0x376   :  { %17889 = vst [vmem:[#allocation76_spill] sm:$0xff] %v12199_v25  ;;  %v2388_v2 = vpop.f32.mrf.mxu3  ;;  %v2121_v60 = vpop.f32.mrf.mxu0 }
 0x377   :  { %v2210_v51 = vpop.f32.mrf.mxu1  ;;  %2617 = vmatmul.bf16.vlgmr.msrb.gmra.mxu2 %v11414_v30 }
 0x378   :  { %v2211_v4 = vadd.f32 %v2210_v51, %v2121_v60 }
 0x37a   :  { %v2300_v15 = vadd.f32 %v2299_v55, %v2211_v4  ;;  %v2302_v3 = vpop.f32.mrf.mxu2 }
 0x37b   :  { %2706 = vmatmul.bf16.vlgmr.msrb.gmra.mxu3 %v17890_v29 }
 0x37c   :  { %v12203_v8 = vadd.f32 %v2388_v2, %v2300_v15 }
 0x37e   :  { %17891 = vst [vmem:[#allocation74_spill] sm:$0xff] %v12203_v8  ;;  %v2391_v48 = vpop.f32.mrf.mxu3  ;;  %v2124_v54 = vpop.f32.mrf.mxu0 }
 0x37f   :  { %v2213_v47 = vpop.f32.mrf.mxu1 }
 0x380   :  { %v2214_v62 = vadd.f32 %v2213_v47, %v2124_v54 }
 0x381   :  { %2439 = vmatmul.bf16.vlgmr.msra.gmra.mxu0 %v11469_v39  ;;  %2528 = vmatmul.bf16.vlgmr.msra.gmra.mxu1 %v11471_v40 }
 0x382   :  { %v2303_v42 = vadd.f32 %v2302_v3, %v2214_v62  ;;  %v2304_v45 = vpop.f32.mrf.mxu2 }
 0x384   :  { %v12207_v33 = vadd.f32 %v2391_v48, %v2303_v42 }
 0x386   :  { %17892 = vst [vmem:[#allocation81_spill] sm:$0xff] %v12207_v33  ;;  %v2393_v44 = vpop.f32.mrf.mxu3  ;;  %v2126_v30 = vpop.f32.mrf.mxu0 }
 0x387   :  { %v2215_v1 = vpop.f32.mrf.mxu1  ;;  %2622 = vmatmul.bf16.gmra.mxu2 %v11507_v9 }
 0x388   :  { %v2216_v59 = vadd.f32 %v2215_v1, %v2126_v30 }
 0x38a   :  { %v2305_v28 = vadd.f32 %v2304_v45, %v2216_v59  ;;  %v2307_v32 = vpop.f32.mrf.mxu2 }
 0x38b   :  { %2711 = vmatmul.bf16.gmra.mxu3 %v11509_v46 }
 0x38c   :  { %v12211_v55 = vadd.f32 %v2393_v44, %v2305_v28 }
 0x38e   :  { %17893 = vst [vmem:[#allocation78_spill] sm:$0xff] %v12211_v55  ;;  %v2396_v2 = vpop.f32.mrf.mxu3  ;;  %v2129_v39 = vpop.f32.mrf.mxu0 }
 0x38f   :  { %v2218_v60 = vpop.f32.mrf.mxu1 }
 0x390   :  { %v2219_v40 = vadd.f32 %v2218_v60, %v2129_v39 }
 0x391   :  { %2444 = vmatmul.bf16.gmra.mxu0 %v11529_v13  ;;  %2533 = vmatmul.bf16.gmra.mxu1 %v11531_v50 }
 0x392   :  { %v2308_v51 = vadd.f32 %v2307_v32, %v2219_v40  ;;  %v2309_v4 = vpop.f32.mrf.mxu2 }
 0x394   :  { %v12215_v29 = vadd.f32 %v2396_v2, %v2308_v51 }
 0x396   :  { %17894 = vst [vmem:[#allocation72_spill] sm:$0xff] %v12215_v29  ;;  %v2398_v15 = vpop.f32.mrf.mxu3  ;;  %v2131_v9 = vpop.f32.mrf.mxu0 }
 0x397   :  { %v2220_v3 = vpop.f32.mrf.mxu1  ;;  %2627 = vmatmul.bf16.gmra.mxu2 %v11543_v27 }
 0x398   :  { %v2221_v46 = vadd.f32 %v2220_v3, %v2131_v9 }
 0x39a   :  { %v2310_v48 = vadd.f32 %v2309_v4, %v2221_v46  ;;  %v2312_v54 = vpop.f32.mrf.mxu2 }
 0x39b   :  { %2716 = vmatmul.bf16.gmra.mxu3 %v11545_v41 }
 0x39c   :  { %v12219_v47 = vadd.f32 %v2398_v15, %v2310_v48 }
 0x39e   :  { %17895 = vst [vmem:[#allocation85_spill] sm:$0xff] %v12219_v47  ;;  %v2401_v62 = vpop.f32.mrf.mxu3  ;;  %v2134_v13 = vpop.f32.mrf.mxu0 }
 0x39f   :  { %v2223_v42 = vpop.f32.mrf.mxu1 }
 0x3a0   :  { %v2224_v50 = vadd.f32 %v2223_v42, %v2134_v13 }
 0x3a1   :  { %2449 = vmatmul.bf16.gmra.mxu0 %v11565_v12  ;;  %2538 = vmatmul.bf16.gmra.mxu1 %v11567_v21 }
 0x3a2   :  { %v2313_v45 = vadd.f32 %v2312_v54, %v2224_v50  ;;  %v2314_v44 = vpop.f32.mrf.mxu2 }
 0x3a4   :  { %v12223_v30 = vadd.f32 %v2401_v62, %v2313_v45 }
 0x3a6   :  { %17896 = vst [vmem:[#allocation82_spill] sm:$0xff] %v12223_v30  ;;  %v2403_v1 = vpop.f32.mrf.mxu3  ;;  %v2136_v27 = vpop.f32.mrf.mxu0 }
 0x3a7   :  { %v2225_v59 = vpop.f32.mrf.mxu1  ;;  %2632 = vmatmul.bf16.gmra.mxu2 %v11603_v36 }
 0x3a8   :  { %v2226_v41 = vadd.f32 %v2225_v59, %v2136_v27 }
 0x3aa   :  { %v2315_v28 = vadd.f32 %v2314_v44, %v2226_v41  ;;  %v2317_v32 = vpop.f32.mrf.mxu2 }
 0x3ab   :  { %2721 = vmatmul.bf16.gmra.mxu3 %v11605_v38 }
 0x3ac   :  { %v12227_v2 = vadd.f32 %v2403_v1, %v2315_v28 }
 0x3ae   :  { %17897 = vst [vmem:[#allocation89_spill] sm:$0xff] %v12227_v2  ;;  %v2406_v39 = vpop.f32.mrf.mxu3  ;;  %v2139_v12 = vpop.f32.mrf.mxu0 }
 0x3af   :  { %v2228_v60 = vpop.f32.mrf.mxu1 }
 0x3b0   :  { %v2229_v21 = vadd.f32 %v2228_v60, %v2139_v12 }
 0x3b1   :  { %2454 = vmatmul.bf16.gmra.mxu0 %v11625_v57  ;;  %2543 = vmatmul.bf16.gmra.mxu1 %v11627_v19 }
 0x3b2   :  { %v2318_v40 = vadd.f32 %v2317_v32, %v2229_v21  ;;  %v2319_v51 = vpop.f32.mrf.mxu2 }
 0x3b4   :  { %v12231_v4 = vadd.f32 %v2406_v39, %v2318_v40 }
 0x3b6   :  { %17898 = vst [vmem:[#allocation88_spill] sm:$0xff] %v12231_v4  ;;  %v2408_v15 = vpop.f32.mrf.mxu3  ;;  %v2141_v36 = vpop.f32.mrf.mxu0 }
 0x3b7   :  { %v2230_v9 = vpop.f32.mrf.mxu1  ;;  %2637 = vmatmul.bf16.gmra.mxu2 %v11639_v11 }
 0x3b8   :  { %v2231_v38 = vadd.f32 %v2230_v9, %v2141_v36 }
 0x3ba   :  { %v2320_v3 = vadd.f32 %v2319_v51, %v2231_v38  ;;  %v2322_v46 = vpop.f32.mrf.mxu2 }
 0x3bb   :  { %2726 = vmatmul.bf16.gmra.mxu3 %v11641_v5 }
 0x3bc   :  { %v12235_v48 = vadd.f32 %v2408_v15, %v2320_v3 }
 0x3be   :  { %17899 = vst [vmem:[#allocation94_spill] sm:$0xff] %v12235_v48  ;;  %v2411_v54 = vpop.f32.mrf.mxu3  ;;  %v2144_v57 = vpop.f32.mrf.mxu0 }
 0x3bf   :  { %v2233_v62 = vpop.f32.mrf.mxu1 }
 0x3c0   :  { %v2234_v19 = vadd.f32 %v2233_v62, %v2144_v57  ;;  %v17905_v62 = vld [vmem:[#allocation91_spill] sm:$0xff] }
 0x3c1   :  { %2459 = vmatmul.bf16.gmra.mxu0 %v11661_v43  ;;  %2548 = vmatmul.bf16.gmra.mxu1 %v11663_v18 }
 0x3c2   :  { %v2323_v13 = vadd.f32 %v2322_v46, %v2234_v19  ;;  %v2324_v42 = vpop.f32.mrf.mxu2 }
 0x3c4   :  { %v12239_v50 = vadd.f32 %v2411_v54, %v2323_v13 }
 0x3c6   :  { %17900 = vst [vmem:[#allocation92_spill] sm:$0xff] %v12239_v50  ;;  %v2413_v45 = vpop.f32.mrf.mxu3  ;;  %v2146_v11 = vpop.f32.mrf.mxu0 }
 0x3c7   :  { %v2235_v44 = vpop.f32.mrf.mxu1  ;;  %2642 = vmatmul.bf16.gmra.mxu2 %v11699_v52 }
 0x3c8   :  { %v2236_v5 = vadd.f32 %v2235_v44, %v2146_v11  ;;  %v17907_v44 = vld [vmem:[#allocation93_spill] sm:$0xff] }
 0x3ca   :  { %v2325_v1 = vadd.f32 %v2324_v42, %v2236_v5  ;;  %v2327_v27 = vpop.f32.mrf.mxu2  ;;  %v17908_v5 = vld [vmem:[#allocation95_spill] sm:$0xff] }
 0x3cb   :  { %2731 = vmatmul.bf16.gmra.mxu3 %v11701_v7 }
 0x3cc   :  { %v12243_v59 = vadd.f32 %v2413_v45, %v2325_v1 }
 0x3ce   :  { %17901 = vst [vmem:[#allocation97_spill] sm:$0xff] %v12243_v59  ;;  %v2416_v41 = vpop.f32.mrf.mxu3  ;;  %v2149_v43 = vpop.f32.mrf.mxu0 }
 0x3cf   :  { %v2238_v28 = vpop.f32.mrf.mxu1 }
 0x3d0   :  { %v2239_v18 = vadd.f32 %v2238_v28, %v2149_v43 }
 0x3d1   :  { %2464 = vmatmul.bf16.gmra.mxu0 %v11721_v49  ;;  %2553 = vmatmul.bf16.gmra.mxu1 %v11723_v22 }
 0x3d2   :  { %v2328_v32 = vadd.f32 %v2327_v27, %v2239_v18  ;;  %v2329_v39 = vpop.f32.mrf.mxu2  ;;  %v17910_v18 = vld [vmem:[#allocation118_spill] sm:$0xff] }
 0x3d4   :  { %v12247_v12 = vadd.f32 %v2416_v41, %v2328_v32  ;;  %v17911_v32 = vld [vmem:[#allocation122_spill] sm:$0xff] }
 0x3d6   :  { %17902 = vst [vmem:[#allocation96_spill] sm:$0xff] %v12247_v12  ;;  %v2418_v60 = vpop.f32.mrf.mxu3  ;;  %v2151_v52 = vpop.f32.mrf.mxu0 }
 0x3d7   :  { %v2240_v21 = vpop.f32.mrf.mxu1  ;;  %2647 = vmatmul.bf16.gmra.mxu2 %v11735_v14 }
 0x3d8   :  { %v2241_v7 = vadd.f32 %v2240_v21, %v2151_v52  ;;  %v17913_v21 = vld [vmem:[#allocation119_spill] sm:$0xff] }
 0x3da   :  { %v2330_v40 = vadd.f32 %v2329_v39, %v2241_v7  ;;  %v2332_v51 = vpop.f32.mrf.mxu2  ;;  %v17914_v7 = vld [vmem:[#allocation114_spill] sm:$0xff] }
 0x3db   :  { %2736 = vmatmul.bf16.gmra.mxu3 %v11737_v34 }
 0x3dc   :  { %v12251_v15 = vadd.f32 %v2418_v60, %v2330_v40 }
 0x3de   :  { %17903 = vst [vmem:[#allocation99_spill] sm:$0xff] %v12251_v15  ;;  %v2421_v36 = vpop.f32.mrf.mxu3  ;;  %v2154_v49 = vpop.f32.mrf.mxu0 }
 0x3df   :  { %v2243_v9 = vpop.f32.mrf.mxu1 }
 0x3e0   :  { %v2244_v22 = vadd.f32 %v2243_v9, %v2154_v49 }
 0x3e1   :  { %2469 = vmatmul.bf16.gmra.mxu0 %v11757_v63  ;;  %2558 = vmatmul.bf16.gmra.mxu1 %v11759_v6 }
 0x3e2   :  { %v2333_v38 = vadd.f32 %v2332_v51, %v2244_v22  ;;  %v2334_v3 = vpop.f32.mrf.mxu2  ;;  %v17915_v22 = vld [vmem:[#allocation120_spill] sm:$0xff] }
 0x3e4   :  { %v12255_v46 = vadd.f32 %v2421_v36, %v2333_v38  ;;  %v17916_v38 = vld [vmem:[#allocation125_spill] sm:$0xff] }
 0x3e6   :  { %17904 = vst [vmem:[#allocation98_spill] sm:$0xff] %v12255_v46  ;;  %v2423_v54 = vpop.f32.mrf.mxu3  ;;  %v2156_v14 = vpop.f32.mrf.mxu0  ;;  %v17955_v46 = vld [vmem:[#allocation56_spill] sm:$0xff] }
 0x3e7   :  { %v2245_v57 = vpop.f32.mrf.mxu1  ;;  %2652 = vmatmul.bf16.gmra.mxu2 %v11783_v23 }
 0x3e8   :  { %v2246_v34 = vadd.f32 %v2245_v57, %v2156_v14 }
 0x3ea   :  { %v2335_v19 = vadd.f32 %v2334_v3, %v2246_v34  ;;  %v2337_v42 = vpop.f32.mrf.mxu2 }
 0x3eb   :  { %2741 = vmatmul.bf16.gmra.mxu3 %v17905_v62 }
 0x3ec   :  { %v12259_v13 = vadd.f32 %v2423_v54, %v2335_v19 }
 0x3ee   :  { %17906 = vst [vmem:[#allocation102_spill] sm:$0xff] %v12259_v13  ;;  %v2159_v45 = vpop.f32.mrf.mxu0  ;;  %v2426_v6 = vpop.f32.mrf.mxu3 }
 0x3ef   :  { %v2248_v63 = vpop.f32.mrf.mxu1 }
 0x3f0   :  { %v2249_v11 = vadd.f32 %v2248_v63, %v2159_v45 }
 0x3f1   :  { %2474 = vmatmul.bf16.gmra.mxu0 %v17907_v44  ;;  %2563 = vmatmul.bf16.gmra.mxu1 %v17908_v5 }
 0x3f2   :  { %v2338_v1 = vadd.f32 %v2337_v42, %v2249_v11  ;;  %v2339_v41 = vpop.f32.mrf.mxu2 }
 0x3f4   :  { %v12263_v27 = vadd.f32 %v2426_v6, %v2338_v1  ;;  %v17919_v1 = vld [vmem:[#allocation126_spill] sm:$0xff] }
 0x3f6   :  { %17909 = vst [vmem:[#allocation101_spill] sm:$0xff] %v12263_v27  ;;  %v2161_v43 = vpop.f32.mrf.mxu0  ;;  %v2428_v60 = vpop.f32.mrf.mxu3 }
 0x3f7   :  { %v2250_v23 = vpop.f32.mrf.mxu1  ;;  %2657 = vmatmul.bf16.gmra.mxu2 %v17910_v18 }
 0x3f8   :  { %v2251_v28 = vadd.f32 %v2250_v23, %v2161_v43 }
 0x3fa   :  { %v2340_v39 = vadd.f32 %v2339_v41, %v2251_v28  ;;  %v2618_v49 = vpop.f32.mrf.mxu2 }
 0x3fb   :  { %2746 = vmatmul.bf16.gmra.mxu3 %v17911_v32 }
 0x3fc   :  { %v12267_v52 = vadd.f32 %v2428_v60, %v2340_v39  ;;  %v17920_v39 = vld [vmem:[#allocation115_spill] sm:$0xff]  ;;  %v17921_v60 = vld [vmem:[#allocation44_spill] sm:$0xff] }
 0x3fe   :  { %17912 = vst [vmem:[#allocation107_spill] sm:$0xff] %v12267_v52  ;;  %v2440_v40 = vpop.f32.mrf.mxu0  ;;  %v2707_v9 = vpop.f32.mrf.mxu3 }
 0x3ff   :  { %v2529_v51 = vpop.f32.mrf.mxu1 }
 0x400   :  { %v2530_v36 = vadd.f32 %v2529_v51, %v2440_v40 }
 0x401   :  { %2479 = vmatmul.bf16.gmra.mxu0 %v17913_v21  ;;  %2568 = vmatmul.bf16.gmra.mxu1 %v17914_v7 }
 0x402   :  { %v2619_v3 = vadd.f32 %v2618_v49, %v2530_v36  ;;  %v2620_v62 = vpop.f32.mrf.mxu2  ;;  %v17922_v49 = vld [vmem:[#allocation45_spill] sm:$0xff] }
 0x404   :  { %v12273_v54 = vadd.f32 %v2707_v9, %v2619_v3  ;;  %v9485_v9 = vld [vmem:[#allocation4 + $0x38] sm:$0xff] }
 0x405   :  { %3409 = vmatpush.bf16.msrb.mxu0 %v9485_v9 }
 0x406   :  { %17917 = vst [vmem:[#allocation105_spill] sm:$0xff] %v12273_v54  ;;  %v2442_v14 = vpop.f32.mrf.mxu0  ;;  %v2709_v19 = vpop.f32.mrf.mxu3 }
 0x407   :  { %2662 = vmatmul.bf16.gmra.mxu2 %v17915_v22  ;;  %v2531_v57 = vpop.f32.mrf.mxu1  ;;  %v9493_v22 = vld [vmem:[#allocation4 + $0x78] sm:$0xff] }
 0x408   :  { %v2532_v34 = vadd.f32 %v2531_v57, %v2442_v14  ;;  %3498 = vmatpush.bf16.msrb.mxu1 %v9493_v22 }
 0x40a   :  { %v2621_v42 = vadd.f32 %v2620_v62, %v2532_v34  ;;  %v2623_v44 = vpop.f32.mrf.mxu2 }
 0x40b   :  { %2751 = vmatmul.bf16.gmra.mxu3 %v17916_v38  ;;  %v17923_v38 = vld [vmem:[#allocation48_spill] sm:$0xff] }
 0x40c   :  { %v12277_v45 = vadd.f32 %v2709_v19, %v2621_v42 }
 0x40e   :  { %17918 = vst [vmem:[#allocation112_spill] sm:$0xff] %v12277_v45  ;;  %v2445_v63 = vpop.f32.mrf.mxu0  ;;  %v2712_v5 = vpop.f32.mrf.mxu3 }
 0x40f   :  { %v2534_v11 = vpop.f32.mrf.mxu1 }
 0x410   :  { %v2535_v6 = vadd.f32 %v2534_v11, %v2445_v63  ;;  %v17924_v11 = vld [vmem:[#allocation46_spill] sm:$0xff] }
 0x411   :  { %2484 = vmatmul.bf16.gmra.mxu0 %v11917_v17  ;;  %2573 = vmatmul.bf16.gmra.mxu1 %v11919_v56 }
 0x412   :  { %v2624_v41 = vadd.f32 %v2623_v44, %v2535_v6  ;;  %v2625_v17 = vpop.f32.mrf.mxu2  ;;  %v17925_v6 = vld [vmem:[#allocation53_spill] sm:$0xff] }
 0x414   :  { %v12281_v43 = vadd.f32 %v2712_v5, %v2624_v41 }
 0x416   :  { %v2447_v23 = vpop.f32.mrf.mxu0  ;;  %v2714_v32 = vpop.f32.mrf.mxu3 }
 0x417   :  { %2667 = vmatmul.bf16.gmra.mxu2 %v11933_v26  ;;  %v2536_v28 = vpop.f32.mrf.mxu1 }
 0x418   :  { %v2537_v18 = vadd.f32 %v2536_v28, %v2447_v23 }
 0x41a   :  { %v2626_v56 = vadd.f32 %v2625_v17, %v2537_v18  ;;  %v2628_v51 = vpop.f32.mrf.mxu2  ;;  %v17926_v18 = vld [vmem:[#allocation54_spill] sm:$0xff] }
 0x41b   :  { %2756 = vmatmul.bf16.gmra.mxu3 %v17919_v1  ;;  %v17927_v17 = vld [vmem:[#allocation58_spill] sm:$0xff] }
 0x41c   :  { %v12285_v21 = vadd.f32 %v2714_v32, %v2626_v56 }
 0x41e   :  { %v2450_v7 = vpop.f32.mrf.mxu0  ;;  %v2717_v36 = vpop.f32.mrf.mxu3 }
 0x41f   :  { %v2539_v40 = vpop.f32.mrf.mxu1 }
 0x420   :  { %v2540_v26 = vadd.f32 %v2539_v40, %v2450_v7 }
 0x421   :  { %2489 = vmatmul.bf16.gmra.mxu0 %v17920_v39  ;;  %2578 = vmatmul.bf16.gmra.mxu1 %v17921_v60 }
 0x422   :  { %v2629_v3 = vadd.f32 %v2628_v51, %v2540_v26  ;;  %v2630_v19 = vpop.f32.mrf.mxu2 }
 0x424   :  { %v12289_v14 = vadd.f32 %v2717_v36, %v2629_v3  ;;  %v17928_v36 = vld [vmem:[#allocation63_spill] sm:$0xff] }
 0x426   :  { %v2452_v57 = vpop.f32.mrf.mxu0  ;;  %v2719_v42 = vpop.f32.mrf.mxu3 }
 0x427   :  { %2672 = vmatmul.bf16.gmra.mxu2 %v17922_v49  ;;  %v2541_v34 = vpop.f32.mrf.mxu1  ;;  %v17929_v49 = vld [vmem:[#allocation60_spill] sm:$0xff] }
 0x428   :  { %v2542_v62 = vadd.f32 %v2541_v34, %v2452_v57 }
 0x42a   :  { %v2631_v63 = vadd.f32 %v2630_v19, %v2542_v62  ;;  %v2633_v23 = vpop.f32.mrf.mxu2  ;;  %v17931_v62 = vld [vmem:[#allocation67_spill] sm:$0xff]  ;;  %v9484_v19 = vld [vmem:[#allocation4 + $0x30] sm:$0xff] }
 0x42b   :  { %2761 = vmatmul.bf16.gmra.mxu3 %v17923_v38  ;;  %3410 = vmatpush.bf16.msrb.mxu0 %v9484_v19 }
 0x42c   :  { %v12293_v44 = vadd.f32 %v2719_v42, %v2631_v63  ;;  %v9492_v42 = vld [vmem:[#allocation4 + $0x70] sm:$0xff]  ;;  %v17932_v63 = vld [vmem:[#allocation64_spill] sm:$0xff] }
 0x42d   :  { %3499 = vmatpush.bf16.msrb.mxu1 %v9492_v42 }
 0x42e   :  { %v2455_v5 = vpop.f32.mrf.mxu0  ;;  %v2722_v28 = vpop.f32.mrf.mxu3 }
 0x42f   :  { %v2544_v1 = vpop.f32.mrf.mxu1 }
 0x430   :  { %v2545_v41 = vadd.f32 %v2544_v1, %v2455_v5 }
 0x431   :  { %2494 = vmatmul.bf16.gmra.mxu0 %v17924_v11  ;;  %2583 = vmatmul.bf16.gmra.mxu1 %v17925_v6 }
 0x432   :  { %v2634_v32 = vadd.f32 %v2633_v23, %v2545_v41  ;;  %v2635_v40 = vpop.f32.mrf.mxu2 }
 0x434   :  { %v12297_v56 = vadd.f32 %v2722_v28, %v2634_v32 }
 0x436   :  { %v2457_v39 = vpop.f32.mrf.mxu0  ;;  %v2724_v26 = vpop.f32.mrf.mxu3 }
 0x437   :  { %2677 = vmatmul.bf16.gmra.mxu2 %v17926_v18  ;;  %v2546_v60 = vpop.f32.mrf.mxu1 }
 0x438   :  { %v2547_v7 = vadd.f32 %v2546_v60, %v2457_v39  ;;  %v17933_v60 = vld [vmem:[#allocation65_spill] sm:$0xff] }
 0x43a   :  { %v2636_v51 = vadd.f32 %v2635_v40, %v2547_v7  ;;  %v2638_v57 = vpop.f32.mrf.mxu2 }
 0x43b   :  { %2766 = vmatmul.bf16.gmra.mxu3 %v17927_v17 }
 0x43c   :  { %v12301_v9 = vadd.f32 %v2724_v26, %v2636_v51 }
 0x43e   :  { %17930 = vst [vmem:[#allocation109_spill] sm:$0xff] %v12301_v9  ;;  %v2460_v22 = vpop.f32.mrf.mxu0  ;;  %v2727_v34 = vpop.f32.mrf.mxu3 }
 0x43f   :  { %v2549_v38 = vpop.f32.mrf.mxu1 }
 0x440   :  { %v2550_v3 = vadd.f32 %v2549_v38, %v2460_v22 }
 0x441   :  { %2499 = vmatmul.bf16.gmra.mxu0 %v17928_v36  ;;  %2588 = vmatmul.bf16.gmra.mxu1 %v17929_v49 }
 0x442   :  { %v2639_v11 = vadd.f32 %v2638_v57, %v2550_v3  ;;  %v12311_v41 = vpop.f32.mrf.mxu2  ;;  %v9483_v3 = vld [vmem:[#allocation4 + $0x28] sm:$0xff] }
 0x443   :  { %v9491_v57 = vld [vmem:[#allocation4 + $0x68] sm:$0xff]  ;;  %3411 = vmatpush.bf16.msrb.mxu0 %v9483_v3 }
 0x444   :  { %v12305_v6 = vadd.f32 %v2727_v34, %v2639_v11  ;;  %3500 = vmatpush.bf16.msrb.mxu1 %v9491_v57 }
 0x446   :  { %v12307_v5 = vpop.f32.mrf.mxu0  ;;  %v12313_v23 = vpop.f32.mrf.mxu3 }
 0x447   :  { %2682 = vmatmul.bf16.gmra.mxu2 %v17931_v62  ;;  %v12309_v1 = vpop.f32.mrf.mxu1 }
 0x44a   :  { %v2643_v32 = vpop.f32.mrf.mxu2 }
 0x44b   :  { %2771 = vmatmul.bf16.gmra.mxu3 %v17932_v63 }
 0x44e   :  { %v2465_v28 = vpop.f32.mrf.mxu0  ;;  %v2732_v39 = vpop.f32.mrf.mxu3 }
 0x44f   :  { %v2554_v18 = vpop.f32.mrf.mxu1 }
 0x450   :  { %v2555_v17 = vadd.f32 %v2554_v18, %v2465_v28 }
 0x451   :  { %2504 = vmatmul.bf16.gmra.mxu0 %v12125_v37  ;;  %2593 = vmatmul.bf16.gmra.mxu1 %v12127_v35 }
 0x452   :  { %v2644_v7 = vadd.f32 %v2643_v32, %v2555_v17  ;;  %v12325_v36 = vpop.f32.mrf.mxu2 }
 0x454   :  { %v12319_v40 = vadd.f32 %v2732_v39, %v2644_v7 }
 0x456   :  { %v12321_v26 = vpop.f32.mrf.mxu0  ;;  %v12327_v37 = vpop.f32.mrf.mxu3 }
 0x457   :  { %2687 = vmatmul.bf16.gmra.mxu2 %v17933_v60  ;;  %v12323_v51 = vpop.f32.mrf.mxu1 }
 0x45a   :  { %v2648_v38 = vpop.f32.mrf.mxu2 }
 0x45b   :  { %2776 = vmatmul.bf16.gmra.mxu3 %v12144_v61 }
 0x45e   :  { %v2470_v35 = vpop.f32.mrf.mxu0  ;;  %v2737_v61 = vpop.f32.mrf.mxu3 }
 0x45f   :  { %v2559_v49 = vpop.f32.mrf.mxu1 }
 0x460   :  { %v2560_v22 = vadd.f32 %v2559_v49, %v2470_v35 }
 0x461   :  { %2509 = vmatmul.bf16.gmra.mxu0 %v12165_v0  ;;  %2598 = vmatmul.bf16.gmra.mxu1 %v12167_v24 }
 0x462   :  { %v2649_v34 = vadd.f32 %v2648_v38, %v2560_v22  ;;  %v12339_v24 = vpop.f32.mrf.mxu2  ;;  %v9482_v38 = vld [vmem:[#allocation4 + $0x20] sm:$0xff] }
 0x463   :  { %3412 = vmatpush.bf16.msrb.mxu0 %v9482_v38 }
 0x464   :  { %v12333_v62 = vadd.f32 %v2737_v61, %v2649_v34  ;;  %v9490_v61 = vld [vmem:[#allocation4 + $0x60] sm:$0xff] }
 0x465   :  { %3501 = vmatpush.bf16.msrb.mxu1 %v9490_v61  ;;  %v17947_v61 = vld [vmem:[#allocation127_spill] sm:$0xff] }
 0x466   :  { %17934 = vst [vmem:[#allocation100_spill] sm:$0xff] %v12333_v62  ;;  %v12335_v19 = vpop.f32.mrf.mxu0  ;;  %v12341_v42 = vpop.f32.mrf.mxu3 }
 0x467   :  { %2692 = vmatmul.bf16.gmra.mxu2 %v12181_v16  ;;  %v12337_v0 = vpop.f32.mrf.mxu1 }
 0x46a   :  { %v2653_v11 = vpop.f32.mrf.mxu2 }
 0x46b   :  { %2781 = vmatmul.bf16.gmra.mxu3 %v12184_v31 }
 0x46e   :  { %v2475_v16 = vpop.f32.mrf.mxu0  ;;  %v2742_v28 = vpop.f32.mrf.mxu3 }
 0x46f   :  { %v2564_v63 = vpop.f32.mrf.mxu1 }
 0x470   :  { %v2565_v31 = vadd.f32 %v2564_v63, %v2475_v16 }
 0x471   :  { %2514 = vmatmul.bf16.gmra.mxu0 %v12193_v20  ;;  %2603 = vmatmul.bf16.gmra.mxu1 %v12195_v10 }
 0x472   :  { %v2654_v18 = vadd.f32 %v2653_v11, %v2565_v31  ;;  %v12351_v60 = vpop.f32.mrf.mxu2 }
 0x474   :  { %v12345_v17 = vadd.f32 %v2742_v28, %v2654_v18 }
 0x476   :  { %17935 = vst [vmem:[#allocation12_spill] sm:$0xff] %v12345_v17  ;;  %v12347_v32 = vpop.f32.mrf.mxu0  ;;  %v12353_v7 = vpop.f32.mrf.mxu3 }
 0x477   :  { %v12349_v39 = vpop.f32.mrf.mxu1  ;;  %17936 = vst [vmem:[#allocation13_spill] sm:$0xff] %v12353_v7  ;;  %v9489_v7 = vld [vmem:[#allocation4 + $0x58] sm:$0xff] }
 0x478   :  { %3502 = vmatpush.bf16.msrb.mxu1 %v9489_v7 }
 0x47a   :  { %v2658_v10 = vpop.f32.mrf.mxu2 }
 0x47e   :  { %v2480_v35 = vpop.f32.mrf.mxu0  ;;  %v2747_v22 = vpop.f32.mrf.mxu3 }
 0x47f   :  { %v2569_v20 = vpop.f32.mrf.mxu1 }
 0x480   :  { %v2570_v49 = vadd.f32 %v2569_v20, %v2480_v35 }
 0x482   :  { %v2659_v3 = vadd.f32 %v2658_v10, %v2570_v49  ;;  %v12361_v63 = vpop.f32.mrf.mxu2 }
 0x483   :  { %17940 = vst [vmem:[#allocation106_spill] sm:$0xff] %v12361_v63 }
 0x484   :  { %v12355_v57 = vadd.f32 %v2747_v22, %v2659_v3  ;;  %v2867_v3 = vmul.f32 %v17947_v61, %v17947_v61 }
 0x486   :  { %17937 = vst [vmem:[#allocation14_spill] sm:$0xff] %v12355_v57  ;;  %v12357_v34 = vpop.f32.mrf.mxu0  ;;  %v12363_v31 = vpop.f32.mrf.mxu3  ;;  %v17948_v57 = vld [vmem:[#allocation124_spill] sm:$0xff] }
 0x487   :  { %17938 = vst [vmem:[#allocation15_spill] sm:$0xff] %v12357_v34  ;;  %v12359_v16 = vpop.f32.mrf.mxu1 }
 0x488   :  { %17939 = vst [vmem:[#allocation103_spill] sm:$0xff] %v12359_v16 }
 0x489   :  { %17941 = vst [vmem:[#allocation104_spill] sm:$0xff] %v12363_v31  ;;  %v2789_v31 = vadd.f32 %v17947_v61, %v17948_v57  ;;  %v9481_v61 = vld [vmem:[#allocation4 + $0x18] sm:$0xff] }
 0x48a   :  { %v2663_v35 = vpop.f32.mrf.mxu2  ;;  %3413 = vmatpush.bf16.msrb.mxu0 %v9481_v61 }
 0x48e   :  { %v2485_v11 = vpop.f32.mrf.mxu0  ;;  %v2752_v20 = vpop.f32.mrf.mxu3 }
 0x48f   :  { %v2574_v28 = vpop.f32.mrf.mxu1 }
 0x490   :  { %v2575_v18 = vadd.f32 %v2574_v28, %v2485_v11  ;;  %v2865_v11 = vmul.f32 %v17948_v57, %v17948_v57  ;;  %v17949_v28 = vld [vmem:[#allocation123_spill] sm:$0xff] }
 0x491   :  { %v17951_v57 = vld [vmem:[#allocation47_spill] sm:$0xff] }
 0x492   :  { %v2664_v52 = vadd.f32 %v2663_v35, %v2575_v18  ;;  %v12371_v22 = vpop.f32.mrf.mxu2  ;;  %v2790_v18 = vadd.f32 %v2789_v31, %v17949_v28  ;;  %v2929_v35 = vadd.f32 %v2867_v3, %v2865_v11  ;;  %v2873_v16 = vmul.f32 %v17951_v57, %v17951_v57  ;;  %v17952_v11 = vld [vmem:[#allocation49_spill] sm:$0xff] }
 0x493   :  { %17945 = vst [vmem:[#allocation18_spill] sm:$0xff] %v12371_v22 }
 0x494   :  { %v12365_v17 = vadd.f32 %v2752_v20, %v2664_v52  ;;  %v2869_v52 = vmul.f32 %v17949_v28, %v17949_v28  ;;  %v17950_v20 = vld [vmem:[#allocation128_spill] sm:$0xff]  ;;  %v2875_v28 = vmul.f32 %v17952_v11, %v17952_v11 }
 0x496   :  { %17942 = vst [vmem:[#allocation108_spill] sm:$0xff] %v12365_v17  ;;  %v12367_v49 = vpop.f32.mrf.mxu0  ;;  %v12373_v38 = vpop.f32.mrf.mxu3  ;;  %v2871_v17 = vmul.f32 %v17950_v20, %v17950_v20  ;;  %v2930_v13 = vadd.f32 %v2929_v35, %v2869_v52 }
 0x497   :  { %17943 = vst [vmem:[#allocation16_spill] sm:$0xff] %v12367_v49  ;;  %v12369_v10 = vpop.f32.mrf.mxu1 }
 0x498   :  { %17944 = vst [vmem:[#allocation17_spill] sm:$0xff] %v12369_v10  ;;  %v2791_v10 = vadd.f32 %v2790_v18, %v17950_v20  ;;  %v2931_v3 = vadd.f32 %v2930_v13, %v2871_v17  ;;  %v17954_v20 = vld [vmem:[#allocation52_spill] sm:$0xff] }
 0x499   :  { %17946 = vst [vmem:[#allocation19_spill] sm:$0xff] %v12373_v38  ;;  %v2877_v52 = vmul.f32 %v17954_v20, %v17954_v20 }
 0x49a   :  { %v2668_v27 = vpop.f32.mrf.mxu2  ;;  %v2792_v34 = vadd.f32 %v2791_v10, %v17951_v57  ;;  %v17959_v57 = vld [vmem:[#allocation66_spill] sm:$0xff] }
 0x49c   :  { %v2793_v18 = vadd.f32 %v2792_v34, %v17952_v11 }
 0x49e   :  { %v2490_v22 = vpop.f32.mrf.mxu0  ;;  %v2757_v63 = vpop.f32.mrf.mxu3  ;;  %v2794_v35 = vadd.f32 %v2793_v18, %v17954_v20  ;;  %v17958_v20 = vld [vmem:[#allocation70_spill] sm:$0xff] }
 0x49f   :  { %v2579_v38 = vpop.f32.mrf.mxu1 }
 0x4a0   :  { %v2580_v49 = vadd.f32 %v2579_v38, %v2490_v22  ;;  %v2932_v38 = vadd.f32 %v2931_v3, %v2873_v16  ;;  %v2795_v17 = vadd.f32 %v2794_v35, %v17955_v46  ;;  %v2885_v35 = vmul.f32 %v17958_v20, %v17958_v20 }
 0x4a2   :  { %v2669_v31 = vadd.f32 %v2668_v27, %v2580_v49  ;;  %v2933_v62 = vadd.f32 %v2932_v38, %v2875_v28  ;;  %v2879_v27 = vmul.f32 %v17955_v46, %v17955_v46  ;;  %v12405_v7 = vpop.f32.mrf.mxu2 }
 0x4a4   :  { %v12393_v22 = vadd.f32 %v2757_v63, %v2669_v31  ;;  %v2934_v16 = vadd.f32 %v2933_v62, %v2877_v52  ;;  %v17956_v63 = vld [vmem:[#allocation62_spill] sm:$0xff]  ;;  %v17957_v31 = vld [vmem:[#allocation71_spill] sm:$0xff]  ;;  %v2887_v62 = vmul.f32 %v17959_v57, %v17959_v57 }
 0x4a5   :  { %v2881_v10 = vmul.f32 %v17956_v63, %v17956_v63  ;;  %v2796_v61 = vadd.f32 %v2795_v17, %v17956_v63  ;;  %v2883_v3 = vmul.f32 %v17957_v31, %v17957_v31 }
 0x4a6   :  { %17953 = vst [vmem:[#allocation110_spill] sm:$0xff] %v12393_v22  ;;  %v12400_v49 = vpop.f32.mrf.mxu0  ;;  %v12407_v34 = vpop.f32.mrf.mxu3  ;;  %v2935_v28 = vadd.f32 %v2934_v16, %v2879_v27 }
 0x4a7   :  { %v12402_v13 = vpop.f32.mrf.mxu1  ;;  %v2797_v18 = vadd.f32 %v2796_v61, %v17957_v31  ;;  %v2889_v61 = vmul.f32 %v12171_v58, %v12171_v58 }
 0x4a8   :  { %v2936_v38 = vadd.f32 %v2935_v28, %v2881_v10 }
 0x4a9   :  { %v2798_v46 = vadd.f32 %v2797_v18, %v17958_v20  ;;  %v2891_v18 = vmul.f32 %v12191_v53, %v12191_v53 }
 0x4aa   :  { %v2937_v11 = vadd.f32 %v2936_v38, %v2883_v3  ;;  %v12425_v17 = vpop.f32.mrf.mxu2 }
 0x4ab   :  { %v2799_v27 = vadd.f32 %v2798_v46, %v17959_v57  ;;  %v2893_v46 = vmul.f32 %v12199_v25, %v12199_v25 }
 0x4ac   :  { %v2938_v10 = vadd.f32 %v2937_v11, %v2885_v35  ;;  %v2895_v11 = vmul.f32 %v12203_v8, %v12203_v8 }
 0x4ad   :  { %v2800_v28 = vadd.f32 %v2799_v27, %v12171_v58  ;;  %v2872_v58 = vmul.f32 %v12285_v21, %v12285_v21 }
 0x4ae   :  { %v12420_v52 = vpop.f32.mrf.mxu0  ;;  %v12427_v16 = vpop.f32.mrf.mxu3  ;;  %v2939_v3 = vadd.f32 %v2938_v10, %v2887_v62 }
 0x4af   :  { %v12422_v22 = vpop.f32.mrf.mxu1  ;;  %v2801_v38 = vadd.f32 %v2800_v28, %v12191_v53  ;;  %v2897_v28 = vmul.f32 %v12207_v33, %v12207_v33  ;;  %v2866_v53 = vmul.f32 %v12273_v54, %v12273_v54 }
 0x4b0   :  { %v2940_v20 = vadd.f32 %v2939_v3, %v2889_v61 }
 0x4b1   :  { %v2802_v57 = vadd.f32 %v2801_v38, %v12199_v25 }
 0x4b2   :  { %v2941_v31 = vadd.f32 %v2940_v20, %v2891_v18  ;;  %v12445_v27 = vpop.f32.mrf.mxu2  ;;  %v2899_v18 = vmul.f32 %v12211_v55, %v12211_v55 }
 0x4b3   :  { %v2803_v62 = vadd.f32 %v2802_v57, %v12203_v8  ;;  %v2901_v57 = vmul.f32 %v12215_v29, %v12215_v29  ;;  %v2868_v8 = vmul.f32 %v12277_v45, %v12277_v45 }
 0x4b4   :  { %v2942_v61 = vadd.f32 %v2941_v31, %v2893_v46 }
 0x4b5   :  { %v2804_v3 = vadd.f32 %v2803_v62, %v12207_v33  ;;  %v2966_v33 = vadd.f32 %v2868_v8, %v2866_v53 }
 0x4b6   :  { %v12440_v35 = vpop.f32.mrf.mxu0  ;;  %v12447_v10 = vpop.f32.mrf.mxu3  ;;  %v2943_v20 = vadd.f32 %v2942_v61, %v2895_v11  ;;  %v2870_v11 = vmul.f32 %v12281_v43, %v12281_v43 }
 0x4b7   :  { %v12442_v63 = vpop.f32.mrf.mxu1  ;;  %17960 = vst [vmem:[#allocation113_spill] sm:$0xff] %v12447_v10  ;;  %v2805_v38 = vadd.f32 %v2804_v3, %v12211_v55  ;;  %v2903_v3 = vmul.f32 %v12219_v47, %v12219_v47 }
 0x4b8   :  { %v2944_v25 = vadd.f32 %v2943_v20, %v2897_v28  ;;  %v2826_v20 = vadd.f32 %v12277_v45, %v12273_v54  ;;  %v2967_v45 = vadd.f32 %v2966_v33, %v2870_v11  ;;  %v2874_v54 = vmul.f32 %v12289_v14, %v12289_v14 }
 0x4b9   :  { %v2806_v31 = vadd.f32 %v2805_v38, %v12215_v29  ;;  %v9488_v29 = vld [vmem:[#allocation4 + $0x50] sm:$0xff] }
 0x4ba   :  { %v2945_v46 = vadd.f32 %v2944_v25, %v2899_v18  ;;  %v12473_v38 = vpop.f32.mrf.mxu2  ;;  %v9480_v18 = vld [vmem:[#allocation4 + $0x10] sm:$0xff]  ;;  %3503 = vmatpush.bf16.msrb.mxu1 %v9488_v29 }
 0x4bb   :  { %v2807_v28 = vadd.f32 %v2806_v31, %v12219_v47  ;;  %v2905_v31 = vmul.f32 %v12223_v30, %v12223_v30  ;;  %v2827_v47 = vadd.f32 %v2826_v20, %v12281_v43  ;;  %3414 = vmatpush.bf16.msrb.mxu0 %v9480_v18  ;;  %v2876_v20 = vmul.f32 %v12293_v44, %v12293_v44 }
 0x4bc   :  { %v2946_v55 = vadd.f32 %v2945_v46, %v2901_v57  ;;  %v2552_v57 = vadd.f32 %v12309_v1, %v12307_v5  ;;  %v2907_v46 = vmul.f32 %v12227_v2, %v12227_v2  ;;  %v2909_v5 = vmul.f32 %v12231_v4, %v12231_v4 }
 0x4bd   :  { %v2808_v10 = vadd.f32 %v2807_v28, %v12223_v30  ;;  %v2828_v28 = vadd.f32 %v2827_v47, %v12285_v21  ;;  %v2968_v30 = vadd.f32 %v2967_v45, %v2872_v58  ;;  %v2557_v58 = vadd.f32 %v12323_v51, %v12321_v26 }
 0x4be   :  { %v12464_v62 = vpop.f32.mrf.mxu0  ;;  %v12475_v25 = vpop.f32.mrf.mxu3  ;;  %v2947_v53 = vadd.f32 %v2946_v55, %v2903_v3  ;;  %v2641_v33 = vadd.f32 %v12311_v41, %v2552_v57  ;;  %v2911_v18 = vmul.f32 %v12235_v48, %v12235_v48  ;;  %v2880_v26 = vmul.f32 %v12301_v9, %v12301_v9 }
 0x4bf   :  { %v12466_v61 = vpop.f32.mrf.mxu1  ;;  %v2809_v8 = vadd.f32 %v2808_v10, %v12227_v2  ;;  %v2829_v55 = vadd.f32 %v2828_v28, %v12289_v14  ;;  %v2969_v1 = vadd.f32 %v2968_v30, %v2874_v54  ;;  %v2878_v10 = vmul.f32 %v12297_v56, %v12297_v56  ;;  %v17976_v2 = vld [vmem:[#allocation14_spill] sm:$0xff] }
 0x4c0   :  { %v2948_v29 = vadd.f32 %v2947_v53, %v2905_v31  ;;  %v12517_v51 = vadd.f32 %v12313_v23, %v2641_v33  ;;  %v2646_v53 = vadd.f32 %v12325_v36, %v2557_v58  ;;  %v2562_v36 = vadd.f32 %v12337_v0, %v12335_v19 }
 0x4c1   :  { %v2810_v11 = vadd.f32 %v2809_v8, %v12231_v4  ;;  %v2830_v31 = vadd.f32 %v2829_v55, %v12293_v44  ;;  %v2970_v54 = vadd.f32 %v2969_v1, %v2876_v20  ;;  %v2882_v20 = vmul.f32 %v12305_v6, %v12305_v6 }
 0x4c2   :  { %v2949_v41 = vadd.f32 %v2948_v29, %v2907_v46  ;;  %v12510_v57 = vpop.f32.mrf.mxu2  ;;  %v2913_v46 = vmul.f32 %v12239_v50, %v12239_v50  ;;  %v2915_v1 = vmul.f32 %v12243_v59, %v12243_v59  ;;  %v2884_v58 = vmul.f32 %v12517_v51, %v12517_v51 }
 0x4c3   :  { %v2811_v3 = vadd.f32 %v2810_v11, %v12235_v48  ;;  %v2831_v28 = vadd.f32 %v2830_v31, %v12297_v56  ;;  %v2971_v11 = vadd.f32 %v2970_v54, %v2878_v10  ;;  %v12535_v10 = vadd.f32 %v12327_v37, %v2646_v53  ;;  %v17975_v48 = vld [vmem:[#allocation18_spill] sm:$0xff] }
 0x4c4   :  { %v2950_v8 = vadd.f32 %v2949_v41, %v2909_v5  ;;  %v2917_v54 = vmul.f32 %v12247_v12, %v12247_v12  ;;  %v2886_v0 = vmul.f32 %v12319_v40, %v12319_v40 }
 0x4c5   :  { %v2812_v29 = vadd.f32 %v2811_v3, %v12239_v50  ;;  %v2832_v23 = vadd.f32 %v2831_v28, %v12301_v9  ;;  %v2972_v5 = vadd.f32 %v2971_v11, %v2880_v26  ;;  %v2919_v11 = vmul.f32 %v12251_v15, %v12251_v15  ;;  %v17965_v9 = vld [vmem:[#allocation103_spill] sm:$0xff] }
 0x4c6   :  { %v12502_v47 = vpop.f32.mrf.mxu0  ;;  %v12512_v30 = vpop.f32.mrf.mxu3  ;;  %v2951_v55 = vadd.f32 %v2950_v8, %v2911_v18  ;;  %v2651_v18 = vadd.f32 %v12339_v24, %v2562_v36  ;;  %v17962_v36 = vld [vmem:[#allocation98_spill] sm:$0xff] }
 0x4c7   :  { %v12504_v45 = vpop.f32.mrf.mxu1  ;;  %v2813_v33 = vadd.f32 %v2812_v29, %v12243_v59  ;;  %v2833_v3 = vadd.f32 %v2832_v23, %v12305_v6  ;;  %v2973_v19 = vadd.f32 %v2972_v5, %v2882_v20  ;;  %v2921_v5 = vmul.f32 %v17962_v36, %v17962_v36 }
 0x4c8   :  { %v2952_v41 = vadd.f32 %v2951_v55, %v2913_v46  ;;  %v2567_v46 = vadd.f32 %v12349_v39, %v12347_v32  ;;  %v2888_v55 = vmul.f32 %v12535_v10, %v12535_v10  ;;  %v12562_v23 = vadd.f32 %v12341_v42, %v2651_v18  ;;  %v17966_v42 = vld [vmem:[#allocation102_spill] sm:$0xff] }
 0x4c9   :  { %v2814_v31 = vadd.f32 %v2813_v33, %v12247_v12  ;;  %v2834_v53 = vadd.f32 %v2833_v3, %v12517_v51  ;;  %v2974_v20 = vadd.f32 %v2973_v19, %v2884_v58  ;;  %v17963_v58 = vld [vmem:[#allocation100_spill] sm:$0xff]  ;;  %v17964_v19 = vld [vmem:[#allocation15_spill] sm:$0xff]  ;;  %v17969_v12 = vld [vmem:[#allocation101_spill] sm:$0xff] }
 0x4ca   :  { %v2953_v37 = vadd.f32 %v2952_v41, %v2915_v1  ;;  %v12551_v24 = vpop.f32.mrf.mxu2  ;;  %17961 = vst [vmem:[#allocation111_spill] sm:$0xff] %v12562_v23  ;;  %v2656_v32 = vadd.f32 %v12351_v60, %v2567_v46  ;;  %v2923_v60 = vmul.f32 %v17966_v42, %v17966_v42  ;;  %v17967_v46 = vld [vmem:[#allocation13_spill] sm:$0xff] }
 0x4cb   :  { %v2815_v29 = vadd.f32 %v2814_v31, %v12251_v15  ;;  %v2835_v1 = vadd.f32 %v2834_v53, %v12319_v40  ;;  %v2975_v41 = vadd.f32 %v2974_v20, %v2886_v0  ;;  %v2890_v31 = vmul.f32 %v17963_v58, %v17963_v58  ;;  %v17968_v20 = vld [vmem:[#allocation106_spill] sm:$0xff] }
 0x4cc   :  { %v2954_v39 = vadd.f32 %v2953_v37, %v2917_v54  ;;  %v2572_v53 = vadd.f32 %v17965_v9, %v17964_v19  ;;  %v2892_v0 = vmul.f32 %v12562_v23, %v12562_v23 }
 0x4cd   :  { %v2816_v33 = vadd.f32 %v2815_v29, %v17962_v36  ;;  %v2836_v3 = vadd.f32 %v2835_v1, %v12535_v10  ;;  %v2976_v54 = vadd.f32 %v2975_v41, %v2888_v55  ;;  %v12580_v29 = vadd.f32 %v17967_v46, %v2656_v32 }
 0x4ce   :  { %v12544_v26 = vpop.f32.mrf.mxu0  ;;  %v12553_v28 = vpop.f32.mrf.mxu3  ;;  %v2955_v15 = vadd.f32 %v2954_v39, %v2919_v11  ;;  %v2661_v1 = vadd.f32 %v17968_v20, %v2572_v53  ;;  %v2925_v55 = vmul.f32 %v17969_v12, %v17969_v12  ;;  %v17972_v20 = vld [vmem:[#allocation16_spill] sm:$0xff] }
 0x4cf   :  { %v12546_v8 = vpop.f32.mrf.mxu1  ;;  %v2817_v18 = vadd.f32 %v2816_v33, %v17966_v42  ;;  %v2837_v37 = vadd.f32 %v2836_v3, %v17963_v58  ;;  %v2977_v33 = vadd.f32 %v2976_v54, %v2890_v31  ;;  %v17970_v3 = vld [vmem:[#allocation12_spill] sm:$0xff]  ;;  %v17973_v42 = vld [vmem:[#allocation17_spill] sm:$0xff]  ;;  %v2896_v54 = vmul.f32 %v12580_v29, %v12580_v29 }
 0x4d0   :  { %v2956_v36 = vadd.f32 %v2955_v15, %v2921_v5  ;;  %v2894_v19 = vmul.f32 %v17970_v3, %v17970_v3  ;;  %v17971_v5 = vld [vmem:[#allocation107_spill] sm:$0xff]  ;;  %v2577_v59 = vadd.f32 %v17973_v42, %v17972_v20  ;;  %v2582_v42 = vadd.f32 %v12402_v13, %v12400_v49  ;;  %v17978_v13 = vld [vmem:[#allocation108_spill] sm:$0xff] }
 0x4d1   :  { %v2818_v9 = vadd.f32 %v2817_v18, %v17969_v12  ;;  %v2838_v41 = vadd.f32 %v2837_v37, %v12562_v23  ;;  %v2927_v18 = vmul.f32 %v17971_v5, %v17971_v5  ;;  %v2978_v12 = vadd.f32 %v2977_v33, %v2892_v0  ;;  %v17974_v37 = vld [vmem:[#allocation104_spill] sm:$0xff]  ;;  %v17977_v20 = vld [vmem:[#allocation19_spill] sm:$0xff] }
 0x4d2   :  { %v12593_v32 = vpop.f32.mrf.mxu2  ;;  %v2957_v15 = vadd.f32 %v2956_v36, %v2923_v60  ;;  %v12606_v50 = vadd.f32 %v17974_v37, %v2661_v1  ;;  %v2666_v4 = vadd.f32 %v17975_v48, %v2577_v59  ;;  %v2671_v59 = vadd.f32 %v12405_v7, %v2582_v42 }
 0x4d3   :  { %v2819_v53 = vadd.f32 %v2818_v9, %v17971_v5  ;;  %v2839_v31 = vadd.f32 %v2838_v41, %v17970_v3  ;;  %v2979_v60 = vadd.f32 %v2978_v12, %v2894_v19  ;;  %v2898_v5 = vmul.f32 %v17976_v2, %v17976_v2 }
 0x4d4   :  { %v2958_v36 = vadd.f32 %v2957_v15, %v2925_v55  ;;  %v2900_v1 = vmul.f32 %v12606_v50, %v12606_v50  ;;  %v12618_v48 = vadd.f32 %v17977_v20, %v2666_v4  ;;  %v2585_v12 = vadd.f32 %v12422_v22, %v12420_v52 }
 0x4d5   :  { %v2840_v9 = vadd.f32 %v2839_v31, %v12580_v29  ;;  %v2820_v23 = vrot.slane %v2819_v53, 4  ;;  %v2980_v33 = vadd.f32 %v2979_v60, %v2896_v54  ;;  %v2587_v4 = vadd.f32 %v12442_v63, %v12440_v35  ;;  %v17979_v63 = vld [vmem:[#allocation110_spill] sm:$0xff] }
 0x4d6   :  { %v12584_v11 = vpop.f32.mrf.mxu0  ;;  %v12595_v46 = vpop.f32.mrf.mxu3  ;;  %v2959_v0 = vadd.f32 %v2958_v36, %v2927_v18  ;;  %v2902_v18 = vmul.f32 %v17978_v13, %v17978_v13  ;;  %v2674_v37 = vadd.f32 %v12425_v17, %v2585_v12  ;;  %v2904_v52 = vmul.f32 %v12618_v48, %v12618_v48 }
 0x4d7   :  { %v12586_v39 = vpop.f32.mrf.mxu1  ;;  %v2841_v41 = vadd.f32 %v2840_v9, %v17976_v2  ;;  %v2981_v15 = vadd.f32 %v2980_v33, %v2898_v5  ;;  %v2821_v7 = vadd.f32 %v2820_v23, %v2819_v53  ;;  %v12635_v5 = vadd.f32 %v12407_v34, %v2671_v59 }
 0x4d8   :  { %v2960_v36 = vrot.slane %v2959_v0, 4  ;;  %v2676_v9 = vadd.f32 %v12445_v27, %v2587_v4  ;;  %v2590_v42 = vadd.f32 %v12466_v61, %v12464_v62  ;;  %v2906_v35 = vmul.f32 %v17979_v63, %v17979_v63  ;;  %v17980_v61 = vld [vmem:[#allocation113_spill] sm:$0xff] }
 0x4d9   :  { %v2842_v49 = vadd.f32 %v2841_v41, %v12606_v50  ;;  %v2982_v60 = vadd.f32 %v2981_v15, %v2900_v1  ;;  %v12644_v23 = vadd.f32 %v12427_v16, %v2674_v37  ;;  %v2822_v41 = vrot.slane %v2821_v7, 2 }
 0x4da   :  { %v2688_v31 = vpop.f32.mrf.mxu2  ;;  %v2679_v53 = vadd.f32 %v12473_v38, %v2590_v42  ;;  %v2961_v1 = vadd.f32 %v2960_v36, %v2959_v0  ;;  %v2592_v34 = vadd.f32 %v12504_v45, %v12502_v47  ;;  %v2908_v62 = vmul.f32 %v12635_v5, %v12635_v5 }
 0x4db   :  { %v2843_v22 = vadd.f32 %v2842_v49, %v17978_v13  ;;  %v2983_v17 = vadd.f32 %v2982_v60, %v2902_v18  ;;  %v12653_v59 = vadd.f32 %v17980_v61, %v2676_v9  ;;  %v2595_v38 = vadd.f32 %v12546_v8, %v12544_v26 }
 0x4dc   :  { %v2681_v16 = vadd.f32 %v12510_v57, %v2592_v34  ;;  %v2910_v45 = vmul.f32 %v12644_v23, %v12644_v23  ;;  %v12662_v37 = vadd.f32 %v12475_v25, %v2679_v53  ;;  %v2823_v4 = vadd.f32 %v2822_v41, %v2821_v7 }
 0x4dd   :  { %v2844_v33 = vadd.f32 %v2843_v22, %v12618_v48  ;;  %v2984_v27 = vadd.f32 %v2983_v17, %v2904_v52  ;;  %v2684_v36 = vadd.f32 %v12551_v24, %v2595_v38  ;;  %v2597_v57 = vadd.f32 %v12586_v39, %v12584_v11 }
 0x4de   :  { %v2510_v55 = vpop.f32.mrf.mxu0  ;;  %v12626_v54 = vpop.f32.mrf.mxu3  ;;  %v2962_v60 = vrot.slane %v2961_v1, 2  ;;  %v2912_v8 = vmul.f32 %v12653_v59, %v12653_v59  ;;  %v12671_v52 = vadd.f32 %v12512_v30, %v2681_v16  ;;  %v2914_v24 = vmul.f32 %v12662_v37, %v12662_v37 }
 0x4df   :  { %v2599_v19 = vpop.f32.mrf.mxu1  ;;  %v2845_v20 = vadd.f32 %v2844_v33, %v17979_v63  ;;  %v2985_v18 = vadd.f32 %v2984_v27, %v2906_v35  ;;  %v2686_v9 = vadd.f32 %v12593_v32, %v2597_v57  ;;  %v12678_v11 = vadd.f32 %v12553_v28, %v2684_v36 }
 0x4e0   :  { %v2600_v25 = vadd.f32 %v2599_v19, %v2510_v55  ;;  %v2824_v33 = vrot.slane %v2823_v4, 1  ;;  %v2963_v35 = vadd.f32 %v2962_v60, %v2961_v1  ;;  %v2916_v32 = vmul.f32 %v12671_v52, %v12671_v52 }
 0x4e1   :  { %v2846_v47 = vadd.f32 %v2845_v20, %v12635_v5  ;;  %v2986_v22 = vadd.f32 %v2985_v18, %v2908_v62  ;;  %v12684_v55 = vadd.f32 %v12595_v46, %v2686_v9  ;;  %v2918_v1 = vmul.f32 %v12678_v11, %v12678_v11 }
 0x4e2   :  { %v2690_v0 = vpop.f32.mrf.mxu2  ;;  %v2689_v39 = vadd.f32 %v2688_v31, %v2600_v25  ;;  %v2964_v16 = vrot.slane %v2963_v35, 1 }
 0x4e3   :  { %v2847_v26 = vadd.f32 %v2846_v47, %v12644_v23  ;;  %v2987_v42 = vadd.f32 %v2986_v22, %v2910_v45 }
 0x4e4   :  { %v12690_v61 = vadd.f32 %v12626_v54, %v2689_v39  ;;  %v17981_v54 = vld [vmem:[#allocation87_spill] sm:$0xff] }
 0x4e5   :  { %v2848_v7 = vadd.f32 %v2847_v26, %v12653_v59  ;;  %v2988_v53 = vadd.f32 %v2987_v42, %v2912_v8 }
 0x4e6   :  { %v2512_v12 = vpop.f32.mrf.mxu0  ;;  %v2779_v49 = vpop.f32.mrf.mxu3  ;;  %v2922_v36 = vmul.f32 %v12690_v61, %v12690_v61 }
 0x4e7   :  { %v2601_v15 = vpop.f32.mrf.mxu1  ;;  %v2849_v30 = vadd.f32 %v2848_v7, %v12662_v37  ;;  %v2989_v28 = vadd.f32 %v2988_v53, %v2914_v24 }
 0x4e8   :  { %v2602_v17 = vadd.f32 %v2601_v15, %v2512_v12  ;;  %v2825_v15 = vadd.f32 %v2824_v33, %v2823_v4  ;;  %v2965_v4 = vadd.f32 %v2964_v16, %v2963_v35 }
 0x4e9   :  { %v2850_v31 = vadd.f32 %v2849_v30, %v12671_v52  ;;  %v2990_v38 = vadd.f32 %v2989_v28, %v2916_v32 }
 0x4ea   :  { %v2691_v19 = vadd.f32 %v2690_v0, %v2602_v17  ;;  %v2693_v20 = vpop.f32.mrf.mxu2  ;;  %v2920_v0 = vmul.f32 %v12684_v55, %v12684_v55  ;;  %v12703_v60 = vmul.f32 %v2825_v15, %v17981_v54  ;;  %v3003_v33 = vmul.f32 %v2965_v4, %v17981_v54 }
 0x4eb   :  { %v2851_v46 = vadd.f32 %v2850_v31, %v12678_v11  ;;  %v2991_v47 = vadd.f32 %v2990_v38, %v2918_v1 }
 0x4ec   :  { %v12695_v18 = vadd.f32 %v2779_v49, %v2691_v19  ;;  %v3005_v53 = vmul.f32 %v12703_v60, %v12703_v60 }
 0x4ed   :  { %v2852_v45 = vadd.f32 %v2851_v46, %v12684_v55  ;;  %v2992_v8 = vadd.f32 %v2991_v47, %v2920_v0 }
 0x4ee   :  { %v2515_v41 = vpop.f32.mrf.mxu0  ;;  %v2782_v62 = vpop.f32.mrf.mxu3  ;;  %v2924_v49 = vmul.f32 %v12695_v18, %v12695_v18 }
 0x4ef   :  { %v2604_v34 = vpop.f32.mrf.mxu1  ;;  %v2853_v9 = vadd.f32 %v2852_v45, %v12690_v61  ;;  %v2993_v7 = vadd.f32 %v2992_v8, %v2922_v36 }
 0x4f0   :  { %v2605_v27 = vadd.f32 %v2604_v34, %v2515_v41 }
 0x4f1   :  { %v2854_v24 = vadd.f32 %v2853_v9, %v12695_v18  ;;  %v2994_v30 = vadd.f32 %v2993_v7, %v2924_v49 }
 0x4f2   :  { %v2694_v12 = vadd.f32 %v2693_v20, %v2605_v27  ;;  %v2695_v42 = vpop.f32.mrf.mxu2  ;;  %v3007_v20 = vsub.f32 %v3003_v33, %v3005_v53 }
 0x4f4   :  { %v12700_v57 = vadd.f32 %v2782_v62, %v2694_v12  ;;  %v3009_v12 = vmax.f32 %v3007_v20, 0.0  ;;  %v9479_v20 = vld [vmem:[#allocation4 + $0x8] sm:$0xff] }
 0x4f5   :  { %3415 = vmatpush.bf16.msrb.mxu0 %v9479_v20  ;;  %v17992_v20 = vld [vmem:[#allocation49_spill] sm:$0xff] }
 0x4f6   :  { %v2517_v22 = vpop.f32.mrf.mxu0  ;;  %v2926_v39 = vmul.f32 %v12700_v57, %v12700_v57  ;;  %v2784_v35 = vpop.f32.mrf.mxu3  ;;  %v2855_v41 = vadd.f32 %v2854_v24, %v12700_v57  ;;  %v3011_v0 = vadd.f32 1e-05, %v3009_v12  ;;  %v2787_v12 = vld [vmem:[#allocation2 + $0x8] sm:$0x3] }
 0x4f7   :  { %v2606_v26 = vpop.f32.mrf.mxu1 }
 0x4f8   :  { %v2607_v25 = vadd.f32 %v2606_v26, %v2517_v22  ;;  %v2995_v32 = vadd.f32 %v2994_v30, %v2926_v39  ;;  %9659 = vrsqrt.f32 %v3011_v0  ;;  %vm3019_vm4 = vweird.f32 %v3011_v0 }
 0x4fa   :  { %v2696_v17 = vadd.f32 %v2695_v42, %v2607_v25 }
 0x4fc   :  { %v12715_v34 = vadd.f32 %v2784_v35, %v2696_v17 }
 0x4fe   :  { %v2856_v19 = vadd.f32 %v2855_v41, %v12715_v34  ;;  %v2928_v27 = vmul.f32 %v12715_v34, %v12715_v34  ;;  %v9660_v25 = vpop.eup %9659 }
 0x4ff   :  { %v3014_v24 = vmul.f32 %v9660_v25, %v3011_v0  ;;  %vm3020_vm1 = vweird.f32 %v9660_v25 }
 0x500   :  { %v2857_v28 = vrot.slane %v2856_v19, 4  ;;  %v2996_v62 = vadd.f32 %v2995_v32, %v2928_v27  ;;  %vm3021_vm5 = vmor %vm3019_vm4, %vm3020_vm1 }
 0x501   :  { %v3015_v39 = vmul.f32 %v9660_v25, %v3014_v24 }
 0x502   :  { %v2858_v31 = vadd.f32 %v2857_v28, %v2856_v19  ;;  %v2997_v1 = vrot.slane %v2996_v62, 4  ;;  %v9487_v28 = vld [vmem:[#allocation4 + $0x48] sm:$0xff] }
 0x503   :  { %v3016_v33 = vmul.f32 0.5, %v3015_v39  ;;  %3504 = vmatpush.bf16.msrb.mxu1 %v9487_v28  ;;  %v17987_v39 = vld [vmem:[#allocation127_spill] sm:$0xff] }
 0x504   :  { %v2859_v15 = vrot.slane %v2858_v31, 2  ;;  %v2998_v16 = vadd.f32 %v2997_v1, %v2996_v62  ;;  %v9486_v1 = vld [vmem:[#allocation4 + $0x40] sm:$0xff] }
 0x505   :  { %v3017_v30 = vsub.f32 1.5, %v3016_v33  ;;  %v17989_v33 = vld [vmem:[#allocation123_spill] sm:$0xff] }
 0x506   :  { %v2860_v38 = vadd.f32 %v2859_v15, %v2858_v31  ;;  %v2999_v46 = vrot.slane %v2998_v16, 2  ;;  %v9478_v31 = vld [vmem:[#allocation4] sm:$0xff] }
 0x507   :  { %v3018_v19 = vmul.f32 %v9660_v25, %v3017_v30  ;;  %3416 = vmatpush.bf16.msrb.mxu0 %v9478_v31  ;;  %3505 = vmatpush.bf16.msrb.mxu1 %v9486_v1  ;;  %v17996_v1 = vld [vmem:[#allocation62_spill] sm:$0xff] }
 0x508   :  { %v2861_v47 = vrot.slane %v2860_v38, 1  ;;  %v3000_v45 = vadd.f32 %v2999_v46, %v2998_v16 }
 0x509   :  { %v3022_v16 = vsel %vm3021_vm5, %v9660_v25, %v3018_v19 }
 0x50a   :  { %v2862_v36 = vadd.f32 %v2861_v47, %v2860_v38  ;;  %v3001_v4 = vrot.slane %v3000_v45, 1 }
 0x50c   :  { %v2864_v22 = vmul.f32 %v2862_v36, %v17981_v54  ;;  %v3002_v26 = vadd.f32 %v3001_v4, %v3000_v45 }
 0x50e   :  { %v3004_v8 = vmul.f32 %v3002_v26, %v17981_v54  ;;  %v3006_v9 = vmul.f32 %v2864_v22, %v2864_v22  ;;  %v18011_v54 = vld [vmem:[#allocation88_spill] sm:$0xff] }
 0x510   :  { %v3008_v49 = vsub.f32 %v3004_v8, %v3006_v9  ;;  %v2788_v8 = vld [vmem:[#allocation2 + $0xa] sm:$0x3] }
 0x512   :  { %v3010_v42 = vmax.f32 %v3008_v49, 0.0  ;;  %v17985_v49 = vld [vmem:[#allocation124_spill] sm:$0xff] }
 0x514   :  { %v3012_v7 = vadd.f32 1e-05, %v3010_v42  ;;  %v17986_v42 = vld [vmem:[#allocation105_spill] sm:$0xff] }
 0x516   :  { %9661 = vrsqrt.f32 %v3012_v7  ;;  %vm3029_vm2 = vweird.f32 %v3012_v7 }
 0x51c   :  { %v9662_v17 = vpop.eup %9661 }
 0x51d   :  { %v3024_v35 = vmul.f32 %v9662_v17, %v3012_v7  ;;  %vm3030_vm0 = vweird.f32 %v9662_v17 }
 0x51e   :  { %vm3031_vm3 = vmor %vm3029_vm2, %vm3030_vm0 }
 0x51f   :  { %v3025_v53 = vmul.f32 %v9662_v17, %v3024_v35 }
 0x521   :  { %v3026_v41 = vmul.f32 0.5, %v3025_v53  ;;  %v17990_v53 = vld [vmem:[#allocation128_spill] sm:$0xff] }
 0x523   :  { %v3027_v32 = vsub.f32 1.5, %v3026_v41 }
 0x525   :  { %v3028_v27 = vmul.f32 %v9662_v17, %v3027_v32  ;;  %v17991_v32 = vld [vmem:[#allocation47_spill] sm:$0xff] }
 0x527   :  { %v3032_v62 = vsel %vm3031_vm3, %v9662_v17, %v3028_v27  ;;  %v17988_v17 = vld [vmem:[#allocation112_spill] sm:$0xff] }
 0x528   :  { %v3035_v15 = vrot.slane %v3032_v62, 7 }
 0x52a   :  { %v3036_v38 = vsel %vm1201_vm13, %v3022_v16, %v3035_v15  ;;  %v17997_v15 = vld [vmem:[#allocation71_spill] sm:$0xff] }
 0x52b   :  { %v3038_v46 = vmul.f32 %v3036_v38, %v2787_v12 }
 0x52d   :  { %v12723_v47 = vperm.slane %v3038_v46, 1  ;;  %v12725_v45 = vperm.slane %v3038_v46, 0 }
 0x52f   :  { %17982 = vst [vmem:[#allocation20_spill] sm:$0xff] %v12723_v47  ;;  %v3045_v0 = vmul.f32 %v12723_v47, %v2864_v22  ;;  %v12730_v36 = vmul.f32 %v12723_v47, %v12715_v34  ;;  %v3044_v26 = vmul.f32 %v12725_v45, %v12703_v60  ;;  %v3052_v25 = vmul.f32 %v12725_v45, %v17985_v49 }
 0x530   :  { %17983 = vst [vmem:[#allocation21_spill] sm:$0xff] %v12725_v45  ;;  %v3053_v7 = vmul.f32 %v12723_v47, %v17986_v42  ;;  %v3054_v22 = vmul.f32 %v12725_v45, %v17987_v39  ;;  %v3055_v34 = vmul.f32 %v12723_v47, %v17988_v17  ;;  %v3056_v35 = vmul.f32 %v12725_v45, %v17989_v33  ;;  %v18003_v17 = vld [vmem:[#allocation76_spill] sm:$0xff] }
 0x531   :  { %17984 = vst [vmem:[#allocation22_spill] sm:$0xff] %v12730_v36  ;;  %v3048_v4 = vrot.slane %v3045_v0, 7  ;;  %v3057_v60 = vmul.f32 %v12723_v47, %v12281_v43  ;;  %v3058_v30 = vmul.f32 %v12725_v45, %v17990_v53  ;;  %v3059_v41 = vmul.f32 %v12723_v47, %v12285_v21  ;;  %v17993_v43 = vld [vmem:[#allocation52_spill] sm:$0xff]  ;;  %v18004_v53 = vld [vmem:[#allocation74_spill] sm:$0xff] }
 0x532   :  { %v3060_v19 = vmul.f32 %v12725_v45, %v17991_v32  ;;  %v12755_v27 = vmul.f32 %v12723_v47, %v12289_v14  ;;  %v3062_v28 = vmul.f32 %v12725_v45, %v17992_v20  ;;  %v12761_v62 = vmul.f32 %v12723_v47, %v12293_v44  ;;  %v18005_v20 = vld [vmem:[#allocation81_spill] sm:$0xff] }
 0x533   :  { %v3049_v9 = vsel %vm1201_vm13, %v3044_v26, %v3048_v4  ;;  %v12765_v31 = vmul.f32 %v12725_v45, %v17993_v43  ;;  %v12769_v21 = vmul.f32 %v12723_v47, %v12297_v56  ;;  %v12773_v12 = vmul.f32 %v12725_v45, %v17996_v1  ;;  %v17998_v56 = vld [vmem:[#allocation70_spill] sm:$0xff] }
 0x534   :  { %v3051_v24 = vsub.f32 %v2788_v8, %v3049_v9  ;;  %v12777_v14 = vmul.f32 %v12723_v47, %v12305_v6  ;;  %v12781_v44 = vmul.f32 %v12725_v45, %v17997_v15  ;;  %v12787_v38 = vmul.f32 %v12723_v47, %v12517_v51  ;;  %v17999_v4 = vld [vmem:[#allocation66_spill] sm:$0xff]  ;;  %v18000_v51 = vld [vmem:[#allocation68_spill] sm:$0xff] }
 0x535   :  { %17994 = vst [vmem:[#allocation23_spill] sm:$0xff] %v12765_v31  ;;  %v12791_v46 = vmul.f32 %v12725_v45, %v17998_v56  ;;  %v12795_v0 = vmul.f32 %v12723_v47, %v12319_v40  ;;  %v12801_v26 = vmul.f32 %v12725_v45, %v17999_v4  ;;  %v12805_v8 = vmul.f32 %v12723_v47, %v12535_v10  ;;  %v18001_v40 = vld [vmem:[#allocation69_spill] sm:$0xff]  ;;  %v18006_v15 = vld [vmem:[#allocation78_spill] sm:$0xff]  ;;  %v18007_v4 = vld [vmem:[#allocation72_spill] sm:$0xff] }
 0x536   :  { %17995 = vst [vmem:[#allocation116_spill] sm:$0xff] %v12769_v21  ;;  %v12783_v16 = vperm.slane %v3051_v24, 0  ;;  %v12797_v6 = vperm.slane %v3051_v24, 1  ;;  %v12809_v9 = vmul.f32 %v12725_v45, %v18000_v51  ;;  %v12813_v49 = vmul.f32 %v12723_v47, %v17963_v58  ;;  %v18002_v24 = vld [vmem:[#allocation111_spill] sm:$0xff]  ;;  %v18013_v31 = vld [vmem:[#allocation94_spill] sm:$0xff] }
 0x537   :  { %v12817_v42 = vmul.f32 %v12725_v45, %v18001_v40  ;;  %v12821_v39 = vmul.f32 %v12723_v47, %v18002_v24  ;;  %v12825_v10 = vmul.f32 %v12725_v45, %v18003_v17  ;;  %v12829_v33 = vmul.f32 %v12723_v47, %v17970_v3  ;;  %v18008_v40 = vld [vmem:[#allocation85_spill] sm:$0xff] }
 0x538   :  { %v12833_v58 = vmul.f32 %v12725_v45, %v18004_v53  ;;  %v12837_v32 = vmul.f32 %v12723_v47, %v12580_v29  ;;  %v12841_v43 = vmul.f32 %v12725_v45, %v18005_v20  ;;  %v12845_v1 = vmul.f32 %v12723_v47, %v17976_v2 }
 0x539   :  { %v12849_v3 = vmul.f32 %v12725_v45, %v18006_v15  ;;  %v12853_v56 = vmul.f32 %v12723_v47, %v12606_v50  ;;  %v12857_v29 = vmul.f32 %v12725_v45, %v18007_v4  ;;  %v12861_v51 = vmul.f32 %v12723_v47, %v17978_v13  ;;  %v18009_v50 = vld [vmem:[#allocation82_spill] sm:$0xff] }
 0x53a   :  { %v12865_v2 = vmul.f32 %v12725_v45, %v18008_v40  ;;  %v12869_v24 = vmul.f32 %v12723_v47, %v12618_v48  ;;  %v3121_v17 = vadd.f32 %v12783_v16, %v3052_v25  ;;  %v12874_v53 = vmul.f32 %v12725_v45, %v18009_v50  ;;  %v18010_v40 = vld [vmem:[#allocation89_spill] sm:$0xff] }
 0x53b   :  { %v3122_v20 = vadd.f32 %v12797_v6, %v3053_v7  ;;  %v3123_v15 = vadd.f32 %v12783_v16, %v3054_v22  ;;  %v3124_v13 = vadd.f32 %v12797_v6, %v3055_v34  ;;  %v12881_v4 = vmul.f32 %v12723_v47, %v17979_v63 }
 0x53c   :  { %v12885_v48 = vmul.f32 %v12725_v45, %v18010_v40  ;;  %v12889_v25 = vmul.f32 %v12723_v47, %v12635_v5  ;;  %v3185_v50 = vmax.f32 %v3121_v17, 0.0  ;;  %v12893_v7 = vmul.f32 %v12725_v45, %v18011_v54  ;;  %v18014_v54 = vld [vmem:[#allocation92_spill] sm:$0xff] }
 0x53d   :  { %v3186_v22 = vmax.f32 %v3122_v20, 0.0  ;;  %v3187_v21 = vmax.f32 %v3123_v15, 0.0  ;;  %v3188_v34 = vmax.f32 %v3124_v13, 0.0  ;;  %v12897_v63 = vmul.f32 %v12723_v47, %v12644_v23 }
 0x53e   :  { %v12901_v40 = vmul.f32 %v12725_v45, %v18013_v31  ;;  %v3125_v36 = vadd.f32 %v12783_v16, %v3056_v35  ;;  %v3127_v5 = vadd.f32 %v12783_v16, %v3058_v30  ;;  %v12907_v17 = vmul.f32 %v12723_v47, %v12653_v59  ;;  %v18015_v31 = vld [vmem:[#allocation97_spill] sm:$0xff] }
 0x53f   :  { %18012 = vst [vmem:[#allocation121_spill] sm:$0xff] %v12897_v63  ;;  %v12911_v20 = vmul.f32 %v12725_v45, %v18014_v54  ;;  %v3249_v15 = vpack.c.bf16 %v3187_v21, %v3185_v50  ;;  %v3250_v13 = vpack.c.bf16 %v3188_v34, %v3186_v22  ;;  %v12915_v23 = vmul.f32 %v12723_v47, %v12662_v37  ;;  %v18016_v37 = vld [vmem:[#allocation96_spill] sm:$0xff] }
 0x540   :  { %v12919_v63 = vmul.f32 %v12725_v45, %v18015_v31  ;;  %v12923_v35 = vmul.f32 %v12723_v47, %v12671_v52  ;;  %v3126_v59 = vadd.f32 %v12797_v6, %v3057_v60  ;;  %v3128_v30 = vadd.f32 %v12797_v6, %v3059_v41  ;;  %v18017_v31 = vld [vmem:[#allocation99_spill] sm:$0xff] }
 0x541   :  { %3417 = vmatmul.bf16.vlgmr.msrb.gmra.mxu0 %v3249_v15  ;;  %3506 = vmatmul.bf16.vlgmr.msrb.gmra.mxu1 %v3250_v13  ;;  %v3129_v21 = vadd.f32 %v12783_v16, %v3060_v19  ;;  %v3131_v50 = vadd.f32 %v12783_v16, %v3062_v28  ;;  %v12931_v22 = vmul.f32 %v12725_v45, %v18016_v37  ;;  %v3189_v52 = vmax.f32 %v3125_v36, 0.0  ;;  %v18019_v15 = vld [vmem:[#allocation98_spill] sm:$0xff] }
 0x542   :  { %v12935_v34 = vmul.f32 %v12723_v47, %v12678_v11  ;;  %v3191_v54 = vmax.f32 %v3127_v5, 0.0  ;;  %v12939_v60 = vmul.f32 %v12725_v45, %v18017_v31  ;;  %v12943_v41 = vmul.f32 %v12723_v47, %v12684_v55  ;;  %v18022_v5 = vld [vmem:[#allocation102_spill] sm:$0xff] }
 0x543   :  { %v3130_v19 = vadd.f32 %v12797_v6, %v12755_v27  ;;  %v3132_v28 = vadd.f32 %v12797_v6, %v12761_v62  ;;  %v12951_v11 = vmul.f32 %v12725_v45, %v18019_v15  ;;  %v12955_v36 = vmul.f32 %v12723_v47, %v12690_v61 }
 0x544   :  { %18018 = vst [vmem:[#allocation117_spill] sm:$0xff] %v12943_v41  ;;  %v12959_v13 = vmul.f32 %v12725_v45, %v18022_v5  ;;  %v12963_v55 = vmul.f32 %v12723_v47, %v12695_v18  ;;  %v3190_v27 = vmax.f32 %v3126_v59, 0.0  ;;  %v3192_v37 = vmax.f32 %v3128_v30, 0.0  ;;  %v18024_v41 = vld [vmem:[#allocation101_spill] sm:$0xff] }
 0x545   :  { %18020 = vst [vmem:[#allocation24_spill] sm:$0xff] %v12951_v11  ;;  %v3193_v31 = vmax.f32 %v3129_v21, 0.0  ;;  %v3195_v62 = vmax.f32 %v3131_v50, 0.0  ;;  %v12967_v15 = vmul.f32 %v12725_v45, %v18024_v41  ;;  %v12971_v61 = vmul.f32 %v12723_v47, %v12700_v57 }
 0x546   :  { %18021 = vst [vmem:[#allocation25_spill] sm:$0xff] %v12955_v36  ;;  %v18025_v36 = vld [vmem:[#allocation107_spill] sm:$0xff]  ;;  %v3194_v11 = vmax.f32 %v3130_v19, 0.0  ;;  %v3196_v18 = vmax.f32 %v3132_v28, 0.0  ;;  %v3137_v59 = vadd.f32 %v12783_v16, %v12773_v12  ;;  %v3139_v30 = vadd.f32 %v12783_v16, %v12781_v44 }
 0x547   :  { %18023 = vst [vmem:[#allocation26_spill] sm:$0xff] %v12959_v13  ;;  %v12975_v5 = vmul.f32 %v12725_v45, %v18025_v36  ;;  %v3251_v13 = vpack.c.bf16 %v3191_v54, %v3189_v52  ;;  %v3138_v21 = vadd.f32 %v12797_v6, %v12777_v14  ;;  %v3140_v57 = vadd.f32 %v12797_v6, %v12787_v38 }
 0x548   :  { %v3141_v50 = vadd.f32 %v12783_v16, %v12791_v46  ;;  %v3143_v52 = vadd.f32 %v12783_v16, %v12801_v26  ;;  %v3252_v54 = vpack.c.bf16 %v3192_v37, %v3190_v27  ;;  %v12989_v41 = vpack.c.bf16 %v3195_v62, %v3193_v31 }
 0x549   :  { %v3201_v19 = vmax.f32 %v3137_v59, 0.0  ;;  %v3203_v12 = vmax.f32 %v3139_v30, 0.0  ;;  %v3202_v28 = vmax.f32 %v3138_v21, 0.0  ;;  %v3204_v36 = vmax.f32 %v3140_v57, 0.0 }
 0x54a   :  { %v3205_v44 = vmax.f32 %v3141_v50, 0.0  ;;  %v3207_v47 = vmax.f32 %v3143_v52, 0.0  ;;  %v12991_v45 = vpack.c.bf16 %v3196_v18, %v3194_v11  ;;  %v3142_v38 = vadd.f32 %v12797_v6, %v12795_v0 }
 0x54b   :  { %v12993_v14 = vpack.c.bf16 %v3203_v12, %v3201_v19  ;;  %v3144_v46 = vadd.f32 %v12797_v6, %v12805_v8  ;;  %v12999_v26 = vpack.c.bf16 %v3204_v36, %v3202_v28  ;;  %v3145_v37 = vadd.f32 %v12783_v16, %v12809_v9 }
 0x54c   :  { %v13001_v27 = vpack.c.bf16 %v3207_v47, %v3205_v44  ;;  %v3147_v31 = vadd.f32 %v12783_v16, %v12817_v42  ;;  %v3206_v11 = vmax.f32 %v3142_v38, 0.0  ;;  %v3146_v18 = vadd.f32 %v12797_v6, %v12813_v49 }
 0x54d   :  { %v3208_v62 = vmax.f32 %v3144_v46, 0.0  ;;  %v3148_v0 = vadd.f32 %v12797_v6, %v12821_v39  ;;  %v3209_v59 = vmax.f32 %v3145_v37, 0.0  ;;  %v3149_v47 = vadd.f32 %v12783_v16, %v12825_v10 }
 0x54e   :  { %v3211_v8 = vmax.f32 %v3147_v31, 0.0  ;;  %v3151_v30 = vadd.f32 %v12783_v16, %v12833_v58  ;;  %v3210_v21 = vmax.f32 %v3146_v18, 0.0  ;;  %v3150_v57 = vadd.f32 %v12797_v6, %v12829_v33 }
 0x54f   :  { %v13015_v9 = vpack.c.bf16 %v3208_v62, %v3206_v11  ;;  %v3212_v42 = vmax.f32 %v3148_v0, 0.0  ;;  %v3213_v49 = vmax.f32 %v3149_v47, 0.0  ;;  %v3152_v39 = vadd.f32 %v12797_v6, %v12837_v32 }
 0x550   :  { %v13019_v50 = vpack.c.bf16 %v3211_v8, %v3209_v59  ;;  %v3215_v52 = vmax.f32 %v3151_v30, 0.0  ;;  %v3214_v19 = vmax.f32 %v3150_v57, 0.0  ;;  %v3153_v58 = vadd.f32 %v12783_v16, %v12841_v43  ;;  %v18026_v57 = vld [vmem:[#allocation121_spill] sm:$0xff] }
 0x551   :  { %3422 = vmatmul.bf16.gmra.mxu0 %v3251_v13  ;;  %3511 = vmatmul.bf16.gmra.mxu1 %v3252_v54  ;;  %v13023_v10 = vpack.c.bf16 %v3212_v42, %v3210_v21  ;;  %v3155_v12 = vadd.f32 %v12783_v16, %v12849_v3  ;;  %v3216_v33 = vmax.f32 %v3152_v39, 0.0  ;;  %v3154_v36 = vadd.f32 %v12797_v6, %v12845_v1 }
 0x552   :  { %v13029_v28 = vpack.c.bf16 %v3215_v52, %v3213_v49  ;;  %v3156_v32 = vadd.f32 %v12797_v6, %v12853_v56  ;;  %v3217_v13 = vmax.f32 %v3153_v58, 0.0  ;;  %v3157_v44 = vadd.f32 %v12783_v16, %v12857_v29 }
 0x553   :  { %v3219_v54 = vmax.f32 %v3155_v12, 0.0  ;;  %v3159_v43 = vadd.f32 %v12783_v16, %v12865_v2  ;;  %v13039_v38 = vpack.c.bf16 %v3216_v33, %v3214_v19  ;;  %v3218_v3 = vmax.f32 %v3154_v36, 0.0 }
 0x554   :  { %v3220_v46 = vmax.f32 %v3156_v32, 0.0  ;;  %v3158_v37 = vadd.f32 %v12797_v6, %v12861_v51  ;;  %v3221_v1 = vmax.f32 %v3157_v44, 0.0  ;;  %v3160_v56 = vadd.f32 %v12797_v6, %v12869_v24 }
 0x555   :  { %v13043_v31 = vpack.c.bf16 %v3219_v54, %v3217_v13  ;;  %v3223_v11 = vmax.f32 %v3159_v43, 0.0  ;;  %v3161_v2 = vadd.f32 %v12783_v16, %v12874_v53  ;;  %v3163_v18 = vadd.f32 %v12783_v16, %v12885_v48 }
 0x556   :  { %v13047_v62 = vpack.c.bf16 %v3220_v46, %v3218_v3  ;;  %v3222_v29 = vmax.f32 %v3158_v37, 0.0  ;;  %v3224_v59 = vmax.f32 %v3160_v56, 0.0  ;;  %v3162_v51 = vadd.f32 %v12797_v6, %v12881_v4  ;;  %v18028_v56 = vld [vmem:[#allocation24_spill] sm:$0xff] }
 0x557   :  { %v13053_v0 = vpack.c.bf16 %v3223_v11, %v3221_v1  ;;  %v3164_v8 = vadd.f32 %v12797_v6, %v12889_v25  ;;  %v3225_v47 = vmax.f32 %v3161_v2, 0.0  ;;  %v3227_v24 = vmax.f32 %v3163_v18, 0.0 }
 0x558   :  { %v3165_v30 = vadd.f32 %v12783_v16, %v12893_v7  ;;  %v3167_v53 = vadd.f32 %v12783_v16, %v12901_v40  ;;  %v13063_v21 = vpack.c.bf16 %v3224_v59, %v3222_v29  ;;  %v3226_v48 = vmax.f32 %v3162_v51, 0.0  ;;  %v18029_v29 = vld [vmem:[#allocation26_spill] sm:$0xff]  ;;  %v18030_v59 = vld [vmem:[#allocation25_spill] sm:$0xff] }
 0x559   :  { %v3228_v42 = vmax.f32 %v3164_v8, 0.0  ;;  %v3166_v49 = vadd.f32 %v12797_v6, %v18026_v57  ;;  %v13067_v52 = vpack.c.bf16 %v3227_v24, %v3225_v47  ;;  %v3168_v25 = vadd.f32 %v12797_v6, %v12907_v17 }
 0x55a   :  { %v3229_v4 = vmax.f32 %v3165_v30, 0.0  ;;  %v3231_v39 = vmax.f32 %v3167_v53, 0.0  ;;  %v3169_v40 = vadd.f32 %v12783_v16, %v12911_v20  ;;  %v3171_v58 = vadd.f32 %v12783_v16, %v12919_v63 }
 0x55b   :  { %v13071_v19 = vpack.c.bf16 %v3228_v42, %v3226_v48  ;;  %v3230_v7 = vmax.f32 %v3166_v49, 0.0  ;;  %v3232_v33 = vmax.f32 %v3168_v25, 0.0  ;;  %v3170_v36 = vadd.f32 %v12797_v6, %v12915_v23  ;;  %v18032_v25 = vld [vmem:[#allocation56_spill] sm:$0xff] }
 0x55c   :  { %v13077_v12 = vpack.c.bf16 %v3231_v39, %v3229_v4  ;;  %v3172_v32 = vadd.f32 %v12797_v6, %v12923_v35  ;;  %v3233_v13 = vmax.f32 %v3169_v40, 0.0  ;;  %v3235_v17 = vmax.f32 %v3171_v58, 0.0  ;;  %v18027_v35 = vld [vmem:[#allocation117_spill] sm:$0xff]  ;;  %v18035_v58 = vld [vmem:[#allocation20_spill] sm:$0xff] }
 0x55d   :  { %v3173_v54 = vadd.f32 %v12783_v16, %v12931_v22  ;;  %v3175_v20 = vadd.f32 %v12783_v16, %v12939_v60  ;;  %v13087_v44 = vpack.c.bf16 %v3232_v33, %v3230_v7  ;;  %v3234_v63 = vmax.f32 %v3170_v36, 0.0  ;;  %v18033_v7 = vld [vmem:[#allocation21_spill] sm:$0xff] }
 0x55e   :  { %v3236_v43 = vmax.f32 %v3172_v32, 0.0  ;;  %v3174_v3 = vadd.f32 %v12797_v6, %v12935_v34  ;;  %v13091_v46 = vpack.c.bf16 %v3235_v17, %v3233_v13  ;;  %v3176_v1 = vadd.f32 %v12797_v6, %v18027_v35  ;;  %v18034_v40 = vld [vmem:[#allocation109_spill] sm:$0xff] }
 0x55f   :  { %v3237_v23 = vmax.f32 %v3173_v54, 0.0  ;;  %v3239_v37 = vmax.f32 %v3175_v20, 0.0  ;;  %v3177_v60 = vadd.f32 %v12783_v16, %v18028_v56  ;;  %v3179_v2 = vadd.f32 %v12783_v16, %v18029_v29  ;;  %v18037_v20 = vld [vmem:[#allocation116_spill] sm:$0xff] }
 0x560   :  { %v13095_v11 = vpack.c.bf16 %v3236_v43, %v3234_v63  ;;  %v3238_v22 = vmax.f32 %v3174_v3, 0.0  ;;  %v3240_v18 = vmax.f32 %v3176_v1, 0.0  ;;  %v3178_v51 = vadd.f32 %v12797_v6, %v18030_v59 }
 0x561   :  { %3427 = vmatmul.bf16.gmra.mxu0 %v12989_v41  ;;  %3516 = vmatmul.bf16.gmra.mxu1 %v12991_v45  ;;  %v13103_v34 = vpack.c.bf16 %v3239_v37, %v3237_v23  ;;  %v3180_v8 = vadd.f32 %v12797_v6, %v12963_v55  ;;  %v3241_v47 = vmax.f32 %v3177_v60, 0.0  ;;  %v3243_v24 = vmax.f32 %v3179_v2, 0.0  ;;  %v18031_v55 = vld [vmem:[#allocation22_spill] sm:$0xff] }
 0x562   :  { %v3181_v30 = vadd.f32 %v12783_v16, %v12967_v15  ;;  %v3183_v53 = vadd.f32 %v12783_v16, %v12975_v5  ;;  %v13113_v41 = vpack.c.bf16 %v3240_v18, %v3238_v22  ;;  %v3242_v45 = vmax.f32 %v3178_v51, 0.0 }
 0x563   :  { %v3244_v48 = vmax.f32 %v3180_v8, 0.0  ;;  %v3182_v42 = vadd.f32 %v12797_v6, %v12971_v61  ;;  %v13117_v57 = vpack.c.bf16 %v3243_v24, %v3241_v47  ;;  %v3184_v39 = vadd.f32 %v12797_v6, %v18031_v55  ;;  %v18036_v61 = vld [vmem:[#allocation23_spill] sm:$0xff]  ;;  %v9499_v55 = vld [vmem:[%s17124_s6 + $0x28] sm:$0xff] }
 0x564   :  { %v3245_v49 = vmax.f32 %v3181_v30, 0.0  ;;  %v3247_v4 = vmax.f32 %v3183_v53, 0.0  ;;  %v3066_v15 = vmul.f32 %v18033_v7, %v18032_v25  ;;  %v3067_v5 = vmul.f32 %v18035_v58, %v18034_v40  ;;  %v9500_v24 = vld [vmem:[%s17124_s6 + $0x30] sm:$0xff] }
 0x565   :  { %v13125_v33 = vpack.c.bf16 %v3244_v48, %v3242_v45  ;;  %v3246_v36 = vmax.f32 %v3182_v42, 0.0  ;;  %v3248_v13 = vmax.f32 %v3184_v39, 0.0  ;;  %v3133_v17 = vadd.f32 %v12783_v16, %v18036_v61 }
 0x566   :  { %v13127_v32 = vpack.c.bf16 %v3247_v4, %v3245_v49  ;;  %v3135_v54 = vadd.f32 %v12783_v16, %v3066_v15  ;;  %v3134_v63 = vadd.f32 %v12797_v6, %v18037_v20  ;;  %v3136_v43 = vadd.f32 %v12797_v6, %v3067_v5  ;;  %v9498_v5 = vld [vmem:[%s17124_s6 + $0x20] sm:$0xff] }
 0x567   :  { %v13135_v3 = vpack.c.bf16 %v3248_v13, %v3246_v36  ;;  %v3197_v23 = vmax.f32 %v3133_v17, 0.0 }
 0x568   :  { %v3199_v37 = vmax.f32 %v3135_v54, 0.0  ;;  %v3198_v35 = vmax.f32 %v3134_v63, 0.0  ;;  %v3200_v1 = vmax.f32 %v3136_v43, 0.0  ;;  %v9497_v43 = vld [vmem:[%s17124_s6 + $0x18] sm:$0xff] }
 0x56a   :  { %v3255_v22 = vpack.c.bf16 %v3199_v37, %v3197_v23  ;;  %v3256_v56 = vpack.c.bf16 %v3200_v1, %v3198_v35 }
 0x571   :  { %3432 = vmatmul.bf16.gmra.mxu0 %v3255_v22  ;;  %3521 = vmatmul.bf16.gmra.mxu1 %v3256_v56 }
 0x581   :  { %3437 = vmatmul.bf16.gmra.mxu0 %v12993_v14  ;;  %3526 = vmatmul.bf16.gmra.mxu1 %v12999_v26 }
 0x591   :  { %3442 = vmatmul.bf16.gmra.mxu0 %v13001_v27  ;;  %3531 = vmatmul.bf16.gmra.mxu1 %v13015_v9 }
 0x5a1   :  { %3447 = vmatmul.bf16.gmra.mxu0 %v13019_v50  ;;  %3536 = vmatmul.bf16.gmra.mxu1 %v13023_v10  ;;  %v9501_v10 = vld [vmem:[%s17124_s6 + $0x38] sm:$0xff] }
 0x5a2   :  { %3900 = vmatpush.bf16.msra.mxu2 %v9501_v10 }
 0x5a6   :  { %3901 = vmatpush.bf16.msra.mxu2 %v9500_v24 }
 0x5aa   :  { %3902 = vmatpush.bf16.msra.mxu2 %v9499_v55 }
 0x5ae   :  { %3903 = vmatpush.bf16.msra.mxu2 %v9498_v5 }
 0x5b1   :  { %3452 = vmatmul.bf16.gmra.mxu0 %v13029_v28  ;;  %3541 = vmatmul.bf16.gmra.mxu1 %v13039_v38 }
 0x5b2   :  { %3904 = vmatpush.bf16.msra.mxu2 %v9497_v43 }
 0x5be   :  { %v3418_v16 = vpop.f32.mrf.mxu0  ;;  %v3507_v6 = vpop.f32.mrf.mxu1 }
 0x5bf   :  { %v13145_v60 = vadd.f32 %v3507_v6, %v3418_v16 }
 0x5c1   :  { %3457 = vmatmul.bf16.gmra.mxu0 %v13043_v31  ;;  %3546 = vmatmul.bf16.gmra.mxu1 %v13047_v62  ;;  %v3627_v10 = vmul.f32 %v13145_v60, %v13145_v60 }
 0x5c6   :  { %v3420_v14 = vpop.f32.mrf.mxu0  ;;  %v3509_v26 = vpop.f32.mrf.mxu1 }
 0x5c7   :  { %v13149_v27 = vadd.f32 %v3509_v26, %v3420_v14  ;;  %v9496_v14 = vld [vmem:[%s17124_s6 + $0x10] sm:$0xff] }
 0x5c8   :  { %3905 = vmatpush.bf16.msra.mxu2 %v9496_v14 }
 0x5ce   :  { %v3423_v9 = vpop.f32.mrf.mxu0  ;;  %v3512_v50 = vpop.f32.mrf.mxu1 }
 0x5cf   :  { %v13151_v29 = vadd.f32 %v3512_v50, %v3423_v9  ;;  %v3628_v50 = vmul.f32 %v13149_v27, %v13149_v27 }
 0x5d1   :  { %3462 = vmatmul.bf16.gmra.mxu0 %v13053_v0  ;;  %3551 = vmatmul.bf16.gmra.mxu1 %v13063_v21 }
 0x5d6   :  { %v3425_v28 = vpop.f32.mrf.mxu0  ;;  %v3514_v38 = vpop.f32.mrf.mxu1 }
 0x5d7   :  { %v13158_v31 = vadd.f32 %v3514_v38, %v3425_v28  ;;  %v3589_v28 = vadd.f32 %v13149_v27, %v13145_v60  ;;  %v3629_v38 = vmul.f32 %v13151_v29, %v13151_v29 }
 0x5de   :  { %v3428_v62 = vpop.f32.mrf.mxu0  ;;  %v3517_v2 = vpop.f32.mrf.mxu1 }
 0x5df   :  { %v13160_v18 = vadd.f32 %v3517_v2, %v3428_v62 }
 0x5e1   :  { %3467 = vmatmul.bf16.gmra.mxu0 %v13067_v52  ;;  %3556 = vmatmul.bf16.gmra.mxu1 %v13071_v19 }
 0x5e6   :  { %v3430_v0 = vpop.f32.mrf.mxu0  ;;  %v3519_v59 = vpop.f32.mrf.mxu1 }
 0x5e7   :  { %v13164_v21 = vadd.f32 %v3519_v59, %v3430_v0  ;;  %v3659_v0 = vadd.f32 %v3628_v50, %v3627_v10  ;;  %v3590_v59 = vadd.f32 %v3589_v28, %v13151_v29 }
 0x5e9   :  { %v3591_v24 = vadd.f32 %v3590_v59, %v13158_v31 }
 0x5ee   :  { %v3433_v51 = vpop.f32.mrf.mxu0  ;;  %v3522_v8 = vpop.f32.mrf.mxu1 }
 0x5ef   :  { %v13166_v47 = vadd.f32 %v3522_v8, %v3433_v51  ;;  %v3630_v51 = vmul.f32 %v13158_v31, %v13158_v31  ;;  %v3660_v8 = vadd.f32 %v3659_v0, %v3629_v38 }
 0x5f1   :  { %3472 = vmatmul.bf16.gmra.mxu0 %v13077_v12  ;;  %3561 = vmatmul.bf16.gmra.mxu1 %v13087_v44  ;;  %v3633_v55 = vmul.f32 %v13166_v47, %v13166_v47 }
 0x5f6   :  { %v3435_v52 = vpop.f32.mrf.mxu0  ;;  %v3524_v30 = vpop.f32.mrf.mxu1 }
 0x5f7   :  { %v13173_v19 = vadd.f32 %v3524_v30, %v3435_v52  ;;  %v3631_v52 = vmul.f32 %v13160_v18, %v13160_v18  ;;  %v3661_v30 = vadd.f32 %v3660_v8, %v3630_v51 }
 0x5f9   :  { %v3634_v5 = vmul.f32 %v13173_v19, %v13173_v19 }
 0x5fe   :  { %v3438_v53 = vpop.f32.mrf.mxu0  ;;  %v3527_v45 = vpop.f32.mrf.mxu1 }
 0x5ff   :  { %v13175_v48 = vadd.f32 %v3527_v45, %v3438_v53  ;;  %v3592_v53 = vadd.f32 %v3591_v24, %v13160_v18  ;;  %v3632_v45 = vmul.f32 %v13164_v21, %v13164_v21 }
 0x601   :  { %3477 = vmatmul.bf16.gmra.mxu0 %v13091_v46  ;;  %3566 = vmatmul.bf16.gmra.mxu1 %v13095_v11 }
 0x606   :  { %v13179_v12 = vpop.f32.mrf.mxu0  ;;  %v13181_v44 = vpop.f32.mrf.mxu1 }
 0x60e   :  { %v3443_v42 = vpop.f32.mrf.mxu0  ;;  %v3532_v49 = vpop.f32.mrf.mxu1 }
 0x60f   :  { %v13183_v4 = vadd.f32 %v3532_v49, %v3443_v42  ;;  %v3662_v42 = vadd.f32 %v3661_v30, %v3631_v52  ;;  %v3593_v49 = vadd.f32 %v3592_v53, %v13164_v21 }
 0x611   :  { %3482 = vmatmul.bf16.gmra.mxu0 %v13103_v34  ;;  %3571 = vmatmul.bf16.gmra.mxu1 %v13113_v41 }
 0x616   :  { %v13190_v46 = vpop.f32.mrf.mxu0  ;;  %v13192_v11 = vpop.f32.mrf.mxu1 }
 0x617   :  { %v13288_v14 = vadd.f32 %v13192_v11, %v13190_v46 }
 0x619   :  { %v3638_v59 = vmul.f32 %v13288_v14, %v13288_v14 }
 0x61e   :  { %v3448_v39 = vpop.f32.mrf.mxu0  ;;  %v3537_v25 = vpop.f32.mrf.mxu1 }
 0x61f   :  { %v13194_v7 = vadd.f32 %v3537_v25, %v3448_v39 }
 0x621   :  { %3487 = vmatmul.bf16.gmra.mxu0 %v13117_v57  ;;  %3576 = vmatmul.bf16.gmra.mxu1 %v13125_v33  ;;  %v3639_v8 = vmul.f32 %v13194_v7, %v13194_v7 }
 0x626   :  { %v13198_v34 = vpop.f32.mrf.mxu0  ;;  %v13200_v41 = vpop.f32.mrf.mxu1 }
 0x627   :  { %v13298_v51 = vadd.f32 %v13200_v41, %v13198_v34  ;;  %v9495_v34 = vld [vmem:[%s17124_s6 + $0x8] sm:$0xff] }
 0x628   :  { %3906 = vmatpush.bf16.msra.mxu2 %v9495_v34 }
 0x629   :  { %v3640_v30 = vmul.f32 %v13298_v51, %v13298_v51 }
 0x62e   :  { %v3453_v15 = vpop.f32.mrf.mxu0  ;;  %v3542_v40 = vpop.f32.mrf.mxu1 }
 0x62f   :  { %v13202_v58 = vadd.f32 %v3542_v40, %v3453_v15  ;;  %v3663_v15 = vadd.f32 %v3662_v42, %v3632_v45  ;;  %v3594_v40 = vadd.f32 %v3593_v49, %v13166_v47 }
 0x631   :  { %3492 = vmatmul.bf16.gmra.mxu0 %v13127_v32  ;;  %3581 = vmatmul.bf16.gmra.mxu1 %v13135_v3  ;;  %v3641_v42 = vmul.f32 %v13202_v58, %v13202_v58 }
 0x636   :  { %v13209_v57 = vpop.f32.mrf.mxu0  ;;  %v13211_v33 = vpop.f32.mrf.mxu1 }
 0x637   :  { %v13308_v53 = vadd.f32 %v13211_v33, %v13209_v57 }
 0x639   :  { %v3642_v57 = vmul.f32 %v13308_v53, %v13308_v53 }
 0x63e   :  { %v3458_v36 = vpop.f32.mrf.mxu0  ;;  %v3547_v13 = vpop.f32.mrf.mxu1 }
 0x63f   :  { %v13213_v61 = vadd.f32 %v3547_v13, %v3458_v36  ;;  %v13278_v36 = vadd.f32 %v13181_v44, %v13179_v12  ;;  %v3664_v13 = vadd.f32 %v3663_v15, %v3633_v55  ;;  %v3637_v44 = vmul.f32 %v13183_v4, %v13183_v4 }
 0x641   :  { %v3665_v43 = vadd.f32 %v3664_v13, %v3634_v5 }
 0x646   :  { %v13215_v17 = vpop.f32.mrf.mxu0  ;;  %v13217_v54 = vpop.f32.mrf.mxu1 }
 0x647   :  { %v13321_v33 = vadd.f32 %v13217_v54, %v13215_v17 }
 0x64e   :  { %v3463_v32 = vpop.f32.mrf.mxu0  ;;  %v3552_v20 = vpop.f32.mrf.mxu1 }
 0x64f   :  { %v13219_v63 = vadd.f32 %v3552_v20, %v3463_v32  ;;  %v3595_v32 = vadd.f32 %v3594_v40, %v13173_v19  ;;  %v3635_v20 = vmul.f32 %v13175_v48, %v13175_v48 }
 0x651   :  { %v3666_v50 = vadd.f32 %v3665_v43, %v3635_v20  ;;  %v3645_v54 = vmul.f32 %v13219_v63, %v13219_v63 }
 0x656   :  { %v13224_v3 = vpop.f32.mrf.mxu0  ;;  %v13226_v23 = vpop.f32.mrf.mxu1 }
 0x65e   :  { %v3468_v37 = vpop.f32.mrf.mxu0  ;;  %v3557_v35 = vpop.f32.mrf.mxu1 }
 0x65f   :  { %v13228_v1 = vadd.f32 %v3557_v35, %v3468_v37  ;;  %v3596_v37 = vadd.f32 %v3595_v32, %v13175_v48  ;;  %v3636_v35 = vmul.f32 %v13278_v36, %v13278_v36  ;;  %v3643_v32 = vmul.f32 %v13213_v61, %v13213_v61 }
 0x661   :  { %v3597_v12 = vadd.f32 %v3596_v37, %v13278_v36  ;;  %v3667_v38 = vadd.f32 %v3666_v50, %v3636_v35  ;;  %v3644_v37 = vmul.f32 %v13321_v33, %v13321_v33  ;;  %v13331_v35 = vadd.f32 %v13226_v23, %v13224_v3 }
 0x663   :  { %v3598_v0 = vadd.f32 %v3597_v12, %v13183_v4  ;;  %v3668_v46 = vadd.f32 %v3667_v38, %v3637_v44 }
 0x665   :  { %v3599_v11 = vadd.f32 %v3598_v0, %v13288_v14  ;;  %v3669_v24 = vadd.f32 %v3668_v46, %v3638_v59  ;;  %v3646_v59 = vmul.f32 %v13331_v35, %v13331_v35 }
 0x666   :  { %v13230_v22 = vpop.f32.mrf.mxu0  ;;  %v13232_v56 = vpop.f32.mrf.mxu1 }
 0x667   :  { %v3600_v52 = vadd.f32 %v3599_v11, %v13194_v7  ;;  %v3670_v41 = vadd.f32 %v3669_v24, %v3639_v8  ;;  %v13341_v46 = vadd.f32 %v13232_v56, %v13230_v22  ;;  %v3647_v11 = vmul.f32 %v13228_v1, %v13228_v1 }
 0x669   :  { %v3601_v45 = vadd.f32 %v3600_v52, %v13298_v51  ;;  %v3671_v15 = vadd.f32 %v3670_v41, %v3640_v30  ;;  %v3648_v30 = vmul.f32 %v13341_v46, %v13341_v46 }
 0x66b   :  { %v3602_v40 = vadd.f32 %v3601_v45, %v13202_v58  ;;  %v3672_v5 = vadd.f32 %v3671_v15, %v3641_v42 }
 0x66d   :  { %v3603_v13 = vadd.f32 %v3602_v40, %v13308_v53  ;;  %v3673_v20 = vadd.f32 %v3672_v5, %v3642_v57 }
 0x66e   :  { %v13234_v16 = vpop.f32.mrf.mxu0  ;;  %v13236_v6 = vpop.f32.mrf.mxu1 }
 0x66f   :  { %v3604_v43 = vadd.f32 %v3603_v13, %v13213_v61  ;;  %v3674_v50 = vadd.f32 %v3673_v20, %v3643_v32  ;;  %v13348_v8 = vadd.f32 %v13236_v6, %v13234_v16 }
 0x671   :  { %v3605_v17 = vadd.f32 %v3604_v43, %v13321_v33  ;;  %v3675_v38 = vadd.f32 %v3674_v50, %v3644_v37  ;;  %v3649_v41 = vmul.f32 %v13348_v8, %v13348_v8 }
 0x673   :  { %v3606_v0 = vadd.f32 %v3605_v17, %v13219_v63  ;;  %v3676_v3 = vadd.f32 %v3675_v38, %v3645_v54 }
 0x675   :  { %v3607_v23 = vadd.f32 %v3606_v0, %v13331_v35  ;;  %v3677_v24 = vadd.f32 %v3676_v3, %v3646_v59 }
 0x676   :  { %v13241_v26 = vpop.f32.mrf.mxu0  ;;  %v13243_v9 = vpop.f32.mrf.mxu1 }
 0x677   :  { %v3608_v52 = vadd.f32 %v3607_v23, %v13228_v1  ;;  %v13355_v22 = vadd.f32 %v13243_v9, %v13241_v26  ;;  %v3678_v56 = vadd.f32 %v3677_v24, %v3647_v11 }
 0x679   :  { %v3609_v34 = vadd.f32 %v3608_v52, %v13341_v46  ;;  %v3679_v42 = vadd.f32 %v3678_v56, %v3648_v30  ;;  %v3650_v40 = vmul.f32 %v13355_v22, %v13355_v22 }
 0x67b   :  { %v3610_v15 = vadd.f32 %v3609_v34, %v13348_v8  ;;  %v3680_v9 = vadd.f32 %v3679_v42, %v3649_v41 }
 0x67d   :  { %v3611_v57 = vadd.f32 %v3610_v15, %v13355_v22 }
 0x67e   :  { %v13253_v62 = vpop.f32.mrf.mxu0  ;;  %v13255_v2 = vpop.f32.mrf.mxu1 }
 0x67f   :  { %v13362_v16 = vadd.f32 %v13255_v2, %v13253_v62  ;;  %v3681_v2 = vadd.f32 %v3680_v9, %v3650_v40 }
 0x681   :  { %v3651_v5 = vmul.f32 %v13362_v16, %v13362_v16  ;;  %v3612_v13 = vadd.f32 %v3611_v57, %v13362_v16 }
 0x683   :  { %v3682_v43 = vadd.f32 %v3681_v2, %v3651_v5 }
 0x686   :  { %v13269_v39 = vpop.f32.mrf.mxu0  ;;  %v13271_v25 = vpop.f32.mrf.mxu1 }
 0x687   :  { %v13369_v26 = vadd.f32 %v13271_v25, %v13269_v39 }
 0x689   :  { %v3652_v32 = vmul.f32 %v13369_v26, %v13369_v26  ;;  %v3613_v39 = vadd.f32 %v3612_v13, %v13369_v26 }
 0x68e   :  { %v3483_v10 = vpop.f32.mrf.mxu0  ;;  %v3572_v28 = vpop.f32.mrf.mxu1 }
 0x68f   :  { %v13374_v62 = vadd.f32 %v3572_v28, %v3483_v10  ;;  %v3683_v10 = vadd.f32 %v3682_v43, %v3652_v32 }
 0x691   :  { %v3653_v25 = vmul.f32 %v13374_v62, %v13374_v62  ;;  %v3614_v28 = vadd.f32 %v3613_v39, %v13374_v62 }
 0x696   :  { %v3485_v49 = vpop.f32.mrf.mxu0  ;;  %v3574_v55 = vpop.f32.mrf.mxu1 }
 0x697   :  { %v13379_v20 = vadd.f32 %v3574_v55, %v3485_v49  ;;  %v3684_v49 = vadd.f32 %v3683_v10, %v3653_v25 }
 0x699   :  { %v3654_v54 = vmul.f32 %v13379_v20, %v13379_v20  ;;  %v3615_v55 = vadd.f32 %v3614_v28, %v13379_v20 }
 0x69b   :  { %v3685_v3 = vadd.f32 %v3684_v49, %v3654_v54 }
 0x69e   :  { %v3488_v12 = vpop.f32.mrf.mxu0  ;;  %v3577_v44 = vpop.f32.mrf.mxu1 }
 0x69f   :  { %v13384_v37 = vadd.f32 %v3577_v44, %v3488_v12 }
 0x6a1   :  { %v3655_v0 = vmul.f32 %v13384_v37, %v13384_v37  ;;  %v3616_v12 = vadd.f32 %v3615_v55, %v13384_v37 }
 0x6a3   :  { %v3686_v23 = vadd.f32 %v3685_v3, %v3655_v0 }
 0x6a6   :  { %v3490_v6 = vpop.f32.mrf.mxu0  ;;  %v3579_v45 = vpop.f32.mrf.mxu1 }
 0x6a7   :  { %v13389_v38 = vadd.f32 %v3579_v45, %v3490_v6 }
 0x6a9   :  { %v3656_v44 = vmul.f32 %v13389_v38, %v13389_v38  ;;  %v3617_v11 = vadd.f32 %v3616_v12, %v13389_v38  ;;  %v9494_v12 = vld [vmem:[%s17124_s6] sm:$0xff] }
 0x6aa   :  { %3907 = vmatpush.bf16.msra.mxu2 %v9494_v12 }
 0x6ab   :  { %v3687_v56 = vadd.f32 %v3686_v23, %v3656_v44 }
 0x6ae   :  { %v3493_v50 = vpop.f32.mrf.mxu0  ;;  %v3582_v17 = vpop.f32.mrf.mxu1 }
 0x6af   :  { %v3583_v59 = vadd.f32 %v3582_v17, %v3493_v50  ;;  %v18038_v17 = vld [vmem:[#allocation87_spill] sm:$0xff] }
 0x6b1   :  { %v3657_v24 = vmul.f32 %v3583_v59, %v3583_v59  ;;  %v3618_v34 = vadd.f32 %v3617_v11, %v3583_v59 }
 0x6b3   :  { %v3688_v6 = vadd.f32 %v3687_v56, %v3657_v24 }
 0x6b6   :  { %v3495_v52 = vpop.f32.mrf.mxu0  ;;  %v3584_v30 = vpop.f32.mrf.mxu1 }
 0x6b7   :  { %v3585_v41 = vadd.f32 %v3584_v30, %v3495_v52  ;;  %v3587_v30 = vld [vmem:[#allocation2 + $0xc] sm:$0x1] }
 0x6b9   :  { %v3619_v45 = vadd.f32 %v3618_v34, %v3585_v41  ;;  %v3658_v42 = vmul.f32 %v3585_v41, %v3585_v41 }
 0x6bb   :  { %v3620_v15 = vrot.slane %v3619_v45, 4  ;;  %v3689_v40 = vadd.f32 %v3688_v6, %v3658_v42 }
 0x6bd   :  { %v3621_v9 = vadd.f32 %v3620_v15, %v3619_v45  ;;  %v3690_v57 = vrot.slane %v3689_v40, 4  ;;  %v3588_v45 = vld [vmem:[#allocation2 + $0xd] sm:$0x1] }
 0x6bf   :  { %v3622_v5 = vrot.slane %v3621_v9, 2  ;;  %v3691_v2 = vadd.f32 %v3690_v57, %v3689_v40  ;;  %v9509_v40 = vld [vmem:[#allocation6 + $0x38] sm:$0xff] }
 0x6c0   :  { %4357 = vmatpush.bf16.msra.mxu3 %v9509_v40 }
 0x6c1   :  { %v3623_v13 = vadd.f32 %v3622_v5, %v3621_v9  ;;  %v3692_v32 = vrot.slane %v3691_v2, 2 }
 0x6c3   :  { %v3624_v43 = vrot.slane %v3623_v13, 1  ;;  %v3693_v39 = vadd.f32 %v3692_v32, %v3691_v2 }
 0x6c5   :  { %v3625_v25 = vadd.f32 %v3624_v43, %v3623_v13  ;;  %v3694_v50 = vrot.slane %v3693_v39, 1 }
 0x6c7   :  { %v3626_v10 = vmul.f32 %v3625_v25, %v18038_v17  ;;  %v3695_v28 = vadd.f32 %v3694_v50, %v3693_v39 }
 0x6c9   :  { %v3696_v54 = vmul.f32 %v3695_v28, %v18038_v17  ;;  %v3697_v49 = vmul.f32 %v3626_v10, %v3626_v10 }
 0x6cb   :  { %v3698_v55 = vsub.f32 %v3696_v54, %v3697_v49 }
 0x6cd   :  { %v3699_v0 = vmax.f32 %v3698_v55, 0.0 }
 0x6cf   :  { %v3700_v3 = vadd.f32 1e-05, %v3699_v0 }
 0x6d1   :  { %9663 = vrsqrt.f32 %v3700_v3  ;;  %vm3707_vm7 = vweird.f32 %v3700_v3 }
 0x6d7   :  { %v9664_v44 = vpop.eup %9663 }
 0x6d8   :  { %v3702_v23 = vmul.f32 %v9664_v44, %v3700_v3  ;;  %vm3708_vm6 = vweird.f32 %v9664_v44 }
 0x6d9   :  { %vm3709_vm8 = vmor %vm3707_vm7, %vm3708_vm6 }
 0x6da   :  { %v3703_v11 = vmul.f32 %v9664_v44, %v3702_v23 }
 0x6dc   :  { %v3704_v24 = vmul.f32 0.5, %v3703_v11 }
 0x6de   :  { %v3705_v52 = vsub.f32 1.5, %v3704_v24 }
 0x6e0   :  { %v3706_v56 = vmul.f32 %v9664_v44, %v3705_v52 }
 0x6e2   :  { %v3710_v34 = vsel %vm3709_vm8, %v9664_v44, %v3706_v56 }
 0x6e3   :  { %v3711_v6 = vmul.f32 %v3710_v34, %v3587_v30 }
 0x6e5   :  { %v3712_v42 = vmul.f32 %v3711_v6, %v3626_v10  ;;  %v13403_v15 = vperm.slane %v3711_v6, 0 }
 0x6e7   :  { %v3713_v9 = vsub.f32 %v3588_v45, %v3712_v42  ;;  %v13406_v57 = vmul.f32 %v13403_v15, %v3585_v41  ;;  %v3717_v2 = vmul.f32 %v13403_v15, %v13145_v60  ;;  %v3718_v13 = vmul.f32 %v13403_v15, %v13149_v27 }
 0x6e8   :  { %v3719_v32 = vmul.f32 %v13403_v15, %v13151_v29  ;;  %v3720_v43 = vmul.f32 %v13403_v15, %v13158_v31  ;;  %v13419_v39 = vmul.f32 %v13403_v15, %v3583_v59  ;;  %v3725_v50 = vmul.f32 %v13403_v15, %v13175_v48 }
 0x6e9   :  { %v13408_v5 = vperm.slane %v3713_v9, 0  ;;  %v3726_v60 = vmul.f32 %v13403_v15, %v13278_v36  ;;  %v3727_v27 = vmul.f32 %v13403_v15, %v13183_v4  ;;  %v3728_v28 = vmul.f32 %v13403_v15, %v13288_v14 }
 0x6ea   :  { %v3729_v54 = vmul.f32 %v13403_v15, %v13194_v7  ;;  %v3730_v48 = vmul.f32 %v13403_v15, %v13298_v51  ;;  %v3731_v36 = vmul.f32 %v13403_v15, %v13202_v58  ;;  %v3732_v4 = vmul.f32 %v13403_v15, %v13308_v53 }
 0x6eb   :  { %v3752_v41 = vadd.f32 %v13408_v5, %v3717_v2  ;;  %v3753_v25 = vadd.f32 %v13408_v5, %v3718_v13  ;;  %v3754_v31 = vadd.f32 %v13408_v5, %v3719_v32  ;;  %v3755_v59 = vadd.f32 %v13408_v5, %v3720_v43 }
 0x6ec   :  { %v3733_v49 = vmul.f32 %v13403_v15, %v13213_v61  ;;  %v3734_v55 = vmul.f32 %v13403_v15, %v13321_v33  ;;  %v3735_v14 = vmul.f32 %v13403_v15, %v13219_v63  ;;  %v3736_v7 = vmul.f32 %v13403_v15, %v13331_v35 }
 0x6ed   :  { %v3784_v29 = vmax.f32 %v3752_v41, 0.0  ;;  %v3785_v10 = vmax.f32 %v3753_v25, 0.0  ;;  %v3737_v51 = vmul.f32 %v13403_v15, %v13228_v1  ;;  %v3738_v58 = vmul.f32 %v13403_v15, %v13341_v46 }
 0x6ee   :  { %v3739_v53 = vmul.f32 %v13403_v15, %v13348_v8  ;;  %v3740_v61 = vmul.f32 %v13403_v15, %v13355_v22  ;;  %v3786_v33 = vmax.f32 %v3754_v31, 0.0  ;;  %v3787_v3 = vmax.f32 %v3755_v59, 0.0 }
 0x6ef   :  { %v3816_v0 = vpack.c.bf16 %v3785_v10, %v3784_v29  ;;  %v3741_v63 = vmul.f32 %v13403_v15, %v13362_v16  ;;  %v3742_v35 = vmul.f32 %v13403_v15, %v13369_v26  ;;  %v3743_v1 = vmul.f32 %v13403_v15, %v13374_v62 }
 0x6f0   :  { %v3744_v46 = vmul.f32 %v13403_v15, %v13379_v20  ;;  %v3745_v8 = vmul.f32 %v13403_v15, %v13384_v37  ;;  %v3746_v22 = vmul.f32 %v13403_v15, %v13389_v38  ;;  %v3760_v12 = vadd.f32 %v13408_v5, %v3725_v50 }
 0x6f1   :  { %3908 = vmatmul.bf16.vlgmr.msra.gmra.mxu2 %v3816_v0  ;;  %v3761_v44 = vadd.f32 %v13408_v5, %v3726_v60  ;;  %v3762_v16 = vadd.f32 %v13408_v5, %v3727_v27  ;;  %v3763_v26 = vadd.f32 %v13408_v5, %v3728_v28  ;;  %v3764_v23 = vadd.f32 %v13408_v5, %v3729_v54 }
 0x6f2   :  { %v3765_v62 = vadd.f32 %v13408_v5, %v3730_v48  ;;  %v3817_v11 = vpack.c.bf16 %v3787_v3, %v3786_v33  ;;  %v3792_v20 = vmax.f32 %v3760_v12, 0.0  ;;  %v3766_v37 = vadd.f32 %v13408_v5, %v3731_v36 }
 0x6f3   :  { %v3793_v24 = vmax.f32 %v3761_v44, 0.0  ;;  %v3794_v52 = vmax.f32 %v3762_v16, 0.0  ;;  %v3795_v30 = vmax.f32 %v3763_v26, 0.0  ;;  %v3796_v38 = vmax.f32 %v3764_v23, 0.0  ;;  %v9508_v16 = vld [vmem:[#allocation6 + $0x30] sm:$0xff] }
 0x6f4   :  { %v3797_v56 = vmax.f32 %v3765_v62, 0.0  ;;  %v3767_v6 = vadd.f32 %v13408_v5, %v3732_v4  ;;  %v3798_v45 = vmax.f32 %v3766_v37, 0.0  ;;  %v3768_v42 = vadd.f32 %v13408_v5, %v3733_v49  ;;  %4358 = vmatpush.bf16.msra.mxu3 %v9508_v16 }
 0x6f5   :  { %v13476_v34 = vpack.c.bf16 %v3793_v24, %v3792_v20  ;;  %v13480_v40 = vpack.c.bf16 %v3795_v30, %v3794_v52  ;;  %v3769_v2 = vadd.f32 %v13408_v5, %v3734_v55  ;;  %v3770_v13 = vadd.f32 %v13408_v5, %v3735_v14 }
 0x6f6   :  { %v13482_v9 = vpack.c.bf16 %v3797_v56, %v3796_v38  ;;  %v3799_v32 = vmax.f32 %v3767_v6, 0.0  ;;  %v3800_v43 = vmax.f32 %v3768_v42, 0.0  ;;  %v3771_v41 = vadd.f32 %v13408_v5, %v3736_v7 }
 0x6f7   :  { %v3772_v25 = vadd.f32 %v13408_v5, %v3737_v51  ;;  %v3801_v50 = vmax.f32 %v3769_v2, 0.0  ;;  %v3802_v60 = vmax.f32 %v3770_v13, 0.0  ;;  %v3773_v27 = vadd.f32 %v13408_v5, %v3738_v58  ;;  %v9507_v2 = vld [vmem:[#allocation6 + $0x28] sm:$0xff]  ;;  %v9506_v13 = vld [vmem:[#allocation6 + $0x20] sm:$0xff] }
 0x6f8   :  { %v3774_v29 = vadd.f32 %v13408_v5, %v3739_v53  ;;  %v3823_v10 = vpack.c.bf16 %v3799_v32, %v3798_v45  ;;  %v3803_v31 = vmax.f32 %v3771_v41, 0.0  ;;  %v3775_v28 = vadd.f32 %v13408_v5, %v3740_v61  ;;  %4359 = vmatpush.bf16.msra.mxu3 %v9507_v2 }
 0x6f9   :  { %v3804_v59 = vmax.f32 %v3772_v25, 0.0  ;;  %v3824_v54 = vpack.c.bf16 %v3801_v50, %v3800_v43  ;;  %v3805_v48 = vmax.f32 %v3773_v27, 0.0  ;;  %v3776_v4 = vadd.f32 %v13408_v5, %v3741_v63 }
 0x6fa   :  { %v3806_v36 = vmax.f32 %v3774_v29, 0.0  ;;  %v3825_v49 = vpack.c.bf16 %v3803_v31, %v3802_v60  ;;  %v3807_v55 = vmax.f32 %v3775_v28, 0.0  ;;  %v3777_v0 = vadd.f32 %v13408_v5, %v3742_v35 }
 0x6fb   :  { %v3778_v14 = vadd.f32 %v13408_v5, %v3743_v1  ;;  %v13494_v7 = vpack.c.bf16 %v3805_v48, %v3804_v59  ;;  %v3808_v51 = vmax.f32 %v3776_v4, 0.0  ;;  %v3779_v58 = vadd.f32 %v13408_v5, %v3744_v46 }
 0x6fc   :  { %v3780_v53 = vadd.f32 %v13408_v5, %v3745_v8  ;;  %v13498_v33 = vpack.c.bf16 %v3807_v55, %v3806_v36  ;;  %v3809_v61 = vmax.f32 %v3777_v0, 0.0  ;;  %v3781_v12 = vadd.f32 %v13408_v5, %v3746_v22  ;;  %4360 = vmatpush.bf16.msra.mxu3 %v9506_v13  ;;  %v9502_v55 = vld [vmem:[#allocation6] sm:$0xff] }
 0x6fd   :  { %v3810_v3 = vmax.f32 %v3778_v14, 0.0  ;;  %v3811_v63 = vmax.f32 %v3779_v58, 0.0  ;;  %v3782_v35 = vadd.f32 %v13408_v5, %v13419_v39  ;;  %v3783_v1 = vadd.f32 %v13408_v5, %v13406_v57 }
 0x6fe   :  { %v3812_v44 = vmax.f32 %v3780_v53, 0.0  ;;  %v13505_v26 = vpack.c.bf16 %v3809_v61, %v3808_v51  ;;  %v3813_v46 = vmax.f32 %v3781_v12, 0.0  ;;  %v3721_v39 = vmul.f32 %v13403_v15, %v13160_v18 }
 0x6ff   :  { %v13507_v8 = vpack.c.bf16 %v3811_v63, %v3810_v3  ;;  %v3814_v23 = vmax.f32 %v3782_v35, 0.0  ;;  %v3815_v62 = vmax.f32 %v3783_v1, 0.0  ;;  %v3722_v57 = vmul.f32 %v13403_v15, %v13164_v21 }
 0x700   :  { %v13509_v20 = vpack.c.bf16 %v3813_v46, %v3812_v44  ;;  %v3723_v38 = vmul.f32 %v13403_v15, %v13166_v47  ;;  %v3724_v56 = vmul.f32 %v13403_v15, %v13173_v19  ;;  %v9505_v47 = vld [vmem:[#allocation6 + $0x18] sm:$0xff]  ;;  %v13528_v19 = vld [vmem:[#allocation2 + $0xe] ss:$0 sm:$0xff] }
 0x701   :  { %3913 = vmatmul.bf16.gmra.mxu2 %v3817_v11  ;;  %v13511_v22 = vpack.c.bf16 %v3815_v62, %v3814_v23  ;;  %v3756_v11 = vadd.f32 %v13408_v5, %v3721_v39  ;;  %v3757_v24 = vadd.f32 %v13408_v5, %v3722_v57  ;;  %4361 = vmatpush.bf16.msra.mxu3 %v9505_v47 }
 0x702   :  { %v3758_v6 = vadd.f32 %v13408_v5, %v3723_v38  ;;  %v3759_v18 = vadd.f32 %v13408_v5, %v3724_v56 }
 0x703   :  { %v3788_v37 = vmax.f32 %v3756_v11, 0.0  ;;  %v3789_v52 = vmax.f32 %v3757_v24, 0.0  ;;  %v4182_v11 = vld [vmem:[%s17119_s1 + $0x8] sm:$0xff] }
 0x704   :  { %v3790_v45 = vmax.f32 %v3758_v6, 0.0  ;;  %v3791_v21 = vmax.f32 %v3759_v18, 0.0 }
 0x705   :  { %v3818_v30 = vpack.c.bf16 %v3789_v52, %v3788_v37 }
 0x706   :  { %v3819_v42 = vpack.c.bf16 %v3791_v21, %v3790_v45 }
 0x711   :  { %3918 = vmatmul.bf16.gmra.mxu2 %v3818_v30 }
 0x721   :  { %3923 = vmatmul.bf16.gmra.mxu2 %v3819_v42 }
 0x731   :  { %3928 = vmatmul.bf16.gmra.mxu2 %v13476_v34 }
 0x741   :  { %3933 = vmatmul.bf16.gmra.mxu2 %v13480_v40 }
 0x751   :  { %3938 = vmatmul.bf16.gmra.mxu2 %v13482_v9  ;;  %v9504_v9 = vld [vmem:[#allocation6 + $0x10] sm:$0xff] }
 0x752   :  { %4362 = vmatpush.bf16.msra.mxu3 %v9504_v9 }
 0x761   :  { %3943 = vmatmul.bf16.gmra.mxu2 %v3823_v10  ;;  %v9503_v10 = vld [vmem:[#allocation6 + $0x8] sm:$0xff] }
 0x762   :  { %4363 = vmatpush.bf16.msra.mxu3 %v9503_v10 }
 0x766   :  { %4364 = vmatpush.bf16.msra.mxu3 %v9502_v55 }
 0x771   :  { %3948 = vmatmul.bf16.gmra.mxu2 %v3824_v54 }
 0x774   :  { %v3909_v15 = vpop.f32.mrf.mxu2 }
 0x775   :  { %v13531_v5 = vadd.f32 %v13528_v19, %v3909_v15 }
 0x777   :  { %3989 = vst [vmem:[%s17130_s12] sm:$0xff] %v13531_v5  ;;  %4021 = vrot.lane.b32.xlu0 %v13531_v5, %s9975_s29 }
 0x77c   :  { %v3911_v34 = vpop.f32.mrf.mxu2 }
 0x77d   :  { %v13540_v40 = vadd.f32 %v13528_v19, %v3911_v34 }
 0x77f   :  { %3990 = vst [vmem:[%s17130_s12 + $0x8] sm:$0xff] %v13540_v40  ;;  %4023 = vrot.lane.b32.xlu0 %v13540_v40, %s9975_s29 }
 0x781   :  { %3953 = vmatmul.bf16.gmra.mxu2 %v3825_v49 }
 0x784   :  { %v3914_v32 = vpop.f32.mrf.mxu2 }
 0x785   :  { %v13549_v43 = vadd.f32 %v13528_v19, %v3914_v32  ;;  %v4184_v32 = vld [vmem:[%s17119_s1 + $0x18] sm:$0xff] }
 0x787   :  { %3991 = vst [vmem:[%s17130_s12 + $0x10] sm:$0xff] %v13549_v43  ;;  %4025 = vrot.lane.b32.xlu1 %v13549_v43, %s9975_s29 }
 0x78c   :  { %v3916_v41 = vpop.f32.mrf.mxu2 }
 0x78d   :  { %v13558_v25 = vadd.f32 %v13528_v19, %v3916_v41 }
 0x78f   :  { %3992 = vst [vmem:[%s17130_s12 + $0x18] sm:$0xff] %v13558_v25  ;;  %4027 = vrot.lane.b32.xlu1 %v13558_v25, %s9975_s29 }
 0x791   :  { %3958 = vmatmul.bf16.gmra.mxu2 %v13494_v7 }
 0x794   :  { %v3919_v50 = vpop.f32.mrf.mxu2 }
 0x795   :  { %v13568_v60 = vadd.f32 %v13528_v19, %v3919_v50 }
 0x797   :  { %3993 = vst [vmem:[%s17130_s12 + $0x20] sm:$0xff] %v13568_v60  ;;  %4029 = vrot.lane.b32.xlu2 %v13568_v60, %s9975_s29 }
 0x79c   :  { %v3921_v27 = vpop.f32.mrf.mxu2 }
 0x79d   :  { %v13577_v29 = vadd.f32 %v13528_v19, %v3921_v27 }
 0x79f   :  { %3994 = vst [vmem:[%s17130_s12 + $0x28] sm:$0xff] %v13577_v29  ;;  %4031 = vrot.lane.b32.xlu2 %v13577_v29, %s9975_s29 }
 0x7a1   :  { %3963 = vmatmul.bf16.gmra.mxu2 %v13498_v33 }
 0x7a4   :  { %v3924_v31 = vpop.f32.mrf.mxu2 }
 0x7a5   :  { %v13587_v59 = vadd.f32 %v13528_v19, %v3924_v31 }
 0x7a7   :  { %3995 = vst [vmem:[%s17130_s12 + $0x30] sm:$0xff] %v13587_v59  ;;  %4033 = vrot.lane.b32.xlu0 %v13587_v59, %s9975_s29 }
 0x7ac   :  { %v3926_v28 = vpop.f32.mrf.mxu2 }
 0x7ad   :  { %v13596_v54 = vadd.f32 %v13528_v19, %v3926_v28 }
 0x7af   :  { %3996 = vst [vmem:[%s17130_s12 + $0x38] sm:$0xff] %v13596_v54  ;;  %4035 = vrot.lane.b32.xlu1 %v13596_v54, %s9975_s29 }
 0x7b1   :  { %3968 = vmatmul.bf16.gmra.mxu2 %v13505_v26 }
 0x7b4   :  { %v3929_v48 = vpop.f32.mrf.mxu2 }
 0x7b5   :  { %v13606_v36 = vadd.f32 %v13528_v19, %v3929_v48 }
 0x7b7   :  { %3997 = vst [vmem:[%s17130_s12 + $0x40] sm:$0xff] %v13606_v36  ;;  %4037 = vrot.lane.b32.xlu2 %v13606_v36, %s9975_s29 }
 0x7bc   :  { %v3931_v4 = vpop.f32.mrf.mxu2 }
 0x7bd   :  { %v13615_v49 = vadd.f32 %v13528_v19, %v3931_v4 }
 0x7bf   :  { %3998 = vst [vmem:[%s17130_s12 + $0x48] sm:$0xff] %v13615_v49  ;;  %4039 = vrot.lane.b32.xlu0 %v13615_v49, %s9975_s29 }
 0x7c1   :  { %3973 = vmatmul.bf16.gmra.mxu2 %v13507_v8 }
 0x7c4   :  { %v3934_v0 = vpop.f32.mrf.mxu2 }
 0x7c5   :  { %v13625_v14 = vadd.f32 %v13528_v19, %v3934_v0 }
 0x7c7   :  { %3999 = vst [vmem:[%s17130_s12 + $0x50] sm:$0xff] %v13625_v14  ;;  %4041 = vrot.lane.b32.xlu1 %v13625_v14, %s9975_s29 }
 0x7cc   :  { %v3936_v7 = vpop.f32.mrf.mxu2 }
 0x7cd   :  { %v13634_v51 = vadd.f32 %v13528_v19, %v3936_v7 }
 0x7cf   :  { %4000 = vst [vmem:[%s17130_s12 + $0x58] sm:$0xff] %v13634_v51  ;;  %4043 = vrot.lane.b32.xlu2 %v13634_v51, %s9975_s29 }
 0x7d1   :  { %3978 = vmatmul.bf16.gmra.mxu2 %v13509_v20 }
 0x7d4   :  { %v3939_v58 = vpop.f32.mrf.mxu2 }
 0x7d5   :  { %v13644_v53 = vadd.f32 %v13528_v19, %v3939_v58 }
 0x7d7   :  { %4001 = vst [vmem:[%s17130_s12 + $0x60] sm:$0xff] %v13644_v53  ;;  %4045 = vrot.lane.b32.xlu0 %v13644_v53, %s9975_s29 }
 0x7dc   :  { %v3941_v33 = vpop.f32.mrf.mxu2 }
 0x7dd   :  { %v13653_v61 = vadd.f32 %v13528_v19, %v3941_v33 }
 0x7df   :  { %4002 = vst [vmem:[%s17130_s12 + $0x68] sm:$0xff] %v13653_v61  ;;  %4047 = vrot.lane.b32.xlu1 %v13653_v61, %s9975_s29 }
 0x7e1   :  { %3983 = vmatmul.bf16.gmra.mxu2 %v13511_v22  ;;  %v4181_v22 = vld [vmem:[%s17119_s1] sm:$0xff] }
 0x7e4   :  { %v3944_v3 = vpop.f32.mrf.mxu2 }
 0x7e5   :  { %v13663_v12 = vadd.f32 %v13528_v19, %v3944_v3 }
 0x7e7   :  { %4003 = vst [vmem:[%s17130_s12 + $0x70] sm:$0xff] %v13663_v12  ;;  %4049 = vrot.lane.b32.xlu2 %v13663_v12, %s9975_s29 }
 0x7e9   :  { %v4022_v63 = vpop.permute.xlu0 %4021 }
 0x7ea   :  { %v4085_v44 = vmul.f32 0.5, %v4022_v63 }
 0x7ec   :  { %v3946_v35 = vpop.f32.mrf.mxu2  ;;  %v4117_v16 = vmul.f32 1.442695, %v4085_v44  ;;  %v4185_v44 = vld [vmem:[%s17119_s1 + $0x20] sm:$0xff] }
 0x7ed   :  { %v13672_v1 = vadd.f32 %v13528_v19, %v3946_v35 }
 0x7ee   :  { %9665 = vpow2.f32 %v4117_v16 }
 0x7ef   :  { %4004 = vst [vmem:[%s17130_s12 + $0x78] sm:$0xff] %v13672_v1  ;;  %4051 = vrot.lane.b32.xlu0 %v13672_v1, %s9975_s29 }
 0x7f1   :  { %v4024_v26 = vpop.permute.xlu0 %4023  ;;  %v4030_v37 = vpop.permute.xlu2 %4029 }
 0x7f2   :  { %v4086_v46 = vmul.f32 0.5, %v4024_v26  ;;  %v4089_v41 = vmul.f32 0.5, %v4030_v37 }
 0x7f4   :  { %v4119_v8 = vmul.f32 1.442695, %v4086_v46  ;;  %v3949_v23 = vpop.f32.mrf.mxu2  ;;  %v9666_v20 = vpop.eup %9665  ;;  %v4125_v4 = vmul.f32 1.442695, %v4089_v41 }
 0x7f5   :  { %v13681_v62 = vadd.f32 %v13528_v19, %v3949_v23  ;;  %v4213_v24 = vmul.f32 %v9666_v20, %v4181_v22 }
 0x7f6   :  { %9667 = vpow2.f32 %v4119_v8 }
 0x7f7   :  { %4005 = vst [vmem:[%s17130_s12 + $0x80] sm:$0xff] %v13681_v62  ;;  %4053 = vrot.lane.b32.xlu1 %v13681_v62, %s9975_s29  ;;  %v4245_v18 = vadd.f32 %v4213_v24, %v13531_v5 }
 0x7f9   :  { %v4026_v39 = vpop.permute.xlu1 %4025  ;;  %v4032_v34 = vpop.permute.xlu2 %4031 }
 0x7fa   :  { %v4087_v57 = vmul.f32 0.5, %v4026_v39  ;;  %v4090_v9 = vmul.f32 0.5, %v4032_v34 }
 0x7fc   :  { %v3951_v52 = vpop.f32.mrf.mxu2  ;;  %v9668_v30 = vpop.eup %9667  ;;  %v4121_v6 = vmul.f32 1.442695, %v4087_v57  ;;  %v4127_v31 = vmul.f32 1.442695, %v4090_v9 }
 0x7fd   :  { %v13696_v38 = vadd.f32 %v13528_v19, %v3951_v52  ;;  %v4214_v56 = vmul.f32 %v9668_v30, %v4182_v11  ;;  %v4187_v30 = vld [vmem:[%s17119_s1 + $0x30] sm:$0xff] }
 0x7fe   :  { %9669 = vpow2.f32 %v4121_v6  ;;  %v4188_v6 = vld [vmem:[%s17119_s1 + $0x38] sm:$0xff] }
 0x7ff   :  { %4006 = vst [vmem:[%s17130_s12 + $0x88] sm:$0xff] %v13696_v38  ;;  %4055 = vrot.lane.b32.xlu2 %v13696_v38, %s9975_s29  ;;  %v4246_v45 = vadd.f32 %v4214_v56, %v13540_v40  ;;  %v4183_v40 = vld [vmem:[%s17119_s1 + $0x10] sm:$0xff] }
 0x801   :  { %v4028_v21 = vpop.permute.xlu1 %4027  ;;  %v4277_v2 = vpack.c.bf16 %v4246_v45, %v4245_v18 }
 0x802   :  { %v4088_v42 = vmul.f32 0.5, %v4028_v21 }
 0x803   :  { %4365 = vmatmul.bf16.vlgmr.msra.gmra.mxu3 %v4277_v2 }
 0x804   :  { %v4123_v13 = vmul.f32 1.442695, %v4088_v42  ;;  %v3954_v47 = vpop.f32.mrf.mxu2  ;;  %v9670_v5 = vpop.eup %9669 }
 0x805   :  { %v13707_v15 = vadd.f32 %v13528_v19, %v3954_v47  ;;  %v4215_v50 = vmul.f32 %v9670_v5, %v4183_v40 }
 0x806   :  { %9671 = vpow2.f32 %v4123_v13 }
 0x807   :  { %4007 = vst [vmem:[%s17130_s12 + $0x90] sm:$0xff] %v13707_v15  ;;  %4057 = vrot.lane.b32.xlu0 %v13707_v15, %s9975_s29  ;;  %v4247_v55 = vadd.f32 %v4215_v50, %v13549_v43  ;;  %9673 = vpow2.f32 %v4127_v31  ;;  %v4186_v43 = vld [vmem:[%s17119_s1 + $0x28] sm:$0xff] }
 0x808   :  { %9675 = vpow2.f32 %v4125_v4 }
 0x80c   :  { %v9672_v27 = vpop.eup %9671  ;;  %v3956_v10 = vpop.f32.mrf.mxu2 }
 0x80d   :  { %v13722_v28 = vadd.f32 %v13528_v19, %v3956_v10  ;;  %v4216_v48 = vmul.f32 %v9672_v27, %v4184_v32  ;;  %v9674_v3 = vpop.eup %9673  ;;  %v4189_v27 = vld [vmem:[%s17119_s1 + $0x40] sm:$0xff] }
 0x80e   :  { %v4218_v16 = vmul.f32 %v9674_v3, %v4186_v43 }
 0x80f   :  { %4008 = vst [vmem:[%s17130_s12 + $0x98] sm:$0xff] %v13722_v28  ;;  %4059 = vrot.lane.b32.xlu1 %v13722_v28, %s9975_s29  ;;  %v4248_v0 = vadd.f32 %v4216_v48, %v13558_v25  ;;  %v9676_v25 = vpop.eup %9675  ;;  %v4190_v48 = vld [vmem:[%s17119_s1 + $0x48] sm:$0xff] }
 0x810   :  { %v4217_v46 = vmul.f32 %v9676_v25, %v4185_v44  ;;  %v4250_v20 = vadd.f32 %v4218_v16, %v13577_v29 }
 0x811   :  { %v4278_v7 = vpack.c.bf16 %v4248_v0, %v4247_v55  ;;  %v4038_v29 = vpop.permute.xlu2 %4037 }
 0x812   :  { %v4249_v22 = vadd.f32 %v4217_v46, %v13568_v60  ;;  %v4093_v56 = vmul.f32 0.5, %v4038_v29 }
 0x813   :  { %4370 = vmatmul.bf16.gmra.mxu3 %v4278_v7 }
 0x814   :  { %v3959_v58 = vpop.f32.mrf.mxu2  ;;  %v4279_v11 = vpack.c.bf16 %v4250_v20, %v4249_v22  ;;  %v4133_v13 = vmul.f32 1.442695, %v4093_v56  ;;  %v4192_v20 = vld [vmem:[%s17119_s1 + $0x58] sm:$0xff] }
 0x815   :  { %v13733_v33 = vadd.f32 %v13528_v19, %v3959_v58 }
 0x817   :  { %4009 = vst [vmem:[%s17130_s12 + $0xa0] sm:$0xff] %v13733_v33  ;;  %4061 = vrot.lane.b32.xlu2 %v13733_v33, %s9975_s29 }
 0x819   :  { %v4034_v63 = vpop.permute.xlu0 %4033 }
 0x81a   :  { %v4091_v35 = vmul.f32 0.5, %v4034_v63 }
 0x81c   :  { %v3961_v26 = vpop.f32.mrf.mxu2  ;;  %v4129_v23 = vmul.f32 1.442695, %v4091_v35 }
 0x81d   :  { %v13748_v8 = vadd.f32 %v13528_v19, %v3961_v26 }
 0x81e   :  { %9677 = vpow2.f32 %v4129_v23 }
 0x81f   :  { %4010 = vst [vmem:[%s17130_s12 + $0xa8] sm:$0xff] %v13748_v8  ;;  %4063 = vrot.lane.b32.xlu0 %v13748_v8, %s9975_s29 }
 0x821   :  { %v4036_v39 = vpop.permute.xlu1 %4035 }
 0x822   :  { %v4092_v57 = vmul.f32 0.5, %v4036_v39 }
 0x823   :  { %4375 = vmatmul.bf16.gmra.mxu3 %v4279_v11 }
 0x824   :  { %v4131_v24 = vmul.f32 1.442695, %v4092_v57  ;;  %v3964_v37 = vpop.f32.mrf.mxu2  ;;  %v9678_v60 = vpop.eup %9677 }
 0x825   :  { %v13759_v52 = vadd.f32 %v13528_v19, %v3964_v37  ;;  %v4219_v18 = vmul.f32 %v9678_v60, %v4187_v30 }
 0x826   :  { %9679 = vpow2.f32 %v4131_v24 }
 0x827   :  { %4011 = vst [vmem:[%s17130_s12 + $0xb0] sm:$0xff] %v13759_v52  ;;  %4065 = vrot.lane.b32.xlu1 %v13759_v52, %s9975_s29  ;;  %v4251_v47 = vadd.f32 %v4219_v18, %v13587_v59  ;;  %9681 = vpow2.f32 %v4133_v13 }
 0x82c   :  { %v9680_v45 = vpop.eup %9679  ;;  %v3966_v21 = vpop.f32.mrf.mxu2 }
 0x82d   :  { %v13774_v42 = vadd.f32 %v13528_v19, %v3966_v21  ;;  %v4220_v2 = vmul.f32 %v9680_v45, %v4188_v6  ;;  %v9682_v59 = vpop.eup %9681 }
 0x82e   :  { %v4221_v55 = vmul.f32 %v9682_v59, %v4189_v27 }
 0x82f   :  { %4012 = vst [vmem:[%s17130_s12 + $0xb8] sm:$0xff] %v13774_v42  ;;  %4067 = vrot.lane.b32.xlu2 %v13774_v42, %s9975_s29  ;;  %v4252_v34 = vadd.f32 %v4220_v2, %v13596_v54  ;;  %v4044_v54 = vpop.permute.xlu2 %4043  ;;  %v4193_v2 = vld [vmem:[%s17119_s1 + $0x60] sm:$0xff] }
 0x830   :  { %v4096_v4 = vmul.f32 0.5, %v4044_v54  ;;  %v4253_v63 = vadd.f32 %v4221_v55, %v13606_v36  ;;  %v4191_v36 = vld [vmem:[%s17119_s1 + $0x50] sm:$0xff] }
 0x831   :  { %v4040_v5 = vpop.permute.xlu0 %4039  ;;  %v4280_v40 = vpack.c.bf16 %v4252_v34, %v4251_v47  ;;  %v4194_v47 = vld [vmem:[%s17119_s1 + $0x68] sm:$0xff] }
 0x832   :  { %v4094_v9 = vmul.f32 0.5, %v4040_v5  ;;  %v4139_v25 = vmul.f32 1.442695, %v4096_v4 }
 0x833   :  { %4380 = vmatmul.bf16.gmra.mxu3 %v4280_v40 }
 0x834   :  { %v4135_v32 = vmul.f32 1.442695, %v4094_v9  ;;  %v3969_v41 = vpop.f32.mrf.mxu2 }
 0x835   :  { %v13785_v50 = vadd.f32 %v13528_v19, %v3969_v41 }
 0x836   :  { %9683 = vpow2.f32 %v4135_v32 }
 0x837   :  { %4013 = vst [vmem:[%s17130_s12 + $0xc0] sm:$0xff] %v13785_v50  ;;  %4069 = vrot.lane.b32.xlu0 %v13785_v50, %s9975_s29 }
 0x839   :  { %v4042_v10 = vpop.permute.xlu1 %4041 }
 0x83a   :  { %v4095_v31 = vmul.f32 0.5, %v4042_v10 }
 0x83c   :  { %v9684_v0 = vpop.eup %9683  ;;  %v3971_v7 = vpop.f32.mrf.mxu2  ;;  %v4137_v58 = vmul.f32 1.442695, %v4095_v31 }
 0x83d   :  { %v13800_v3 = vadd.f32 %v13528_v19, %v3971_v7  ;;  %v4222_v43 = vmul.f32 %v9684_v0, %v4190_v48  ;;  %v4195_v0 = vld [vmem:[%s17119_s1 + $0x70] sm:$0xff] }
 0x83e   :  { %9685 = vpow2.f32 %v4137_v58 }
 0x83f   :  { %4014 = vst [vmem:[%s17130_s12 + $0xc8] sm:$0xff] %v13800_v3  ;;  %4071 = vrot.lane.b32.xlu1 %v13800_v3, %s9975_s29  ;;  %v4254_v44 = vadd.f32 %v4222_v43, %v13615_v49  ;;  %9687 = vpow2.f32 %v4139_v25  ;;  %v4196_v43 = vld [vmem:[%s17119_s1 + $0x78] sm:$0xff] }
 0x841   :  { %v4281_v35 = vpack.c.bf16 %v4254_v44, %v4253_v63 }
 0x843   :  { %4385 = vmatmul.bf16.gmra.mxu3 %v4281_v35 }
 0x844   :  { %v3974_v16 = vpop.f32.mrf.mxu2  ;;  %v9686_v46 = vpop.eup %9685 }
 0x845   :  { %v13811_v26 = vadd.f32 %v13528_v19, %v3974_v16  ;;  %v9688_v49 = vpop.eup %9687  ;;  %v4223_v39 = vmul.f32 %v9686_v46, %v4191_v36 }
 0x846   :  { %v4224_v11 = vmul.f32 %v9688_v49, %v4192_v20 }
 0x847   :  { %4015 = vst [vmem:[%s17130_s12 + $0xd0] sm:$0xff] %v13811_v26  ;;  %4073 = vrot.lane.b32.xlu2 %v13811_v26, %s9975_s29  ;;  %v4255_v29 = vadd.f32 %v4223_v39, %v13625_v14  ;;  %v4050_v14 = vpop.permute.xlu2 %4049  ;;  %v4197_v39 = vld [vmem:[%s17119_s1 + $0x80] sm:$0xff] }
 0x848   :  { %v4256_v60 = vadd.f32 %v4224_v11, %v13634_v51  ;;  %v4099_v13 = vmul.f32 0.5, %v4050_v14 }
 0x849   :  { %v4046_v23 = vpop.permute.xlu0 %4045 }
 0x84a   :  { %v4097_v22 = vmul.f32 0.5, %v4046_v23  ;;  %v4282_v6 = vpack.c.bf16 %v4256_v60, %v4255_v29  ;;  %v4145_v41 = vmul.f32 1.442695, %v4099_v13 }
 0x84c   :  { %v3976_v57 = vpop.f32.mrf.mxu2  ;;  %v4141_v37 = vmul.f32 1.442695, %v4097_v22 }
 0x84d   :  { %v13826_v24 = vadd.f32 %v13528_v19, %v3976_v57 }
 0x84e   :  { %9689 = vpow2.f32 %v4141_v37  ;;  %v4198_v37 = vld [vmem:[%s17119_s1 + $0x88] sm:$0xff] }
 0x84f   :  { %4016 = vst [vmem:[%s17130_s12 + $0xd8] sm:$0xff] %v13826_v24  ;;  %4075 = vrot.lane.b32.xlu0 %v13826_v24, %s9975_s29 }
 0x851   :  { %v4048_v30 = vpop.permute.xlu1 %4047 }
 0x852   :  { %v4098_v56 = vmul.f32 0.5, %v4048_v30 }
 0x853   :  { %4390 = vmatmul.bf16.gmra.mxu3 %v4282_v6 }
 0x854   :  { %v4143_v18 = vmul.f32 1.442695, %v4098_v56  ;;  %v3979_v45 = vpop.f32.mrf.mxu2  ;;  %v9690_v51 = vpop.eup %9689 }
 0x855   :  { %v13837_v21 = vadd.f32 %v13528_v19, %v3979_v45  ;;  %v4225_v34 = vmul.f32 %v9690_v51, %v4193_v2 }
 0x856   :  { %9691 = vpow2.f32 %v4143_v18 }
 0x857   :  { %4017 = vst [vmem:[%s17130_s12 + $0xe0] sm:$0xff] %v13837_v21  ;;  %4077 = vrot.lane.b32.xlu1 %v13837_v21, %s9975_s29  ;;  %v4257_v59 = vadd.f32 %v4225_v34, %v13644_v53  ;;  %9693 = vpow2.f32 %v4145_v41 }
 0x85c   :  { %v9692_v5 = vpop.eup %9691  ;;  %v3981_v40 = vpop.f32.mrf.mxu2 }
 0x85d   :  { %v13852_v9 = vadd.f32 %v13528_v19, %v3981_v40  ;;  %v4226_v32 = vmul.f32 %v9692_v5, %v4194_v47  ;;  %v9694_v53 = vpop.eup %9693  ;;  %v4199_v47 = vld [vmem:[%s17119_s1 + $0x90] sm:$0xff] }
 0x85e   :  { %v4227_v63 = vmul.f32 %v9694_v53, %v4195_v0  ;;  %v4201_v0 = vld [vmem:[%s17119_s1 + $0xa0] sm:$0xff] }
 0x85f   :  { %4018 = vst [vmem:[%s17130_s12 + $0xe8] sm:$0xff] %v13852_v9  ;;  %4079 = vrot.lane.b32.xlu2 %v13852_v9, %s9975_s29  ;;  %v4258_v54 = vadd.f32 %v4226_v32, %v13653_v61  ;;  %v4056_v61 = vpop.permute.xlu2 %4055 }
 0x860   :  { %v4102_v25 = vmul.f32 0.5, %v4056_v61  ;;  %v4259_v23 = vadd.f32 %v4227_v63, %v13663_v12 }
 0x861   :  { %v4052_v27 = vpop.permute.xlu0 %4051  ;;  %v4283_v10 = vpack.c.bf16 %v4258_v54, %v4257_v59 }
 0x862   :  { %v4100_v31 = vmul.f32 0.5, %v4052_v27  ;;  %v4151_v49 = vmul.f32 1.442695, %v4102_v25 }
 0x863   :  { %4395 = vmatmul.bf16.gmra.mxu3 %v4283_v10 }
 0x864   :  { %v4147_v48 = vmul.f32 1.442695, %v4100_v31  ;;  %v3984_v4 = vpop.f32.mrf.mxu2 }
 0x865   :  { %v13863_v55 = vadd.f32 %v13528_v19, %v3984_v4 }
 0x866   :  { %9695 = vpow2.f32 %v4147_v48 }
 0x867   :  { %4019 = vst [vmem:[%s17130_s12 + $0xf0] sm:$0xff] %v13863_v55  ;;  %4081 = vrot.lane.b32.xlu0 %v13863_v55, %s9975_s29 }
 0x869   :  { %v4054_v7 = vpop.permute.xlu1 %4053 }
 0x86a   :  { %v4101_v58 = vmul.f32 0.5, %v4054_v7 }
 0x86c   :  { %v9696_v44 = vpop.eup %9695  ;;  %v3986_v35 = vpop.f32.mrf.mxu2  ;;  %v4149_v16 = vmul.f32 1.442695, %v4101_v58 }
 0x86d   :  { %v13878_v46 = vadd.f32 %v13528_v19, %v3986_v35  ;;  %v4228_v36 = vmul.f32 %v9696_v44, %v4196_v43  ;;  %v8994_v43 = vld [vmem:[#allocation7 + $0x78] sm:$0xf0]  ;;  %v8992_v35 = vld [vmem:[#allocation7 + $0x70] sm:$0xf] }
 0x86e   :  { %9697 = vpow2.f32 %v4149_v16  ;;  %v9525_v16 = vld [vmem:[#allocation7 + $0x74] sm:$0xf0] }
 0x86f   :  { %4020 = vst [vmem:[%s17130_s12 + $0xf8] sm:$0xff] %v13878_v46  ;;  %4083 = vrot.lane.b32.xlu1 %v13878_v46, %s9975_s29  ;;  %v4260_v20 = vadd.f32 %v4228_v36, %v13672_v1  ;;  %9699 = vpow2.f32 %v4151_v49  ;;  %v8993_v49 = vor.u32 %v9525_v16, %v8992_v35 }
 0x871   :  { %v4284_v22 = vpack.c.bf16 %v4260_v20, %v4259_v23  ;;  %v4062_v51 = vpop.permute.xlu2 %4061  ;;  %4787 = vmatpush.bf16.msra.mxu0 %v8993_v49 }
 0x872   :  { %v4105_v34 = vmul.f32 0.5, %v4062_v51 }
 0x873   :  { %4400 = vmatmul.bf16.gmra.mxu3 %v4284_v22 }
 0x874   :  { %v9698_v19 = vpop.eup %9697  ;;  %v4157_v32 = vmul.f32 1.442695, %v4105_v34 }
 0x875   :  { %v9700_v57 = vpop.eup %9699  ;;  %v4229_v60 = vmul.f32 %v9698_v19, %v4197_v39 }
 0x876   :  { %v4230_v12 = vmul.f32 %v9700_v57, %v4198_v37 }
 0x877   :  { %v4261_v1 = vadd.f32 %v4229_v60, %v13681_v62  ;;  %v4200_v62 = vld [vmem:[%s17119_s1 + $0x98] sm:$0xff]  ;;  %v4203_v60 = vld [vmem:[%s17119_s1 + $0xb0] sm:$0xff] }
 0x878   :  { %v4262_v56 = vadd.f32 %v4230_v12, %v13696_v38 }
 0x879   :  { %v4058_v11 = vpop.permute.xlu0 %4057 }
 0x87a   :  { %v4103_v29 = vmul.f32 0.5, %v4058_v11  ;;  %v4285_v45 = vpack.c.bf16 %v4262_v56, %v4261_v1  ;;  %v4204_v1 = vld [vmem:[%s17119_s1 + $0xb8] sm:$0xff] }
 0x87c   :  { %v4153_v30 = vmul.f32 1.442695, %v4103_v29 }
 0x87e   :  { %9701 = vpow2.f32 %v4153_v30 }
 0x881   :  { %v4060_v6 = vpop.permute.xlu1 %4059 }
 0x882   :  { %v4104_v18 = vmul.f32 0.5, %v4060_v6 }
 0x883   :  { %4405 = vmatmul.bf16.gmra.mxu3 %v4285_v45 }
 0x884   :  { %v4155_v14 = vmul.f32 1.442695, %v4104_v18  ;;  %v9702_v13 = vpop.eup %9701 }
 0x885   :  { %v4231_v38 = vmul.f32 %v9702_v13, %v4199_v47 }
 0x886   :  { %9703 = vpow2.f32 %v4155_v14  ;;  %v13896_v2 = vpop.f32.mrf.mxu3 }
 0x887   :  { %v4263_v59 = vadd.f32 %v4231_v38, %v13707_v15  ;;  %9705 = vpow2.f32 %v4157_v32  ;;  %v4202_v15 = vld [vmem:[%s17119_s1 + $0xa8] sm:$0xff]  ;;  %v9522_v32 = vld [vmem:[#allocation7 + $0x64] sm:$0xf] }
 0x889   :  { %v4068_v61 = vpop.permute.xlu2 %4067 }
 0x88a   :  { %v4108_v25 = vmul.f32 0.5, %v4068_v61 }
 0x88c   :  { %v9704_v5 = vpop.eup %9703  ;;  %v4163_v22 = vmul.f32 1.442695, %v4108_v25 }
 0x88d   :  { %v4232_v40 = vmul.f32 %v9704_v5, %v4200_v62  ;;  %v9706_v53 = vpop.eup %9705 }
 0x88e   :  { %v13904_v41 = vpop.f32.mrf.mxu3  ;;  %v4233_v63 = vmul.f32 %v9706_v53, %v4201_v0 }
 0x88f   :  { %v4264_v54 = vadd.f32 %v4232_v40, %v13722_v28  ;;  %v9524_v28 = vld [vmem:[#allocation7 + $0x74] sm:$0xf]  ;;  %v4205_v40 = vld [vmem:[%s17119_s1 + $0xc0] sm:$0xff] }
 0x890   :  { %v8997_v44 = vor.u32 %v9524_v28, %v8994_v43  ;;  %v4265_v39 = vadd.f32 %v4233_v63, %v13733_v33 }
 0x891   :  { %v4064_v27 = vpop.permute.xlu0 %4063  ;;  %v4286_v10 = vpack.c.bf16 %v4264_v54, %v4263_v59  ;;  %v8986_v59 = vld [vmem:[#allocation7 + $0x68] sm:$0xf0] }
 0x892   :  { %v4106_v31 = vmul.f32 0.5, %v4064_v27  ;;  %4876 = vmatpush.bf16.msra.mxu1 %v8997_v44  ;;  %v8989_v27 = vor.u32 %v9522_v32, %v8986_v59 }
 0x893   :  { %4410 = vmatmul.bf16.gmra.mxu3 %v4286_v10  ;;  %v8984_v10 = vld [vmem:[#allocation7 + $0x60] sm:$0xf] }
 0x894   :  { %v4159_v48 = vmul.f32 1.442695, %v4106_v31  ;;  %v9523_v31 = vld [vmem:[#allocation7 + $0x64] sm:$0xf0] }
 0x895   :  { %v8985_v53 = vor.u32 %v9523_v31, %v8984_v10 }
 0x896   :  { %9707 = vpow2.f32 %v4159_v48  ;;  %v13908_v4 = vpop.f32.mrf.mxu3  ;;  %4877 = vmatpush.bf16.msra.mxu1 %v8989_v27 }
 0x897   :  { %4788 = vmatpush.bf16.msra.mxu0 %v8985_v53  ;;  %v4211_v53 = vld [vmem:[%s17119_s1 + $0xf0] sm:$0xff] }
 0x899   :  { %v4066_v7 = vpop.permute.xlu1 %4065 }
 0x89a   :  { %v4107_v58 = vmul.f32 0.5, %v4066_v7 }
 0x89c   :  { %v9708_v36 = vpop.eup %9707  ;;  %v4161_v23 = vmul.f32 1.442695, %v4107_v58 }
 0x89d   :  { %v4234_v20 = vmul.f32 %v9708_v36, %v4202_v15  ;;  %v4207_v36 = vld [vmem:[%s17119_s1 + $0xd0] sm:$0xff] }
 0x89e   :  { %v13916_v19 = vpop.f32.mrf.mxu3  ;;  %9709 = vpow2.f32 %v4161_v23 }
 0x89f   :  { %v4266_v57 = vadd.f32 %v4234_v20, %v13748_v8  ;;  %9711 = vpow2.f32 %v4163_v22 }
 0x8a1   :  { %v4287_v11 = vpack.c.bf16 %v4266_v57, %v4265_v39  ;;  %v4074_v62 = vpop.permute.xlu2 %4073 }
 0x8a3   :  { %4415 = vmatmul.bf16.gmra.mxu3 %v4287_v11 }
 0x8a4   :  { %v9710_v37 = vpop.eup %9709 }
 0x8a5   :  { %v9712_v12 = vpop.eup %9711  ;;  %v4235_v56 = vmul.f32 %v9710_v37, %v4203_v60 }
 0x8a6   :  { %v13920_v29 = vpop.f32.mrf.mxu3  ;;  %v4236_v8 = vmul.f32 %v9712_v12, %v4204_v1 }
 0x8a7   :  { %v4267_v18 = vadd.f32 %v4235_v56, %v13759_v52  ;;  %v4111_v52 = vmul.f32 0.5, %v4074_v62  ;;  %v4209_v56 = vld [vmem:[%s17119_s1 + $0xe0] sm:$0xff] }
 0x8a8   :  { %v4268_v14 = vadd.f32 %v4236_v8, %v13774_v42  ;;  %v4206_v42 = vld [vmem:[%s17119_s1 + $0xc8] sm:$0xff] }
 0x8a9   :  { %v4070_v30 = vpop.permute.xlu0 %4069  ;;  %v4169_v0 = vmul.f32 1.442695, %v4111_v52 }
 0x8aa   :  { %v4109_v33 = vmul.f32 0.5, %v4070_v30  ;;  %v4288_v47 = vpack.c.bf16 %v4268_v14, %v4267_v18 }
 0x8ac   :  { %v4165_v6 = vmul.f32 1.442695, %v4109_v33 }
 0x8ae   :  { %v13929_v45 = vpop.f32.mrf.mxu3  ;;  %9713 = vpow2.f32 %v4165_v6  ;;  %v4210_v6 = vld [vmem:[%s17119_s1 + $0xe8] sm:$0xff] }
 0x8b1   :  { %v4072_v51 = vpop.permute.xlu1 %4071 }
 0x8b2   :  { %v4110_v13 = vmul.f32 0.5, %v4072_v51  ;;  %v8978_v51 = vld [vmem:[#allocation7 + $0x58] sm:$0xf0] }
 0x8b3   :  { %4420 = vmatmul.bf16.gmra.mxu3 %v4288_v47  ;;  %v8976_v47 = vld [vmem:[#allocation7 + $0x50] sm:$0xf] }
 0x8b4   :  { %v4167_v34 = vmul.f32 1.442695, %v4110_v13  ;;  %v9714_v5 = vpop.eup %9713 }
 0x8b5   :  { %v4237_v54 = vmul.f32 %v9714_v5, %v4205_v40 }
 0x8b6   :  { %9715 = vpow2.f32 %v4167_v34  ;;  %v13932_v38 = vpop.f32.mrf.mxu3  ;;  %v9521_v34 = vld [vmem:[#allocation7 + $0x54] sm:$0xf0] }
 0x8b7   :  { %v4269_v58 = vadd.f32 %v4237_v54, %v13785_v50  ;;  %9717 = vpow2.f32 %v4169_v0  ;;  %v4208_v50 = vld [vmem:[%s17119_s1 + $0xd8] sm:$0xff]  ;;  %v8977_v5 = vor.u32 %v9521_v34, %v8976_v47  ;;  %v4486_v47 = vmul.f32 %v13896_v2, %v13896_v2 }
 0x8b8   :  { %v4448_v34 = vadd.f32 %v13904_v41, %v13896_v2 }
 0x8b9   :  { %v4080_v16 = vpop.permute.xlu2 %4079  ;;  %4789 = vmatpush.bf16.msra.mxu0 %v8977_v5 }
 0x8ba   :  { %v4449_v5 = vadd.f32 %v4448_v34, %v13908_v4  ;;  %v8946_v34 = vld [vmem:[#allocation7 + $0x18] sm:$0xf0] }
 0x8bc   :  { %v9716_v48 = vpop.eup %9715 }
 0x8bd   :  { %v4238_v61 = vmul.f32 %v9716_v48, %v4206_v42  ;;  %v9718_v35 = vpop.eup %9717 }
 0x8be   :  { %v13940_v7 = vpop.f32.mrf.mxu3  ;;  %v4239_v20 = vmul.f32 %v9718_v35, %v4207_v36  ;;  %v8970_v35 = vld [vmem:[#allocation7 + $0x48] sm:$0xf0] }
 0x8bf   :  { %v4270_v15 = vadd.f32 %v4238_v61, %v13800_v3  ;;  %v4114_v3 = vmul.f32 0.5, %v4080_v16  ;;  %v8968_v16 = vld [vmem:[#allocation7 + $0x40] sm:$0xf] }
 0x8c0   :  { %v4271_v60 = vadd.f32 %v4239_v20, %v13811_v26 }
 0x8c1   :  { %v4076_v28 = vpop.permute.xlu0 %4075  ;;  %v4289_v43 = vpack.c.bf16 %v4270_v15, %v4269_v58  ;;  %v4175_v11 = vmul.f32 1.442695, %v4114_v3 }
 0x8c2   :  { %v4112_v25 = vmul.f32 0.5, %v4076_v28 }
 0x8c3   :  { %4425 = vmatmul.bf16.gmra.mxu3 %v4289_v43 }
 0x8c4   :  { %v4171_v63 = vmul.f32 1.442695, %v4112_v25 }
 0x8c6   :  { %9719 = vpow2.f32 %v4171_v63  ;;  %v13944_v44 = vpop.f32.mrf.mxu3  ;;  %v9518_v63 = vld [vmem:[#allocation7 + $0x44] sm:$0xf] }
 0x8c7   :  { %v8973_v36 = vor.u32 %v9518_v63, %v8970_v35 }
 0x8c9   :  { %v4078_v49 = vpop.permute.xlu1 %4077 }
 0x8ca   :  { %v4113_v23 = vmul.f32 0.5, %v4078_v49  ;;  %v9519_v49 = vld [vmem:[#allocation7 + $0x44] sm:$0xf0] }
 0x8cc   :  { %v9720_v22 = vpop.eup %9719  ;;  %v4173_v39 = vmul.f32 1.442695, %v4113_v23  ;;  %v8969_v23 = vor.u32 %v9519_v49, %v8968_v16  ;;  %v4494_v16 = vmul.f32 %v13944_v44, %v13944_v44 }
 0x8cd   :  { %v4240_v57 = vmul.f32 %v9720_v22, %v4208_v50  ;;  %v8962_v22 = vld [vmem:[#allocation7 + $0x38] sm:$0xf0] }
 0x8ce   :  { %v13952_v37 = vpop.f32.mrf.mxu3  ;;  %9721 = vpow2.f32 %v4173_v39  ;;  %4790 = vmatpush.bf16.msra.mxu0 %v8969_v23  ;;  %v8960_v39 = vld [vmem:[#allocation7 + $0x30] sm:$0xf] }
 0x8cf   :  { %v4272_v12 = vadd.f32 %v4240_v57, %v13826_v24  ;;  %9723 = vpow2.f32 %v4175_v11  ;;  %v9520_v24 = vld [vmem:[#allocation7 + $0x54] sm:$0xf]  ;;  %v9517_v11 = vld [vmem:[#allocation7 + $0x34] sm:$0xf0]  ;;  %v4495_v23 = vmul.f32 %v13952_v37, %v13952_v37 }
 0x8d0   :  { %v8981_v13 = vor.u32 %v9520_v24, %v8978_v51 }
 0x8d1   :  { %v4290_v30 = vpack.c.bf16 %v4272_v12, %v4271_v60  ;;  %v8961_v60 = vor.u32 %v9517_v11, %v8960_v39 }
 0x8d2   :  { %4878 = vmatpush.bf16.msra.mxu1 %v8981_v13  ;;  %v4487_v13 = vmul.f32 %v13904_v41, %v13904_v41 }
 0x8d3   :  { %4430 = vmatmul.bf16.gmra.mxu3 %v4290_v30  ;;  %4791 = vmatpush.bf16.msra.mxu0 %v8961_v60 }
 0x8d4   :  { %v9722_v1 = vpop.eup %9721 }
 0x8d5   :  { %v9724_v8 = vpop.eup %9723  ;;  %v4241_v14 = vmul.f32 %v9722_v1, %v4209_v56 }
 0x8d6   :  { %v13956_v33 = vpop.f32.mrf.mxu3  ;;  %v4242_v62 = vmul.f32 %v9724_v8, %v4210_v6  ;;  %4879 = vmatpush.bf16.msra.mxu1 %v8973_v36  ;;  %v9514_v8 = vld [vmem:[#allocation7 + $0x24] sm:$0xf]  ;;  %v8954_v6 = vld [vmem:[#allocation7 + $0x28] sm:$0xf0] }
 0x8d7   :  { %v4273_v52 = vadd.f32 %v4241_v14, %v13837_v21  ;;  %v4212_v21 = vld [vmem:[%s17119_s1 + $0xf8] sm:$0xff]  ;;  %v9515_v14 = vld [vmem:[#allocation7 + $0x24] sm:$0xf0]  ;;  %v4496_v39 = vmul.f32 %v13956_v33, %v13956_v33 }
 0x8d8   :  { %v4274_v32 = vadd.f32 %v4242_v62, %v13852_v9  ;;  %v4488_v62 = vmul.f32 %v13908_v4, %v13908_v4 }
 0x8d9   :  { %v4082_v18 = vpop.permute.xlu0 %4081 }
 0x8da   :  { %v4115_v26 = vmul.f32 0.5, %v4082_v18  ;;  %v4291_v27 = vpack.c.bf16 %v4274_v32, %v4273_v52  ;;  %v8952_v18 = vld [vmem:[#allocation7 + $0x20] sm:$0xf]  ;;  %v4489_v52 = vmul.f32 %v13916_v19, %v13916_v19 }
 0x8db   :  { %v8953_v24 = vor.u32 %v9515_v14, %v8952_v18 }
 0x8dc   :  { %v4177_v40 = vmul.f32 1.442695, %v4115_v26  ;;  %v8957_v26 = vor.u32 %v9514_v8, %v8954_v6 }
 0x8dd   :  { %4792 = vmatpush.bf16.msra.mxu0 %v8953_v24 }
 0x8de   :  { %v13965_v42 = vpop.f32.mrf.mxu3  ;;  %9725 = vpow2.f32 %v4177_v40  ;;  %v4518_v40 = vadd.f32 %v4487_v13, %v4486_v47  ;;  %v9512_v47 = vld [vmem:[#allocation7 + $0x14] sm:$0xf] }
 0x8df   :  { %v4497_v60 = vmul.f32 %v13965_v42, %v13965_v42 }
 0x8e1   :  { %v4084_v59 = vpop.permute.xlu1 %4083 }
 0x8e2   :  { %v4116_v54 = vmul.f32 0.5, %v4084_v59  ;;  %v4519_v59 = vadd.f32 %v4518_v40, %v4488_v62  ;;  %v8944_v62 = vld [vmem:[#allocation7 + $0x10] sm:$0xf]  ;;  %v9513_v40 = vld [vmem:[#allocation7 + $0x14] sm:$0xf0] }
 0x8e3   :  { %4435 = vmatmul.bf16.gmra.mxu3 %v4291_v27  ;;  %v4490_v27 = vmul.f32 %v13920_v29, %v13920_v29 }
 0x8e4   :  { %v4179_v10 = vmul.f32 1.442695, %v4116_v54  ;;  %v9726_v48 = vpop.eup %9725  ;;  %v4450_v54 = vadd.f32 %v4449_v5, %v13916_v19  ;;  %v8949_v5 = vor.u32 %v9512_v47, %v8946_v34 }
 0x8e5   :  { %v4243_v61 = vmul.f32 %v9726_v48, %v4211_v53  ;;  %v4520_v48 = vadd.f32 %v4519_v59, %v4489_v52  ;;  %v4491_v53 = vmul.f32 %v13929_v45, %v13929_v45 }
 0x8e6   :  { %9727 = vpow2.f32 %v4179_v10  ;;  %v13968_v31 = vpop.f32.mrf.mxu3  ;;  %v4451_v10 = vadd.f32 %v4450_v54, %v13920_v29 }
 0x8e7   :  { %v4275_v15 = vadd.f32 %v4243_v61, %v13863_v55 }
 0x8e8   :  { %v4452_v61 = vadd.f32 %v4451_v10, %v13929_v45 }
 0x8ec   :  { %v9728_v9 = vpop.eup %9727 }
 0x8ed   :  { %v4244_v0 = vmul.f32 %v9728_v9, %v4212_v21  ;;  %v4521_v21 = vadd.f32 %v4520_v48, %v4490_v27  ;;  %v4492_v9 = vmul.f32 %v13932_v38, %v13932_v38  ;;  %v8945_v27 = vor.u32 %v9513_v40, %v8944_v62 }
 0x8ee   :  { %v13976_v58 = vpop.f32.mrf.mxu3 }
 0x8ef   :  { %v4276_v28 = vadd.f32 %v4244_v0, %v13878_v46  ;;  %v9516_v46 = vld [vmem:[#allocation7 + $0x34] sm:$0xf]  ;;  %v4453_v0 = vadd.f32 %v4452_v61, %v13932_v38  ;;  %v4499_v13 = vmul.f32 %v13976_v58, %v13976_v58  ;;  %4793 = vmatpush.bf16.msra.mxu0 %v8945_v27 }
 0x8f0   :  { %v8965_v57 = vor.u32 %v9516_v46, %v8962_v22 }
 0x8f1   :  { %v4292_v43 = vpack.c.bf16 %v4276_v28, %v4275_v15  ;;  %v4522_v15 = vadd.f32 %v4521_v21, %v4491_v53  ;;  %v4493_v28 = vmul.f32 %v13940_v7, %v13940_v7  ;;  %v4454_v35 = vadd.f32 %v4453_v0, %v13940_v7 }
 0x8f2   :  { %4880 = vmatpush.bf16.msra.mxu1 %v8965_v57 }
 0x8f3   :  { %4440 = vmatmul.bf16.gmra.mxu3 %v4292_v43  ;;  %v4523_v63 = vadd.f32 %v4522_v15, %v4492_v9  ;;  %v4455_v36 = vadd.f32 %v4454_v35, %v13944_v44 }
 0x8f5   :  { %v4524_v49 = vadd.f32 %v4523_v63, %v4493_v28  ;;  %v4456_v22 = vadd.f32 %v4455_v36, %v13952_v37 }
 0x8f6   :  { %v13980_v25 = vpop.f32.mrf.mxu3  ;;  %4881 = vmatpush.bf16.msra.mxu1 %v8957_v26  ;;  %v4498_v26 = vmul.f32 %v13968_v31, %v13968_v31 }
 0x8f7   :  { %v4525_v46 = vadd.f32 %v4524_v49, %v4494_v16  ;;  %v4457_v57 = vadd.f32 %v4456_v22, %v13956_v33  ;;  %v4500_v54 = vmul.f32 %v13980_v25, %v13980_v25 }
 0x8f9   :  { %v4526_v11 = vadd.f32 %v4525_v46, %v4495_v23  ;;  %v4458_v18 = vadd.f32 %v4457_v57, %v13965_v42 }
 0x8fa   :  { %4882 = vmatpush.bf16.msra.mxu1 %v8949_v5 }
 0x8fb   :  { %v4527_v6 = vadd.f32 %v4526_v11, %v4496_v39  ;;  %v4459_v14 = vadd.f32 %v4458_v18, %v13968_v31 }
 0x8fd   :  { %v4528_v24 = vadd.f32 %v4527_v6, %v4497_v60  ;;  %v4460_v59 = vadd.f32 %v4459_v14, %v13976_v58 }
 0x8fe   :  { %v13982_v50 = vpop.f32.mrf.mxu3 }
 0x8ff   :  { %v4529_v52 = vadd.f32 %v4528_v24, %v4498_v26  ;;  %v4461_v10 = vadd.f32 %v4460_v59, %v13980_v25  ;;  %v4501_v53 = vmul.f32 %v13982_v50, %v13982_v50 }
 0x901   :  { %v4530_v48 = vadd.f32 %v4529_v52, %v4499_v13  ;;  %v4462_v9 = vadd.f32 %v4461_v10, %v13982_v50 }
 0x903   :  { %v4531_v61 = vadd.f32 %v4530_v48, %v4500_v54 }
 0x905   :  { %v4532_v28 = vadd.f32 %v4531_v61, %v4501_v53 }
 0x906   :  { %v13984_v3 = vpop.f32.mrf.mxu3 }
 0x907   :  { %v4502_v0 = vmul.f32 %v13984_v3, %v13984_v3  ;;  %v4463_v15 = vadd.f32 %v4462_v9, %v13984_v3 }
 0x909   :  { %v4533_v35 = vadd.f32 %v4532_v28, %v4502_v0 }
 0x90e   :  { %v13986_v20 = vpop.f32.mrf.mxu3 }
 0x90f   :  { %v4503_v63 = vmul.f32 %v13986_v20, %v13986_v20  ;;  %v4464_v16 = vadd.f32 %v4463_v15, %v13986_v20 }
 0x911   :  { %v4534_v23 = vadd.f32 %v4533_v35, %v4503_v63 }
 0x916   :  { %v13988_v55 = vpop.f32.mrf.mxu3 }
 0x917   :  { %v4504_v36 = vmul.f32 %v13988_v55, %v13988_v55  ;;  %v4465_v49 = vadd.f32 %v4464_v16, %v13988_v55 }
 0x919   :  { %v4535_v39 = vadd.f32 %v4534_v23, %v4504_v36 }
 0x91e   :  { %v13990_v12 = vpop.f32.mrf.mxu3 }
 0x91f   :  { %v4505_v46 = vmul.f32 %v13990_v12, %v13990_v12  ;;  %v4466_v57 = vadd.f32 %v4465_v49, %v13990_v12 }
 0x921   :  { %v4536_v6 = vadd.f32 %v4535_v39, %v4505_v46 }
 0x926   :  { %v13992_v30 = vpop.f32.mrf.mxu3 }
 0x927   :  { %v4506_v11 = vmul.f32 %v13992_v30, %v13992_v30  ;;  %v4467_v60 = vadd.f32 %v4466_v57, %v13992_v30 }
 0x929   :  { %v4537_v26 = vadd.f32 %v4536_v6, %v4506_v11 }
 0x92e   :  { %v13994_v1 = vpop.f32.mrf.mxu3 }
 0x92f   :  { %v4507_v18 = vmul.f32 %v13994_v1, %v13994_v1  ;;  %v4468_v14 = vadd.f32 %v4467_v60, %v13994_v1 }
 0x931   :  { %v4538_v47 = vadd.f32 %v4537_v26, %v4507_v18 }
 0x936   :  { %v13996_v56 = vpop.f32.mrf.mxu3 }
 0x937   :  { %v4508_v24 = vmul.f32 %v13996_v56, %v13996_v56  ;;  %v4469_v13 = vadd.f32 %v4468_v14, %v13996_v56 }
 0x939   :  { %v4539_v5 = vadd.f32 %v4538_v47, %v4508_v24 }
 0x93e   :  { %v13998_v51 = vpop.f32.mrf.mxu3 }
 0x93f   :  { %v4509_v34 = vmul.f32 %v13998_v51, %v13998_v51  ;;  %v4470_v40 = vadd.f32 %v4469_v13, %v13998_v51 }
 0x941   :  { %v4540_v54 = vadd.f32 %v4539_v5, %v4509_v34 }
 0x946   :  { %v14011_v32 = vpop.f32.mrf.mxu3 }
 0x947   :  { %v4510_v52 = vmul.f32 %v14011_v32, %v14011_v32  ;;  %v4471_v59 = vadd.f32 %v4470_v40, %v14011_v32 }
 0x949   :  { %v4541_v10 = vadd.f32 %v4540_v54, %v4510_v52 }
 0x94e   :  { %v14025_v43 = vpop.f32.mrf.mxu3 }
 0x94f   :  { %v4511_v27 = vmul.f32 %v14025_v43, %v14025_v43  ;;  %v4472_v48 = vadd.f32 %v4471_v59, %v14025_v43 }
 0x951   :  { %v4542_v9 = vadd.f32 %v4541_v10, %v4511_v27 }
 0x956   :  { %v14039_v8 = vpop.f32.mrf.mxu3 }
 0x957   :  { %v4512_v53 = vmul.f32 %v14039_v8, %v14039_v8  ;;  %v4473_v61 = vadd.f32 %v4472_v48, %v14039_v8 }
 0x959   :  { %v4543_v28 = vadd.f32 %v4542_v9, %v4512_v53 }
 0x95e   :  { %v14053_v21 = vpop.f32.mrf.mxu3 }
 0x95f   :  { %v4513_v0 = vmul.f32 %v14053_v21, %v14053_v21  ;;  %v4474_v63 = vadd.f32 %v4473_v61, %v14053_v21 }
 0x961   :  { %v4544_v36 = vadd.f32 %v4543_v28, %v4513_v0 }
 0x966   :  { %v14067_v22 = vpop.f32.mrf.mxu3 }
 0x967   :  { %v4514_v35 = vmul.f32 %v14067_v22, %v14067_v22  ;;  %v4475_v16 = vadd.f32 %v4474_v63, %v14067_v22 }
 0x969   :  { %v4545_v23 = vadd.f32 %v4544_v36, %v4514_v35  ;;  %v9510_v35 = vld [vmem:[#allocation7 + $0x4] sm:$0xf] }
 0x96e   :  { %v14081_v62 = vpop.f32.mrf.mxu3 }
 0x96f   :  { %v4515_v49 = vmul.f32 %v14081_v62, %v14081_v62  ;;  %v4476_v46 = vadd.f32 %v4475_v16, %v14081_v62  ;;  %v8938_v16 = vld [vmem:[#allocation7 + $0x8] sm:$0xf0] }
 0x970   :  { %v8941_v36 = vor.u32 %v9510_v35, %v8938_v16 }
 0x971   :  { %v4546_v11 = vadd.f32 %v4545_v23, %v4515_v49  ;;  %v8936_v49 = vld [vmem:[#allocation7] sm:$0xf]  ;;  %v9511_v23 = vld [vmem:[#allocation7 + $0x4] sm:$0xf0] }
 0x972   :  { %4883 = vmatpush.bf16.msra.mxu1 %v8941_v36 }
 0x976   :  { %v14095_v15 = vpop.f32.mrf.mxu3 }
 0x977   :  { %v4516_v39 = vmul.f32 %v14095_v15, %v14095_v15  ;;  %v4477_v57 = vadd.f32 %v4476_v46, %v14095_v15 }
 0x979   :  { %v4547_v6 = vadd.f32 %v4546_v11, %v4516_v39  ;;  %v8937_v39 = vor.u32 %v9511_v23, %v8936_v49 }
 0x97b   :  { %4794 = vmatpush.bf16.msra.mxu0 %v8937_v39 }
 0x97e   :  { %v4443_v60 = vpop.f32.mrf.mxu3 }
 0x97f   :  { %v4478_v18 = vadd.f32 %v4477_v57, %v4443_v60  ;;  %v4517_v26 = vmul.f32 %v4443_v60, %v4443_v60 }
 0x981   :  { %v4479_v14 = vrot.slane %v4478_v18, 4  ;;  %v4548_v24 = vadd.f32 %v4547_v6, %v4517_v26  ;;  %v4446_v26 = vld [vmem:[#allocation2 + $0xf] sm:$0x1] }
 0x983   :  { %v4480_v13 = vadd.f32 %v4479_v14, %v4478_v18  ;;  %v4549_v47 = vrot.slane %v4548_v24, 4 }
 0x985   :  { %v4481_v34 = vrot.slane %v4480_v13, 2  ;;  %v4550_v5 = vadd.f32 %v4549_v47, %v4548_v24  ;;  %v4447_v47 = vld [vmem:[#allocation2 + $0x10] sm:$0x1] }
 0x987   :  { %v4482_v40 = vadd.f32 %v4481_v34, %v4480_v13  ;;  %v4551_v52 = vrot.slane %v4550_v5, 2 }
 0x989   :  { %v4483_v59 = vrot.slane %v4482_v40, 1  ;;  %v4552_v54 = vadd.f32 %v4551_v52, %v4550_v5 }
 0x98b   :  { %v4484_v27 = vadd.f32 %v4483_v59, %v4482_v40  ;;  %v4553_v10 = vrot.slane %v4552_v54, 1 }
 0x98d   :  { %v4485_v48 = vmul.f32 %v4484_v27, %v18038_v17  ;;  %v4554_v53 = vadd.f32 %v4553_v10, %v4552_v54 }
 0x98f   :  { %v4555_v61 = vmul.f32 %v4554_v53, %v18038_v17  ;;  %v4556_v9 = vmul.f32 %v4485_v48, %v4485_v48 }
 0x991   :  { %v4557_v0 = vsub.f32 %v4555_v61, %v4556_v9 }
 0x993   :  { %v4558_v28 = vmax.f32 %v4557_v0, 0.0 }
 0x995   :  { %v4559_v63 = vadd.f32 1e-05, %v4558_v28 }
 0x997   :  { %9729 = vrsqrt.f32 %v4559_v63  ;;  %vm4566_vm10 = vweird.f32 %v4559_v63 }
 0x99d   :  { %v9730_v46 = vpop.eup %9729 }
 0x99e   :  { %v4561_v57 = vmul.f32 %v9730_v46, %v4559_v63  ;;  %vm4567_vm9 = vweird.f32 %v9730_v46 }
 0x99f   :  { %vm4568_vm12 = vmor %vm4566_vm10, %vm4567_vm9 }
 0x9a0   :  { %v4562_v11 = vmul.f32 %v9730_v46, %v4561_v57 }
 0x9a2   :  { %v4563_v6 = vmul.f32 0.5, %v4562_v11 }
 0x9a4   :  { %v4564_v18 = vsub.f32 1.5, %v4563_v6 }
 0x9a6   :  { %v4565_v14 = vmul.f32 %v9730_v46, %v4564_v18 }
 0x9a8   :  { %v4569_v24 = vsel %vm4568_vm12, %v9730_v46, %v4565_v14 }
 0x9a9   :  { %v4570_v13 = vmul.f32 %v4569_v24, %v4446_v26 }
 0x9ab   :  { %v4571_v34 = vmul.f32 %v4570_v13, %v4485_v48  ;;  %v14109_v40 = vperm.slane %v4570_v13, 0 }
 0x9ad   :  { %v4572_v5 = vsub.f32 %v4447_v47, %v4571_v34  ;;  %v14112_v52 = vmul.f32 %v14109_v40, %v4443_v60  ;;  %v4576_v54 = vmul.f32 %v14109_v40, %v13896_v2  ;;  %v4577_v27 = vmul.f32 %v14109_v40, %v13904_v41 }
 0x9ae   :  { %v4578_v10 = vmul.f32 %v14109_v40, %v13908_v4  ;;  %v4579_v48 = vmul.f32 %v14109_v40, %v13916_v19  ;;  %v4584_v53 = vmul.f32 %v14109_v40, %v13944_v44  ;;  %v4585_v60 = vmul.f32 %v14109_v40, %v13952_v37 }
 0x9af   :  { %v14114_v59 = vperm.slane %v4572_v5, 0  ;;  %v4586_v61 = vmul.f32 %v14109_v40, %v13956_v33  ;;  %v4588_v2 = vmul.f32 %v14109_v40, %v13968_v31  ;;  %v4590_v41 = vmul.f32 %v14109_v40, %v13980_v25 }
 0x9b0   :  { %v4592_v4 = vmul.f32 %v14109_v40, %v13984_v3  ;;  %v4594_v19 = vmul.f32 %v14109_v40, %v13988_v55  ;;  %v4596_v44 = vmul.f32 %v14109_v40, %v13992_v30  ;;  %v4598_v37 = vmul.f32 %v14109_v40, %v13996_v56 }
 0x9b1   :  { %v4600_v33 = vmul.f32 %v14109_v40, %v14011_v32  ;;  %v4606_v31 = vmul.f32 %v14109_v40, %v14095_v15  ;;  %v4611_v25 = vadd.f32 %v14114_v59, %v4576_v54  ;;  %v4602_v3 = vmul.f32 %v14109_v40, %v14039_v8 }
 0x9b2   :  { %v4604_v55 = vmul.f32 %v14109_v40, %v14067_v22  ;;  %v4612_v9 = vadd.f32 %v14114_v59, %v4577_v27  ;;  %v4619_v30 = vadd.f32 %v14114_v59, %v4584_v53  ;;  %v4621_v56 = vadd.f32 %v14114_v59, %v4586_v61 }
 0x9b3   :  { %v4623_v0 = vadd.f32 %v14114_v59, %v4588_v2  ;;  %v4625_v32 = vadd.f32 %v14114_v59, %v4590_v41  ;;  %v4627_v15 = vadd.f32 %v14114_v59, %v4592_v4  ;;  %v4629_v28 = vadd.f32 %v14114_v59, %v4594_v19 }
 0x9b4   :  { %v4631_v63 = vadd.f32 %v14114_v59, %v4596_v44  ;;  %v4633_v8 = vadd.f32 %v14114_v59, %v4598_v37  ;;  %v14161_v22 = vadd.f32 %v14114_v59, %v4600_v33  ;;  %v14164_v35 = vadd.f32 %v14114_v59, %v4602_v3 }
 0x9b5   :  { %v14167_v16 = vadd.f32 %v14114_v59, %v4604_v55  ;;  %v14170_v36 = vadd.f32 %v14114_v59, %v4606_v31  ;;  %v4643_v49 = vmax.f32 %v4611_v25, 0.0  ;;  %v4587_v23 = vmul.f32 %v14109_v40, %v13965_v42 }
 0x9b6   :  { %v4589_v46 = vmul.f32 %v14109_v40, %v13976_v58  ;;  %v4591_v39 = vmul.f32 %v14109_v40, %v13982_v50  ;;  %v4644_v57 = vmax.f32 %v4612_v9, 0.0  ;;  %v4593_v11 = vmul.f32 %v14109_v40, %v13986_v20 }
 0x9b7   :  { %v4595_v6 = vmul.f32 %v14109_v40, %v13990_v12  ;;  %v4597_v18 = vmul.f32 %v14109_v40, %v13994_v1  ;;  %v4620_v26 = vadd.f32 %v14114_v59, %v4585_v60  ;;  %v4599_v42 = vmul.f32 %v14109_v40, %v13998_v51 }
 0x9b8   :  { %v4601_v58 = vmul.f32 %v14109_v40, %v14025_v43  ;;  %v4675_v14 = vpack.c.bf16 %v4644_v57, %v4643_v49  ;;  %v4651_v50 = vmax.f32 %v4619_v30, 0.0  ;;  %v4603_v24 = vmul.f32 %v14109_v40, %v14053_v21 }
 0x9b9   :  { %v4652_v20 = vmax.f32 %v4620_v26, 0.0  ;;  %v4622_v13 = vadd.f32 %v14114_v59, %v4587_v23  ;;  %v4653_v12 = vmax.f32 %v4621_v56, 0.0  ;;  %v4605_v1 = vmul.f32 %v14109_v40, %v14081_v62 }
 0x9ba   :  { %v4613_v47 = vadd.f32 %v14114_v59, %v4578_v10  ;;  %4795 = vmatmul.bf16.vlgmr.msra.gmra.mxu0 %v4675_v14  ;;  %4884 = vmatmul.bf16.vlgmr.msra.gmra.mxu1 %v4675_v14  ;;  %v4624_v51 = vadd.f32 %v14114_v59, %v4589_v46  ;;  %v4655_v34 = vmax.f32 %v4623_v0, 0.0  ;;  %v4614_v43 = vadd.f32 %v14114_v59, %v4579_v48 }
 0x9bb   :  { %v14197_v5 = vpack.c.bf16 %v4652_v20, %v4651_v50  ;;  %v4654_v54 = vmax.f32 %v4622_v13, 0.0  ;;  %v4626_v21 = vadd.f32 %v14114_v59, %v4591_v39  ;;  %v4657_v53 = vmax.f32 %v4625_v32, 0.0 }
 0x9bc   :  { %v4656_v27 = vmax.f32 %v4624_v51, 0.0  ;;  %v4628_v60 = vadd.f32 %v14114_v59, %v4593_v11  ;;  %v4659_v61 = vmax.f32 %v4627_v15, 0.0  ;;  %v4630_v10 = vadd.f32 %v14114_v59, %v4595_v6 }
 0x9bd   :  { %v4680_v62 = vpack.c.bf16 %v4654_v54, %v4653_v12  ;;  %v4658_v2 = vmax.f32 %v4626_v21, 0.0  ;;  %v4661_v41 = vmax.f32 %v4629_v28, 0.0  ;;  %v4632_v44 = vadd.f32 %v14114_v59, %v4597_v18 }
 0x9be   :  { %v4681_v4 = vpack.c.bf16 %v4656_v27, %v4655_v34  ;;  %v4660_v19 = vmax.f32 %v4628_v60, 0.0  ;;  %v4663_v48 = vmax.f32 %v4631_v63, 0.0  ;;  %v4662_v33 = vmax.f32 %v4630_v10, 0.0  ;;  %v9112_v27 = vld [vmem:[%s17127_s9 + $0xe0] sm:$0xf] }
 0x9bf   :  { %v4682_v37 = vpack.c.bf16 %v4658_v2, %v4657_v53  ;;  %v4634_v31 = vadd.f32 %v14114_v59, %v4599_v42  ;;  %v4665_v25 = vmax.f32 %v4633_v8, 0.0  ;;  %v4664_v55 = vmax.f32 %v4632_v44, 0.0  ;;  %v9556_v53 = vld [vmem:[%s17127_s9 + $0xec] sm:$0xf0]  ;;  %v9240_v60 = vld [vmem:[%s17127_s9 + $0x1e0] sm:$0xf] }
 0x9c0   :  { %v4683_v3 = vpack.c.bf16 %v4660_v19, %v4659_v61  ;;  %v4636_v9 = vadd.f32 %v14114_v59, %v4601_v58  ;;  %v4667_v30 = vmax.f32 %v14161_v22, 0.0  ;;  %v4684_v56 = vpack.c.bf16 %v4662_v33, %v4661_v41  ;;  %v9554_v2 = vld [vmem:[%s17127_s9 + $0xe4] sm:$0xf]  ;;  %v9114_v10 = vld [vmem:[%s17127_s9 + $0xf0] sm:$0xf0] }
 0x9c1   :  { %v4666_v0 = vmax.f32 %v4634_v31, 0.0  ;;  %v4638_v32 = vadd.f32 %v14114_v59, %v4603_v24  ;;  %v4669_v15 = vmax.f32 %v14164_v35, 0.0  ;;  %v14208_v28 = vpack.c.bf16 %v4664_v55, %v4663_v48  ;;  %v9586_v19 = vld [vmem:[%s17127_s9 + $0x1e4] sm:$0xf]  ;;  %v9242_v44 = vld [vmem:[%s17127_s9 + $0x1f0] sm:$0xf0] }
 0x9c2   :  { %v4668_v63 = vmax.f32 %v4636_v9, 0.0  ;;  %v4640_v49 = vadd.f32 %v14114_v59, %v4605_v1  ;;  %v4671_v23 = vmax.f32 %v14167_v16, 0.0  ;;  %v4642_v39 = vadd.f32 %v14114_v59, %v14112_v52 }
 0x9c3   :  { %v14212_v8 = vpack.c.bf16 %v4666_v0, %v4665_v25  ;;  %v4670_v46 = vmax.f32 %v4638_v32, 0.0  ;;  %v4673_v22 = vmax.f32 %v14170_v36, 0.0  ;;  %v4645_v57 = vmax.f32 %v4613_v47, 0.0  ;;  %v9552_v0 = vld [vmem:[%s17127_s9 + $0xcc] sm:$0xf0] }
 0x9c4   :  { %v4646_v11 = vmax.f32 %v4614_v43, 0.0  ;;  %v14217_v6 = vpack.c.bf16 %v4668_v63, %v4667_v30  ;;  %v4672_v35 = vmax.f32 %v4640_v49, 0.0  ;;  %v4674_v26 = vmax.f32 %v4642_v39, 0.0  ;;  %v9224_v32 = vld [vmem:[%s17127_s9 + $0x1c0] sm:$0xf] }
 0x9c5   :  { %v14219_v18 = vpack.c.bf16 %v4670_v46, %v4669_v15  ;;  %v4580_v52 = vmul.f32 %v14109_v40, %v13920_v29  ;;  %v4581_v36 = vmul.f32 %v14109_v40, %v13929_v45  ;;  %v4582_v12 = vmul.f32 %v14109_v40, %v13932_v38  ;;  %v9550_v63 = vld [vmem:[%s17127_s9 + $0xc4] sm:$0xf]  ;;  %v9098_v49 = vld [vmem:[%s17127_s9 + $0xd0] sm:$0xf0] }
 0x9c6   :  { %v14221_v42 = vpack.c.bf16 %v4672_v35, %v4671_v23  ;;  %v14223_v58 = vpack.c.bf16 %v4674_v26, %v4673_v22  ;;  %v4676_v16 = vpack.c.bf16 %v4646_v11, %v4645_v57  ;;  %v4583_v1 = vmul.f32 %v14109_v40, %v13940_v7  ;;  %v9582_v46 = vld [vmem:[%s17127_s9 + $0x1c4] sm:$0xf]  ;;  %v9226_v39 = vld [vmem:[%s17127_s9 + $0x1d0] sm:$0xf0] }
 0x9c7   :  { %v4615_v14 = vadd.f32 %v14114_v59, %v4580_v52  ;;  %v4616_v50 = vadd.f32 %v14114_v59, %v4581_v36  ;;  %v4617_v29 = vadd.f32 %v14114_v59, %v4582_v12  ;;  %v9113_v61 = vor.u32 %v9556_v53, %v9112_v27  ;;  %v9082_v12 = vld [vmem:[%s17127_s9 + $0xb0] sm:$0xf0] }
 0x9c8   :  { %v4618_v47 = vadd.f32 %v14114_v59, %v4583_v1  ;;  %v9245_v48 = vor.u32 %v9586_v19, %v9242_v44  ;;  %v9229_v22 = vor.u32 %v9582_v46, %v9226_v39  ;;  %v9542_v44 = vld [vmem:[%s17127_s9 + $0x84] sm:$0xf] }
 0x9c9   :  { %v4647_v24 = vmax.f32 %v4615_v14, 0.0  ;;  %v4648_v20 = vmax.f32 %v4616_v50, 0.0  ;;  %v4649_v45 = vmax.f32 %v4617_v29, 0.0  ;;  %5843 = vmatpush.bf16.msrb.mxu2 %v9113_v61  ;;  %v9548_v50 = vld [vmem:[%s17127_s9 + $0xac] sm:$0xf0] }
 0x9ca   :  { %4800 = vmatmul.bf16.gmra.mxu0 %v4676_v16  ;;  %4889 = vmatmul.bf16.gmra.mxu1 %v4676_v16  ;;  %v4650_v51 = vmax.f32 %v4618_v47, 0.0  ;;  %v9578_v47 = vld [vmem:[%s17127_s9 + $0x1a4] sm:$0xf] }
 0x9cb   :  { %v4677_v13 = vpack.c.bf16 %v4648_v20, %v4647_v24  ;;  %6110 = vmatpush.bf16.msrb.mxu1 %v9245_v48  ;;  %v9208_v24 = vld [vmem:[%s17127_s9 + $0x1a0] sm:$0xf]  ;;  %v9066_v48 = vld [vmem:[%s17127_s9 + $0x90] sm:$0xf0] }
 0x9cc   :  { %v4678_v34 = vpack.c.bf16 %v4650_v51, %v4649_v45  ;;  %v9210_v45 = vld [vmem:[%s17127_s9 + $0x1b0] sm:$0xf0] }
 0x9cd   :  { %v9213_v51 = vor.u32 %v9578_v47, %v9210_v45  ;;  %v9570_v45 = vld [vmem:[%s17127_s9 + $0x164] sm:$0xf] }
 0x9cf   :  { %6111 = vmatpush.bf16.msrb.mxu1 %v9229_v22 }
 0x9d3   :  { %6112 = vmatpush.bf16.msrb.mxu1 %v9213_v51  ;;  %v9178_v51 = vld [vmem:[%s17127_s9 + $0x170] sm:$0xf0] }
 0x9da   :  { %4805 = vmatmul.bf16.gmra.mxu0 %v4677_v13  ;;  %4894 = vmatmul.bf16.gmra.mxu1 %v4677_v13  ;;  %v9546_v13 = vld [vmem:[%s17127_s9 + $0xa4] sm:$0xf] }
 0x9db   :  { %v9085_v29 = vor.u32 %v9546_v13, %v9082_v12  ;;  %v9572_v13 = vld [vmem:[%s17127_s9 + $0x16c] sm:$0xf0]  ;;  %v9538_v12 = vld [vmem:[%s17127_s9 + $0x64] sm:$0xf] }
 0x9ea   :  { %4810 = vmatmul.bf16.gmra.mxu0 %v4678_v34  ;;  %4899 = vmatmul.bf16.gmra.mxu1 %v4678_v34 }
 0x9fa   :  { %4815 = vmatmul.bf16.gmra.mxu0 %v14197_v5  ;;  %4904 = vmatmul.bf16.gmra.mxu1 %v14197_v5 }
 0xa0a   :  { %4820 = vmatmul.bf16.gmra.mxu0 %v4680_v62  ;;  %4909 = vmatmul.bf16.gmra.mxu1 %v4680_v62  ;;  %v9588_v62 = vld [vmem:[%s17127_s9 + $0x1ec] sm:$0xf0] }
 0xa0b   :  { %v9241_v41 = vor.u32 %v9588_v62, %v9240_v60 }
 0xa0d   :  { %5932 = vmatpush.bf16.msrb.mxu3 %v9241_v41  ;;  %v9544_v41 = vld [vmem:[%s17127_s9 + $0x8c] sm:$0xf0] }
 0xa1a   :  { %4825 = vmatmul.bf16.gmra.mxu0 %v4681_v4  ;;  %4914 = vmatmul.bf16.gmra.mxu1 %v4681_v4  ;;  %v9117_v4 = vor.u32 %v9554_v2, %v9114_v10 }
 0xa1c   :  { %6021 = vmatpush.bf16.msrb.mxu0 %v9117_v4  ;;  %v9192_v4 = vld [vmem:[%s17127_s9 + $0x180] sm:$0xf] }
 0xa2a   :  { %4830 = vmatmul.bf16.gmra.mxu0 %v4682_v37  ;;  %4919 = vmatmul.bf16.gmra.mxu1 %v4682_v37 }
 0xa37   :  { %v14239_v38 = vpop.f32.mrf.mxu0  ;;  %v14241_v7 = vpop.f32.mrf.mxu1 }
 0xa38   :  { %18039 = vst [vmem:[#allocation27_spill] sm:$0xff] %v14239_v38 }
 0xa39   :  { %18040 = vst [vmem:[#allocation50_spill] sm:$0xff] %v14241_v7 }
 0xa3a   :  { %4835 = vmatmul.bf16.gmra.mxu0 %v4683_v3  ;;  %4924 = vmatmul.bf16.gmra.mxu1 %v4683_v3 }
 0xa3f   :  { %v14243_v40 = vpop.f32.mrf.mxu0  ;;  %v14245_v59 = vpop.f32.mrf.mxu1 }
 0xa40   :  { %18041 = vst [vmem:[#allocation51_spill] sm:$0xff] %v14243_v40 }
 0xa41   :  { %18042 = vst [vmem:[#allocation28_spill] sm:$0xff] %v14245_v59 }
 0xa47   :  { %v14247_v43 = vpop.f32.mrf.mxu0  ;;  %v14249_v54 = vpop.f32.mrf.mxu1 }
 0xa48   :  { %18043 = vst [vmem:[#allocation29_spill] sm:$0xff] %v14247_v43 }
 0xa49   :  { %18044 = vst [vmem:[#allocation30_spill] sm:$0xff] %v14249_v54 }
 0xa4a   :  { %4840 = vmatmul.bf16.gmra.mxu0 %v4684_v56  ;;  %4929 = vmatmul.bf16.gmra.mxu1 %v4684_v56  ;;  %v9096_v56 = vld [vmem:[%s17127_s9 + $0xc0] sm:$0xf] }
 0xa4b   :  { %v9097_v15 = vor.u32 %v9552_v0, %v9096_v56  ;;  %v9069_v0 = vor.u32 %v9542_v44, %v9066_v48 }
 0xa4d   :  { %5844 = vmatpush.bf16.msrb.mxu2 %v9097_v15  ;;  %v9194_v15 = vld [vmem:[%s17127_s9 + $0x190] sm:$0xf0] }
 0xa4f   :  { %v14251_v5 = vpop.f32.mrf.mxu0  ;;  %v14253_v21 = vpop.f32.mrf.mxu1 }
 0xa50   :  { %18045 = vst [vmem:[#allocation31_spill] sm:$0xff] %v14251_v5 }
 0xa51   :  { %18046 = vst [vmem:[#allocation55_spill] sm:$0xff] %v14253_v21 }
 0xa57   :  { %v14279_v37 = vpop.f32.mrf.mxu0  ;;  %v14281_v33 = vpop.f32.mrf.mxu1 }
 0xa58   :  { %18047 = vst [vmem:[#allocation59_spill] sm:$0xff] %v14279_v37 }
 0xa59   :  { %18048 = vst [vmem:[#allocation57_spill] sm:$0xff] %v14281_v33 }
 0xa5a   :  { %4845 = vmatmul.bf16.gmra.mxu0 %v14208_v28  ;;  %4934 = vmatmul.bf16.gmra.mxu1 %v14208_v28  ;;  %v9584_v28 = vld [vmem:[%s17127_s9 + $0x1cc] sm:$0xf0] }
 0xa5b   :  { %v9225_v23 = vor.u32 %v9584_v28, %v9224_v32  ;;  %v9574_v32 = vld [vmem:[%s17127_s9 + $0x184] sm:$0xf] }
 0xa5c   :  { %v9197_v28 = vor.u32 %v9574_v32, %v9194_v15  ;;  %v9032_v32 = vld [vmem:[%s17127_s9 + $0x40] sm:$0xf]  ;;  %v9536_v15 = vld [vmem:[%s17127_s9 + $0x4c] sm:$0xf0] }
 0xa5d   :  { %5933 = vmatpush.bf16.msrb.mxu3 %v9225_v23 }
 0xa5e   :  { %6113 = vmatpush.bf16.msrb.mxu1 %v9197_v28  ;;  %v9160_v28 = vld [vmem:[%s17127_s9 + $0x140] sm:$0xf] }
 0xa5f   :  { %v14285_v31 = vpop.f32.mrf.mxu0  ;;  %v14287_v25 = vpop.f32.mrf.mxu1 }
 0xa60   :  { %18049 = vst [vmem:[#allocation61_spill] sm:$0xff] %v14285_v31 }
 0xa61   :  { %18050 = vst [vmem:[#allocation32_spill] sm:$0xff] %v14287_v25 }
 0xa67   :  { %v14289_v3 = vpop.f32.mrf.mxu0  ;;  %v14291_v55 = vpop.f32.mrf.mxu1 }
 0xa68   :  { %18051 = vst [vmem:[#allocation33_spill] sm:$0xff] %v14289_v3 }
 0xa69   :  { %18052 = vst [vmem:[#allocation34_spill] sm:$0xff] %v14291_v55 }
 0xa6a   :  { %4850 = vmatmul.bf16.gmra.mxu0 %v14212_v8  ;;  %4939 = vmatmul.bf16.gmra.mxu1 %v14212_v8  ;;  %v9101_v8 = vor.u32 %v9550_v63, %v9098_v49 }
 0xa6c   :  { %6022 = vmatpush.bf16.msrb.mxu0 %v9101_v8 }
 0xa6f   :  { %v14295_v9 = vpop.f32.mrf.mxu0  ;;  %v14297_v30 = vpop.f32.mrf.mxu1 }
 0xa70   :  { %18053 = vst [vmem:[#allocation35_spill] sm:$0xff] %v14295_v9  ;;  %6023 = vmatpush.bf16.msrb.mxu0 %v9085_v29 }
 0xa71   :  { %18054 = vst [vmem:[#allocation73_spill] sm:$0xff] %v14297_v30 }
 0xa74   :  { %6024 = vmatpush.bf16.msrb.mxu0 %v9069_v0 }
 0xa77   :  { %v14323_v57 = vpop.f32.mrf.mxu0  ;;  %v14325_v11 = vpop.f32.mrf.mxu1 }
 0xa7a   :  { %4855 = vmatmul.bf16.gmra.mxu0 %v14217_v6  ;;  %4944 = vmatmul.bf16.gmra.mxu1 %v14217_v6  ;;  %v9080_v6 = vld [vmem:[%s17127_s9 + $0xa0] sm:$0xf] }
 0xa7b   :  { %v9081_v20 = vor.u32 %v9548_v50, %v9080_v6  ;;  %v9048_v50 = vld [vmem:[%s17127_s9 + $0x60] sm:$0xf] }
 0xa7d   :  { %5845 = vmatpush.bf16.msrb.mxu2 %v9081_v20  ;;  %v9176_v20 = vld [vmem:[%s17127_s9 + $0x160] sm:$0xf] }
 0xa7e   :  { %v9177_v29 = vor.u32 %v9572_v13, %v9176_v20  ;;  %v9033_v20 = vor.u32 %v9536_v15, %v9032_v32  ;;  %v9534_v13 = vld [vmem:[%s17127_s9 + $0x44] sm:$0xf]  ;;  %v5047_v32 = vmul.f32 %v14247_v43, %v14247_v43  ;;  %v5048_v15 = vmul.f32 %v14249_v54, %v14249_v54 }
 0xa7f   :  { %v14329_v35 = vpop.f32.mrf.mxu0  ;;  %v14331_v26 = vpop.f32.mrf.mxu1 }
 0xa87   :  { %v14333_v16 = vpop.f32.mrf.mxu0  ;;  %v14335_v52 = vpop.f32.mrf.mxu1 }
 0xa8a   :  { %4860 = vmatmul.bf16.gmra.mxu0 %v14219_v18  ;;  %4949 = vmatmul.bf16.gmra.mxu1 %v14219_v18  ;;  %v9580_v18 = vld [vmem:[%s17127_s9 + $0x1ac] sm:$0xf0] }
 0xa8b   :  { %v9209_v1 = vor.u32 %v9580_v18, %v9208_v24  ;;  %v9540_v24 = vld [vmem:[%s17127_s9 + $0x6c] sm:$0xf0] }
 0xa8c   :  { %v9049_v18 = vor.u32 %v9540_v24, %v9048_v50  ;;  %v5045_v50 = vmul.f32 %v14243_v40, %v14243_v40  ;;  %v5046_v24 = vmul.f32 %v14245_v59, %v14245_v59 }
 0xa8d   :  { %5934 = vmatpush.bf16.msrb.mxu3 %v9209_v1  ;;  %v9050_v1 = vld [vmem:[%s17127_s9 + $0x70] sm:$0xf0] }
 0xa8e   :  { %v9053_v47 = vor.u32 %v9538_v12, %v9050_v1  ;;  %v9034_v12 = vld [vmem:[%s17127_s9 + $0x50] sm:$0xf0]  ;;  %v5043_v1 = vmul.f32 %v14239_v38, %v14239_v38 }
 0xa8f   :  { %v14339_v36 = vpop.f32.mrf.mxu0  ;;  %v14341_v14 = vpop.f32.mrf.mxu1 }
 0xa90   :  { %6025 = vmatpush.bf16.msrb.mxu0 %v9053_v47  ;;  %v9037_v47 = vor.u32 %v9534_v13, %v9034_v12  ;;  %v5004_v13 = vadd.f32 %v14245_v59, %v14241_v7  ;;  %v5107_v12 = vadd.f32 %v5045_v50, %v5043_v1  ;;  %v5051_v59 = vmul.f32 %v14279_v37, %v14279_v37 }
 0xa91   :  { %v5052_v50 = vmul.f32 %v14281_v33, %v14281_v33 }
 0xa94   :  { %6026 = vmatpush.bf16.msrb.mxu0 %v9037_v47 }
 0xa97   :  { %v14367_v34 = vpop.f32.mrf.mxu0  ;;  %v14369_v27 = vpop.f32.mrf.mxu1 }
 0xa9a   :  { %4865 = vmatmul.bf16.gmra.mxu0 %v14221_v42  ;;  %4954 = vmatmul.bf16.gmra.mxu1 %v14221_v42  ;;  %v9064_v42 = vld [vmem:[%s17127_s9 + $0x80] sm:$0xf] }
 0xa9b   :  { %v9065_v19 = vor.u32 %v9544_v41, %v9064_v42  ;;  %v9181_v42 = vor.u32 %v9570_v45, %v9178_v51  ;;  %v9566_v45 = vld [vmem:[%s17127_s9 + $0x144] sm:$0xf]  ;;  %v9162_v51 = vld [vmem:[%s17127_s9 + $0x150] sm:$0xf0] }
 0xa9d   :  { %5846 = vmatpush.bf16.msrb.mxu2 %v9065_v19  ;;  %6114 = vmatpush.bf16.msrb.mxu1 %v9181_v42  ;;  %v5044_v42 = vmul.f32 %v14241_v7, %v14241_v7 }
 0xa9f   :  { %v14373_v53 = vpop.f32.mrf.mxu0  ;;  %v14375_v60 = vpop.f32.mrf.mxu1  ;;  %v5144_v17 = vadd.f32 %v5046_v24, %v5044_v42 }
 0xaa1   :  { %5847 = vmatpush.bf16.msrb.mxu2 %v9049_v18  ;;  %v9568_v18 = vld [vmem:[%s17127_s9 + $0x14c] sm:$0xf0] }
 0xaa5   :  { %5848 = vmatpush.bf16.msrb.mxu2 %v9033_v20 }
 0xaa7   :  { %v14377_v61 = vpop.f32.mrf.mxu0  ;;  %v14379_v62 = vpop.f32.mrf.mxu1 }
 0xaaa   :  { %4870 = vmatmul.bf16.gmra.mxu0 %v14223_v58  ;;  %4959 = vmatmul.bf16.gmra.mxu1 %v14223_v58  ;;  %v9576_v58 = vld [vmem:[%s17127_s9 + $0x18c] sm:$0xf0] }
 0xaab   :  { %v9193_v56 = vor.u32 %v9576_v58, %v9192_v4 }
 0xaad   :  { %5935 = vmatpush.bf16.msrb.mxu3 %v9193_v56 }
 0xaaf   :  { %v14383_v2 = vpop.f32.mrf.mxu0  ;;  %v14385_v10 = vpop.f32.mrf.mxu1 }
 0xab1   :  { %5936 = vmatpush.bf16.msrb.mxu3 %v9177_v29  ;;  %v9161_v29 = vor.u32 %v9568_v18, %v9160_v28  ;;  %v9165_v28 = vor.u32 %v9566_v45, %v9162_v51  ;;  %v4967_v18 = vadd.f32 %v14243_v40, %v14239_v38  ;;  %v5005_v45 = vadd.f32 %v5004_v13, %v14249_v54 }
 0xab2   :  { %v5108_v51 = vadd.f32 %v5107_v12, %v5047_v32  ;;  %v5145_v40 = vadd.f32 %v5144_v17, %v5048_v15  ;;  %v5053_v32 = vmul.f32 %v14285_v31, %v14285_v31  ;;  %v5054_v17 = vmul.f32 %v14287_v25, %v14287_v25 }
 0xab3   :  { %6115 = vmatpush.bf16.msrb.mxu1 %v9165_v28  ;;  %v4968_v20 = vadd.f32 %v4967_v18, %v14247_v43  ;;  %v5006_v47 = vadd.f32 %v5005_v45, %v14253_v21  ;;  %v5055_v54 = vmul.f32 %v14289_v3, %v14289_v3 }
 0xab5   :  { %5937 = vmatpush.bf16.msrb.mxu3 %v9161_v29  ;;  %v4969_v29 = vadd.f32 %v4968_v20, %v14251_v5  ;;  %v5007_v18 = vadd.f32 %v5006_v47, %v14281_v33  ;;  %v5056_v20 = vmul.f32 %v14291_v55, %v14291_v55 }
 0xab7   :  { %v14411_v63 = vpop.f32.mrf.mxu0  ;;  %v14413_v49 = vpop.f32.mrf.mxu1  ;;  %v4970_v15 = vadd.f32 %v4969_v29, %v14279_v37  ;;  %v5058_v29 = vmul.f32 %v14297_v30, %v14297_v30 }
 0xabf   :  { %v14415_v23 = vpop.f32.mrf.mxu0  ;;  %v14417_v8 = vpop.f32.mrf.mxu1 }
 0xac7   :  { %v14419_v46 = vpop.f32.mrf.mxu0  ;;  %v14421_v39 = vpop.f32.mrf.mxu1 }
 0xacf   :  { %v14423_v22 = vpop.f32.mrf.mxu0  ;;  %v14425_v6 = vpop.f32.mrf.mxu1 }
 0xad7   :  { %v14451_v41 = vpop.f32.mrf.mxu0  ;;  %v14453_v4 = vpop.f32.mrf.mxu1 }
 0xadf   :  { %v14455_v19 = vpop.f32.mrf.mxu0  ;;  %v14457_v58 = vpop.f32.mrf.mxu1 }
 0xae7   :  { %v14459_v44 = vpop.f32.mrf.mxu0  ;;  %v14461_v48 = vpop.f32.mrf.mxu1 }
 0xae8   :  { %v5087_v37 = vmul.f32 %v14459_v44, %v14459_v44 }
 0xaef   :  { %v14463_v56 = vpop.f32.mrf.mxu0  ;;  %v14465_v0 = vpop.f32.mrf.mxu1 }
 0xaf0   :  { %18055 = vst [vmem:[#allocation77_spill] sm:$0xff] %v14463_v56  ;;  %v5050_v56 = vmul.f32 %v14253_v21, %v14253_v21 }
 0xaf1   :  { %18056 = vst [vmem:[#allocation75_spill] sm:$0xff] %v14465_v0  ;;  %v5049_v0 = vmul.f32 %v14251_v5, %v14251_v5 }
 0xaf2   :  { %v5146_v28 = vadd.f32 %v5145_v40, %v5050_v56  ;;  %v4971_v40 = vadd.f32 %v4970_v15, %v14285_v31  ;;  %v5008_v56 = vadd.f32 %v5007_v18, %v14287_v25  ;;  %v5060_v15 = vmul.f32 %v14325_v11, %v14325_v11 }
 0xaf3   :  { %v5109_v42 = vadd.f32 %v5108_v51, %v5049_v0  ;;  %v5057_v51 = vmul.f32 %v14295_v9, %v14295_v9  ;;  %v5079_v31 = vmul.f32 %v14419_v46, %v14419_v46 }
 0xaf4   :  { %v5147_v12 = vadd.f32 %v5146_v28, %v5052_v50  ;;  %v5009_v50 = vadd.f32 %v5008_v56, %v14291_v55  ;;  %v5059_v28 = vmul.f32 %v14323_v57, %v14323_v57 }
 0xaf5   :  { %v5110_v13 = vadd.f32 %v5109_v42, %v5051_v59  ;;  %v4972_v59 = vadd.f32 %v4971_v40, %v14289_v3  ;;  %v5063_v3 = vmul.f32 %v14333_v16, %v14333_v16 }
 0xaf6   :  { %v5148_v45 = vadd.f32 %v5147_v12, %v5054_v17 }
 0xaf7   :  { %v14517_v24 = vpop.f32.mrf.mxu0  ;;  %v14519_v1 = vpop.f32.mrf.mxu1  ;;  %v5111_v0 = vadd.f32 %v5110_v13, %v5053_v32  ;;  %v4973_v18 = vadd.f32 %v4972_v59, %v14295_v9  ;;  %v5010_v13 = vadd.f32 %v5009_v50, %v14297_v30  ;;  %v5064_v59 = vmul.f32 %v14335_v52, %v14335_v52 }
 0xaf8   :  { %v5149_v42 = vadd.f32 %v5148_v45, %v5056_v20  ;;  %v5062_v20 = vmul.f32 %v14331_v26, %v14331_v26  ;;  %v5071_v9 = vmul.f32 %v14377_v61, %v14377_v61  ;;  %v5091_v5 = vmul.f32 %v14517_v24, %v14517_v24 }
 0xaf9   :  { %v5112_v47 = vadd.f32 %v5111_v0, %v5055_v54  ;;  %v5061_v54 = vmul.f32 %v14329_v35, %v14329_v35  ;;  %v4974_v56 = vadd.f32 %v4973_v18, %v14323_v57  ;;  %v5011_v0 = vadd.f32 %v5010_v13, %v14325_v11 }
 0xafa   :  { %v5150_v40 = vadd.f32 %v5149_v42, %v5058_v29  ;;  %v5065_v42 = vmul.f32 %v14339_v36, %v14339_v36  ;;  %v5066_v18 = vmul.f32 %v14341_v14, %v14341_v14 }
 0xafb   :  { %v5113_v12 = vadd.f32 %v5112_v47, %v5057_v51  ;;  %v4975_v51 = vadd.f32 %v4974_v56, %v14329_v35  ;;  %v5012_v29 = vadd.f32 %v5011_v0, %v14331_v26  ;;  %v5068_v56 = vmul.f32 %v14369_v27, %v14369_v27 }
 0xafc   :  { %v5151_v55 = vadd.f32 %v5150_v40, %v5060_v15  ;;  %v5067_v40 = vmul.f32 %v14367_v34, %v14367_v34 }
 0xafd   :  { %v5114_v45 = vadd.f32 %v5113_v12, %v5059_v28  ;;  %v4976_v28 = vadd.f32 %v4975_v51, %v14333_v16  ;;  %v5013_v15 = vadd.f32 %v5012_v29, %v14335_v52 }
 0xafe   :  { %v5152_v47 = vadd.f32 %v5151_v55, %v5062_v20 }
 0xaff   :  { %v14545_v32 = vpop.f32.mrf.mxu0  ;;  %v14547_v17 = vpop.f32.mrf.mxu1  ;;  %v5115_v50 = vadd.f32 %v5114_v45, %v5061_v54  ;;  %v4977_v20 = vadd.f32 %v4976_v28, %v14339_v36  ;;  %v5014_v0 = vadd.f32 %v5013_v15, %v14341_v14  ;;  %v5072_v28 = vmul.f32 %v14379_v62, %v14379_v62 }
 0xb00   :  { %v5153_v12 = vadd.f32 %v5152_v47, %v5064_v59  ;;  %v5070_v59 = vmul.f32 %v14375_v60, %v14375_v60 }
 0xb01   :  { %v5116_v13 = vadd.f32 %v5115_v50, %v5063_v3  ;;  %v5069_v3 = vmul.f32 %v14373_v53, %v14373_v53  ;;  %v4978_v29 = vadd.f32 %v4977_v20, %v14367_v34  ;;  %v5015_v50 = vadd.f32 %v5014_v0, %v14369_v27 }
 0xb02   :  { %v5154_v51 = vadd.f32 %v5153_v12, %v5066_v18  ;;  %v5073_v12 = vmul.f32 %v14383_v2, %v14383_v2  ;;  %v5074_v20 = vmul.f32 %v14385_v10, %v14385_v10 }
 0xb03   :  { %v5117_v45 = vadd.f32 %v5116_v13, %v5065_v42  ;;  %v4979_v42 = vadd.f32 %v4978_v29, %v14373_v53  ;;  %v5016_v18 = vadd.f32 %v5015_v50, %v14375_v60  ;;  %v5076_v29 = vmul.f32 %v14413_v49, %v14413_v49 }
 0xb04   :  { %v5155_v30 = vadd.f32 %v5154_v51, %v5068_v56  ;;  %v5075_v51 = vmul.f32 %v14411_v63, %v14411_v63 }
 0xb05   :  { %v5118_v47 = vadd.f32 %v5117_v45, %v5067_v40  ;;  %v4980_v40 = vadd.f32 %v4979_v42, %v14377_v61  ;;  %v5017_v56 = vadd.f32 %v5016_v18, %v14379_v62 }
 0xb06   :  { %v5156_v13 = vadd.f32 %v5155_v30, %v5070_v59 }
 0xb07   :  { %v14573_v54 = vpop.f32.mrf.mxu0  ;;  %v14575_v55 = vpop.f32.mrf.mxu1  ;;  %v5119_v15 = vadd.f32 %v5118_v47, %v5069_v3  ;;  %v4981_v59 = vadd.f32 %v4980_v40, %v14383_v2  ;;  %v5018_v50 = vadd.f32 %v5017_v56, %v14385_v10  ;;  %v5080_v40 = vmul.f32 %v14421_v39, %v14421_v39 }
 0xb08   :  { %18057 = vst [vmem:[#allocation79_spill] sm:$0xff] %v14573_v54  ;;  %v5157_v45 = vadd.f32 %v5156_v13, %v5072_v28  ;;  %v5078_v28 = vmul.f32 %v14417_v8, %v14417_v8  ;;  %v5095_v7 = vmul.f32 %v14573_v54, %v14573_v54 }
 0xb09   :  { %18058 = vst [vmem:[#allocation36_spill] sm:$0xff] %v14575_v55  ;;  %v5120_v0 = vadd.f32 %v5119_v15, %v5071_v9  ;;  %v5077_v9 = vmul.f32 %v14415_v23, %v14415_v23  ;;  %v4982_v18 = vadd.f32 %v4981_v59, %v14411_v63  ;;  %v5019_v15 = vadd.f32 %v5018_v50, %v14413_v49 }
 0xb0a   :  { %v5158_v42 = vadd.f32 %v5157_v45, %v5074_v20  ;;  %v5081_v45 = vmul.f32 %v14423_v22, %v14423_v22  ;;  %v5082_v59 = vmul.f32 %v14425_v6, %v14425_v6 }
 0xb0b   :  { %v5121_v47 = vadd.f32 %v5120_v0, %v5073_v12  ;;  %v4983_v12 = vadd.f32 %v4982_v18, %v14415_v23  ;;  %v5020_v20 = vadd.f32 %v5019_v15, %v14417_v8  ;;  %v5084_v18 = vmul.f32 %v14453_v4, %v14453_v4 }
 0xb0c   :  { %v5159_v25 = vadd.f32 %v5158_v42, %v5076_v29  ;;  %v5083_v42 = vmul.f32 %v14451_v41, %v14451_v41 }
 0xb0d   :  { %v5122_v13 = vadd.f32 %v5121_v47, %v5075_v51  ;;  %v4984_v51 = vadd.f32 %v4983_v12, %v14419_v46  ;;  %v5021_v29 = vadd.f32 %v5020_v20, %v14421_v39 }
 0xb0e   :  { %v5160_v0 = vadd.f32 %v5159_v25, %v5078_v28 }
 0xb0f   :  { %v14601_v3 = vpop.f32.mrf.mxu0  ;;  %v14603_v30 = vpop.f32.mrf.mxu1  ;;  %v5123_v56 = vadd.f32 %v5122_v13, %v5077_v9  ;;  %v4985_v28 = vadd.f32 %v4984_v51, %v14423_v22  ;;  %v5022_v15 = vadd.f32 %v5021_v29, %v14425_v6  ;;  %v5088_v51 = vmul.f32 %v14461_v48, %v14461_v48 }
 0xb10   :  { %18059 = vst [vmem:[#allocation37_spill] sm:$0xff] %v14601_v3  ;;  %v5161_v47 = vadd.f32 %v5160_v0, %v5080_v40  ;;  %v5086_v40 = vmul.f32 %v14457_v58, %v14457_v58 }
 0xb11   :  { %18060 = vst [vmem:[#allocation38_spill] sm:$0xff] %v14603_v30  ;;  %v5124_v50 = vadd.f32 %v5123_v56, %v5079_v31  ;;  %v5085_v31 = vmul.f32 %v14455_v19, %v14455_v19  ;;  %v4986_v20 = vadd.f32 %v4985_v28, %v14451_v41  ;;  %v5023_v56 = vadd.f32 %v5022_v15, %v14453_v4  ;;  %v18064_v28 = vld [vmem:[#allocation75_spill] sm:$0xff] }
 0xb12   :  { %v5162_v12 = vadd.f32 %v5161_v47, %v5082_v59  ;;  %v18063_v47 = vld [vmem:[#allocation77_spill] sm:$0xff]  ;;  %v5090_v15 = vmul.f32 %v18064_v28, %v18064_v28 }
 0xb13   :  { %v5125_v13 = vadd.f32 %v5124_v50, %v5081_v45  ;;  %v4987_v45 = vadd.f32 %v4986_v20, %v14455_v19  ;;  %v5024_v59 = vadd.f32 %v5023_v56, %v14457_v58  ;;  %v5089_v21 = vmul.f32 %v18063_v47, %v18063_v47 }
 0xb14   :  { %v5163_v33 = vadd.f32 %v5162_v12, %v5084_v18  ;;  %v5092_v20 = vmul.f32 %v14519_v1, %v14519_v1 }
 0xb15   :  { %v5126_v0 = vadd.f32 %v5125_v13, %v5083_v42  ;;  %v4988_v42 = vadd.f32 %v4987_v45, %v14459_v44  ;;  %v5025_v18 = vadd.f32 %v5024_v59, %v14461_v48 }
 0xb16   :  { %v5164_v50 = vadd.f32 %v5163_v33, %v5086_v40 }
 0xb17   :  { %v14629_v9 = vpop.f32.mrf.mxu0  ;;  %v14631_v25 = vpop.f32.mrf.mxu1  ;;  %v5127_v29 = vadd.f32 %v5126_v0, %v5085_v31  ;;  %v4989_v40 = vadd.f32 %v4988_v42, %v18063_v47  ;;  %v5026_v56 = vadd.f32 %v5025_v18, %v18064_v28  ;;  %v5096_v42 = vmul.f32 %v14575_v55, %v14575_v55 }
 0xb18   :  { %18061 = vst [vmem:[#allocation39_spill] sm:$0xff] %v14629_v9  ;;  %v5165_v12 = vadd.f32 %v5164_v50, %v5088_v51  ;;  %v5094_v51 = vmul.f32 %v14547_v17, %v14547_v17 }
 0xb19   :  { %18062 = vst [vmem:[#allocation80_spill] sm:$0xff] %v14631_v25  ;;  %v5128_v13 = vadd.f32 %v5127_v29, %v5087_v37  ;;  %v5093_v37 = vmul.f32 %v14545_v32, %v14545_v32  ;;  %v4990_v59 = vadd.f32 %v4989_v40, %v14517_v24  ;;  %v5027_v29 = vadd.f32 %v5026_v56, %v14519_v1 }
 0xb1a   :  { %v5166_v45 = vadd.f32 %v5165_v12, %v5090_v15  ;;  %v5097_v12 = vmul.f32 %v14601_v3, %v14601_v3  ;;  %v5098_v40 = vmul.f32 %v14603_v30, %v14603_v30 }
 0xb1b   :  { %v5129_v0 = vadd.f32 %v5128_v13, %v5089_v21  ;;  %v4991_v21 = vadd.f32 %v4990_v59, %v14545_v32  ;;  %v5028_v15 = vadd.f32 %v5027_v29, %v14547_v17  ;;  %v5100_v59 = vmul.f32 %v14631_v25, %v14631_v25 }
 0xb1c   :  { %v5167_v43 = vadd.f32 %v5166_v45, %v5092_v20  ;;  %v5099_v45 = vmul.f32 %v14629_v9, %v14629_v9 }
 0xb1d   :  { %v5130_v50 = vadd.f32 %v5129_v0, %v5091_v5  ;;  %v4992_v5 = vadd.f32 %v4991_v21, %v14573_v54  ;;  %v5029_v20 = vadd.f32 %v5028_v15, %v14575_v55 }
 0xb1e   :  { %v5168_v13 = vadd.f32 %v5167_v43, %v5094_v51 }
 0xb1f   :  { %v14657_v31 = vpop.f32.mrf.mxu0  ;;  %v14659_v33 = vpop.f32.mrf.mxu1  ;;  %v5131_v18 = vadd.f32 %v5130_v50, %v5093_v37  ;;  %v4993_v51 = vadd.f32 %v4992_v5, %v14601_v3  ;;  %v5030_v29 = vadd.f32 %v5029_v20, %v14603_v30 }
 0xb20   :  { %18065 = vst [vmem:[#allocation84_spill] sm:$0xff] %v14657_v31  ;;  %v5169_v0 = vadd.f32 %v5168_v13, %v5096_v42  ;;  %v5102_v42 = vmul.f32 %v14659_v33, %v14659_v33 }
 0xb21   :  { %18066 = vst [vmem:[#allocation86_spill] sm:$0xff] %v14659_v33  ;;  %v5132_v56 = vadd.f32 %v5131_v18, %v5095_v7  ;;  %v5101_v7 = vmul.f32 %v14657_v31, %v14657_v31  ;;  %v4994_v15 = vadd.f32 %v4993_v51, %v14629_v9  ;;  %v5031_v18 = vadd.f32 %v5030_v29, %v14631_v25 }
 0xb22   :  { %v5170_v21 = vadd.f32 %v5169_v0, %v5098_v40 }
 0xb23   :  { %v5133_v50 = vadd.f32 %v5132_v56, %v5097_v12  ;;  %v4995_v12 = vadd.f32 %v4994_v15, %v14657_v31  ;;  %v5032_v40 = vadd.f32 %v5031_v18, %v14659_v33 }
 0xb24   :  { %v5171_v38 = vadd.f32 %v5170_v21, %v5100_v59 }
 0xb25   :  { %v5134_v13 = vadd.f32 %v5133_v50, %v5099_v45 }
 0xb26   :  { %v5172_v56 = vadd.f32 %v5171_v38, %v5102_v42 }
 0xb27   :  { %v14685_v37 = vpop.f32.mrf.mxu0  ;;  %v14687_v43 = vpop.f32.mrf.mxu1  ;;  %v5135_v20 = vadd.f32 %v5134_v13, %v5101_v7 }
 0xb28   :  { %18067 = vst [vmem:[#allocation83_spill] sm:$0xff] %v14685_v37  ;;  %v5103_v55 = vmul.f32 %v14685_v37, %v14685_v37  ;;  %v5104_v5 = vmul.f32 %v14687_v43, %v14687_v43  ;;  %v4996_v0 = vadd.f32 %v4995_v12, %v14685_v37  ;;  %v5033_v51 = vadd.f32 %v5032_v40, %v14687_v43 }
 0xb29   :  { %18068 = vst [vmem:[#allocation40_spill] sm:$0xff] %v14687_v43 }
 0xb2a   :  { %v5136_v9 = vadd.f32 %v5135_v20, %v5103_v55  ;;  %v5173_v29 = vadd.f32 %v5172_v56, %v5104_v5 }
 0xb2f   :  { %v14705_v45 = vpop.f32.mrf.mxu0  ;;  %v14707_v59 = vpop.f32.mrf.mxu1 }
 0xb30   :  { %18069 = vst [vmem:[#allocation41_spill] sm:$0xff] %v14705_v45  ;;  %v4997_v50 = vadd.f32 %v4996_v0, %v14705_v45  ;;  %v5105_v21 = vmul.f32 %v14705_v45, %v14705_v45  ;;  %v5034_v15 = vadd.f32 %v5033_v51, %v14707_v59  ;;  %v5106_v38 = vmul.f32 %v14707_v59, %v14707_v59 }
 0xb32   :  { %v4998_v7 = vrot.slane %v4997_v50, 4  ;;  %v5137_v42 = vadd.f32 %v5136_v9, %v5105_v21  ;;  %v5035_v18 = vrot.slane %v5034_v15, 4  ;;  %v5174_v13 = vadd.f32 %v5173_v29, %v5106_v38 }
 0xb34   :  { %v4999_v55 = vadd.f32 %v4998_v7, %v4997_v50  ;;  %v5138_v5 = vrot.slane %v5137_v42, 4  ;;  %v5036_v12 = vadd.f32 %v5035_v18, %v5034_v15  ;;  %v5175_v40 = vrot.slane %v5174_v13, 4  ;;  %v18070_v50 = vld [vmem:[#allocation87_spill] sm:$0xff] }
 0xb36   :  { %v5000_v20 = vrot.slane %v4999_v55, 2  ;;  %v5139_v56 = vadd.f32 %v5138_v5, %v5137_v42  ;;  %v5037_v43 = vrot.slane %v5036_v12, 2  ;;  %v5176_v0 = vadd.f32 %v5175_v40, %v5174_v13 }
 0xb38   :  { %v5001_v37 = vadd.f32 %v5000_v20, %v4999_v55  ;;  %v5140_v33 = vrot.slane %v5139_v56, 2  ;;  %v5038_v45 = vadd.f32 %v5037_v43, %v5036_v12  ;;  %v5177_v31 = vrot.slane %v5176_v0, 2 }
 0xb3a   :  { %v5002_v51 = vrot.slane %v5001_v37, 1  ;;  %v5141_v25 = vadd.f32 %v5140_v33, %v5139_v56  ;;  %v5039_v30 = vrot.slane %v5038_v45, 1  ;;  %v5178_v3 = vadd.f32 %v5177_v31, %v5176_v0 }
 0xb3c   :  { %v5003_v54 = vadd.f32 %v5002_v51, %v5001_v37  ;;  %v5142_v9 = vrot.slane %v5141_v25, 1  ;;  %v5040_v21 = vadd.f32 %v5039_v30, %v5038_v45  ;;  %v5179_v29 = vrot.slane %v5178_v3, 1 }
 0xb3e   :  { %v5041_v38 = vmul.f32 %v5003_v54, %v18070_v50  ;;  %v5143_v15 = vadd.f32 %v5142_v9, %v5141_v25  ;;  %v5042_v7 = vmul.f32 %v5040_v21, %v18070_v50  ;;  %v5180_v42 = vadd.f32 %v5179_v29, %v5178_v3 }
 0xb40   :  { %v5181_v18 = vmul.f32 %v5143_v15, %v18070_v50  ;;  %v5183_v13 = vmul.f32 %v5041_v38, %v5041_v38  ;;  %v5182_v43 = vmul.f32 %v5180_v42, %v18070_v50  ;;  %v5184_v55 = vmul.f32 %v5042_v7, %v5042_v7  ;;  %v4965_v42 = vld [vmem:[#allocation2 + $0x11] sm:$0x3]  ;;  %v18107_v50 = vld [vmem:[#allocation29_spill] sm:$0xff] }
 0xb42   :  { %v5185_v5 = vsub.f32 %v5181_v18, %v5183_v13  ;;  %v5186_v33 = vsub.f32 %v5182_v43, %v5184_v55 }
 0xb44   :  { %v5187_v12 = vmax.f32 %v5185_v5, 0.0  ;;  %v5188_v31 = vmax.f32 %v5186_v33, 0.0 }
 0xb46   :  { %v5189_v37 = vadd.f32 1e-05, %v5187_v12  ;;  %v5190_v40 = vadd.f32 1e-05, %v5188_v31  ;;  %v4966_v31 = vld [vmem:[#allocation2 + $0x13] sm:$0x3] }
 0xb48   :  { %9731 = vrsqrt.f32 %v5189_v37  ;;  %vm5207_vm1 = vweird.f32 %v5190_v40  ;;  %vm5197_vm3 = vweird.f32 %v5189_v37 }
 0xb49   :  { %9733 = vrsqrt.f32 %v5190_v40 }
 0xb4e   :  { %v9732_v30 = vpop.eup %9731 }
 0xb4f   :  { %v9734_v54 = vpop.eup %9733  ;;  %v5192_v25 = vmul.f32 %v9732_v30, %v5189_v37  ;;  %vm5198_vm0 = vweird.f32 %v9732_v30 }
 0xb50   :  { %v5202_v45 = vmul.f32 %v9734_v54, %v5190_v40  ;;  %vm5208_vm14 = vweird.f32 %v9734_v54  ;;  %vm5199_vm4 = vmor %vm5197_vm3, %vm5198_vm0 }
 0xb51   :  { %v5193_v20 = vmul.f32 %v9732_v30, %v5192_v25  ;;  %vm5209_vm2 = vmor %vm5207_vm1, %vm5208_vm14 }
 0xb52   :  { %v5203_v3 = vmul.f32 %v9734_v54, %v5202_v45 }
 0xb53   :  { %v5194_v56 = vmul.f32 0.5, %v5193_v20 }
 0xb54   :  { %v5204_v0 = vmul.f32 0.5, %v5203_v3 }
 0xb55   :  { %v5195_v51 = vsub.f32 1.5, %v5194_v56 }
 0xb56   :  { %v5205_v9 = vsub.f32 1.5, %v5204_v0 }
 0xb57   :  { %v5196_v21 = vmul.f32 %v9732_v30, %v5195_v51 }
 0xb58   :  { %v5206_v29 = vmul.f32 %v9734_v54, %v5205_v9 }
 0xb59   :  { %v5200_v13 = vsel %vm5199_vm4, %v9732_v30, %v5196_v21  ;;  %v18076_v21 = vld [vmem:[#allocation79_spill] sm:$0xff] }
 0xb5a   :  { %v5210_v15 = vsel %vm5209_vm2, %v9734_v54, %v5206_v29  ;;  %v18077_v29 = vld [vmem:[#allocation36_spill] sm:$0xff] }
 0xb5b   :  { %v5213_v18 = vrot.slane %v5210_v15, 7  ;;  %v18078_v15 = vld [vmem:[#allocation37_spill] sm:$0xff] }
 0xb5d   :  { %v5214_v43 = vsel %vm1201_vm13, %v5200_v13, %v5213_v18  ;;  %v18080_v18 = vld [vmem:[#allocation39_spill] sm:$0xff]  ;;  %v18081_v13 = vld [vmem:[#allocation80_spill] sm:$0xff] }
 0xb5e   :  { %v5216_v55 = vmul.f32 %v5214_v43, %v4965_v42  ;;  %v18079_v42 = vld [vmem:[#allocation38_spill] sm:$0xff]  ;;  %v18082_v43 = vld [vmem:[#allocation84_spill] sm:$0xff] }
 0xb60   :  { %v14720_v5 = vperm.slane %v5216_v55, 0  ;;  %v14722_v33 = vperm.slane %v5216_v55, 1  ;;  %v18083_v55 = vld [vmem:[#allocation86_spill] sm:$0xff] }
 0xb62   :  { %18071 = vst [vmem:[#allocation42_spill] sm:$0xff] %v14720_v5  ;;  %v5223_v12 = vmul.f32 %v14722_v33, %v5042_v7  ;;  %v5222_v25 = vmul.f32 %v14720_v5, %v5041_v38  ;;  %v5293_v45 = vmul.f32 %v14722_v33, %v14707_v59  ;;  %v5246_v3 = vmul.f32 %v14720_v5, %v14323_v57 }
 0xb63   :  { %18072 = vst [vmem:[#allocation43_spill] sm:$0xff] %v14722_v33  ;;  %v5247_v7 = vmul.f32 %v14722_v33, %v14325_v11  ;;  %v5248_v38 = vmul.f32 %v14720_v5, %v14329_v35  ;;  %v5249_v0 = vmul.f32 %v14722_v33, %v14331_v26  ;;  %v5250_v59 = vmul.f32 %v14720_v5, %v14333_v16 }
 0xb64   :  { %v5226_v40 = vrot.slane %v5223_v12, 7  ;;  %v5251_v51 = vmul.f32 %v14722_v33, %v14335_v52  ;;  %v5252_v57 = vmul.f32 %v14720_v5, %v14339_v36  ;;  %v5253_v11 = vmul.f32 %v14722_v33, %v14341_v14 }
 0xb65   :  { %v5254_v35 = vmul.f32 %v14720_v5, %v14367_v34  ;;  %v5255_v9 = vmul.f32 %v14722_v33, %v14369_v27  ;;  %v5256_v26 = vmul.f32 %v14720_v5, %v14373_v53  ;;  %v5257_v16 = vmul.f32 %v14722_v33, %v14375_v60 }
 0xb66   :  { %v5227_v37 = vsel %vm1201_vm13, %v5222_v25, %v5226_v40  ;;  %v5258_v52 = vmul.f32 %v14720_v5, %v14377_v61  ;;  %v5259_v36 = vmul.f32 %v14722_v33, %v14379_v62  ;;  %v5260_v14 = vmul.f32 %v14720_v5, %v14383_v2  ;;  %v18085_v40 = vld [vmem:[#allocation40_spill] sm:$0xff] }
 0xb67   :  { %v5229_v54 = vsub.f32 %v4966_v31, %v5227_v37  ;;  %v5261_v34 = vmul.f32 %v14722_v33, %v14385_v10  ;;  %v5262_v27 = vmul.f32 %v14720_v5, %v14411_v63  ;;  %v5263_v53 = vmul.f32 %v14722_v33, %v14413_v49  ;;  %v18084_v31 = vld [vmem:[#allocation83_spill] sm:$0xff] }
 0xb68   :  { %v5264_v60 = vmul.f32 %v14720_v5, %v14415_v23  ;;  %v5265_v61 = vmul.f32 %v14722_v33, %v14417_v8  ;;  %v5266_v62 = vmul.f32 %v14720_v5, %v14419_v46  ;;  %v5267_v2 = vmul.f32 %v14722_v33, %v14421_v39 }
 0xb69   :  { %v14729_v30 = vperm.slane %v5229_v54, 1  ;;  %v14740_v56 = vperm.slane %v5229_v54, 0  ;;  %v5268_v10 = vmul.f32 %v14720_v5, %v14423_v22  ;;  %v5269_v63 = vmul.f32 %v14722_v33, %v14425_v6  ;;  %v18086_v54 = vld [vmem:[#allocation41_spill] sm:$0xff] }
 0xb6a   :  { %v5270_v49 = vmul.f32 %v14720_v5, %v14451_v41  ;;  %v5271_v23 = vmul.f32 %v14722_v33, %v14453_v4  ;;  %v5272_v8 = vmul.f32 %v14720_v5, %v14455_v19  ;;  %v5273_v46 = vmul.f32 %v14722_v33, %v14457_v58 }
 0xb6b   :  { %18073 = vst [vmem:[#allocation90_spill] sm:$0xff] %v14729_v30  ;;  %v14732_v20 = vadd.f32 %v14729_v30, %v5293_v45  ;;  %v5274_v39 = vmul.f32 %v14720_v5, %v14459_v44  ;;  %v5275_v22 = vmul.f32 %v14722_v33, %v14461_v48  ;;  %v5276_v6 = vmul.f32 %v14720_v5, %v18063_v47 }
 0xb6c   :  { %18075 = vst [vmem:[#allocation93_spill] sm:$0xff] %v14740_v56  ;;  %v5277_v41 = vmul.f32 %v14722_v33, %v18064_v28  ;;  %v5278_v4 = vmul.f32 %v14720_v5, %v14517_v24  ;;  %v5279_v19 = vmul.f32 %v14722_v33, %v14519_v1  ;;  %v5280_v58 = vmul.f32 %v14720_v5, %v14545_v32 }
 0xb6d   :  { %18074 = vst [vmem:[#allocation91_spill] sm:$0xff] %v14732_v20  ;;  %v5281_v44 = vmul.f32 %v14722_v33, %v14547_v17  ;;  %v5282_v48 = vmul.f32 %v14720_v5, %v18076_v21  ;;  %v5283_v47 = vmul.f32 %v14722_v33, %v18077_v29  ;;  %v5284_v28 = vmul.f32 %v14720_v5, %v18078_v15 }
 0xb6e   :  { %v5285_v24 = vmul.f32 %v14722_v33, %v18079_v42  ;;  %v5286_v1 = vmul.f32 %v14720_v5, %v18080_v18  ;;  %v5287_v32 = vmul.f32 %v14722_v33, %v18081_v13  ;;  %v5288_v17 = vmul.f32 %v14720_v5, %v18082_v43 }
 0xb6f   :  { %v5289_v12 = vmul.f32 %v14722_v33, %v18083_v55  ;;  %v5290_v25 = vmul.f32 %v14720_v5, %v18084_v31  ;;  %v5291_v37 = vmul.f32 %v14722_v33, %v18085_v40  ;;  %v5292_v45 = vmul.f32 %v14720_v5, %v18086_v54 }
 0xb70   :  { %v14831_v21 = vadd.f32 %v14740_v56, %v5246_v3  ;;  %v14834_v29 = vadd.f32 %v14729_v30, %v5247_v7  ;;  %v14837_v15 = vadd.f32 %v14740_v56, %v5248_v38  ;;  %v14840_v42 = vadd.f32 %v14729_v30, %v5249_v0 }
 0xb71   :  { %v14843_v18 = vadd.f32 %v14740_v56, %v5250_v59  ;;  %v14846_v13 = vadd.f32 %v14729_v30, %v5251_v51  ;;  %v14849_v43 = vadd.f32 %v14740_v56, %v5252_v57  ;;  %v14852_v3 = vadd.f32 %v14729_v30, %v5253_v11 }
 0xb72   :  { %v14855_v7 = vadd.f32 %v14740_v56, %v5254_v35  ;;  %v14858_v38 = vadd.f32 %v14729_v30, %v5255_v9  ;;  %v14861_v0 = vadd.f32 %v14740_v56, %v5256_v26  ;;  %v14864_v59 = vadd.f32 %v14729_v30, %v5257_v16 }
 0xb73   :  { %v14867_v51 = vadd.f32 %v14740_v56, %v5258_v52  ;;  %v14870_v57 = vadd.f32 %v14729_v30, %v5259_v36  ;;  %v14873_v11 = vadd.f32 %v14740_v56, %v5260_v14  ;;  %v14876_v35 = vadd.f32 %v14729_v30, %v5261_v34 }
 0xb74   :  { %v14879_v9 = vadd.f32 %v14740_v56, %v5262_v27  ;;  %v14882_v26 = vadd.f32 %v14729_v30, %v5263_v53  ;;  %v14885_v16 = vadd.f32 %v14740_v56, %v5264_v60  ;;  %v14888_v52 = vadd.f32 %v14729_v30, %v5265_v61 }
 0xb75   :  { %v14891_v36 = vadd.f32 %v14740_v56, %v5266_v62  ;;  %v14894_v14 = vadd.f32 %v14729_v30, %v5267_v2  ;;  %v14897_v34 = vadd.f32 %v14740_v56, %v5268_v10  ;;  %v14900_v27 = vadd.f32 %v14729_v30, %v5269_v63 }
 0xb76   :  { %v14903_v53 = vadd.f32 %v14740_v56, %v5270_v49  ;;  %v14906_v60 = vadd.f32 %v14729_v30, %v5271_v23  ;;  %v14909_v61 = vadd.f32 %v14740_v56, %v5272_v8  ;;  %v14912_v62 = vadd.f32 %v14729_v30, %v5273_v46 }
 0xb77   :  { %18087 = vst [vmem:[#allocation95_spill] sm:$0xff] %v14894_v14  ;;  %v14915_v2 = vadd.f32 %v14740_v56, %v5274_v39  ;;  %v14918_v10 = vadd.f32 %v14729_v30, %v5275_v22  ;;  %v14921_v63 = vadd.f32 %v14740_v56, %v5276_v6  ;;  %v14924_v49 = vadd.f32 %v14729_v30, %v5277_v41 }
 0xb78   :  { %18088 = vst [vmem:[#allocation118_spill] sm:$0xff] %v14897_v34  ;;  %v14927_v23 = vadd.f32 %v14740_v56, %v5278_v4  ;;  %v14930_v8 = vadd.f32 %v14729_v30, %v5279_v19  ;;  %v14933_v46 = vadd.f32 %v14740_v56, %v5280_v58  ;;  %v14936_v39 = vadd.f32 %v14729_v30, %v5281_v44 }
 0xb79   :  { %18089 = vst [vmem:[#allocation122_spill] sm:$0xff] %v14900_v27  ;;  %v14939_v22 = vadd.f32 %v14740_v56, %v5282_v48  ;;  %v14942_v6 = vadd.f32 %v14729_v30, %v5283_v47  ;;  %v14945_v41 = vadd.f32 %v14740_v56, %v5284_v28  ;;  %v14948_v4 = vadd.f32 %v14729_v30, %v5285_v24  ;;  %v9128_v27 = vld [vmem:[%s17127_s9 + $0x100] sm:$0xf] }
 0xb7a   :  { %18090 = vst [vmem:[#allocation119_spill] sm:$0xff] %v14903_v53  ;;  %v14951_v19 = vadd.f32 %v14740_v56, %v5286_v1  ;;  %v14954_v58 = vadd.f32 %v14729_v30, %v5287_v32  ;;  %v14957_v44 = vadd.f32 %v14740_v56, %v5288_v17  ;;  %v14960_v48 = vadd.f32 %v14729_v30, %v5289_v12  ;;  %v18103_v1 = vld [vmem:[#allocation27_spill] sm:$0xff]  ;;  %v18104_v32 = vld [vmem:[#allocation50_spill] sm:$0xff]  ;;  %v18106_v12 = vld [vmem:[#allocation28_spill] sm:$0xff] }
 0xb7b   :  { %18091 = vst [vmem:[#allocation114_spill] sm:$0xff] %v14906_v60  ;;  %v14963_v47 = vadd.f32 %v14740_v56, %v5290_v25  ;;  %v14966_v28 = vadd.f32 %v14729_v30, %v5291_v37  ;;  %v14969_v24 = vadd.f32 %v14740_v56, %v5292_v45  ;;  %v5230_v55 = vmul.f32 %v14720_v5, %v18103_v1  ;;  %v18105_v17 = vld [vmem:[#allocation51_spill] sm:$0xff]  ;;  %v9526_v60 = vld [vmem:[%s17127_s9 + $0x4] sm:$0xf] }
 0xb7c   :  { %18092 = vst [vmem:[#allocation120_spill] sm:$0xff] %v14909_v61  ;;  %v5231_v31 = vmul.f32 %v14722_v33, %v18104_v32  ;;  %v5232_v40 = vmul.f32 %v14720_v5, %v18105_v17  ;;  %v5233_v54 = vmul.f32 %v14722_v33, %v18106_v12  ;;  %v14994_v17 = vmul.f32 %v14720_v5, %v18107_v50  ;;  %v9016_v50 = vld [vmem:[%s17127_s9 + $0x20] sm:$0xf]  ;;  %v9530_v32 = vld [vmem:[%s17127_s9 + $0x24] sm:$0xf] }
 0xb7d   :  { %18093 = vst [vmem:[#allocation125_spill] sm:$0xff] %v14912_v62  ;;  %v14980_v25 = vadd.f32 %v14740_v56, %v5230_v55  ;;  %v18111_v55 = vld [vmem:[#allocation31_spill] sm:$0xff]  ;;  %v9558_v53 = vld [vmem:[%s17127_s9 + $0x104] sm:$0xf]  ;;  %v5415_v20 = vmax.f32 %v14939_v22, 0.0 }
 0xb7e   :  { %18094 = vst [vmem:[#allocation126_spill] sm:$0xff] %v14915_v2  ;;  %v14983_v37 = vadd.f32 %v14729_v30, %v5231_v31  ;;  %v14986_v45 = vadd.f32 %v14740_v56, %v5232_v40  ;;  %v14989_v1 = vadd.f32 %v14729_v30, %v5233_v54  ;;  %v15002_v31 = vmul.f32 %v14720_v5, %v18111_v55  ;;  %v9144_v55 = vld [vmem:[%s17127_s9 + $0x120] sm:$0xf]  ;;  %v9564_v56 = vld [vmem:[%s17127_s9 + $0x12c] sm:$0xf0] }
 0xb7f   :  { %18095 = vst [vmem:[#allocation115_spill] sm:$0xff] %v14918_v10  ;;  %v9018_v54 = vld [vmem:[%s17127_s9 + $0x30] sm:$0xf0]  ;;  %v9562_v5 = vld [vmem:[%s17127_s9 + $0x124] sm:$0xf]  ;;  %v9145_v62 = vor.u32 %v9564_v56, %v9144_v55  ;;  %v18113_v14 = vmax.f32 %v14980_v25, 0.0 }
 0xb80   :  { %18096 = vst [vmem:[#allocation44_spill] sm:$0xff] %v14921_v63  ;;  %v9000_v30 = vld [vmem:[%s17127_s9] sm:$0xf]  ;;  %v9002_v61 = vld [vmem:[%s17127_s9 + $0x10] sm:$0xf0]  ;;  %v18117_v25 = vmax.f32 %v14831_v21, 0.0 }
 0xb81   :  { %18097 = vst [vmem:[#allocation45_spill] sm:$0xff] %v14924_v49  ;;  %v9120_v10 = vld [vmem:[%s17127_s9 + $0xe8] sm:$0xf]  ;;  %v9557_v63 = vld [vmem:[%s17127_s9 + $0xf4] sm:$0xf0]  ;;  %5938 = vmatpush.bf16.msrb.mxu3 %v9145_v62  ;;  %v18116_v62 = vmax.f32 %v14989_v1, 0.0 }
 0xb82   :  { %18098 = vst [vmem:[#allocation48_spill] sm:$0xff] %v14927_v23  ;;  %v9248_v2 = vld [vmem:[%s17127_s9 + $0x1e8] sm:$0xf]  ;;  %v9589_v49 = vld [vmem:[%s17127_s9 + $0x1f4] sm:$0xf0]  ;;  %v18123_v21 = vmax.f32 %v14846_v13, 0.0 }
 0xb83   :  { %18099 = vst [vmem:[#allocation46_spill] sm:$0xff] %v14930_v8  ;;  %v9021_v8 = vor.u32 %v9530_v32, %v9018_v54  ;;  %v9555_v40 = vld [vmem:[%s17127_s9 + $0xec] sm:$0xf]  ;;  %v9122_v56 = vld [vmem:[%s17127_s9 + $0xf8] sm:$0xf0]  ;;  %v18114_v32 = vmax.f32 %v14986_v45, 0.0  ;;  %v9249_v54 = vor.u32 %v9589_v49, %v9248_v2 }
 0xb84   :  { %18100 = vst [vmem:[#allocation53_spill] sm:$0xff] %v14933_v46  ;;  %v9587_v55 = vld [vmem:[%s17127_s9 + $0x1ec] sm:$0xf]  ;;  %v9125_v46 = vor.u32 %v9555_v40, %v9122_v56  ;;  %v18118_v45 = vmax.f32 %v14837_v15, 0.0  ;;  %v5422_v2 = vmax.f32 %v14960_v48, 0.0  ;;  %v18124_v15 = vmax.f32 %v14852_v3, 0.0 }
 0xb85   :  { %18101 = vst [vmem:[#allocation54_spill] sm:$0xff] %v14936_v39  ;;  %v15127_v39 = vpack.c.bf16 %v18114_v32, %v18113_v14  ;;  %6027 = vmatpush.bf16.msrb.mxu0 %v9021_v8  ;;  %v18122_v8 = vmax.f32 %v14849_v43, 0.0  ;;  %v18128_v43 = vmax.f32 %v14864_v59, 0.0  ;;  %v5423_v48 = vmax.f32 %v14963_v47, 0.0  ;;  %v9234_v22 = vld [vmem:[%s17127_s9 + $0x1d8] sm:$0xf0] }
 0xb86   :  { %18102 = vst [vmem:[#allocation58_spill] sm:$0xff] %v14969_v24  ;;  %v18109_v24 = vld [vmem:[#allocation30_spill] sm:$0xff]  ;;  %v15139_v14 = vpack.c.bf16 %v18118_v45, %v18117_v25  ;;  %v18129_v13 = vmax.f32 %v14867_v51, 0.0  ;;  %v18130_v3 = vmax.f32 %v14873_v11, 0.0  ;;  %v18134_v59 = vmax.f32 %v14885_v16, 0.0 }
 0xb87   :  { %18108 = vst [vmem:[#allocation63_spill] sm:$0xff] %v14994_v17  ;;  %v14998_v12 = vmul.f32 %v14722_v33, %v18109_v24  ;;  %v9532_v24 = vld [vmem:[%s17127_s9 + $0x2c] sm:$0xf0]  ;;  %v5424_v47 = vmax.f32 %v14966_v28, 0.0  ;;  %v18135_v51 = vmax.f32 %v14882_v26, 0.0  ;;  %v18136_v11 = vmax.f32 %v14888_v52, 0.0 }
 0xb88   :  { %18112 = vst [vmem:[#allocation67_spill] sm:$0xff] %v15002_v31  ;;  %v9146_v31 = vld [vmem:[%s17127_s9 + $0x130] sm:$0xf0]  ;;  %v9528_v17 = vld [vmem:[%s17127_s9 + $0xc] sm:$0xf0]  ;;  %v9017_v23 = vor.u32 %v9532_v24, %v9016_v50  ;;  %v15177_v1 = vpack.c.bf16 %v18130_v3, %v18129_v13  ;;  %v18159_v13 = vld [vmem:[#allocation45_spill] sm:$0xff] }
 0xb89   :  { %18110 = vst [vmem:[#allocation60_spill] sm:$0xff] %v14998_v12  ;;  %v9560_v33 = vld [vmem:[%s17127_s9 + $0x10c] sm:$0xf0]  ;;  %v9130_v12 = vld [vmem:[%s17127_s9 + $0x110] sm:$0xf0]  ;;  %v9149_v34 = vor.u32 %v9562_v5, %v9146_v31  ;;  %v9001_v50 = vor.u32 %v9528_v17, %v9000_v30  ;;  %v5421_v31 = vmax.f32 %v14957_v44, 0.0  ;;  %v9005_v30 = vor.u32 %v9526_v60, %v9002_v61 }
 0xb8a   :  { %5849 = vmatpush.bf16.msrb.mxu2 %v9017_v23  ;;  %v9129_v24 = vor.u32 %v9560_v33, %v9128_v27  ;;  %v9250_v5 = vld [vmem:[%s17127_s9 + $0x1f8] sm:$0xf0]  ;;  %v9133_v33 = vor.u32 %v9558_v53, %v9130_v12  ;;  %v18115_v27 = vmax.f32 %v14983_v37, 0.0  ;;  %v9121_v17 = vor.u32 %v9557_v63, %v9120_v10 }
 0xb8b   :  { %6116 = vmatpush.bf16.msrb.mxu1 %v9149_v34  ;;  %v9253_v44 = vor.u32 %v9587_v55, %v9250_v5  ;;  %v18119_v34 = vmax.f32 %v14834_v29, 0.0  ;;  %v18120_v53 = vmax.f32 %v14840_v42, 0.0  ;;  %v18121_v61 = vmax.f32 %v14843_v18, 0.0  ;;  %6028 = vmatpush.bf16.msrb.mxu0 %v9005_v30  ;;  %v18145_v26 = vld [vmem:[#allocation119_spill] sm:$0xff]  ;;  %v18147_v30 = vld [vmem:[#allocation120_spill] sm:$0xff] }
 0xb8c   :  { %v15133_v23 = vpack.c.bf16 %v18116_v62, %v18115_v27  ;;  %5939 = vmatpush.bf16.msrb.mxu3 %v9129_v24  ;;  %v15158_v63 = vpack.c.bf16 %v18124_v15, %v18123_v21  ;;  %v18125_v29 = vmax.f32 %v14855_v7, 0.0  ;;  %v18126_v42 = vmax.f32 %v14861_v0, 0.0  ;;  %v18142_v24 = vld [vmem:[#allocation122_spill] sm:$0xff]  ;;  %v9104_v15 = vld [vmem:[%s17127_s9 + $0xc8] sm:$0xf] }
 0xb8d   :  { %v15145_v60 = vpack.c.bf16 %v18120_v53, %v18119_v34  ;;  %v15151_v10 = vpack.c.bf16 %v18122_v8, %v18121_v61  ;;  %v18127_v18 = vmax.f32 %v14858_v38, 0.0  ;;  %v18131_v7 = vmax.f32 %v14870_v57, 0.0  ;;  %v18144_v28 = vld [vmem:[#allocation58_spill] sm:$0xff]  ;;  %v18155_v61 = vld [vmem:[#allocation44_spill] sm:$0xff] }
 0xb8e   :  { %5850 = vmatpush.bf16.msrb.mxu2 %v9001_v50  ;;  %v15164_v49 = vpack.c.bf16 %v18126_v42, %v18125_v29  ;;  %v18132_v0 = vmax.f32 %v14876_v35, 0.0  ;;  %v18133_v38 = vmax.f32 %v14879_v9, 0.0  ;;  %v15196_v56 = vpack.c.bf16 %v18136_v11, %v18135_v51  ;;  %v18138_v35 = vld [vmem:[#allocation118_spill] sm:$0xff]  ;;  %v18140_v9 = vld [vmem:[#allocation95_spill] sm:$0xff]  ;;  %6029 = vmatmul.bf16.vlgmr.msrb.gmra.mxu0 %v15127_v39  ;;  %v9232_v42 = vld [vmem:[%s17127_s9 + $0x1c8] sm:$0xf] }
 0xb8f   :  { %v15170_v37 = vpack.c.bf16 %v18128_v43, %v18127_v18  ;;  %6117 = vmatpush.bf16.msrb.mxu1 %v9133_v33  ;;  %v18137_v57 = vmax.f32 %v14891_v36, 0.0  ;;  %v18139_v32 = vmax.f32 %v18138_v35, 0.0  ;;  %v18141_v16 = vmax.f32 %v18140_v9, 0.0  ;;  %5940 = vmatmul.bf16.vlgmr.msrb.gmra.mxu3 %v15133_v23  ;;  %v18149_v27 = vld [vmem:[#allocation114_spill] sm:$0xff]  ;;  %v9553_v29 = vld [vmem:[%s17127_s9 + $0xd4] sm:$0xf0] }
 0xb90   :  { %v15183_v12 = vpack.c.bf16 %v18132_v0, %v18131_v7  ;;  %v15189_v40 = vpack.c.bf16 %v18134_v59, %v18133_v38  ;;  %6288 = vmatpush.bf16.msra.mxu3 %v9249_v54  ;;  %v18143_v55 = vmax.f32 %v18142_v24, 0.0  ;;  %v5425_v54 = vmax.f32 %v18144_v28, 0.0  ;;  %v18153_v34 = vld [vmem:[#allocation126_spill] sm:$0xff]  ;;  %v18157_v18 = vld [vmem:[#allocation115_spill] sm:$0xff]  ;;  %v18161_v0 = vld [vmem:[#allocation48_spill] sm:$0xff]  ;;  %6377 = vmatpush.bf16.msra.mxu0 %v9125_v46 }
 0xb91   :  { %v15202_v50 = vpack.c.bf16 %v18139_v32, %v18137_v57  ;;  %5851 = vmatmul.bf16.vlgmr.msrb.gmra.mxu2 %v15127_v39  ;;  %v18146_v52 = vmax.f32 %v18145_v26, 0.0  ;;  %v18148_v36 = vmax.f32 %v18147_v30, 0.0  ;;  %v18150_v62 = vmax.f32 %v18149_v27, 0.0  ;;  %v18163_v59 = vld [vmem:[#allocation53_spill] sm:$0xff]  ;;  %v18165_v57 = vld [vmem:[#allocation46_spill] sm:$0xff] }
 0xb92   :  { %6199 = vmatpush.bf16.msra.mxu2 %v9121_v17  ;;  %v15208_v5 = vpack.c.bf16 %v18143_v55, %v18141_v16  ;;  %v18151_v17 = vld [vmem:[#allocation125_spill] sm:$0xff]  ;;  %v18154_v53 = vmax.f32 %v18153_v34, 0.0  ;;  %v18156_v8 = vmax.f32 %v18155_v61, 0.0  ;;  %6118 = vmatmul.bf16.vlgmr.msrb.gmra.mxu1 %v15133_v23  ;;  %v18158_v43 = vmax.f32 %v18157_v18, 0.0  ;;  %v18167_v32 = vld [vmem:[#allocation54_spill] sm:$0xff]  ;;  %v18175_v34 = vld [vmem:[#allocation43_spill] sm:$0xff] }
 0xb93   :  { %v15217_v33 = vpack.c.bf16 %v18148_v36, %v18146_v52  ;;  %v18152_v25 = vmax.f32 %v18151_v17, 0.0  ;;  %v18160_v3 = vmax.f32 %v18159_v13, 0.0  ;;  %v18162_v38 = vmax.f32 %v18161_v0, 0.0  ;;  %6466 = vmatpush.bf16.msra.mxu1 %v9253_v44  ;;  %v9585_v55 = vld [vmem:[%s17127_s9 + $0x1d4] sm:$0xf0]  ;;  %v18181_v13 = vld [vmem:[#allocation90_spill] sm:$0xff] }
 0xb94   :  { %v15229_v21 = vpack.c.bf16 %v18156_v8, %v18154_v53  ;;  %v18164_v51 = vmax.f32 %v18163_v59, 0.0  ;;  %v18166_v35 = vmax.f32 %v18165_v57, 0.0  ;;  %v18168_v9 = vmax.f32 %v18167_v32, 0.0  ;;  %v9551_v28 = vld [vmem:[%s17127_s9 + $0xcc] sm:$0xf]  ;;  %v18178_v18 = vld [vmem:[#allocation63_spill] sm:$0xff] }
 0xb95   :  { %v15223_v45 = vpack.c.bf16 %v18152_v25, %v18150_v62  ;;  %v15246_v7 = vpack.c.bf16 %v18160_v3, %v18158_v43  ;;  %v9105_v24 = vor.u32 %v9553_v29, %v9104_v15  ;;  %v9106_v26 = vld [vmem:[%s17127_s9 + $0xd8] sm:$0xf0]  ;;  %v18169_v52 = vmax.f32 %v14945_v41, 0.0  ;;  %v9583_v17 = vld [vmem:[%s17127_s9 + $0x1cc] sm:$0xf] }
 0xb96   :  { %v15252_v11 = vpack.c.bf16 %v18164_v51, %v18162_v38  ;;  %v15258_v16 = vpack.c.bf16 %v18168_v9, %v18166_v35  ;;  %v18170_v46 = vmax.f32 %v14942_v6, 0.0  ;;  %v18171_v44 = vmax.f32 %v14948_v4, 0.0  ;;  %v18174_v4 = vld [vmem:[#allocation55_spill] sm:$0xff]  ;;  %v18179_v43 = vld [vmem:[#allocation93_spill] sm:$0xff]  ;;  %v18184_v35 = vld [vmem:[#allocation42_spill] sm:$0xff] }
 0xb97   :  { %v15273_v30 = vpack.c.bf16 %v18169_v52, %v5415_v20  ;;  %v9233_v27 = vor.u32 %v9585_v55, %v9232_v42  ;;  %v9109_v62 = vor.u32 %v9551_v28, %v9106_v26  ;;  %v18172_v41 = vmax.f32 %v14951_v19, 0.0  ;;  %6200 = vmatpush.bf16.msra.mxu2 %v9105_v24  ;;  %v18176_v15 = vld [vmem:[#allocation91_spill] sm:$0xff]  ;;  %v18185_v9 = vld [vmem:[#allocation57_spill] sm:$0xff]  ;;  %v18187_v26 = vld [vmem:[#allocation32_spill] sm:$0xff] }
 0xb98   :  { %v15279_v36 = vpack.c.bf16 %v18171_v44, %v18170_v46  ;;  %v18173_v6 = vmax.f32 %v14954_v58, 0.0  ;;  %v5237_v53 = vmul.f32 %v18175_v34, %v18174_v4  ;;  %v9237_v61 = vor.u32 %v9583_v17, %v9234_v22  ;;  %v18183_v57 = vld [vmem:[#allocation59_spill] sm:$0xff]  ;;  %v18186_v55 = vld [vmem:[#allocation61_spill] sm:$0xff] }
 0xb99   :  { %v15289_v20 = vpack.c.bf16 %v5421_v31, %v18172_v41  ;;  %v15297_v8 = vpack.c.bf16 %v5425_v54, %v5423_v48  ;;  %v18177_v29 = vmax.f32 %v18176_v15, 0.0  ;;  %v5303_v19 = vadd.f32 %v18179_v43, %v18178_v18  ;;  %6289 = vmatpush.bf16.msra.mxu3 %v9233_v27  ;;  %v18180_v31 = vld [vmem:[#allocation60_spill] sm:$0xff]  ;;  %6378 = vmatpush.bf16.msra.mxu0 %v9109_v62  ;;  %v9549_v15 = vld [vmem:[%s17127_s9 + $0xb4] sm:$0xf0] }
 0xb9a   :  { %v15293_v25 = vpack.c.bf16 %v5422_v2, %v18173_v6  ;;  %v5304_v58 = vadd.f32 %v18181_v13, %v18180_v31  ;;  %v18182_v2 = vld [vmem:[#allocation67_spill] sm:$0xff]  ;;  %v5306_v0 = vadd.f32 %v18181_v13, %v5237_v53  ;;  %6467 = vmatpush.bf16.msra.mxu1 %v9237_v61  ;;  %v5238_v32 = vmul.f32 %v18184_v35, %v18183_v57  ;;  %v9088_v61 = vld [vmem:[%s17127_s9 + $0xa8] sm:$0xf]  ;;  %v9547_v31 = vld [vmem:[%s17127_s9 + $0xac] sm:$0xf] }
 0xb9b   :  { %v15301_v42 = vpack.c.bf16 %v18177_v29, %v5424_v47  ;;  %v5305_v3 = vadd.f32 %v18179_v43, %v18182_v2  ;;  %v5367_v48 = vmax.f32 %v5303_v19, 0.0  ;;  %v5239_v24 = vmul.f32 %v18175_v34, %v18185_v9  ;;  %v9216_v29 = vld [vmem:[%s17127_s9 + $0x1a8] sm:$0xf]  ;;  %v9581_v19 = vld [vmem:[%s17127_s9 + $0x1b4] sm:$0xf0] }
 0xb9c   :  { %v5368_v54 = vmax.f32 %v5304_v58, 0.0  ;;  %v5370_v59 = vmax.f32 %v5306_v0, 0.0  ;;  %v5240_v28 = vmul.f32 %v18184_v35, %v18186_v55  ;;  %v5241_v52 = vmul.f32 %v18175_v34, %v18187_v26  ;;  %v9090_v58 = vld [vmem:[%s17127_s9 + $0xb8] sm:$0xf0]  ;;  %v18188_v2 = vld [vmem:[#allocation33_spill] sm:$0xff] }
 0xb9d   :  { %v5369_v38 = vmax.f32 %v5305_v3, 0.0  ;;  %v5307_v46 = vadd.f32 %v18179_v43, %v5238_v32  ;;  %v5308_v44 = vadd.f32 %v18181_v13, %v5239_v24  ;;  %v9089_v18 = vor.u32 %v9549_v15, %v9088_v61  ;;  %v18190_v32 = vld [vmem:[#allocation35_spill] sm:$0xff]  ;;  %v18191_v24 = vld [vmem:[#allocation73_spill] sm:$0xff] }
 0xb9e   :  { %v15312_v51 = vpack.c.bf16 %v5370_v59, %v5368_v54  ;;  %v5309_v27 = vadd.f32 %v18179_v43, %v5240_v28  ;;  %v5310_v62 = vadd.f32 %v18181_v13, %v5241_v52  ;;  %v5242_v3 = vmul.f32 %v18184_v35, %v18188_v2  ;;  %v9579_v54 = vld [vmem:[%s17127_s9 + $0x1ac] sm:$0xf]  ;;  %v9577_v61 = vld [vmem:[%s17127_s9 + $0x194] sm:$0xf0] }
 0xb9f   :  { %v15310_v47 = vpack.c.bf16 %v5369_v38, %v5367_v48  ;;  %v5371_v17 = vmax.f32 %v5307_v46, 0.0  ;;  %v5372_v22 = vmax.f32 %v5308_v44, 0.0  ;;  %v9217_v0 = vor.u32 %v9581_v19, %v9216_v29  ;;  %v9218_v38 = vld [vmem:[%s17127_s9 + $0x1b8] sm:$0xf0]  ;;  %v18189_v59 = vld [vmem:[#allocation34_spill] sm:$0xff]  ;;  %6201 = vmatpush.bf16.msra.mxu2 %v9089_v18 }
 0xba0   :  { %5945 = vmatmul.bf16.gmra.mxu3 %v15312_v51  ;;  %v5373_v41 = vmax.f32 %v5309_v27, 0.0  ;;  %v5374_v6 = vmax.f32 %v5310_v62, 0.0  ;;  %v9093_v48 = vor.u32 %v9547_v31, %v9090_v58  ;;  %v5243_v57 = vmul.f32 %v18175_v34, %v18189_v59  ;;  %v9543_v15 = vld [vmem:[%s17127_s9 + $0x8c] sm:$0xf]  ;;  %v9074_v29 = vld [vmem:[%s17127_s9 + $0x98] sm:$0xf0] }
 0xba1   :  { %5856 = vmatmul.bf16.gmra.mxu2 %v15310_v47  ;;  %6034 = vmatmul.bf16.gmra.mxu0 %v15310_v47  ;;  %v5244_v9 = vmul.f32 %v18184_v35, %v18190_v32  ;;  %v5245_v55 = vmul.f32 %v18175_v34, %v18191_v24  ;;  %v9221_v28 = vor.u32 %v9579_v54, %v9218_v38  ;;  %v9575_v31 = vld [vmem:[%s17127_s9 + $0x18c] sm:$0xf]  ;;  %v9202_v58 = vld [vmem:[%s17127_s9 + $0x198] sm:$0xf0]  ;;  %v9573_v38 = vld [vmem:[%s17127_s9 + $0x174] sm:$0xf0] }
 0xba2   :  { %6123 = vmatmul.bf16.gmra.mxu1 %v15312_v51  ;;  %v15330_v4 = vpack.c.bf16 %v5373_v41, %v5371_v17  ;;  %v15332_v53 = vpack.c.bf16 %v5374_v6, %v5372_v22  ;;  %6290 = vmatpush.bf16.msra.mxu3 %v9217_v0  ;;  %v5311_v26 = vadd.f32 %v18179_v43, %v5242_v3  ;;  %v9200_v41 = vld [vmem:[%s17127_s9 + $0x188] sm:$0xf]  ;;  %v9541_v0 = vld [vmem:[%s17127_s9 + $0x74] sm:$0xf0]  ;;  %v9058_v32 = vld [vmem:[%s17127_s9 + $0x78] sm:$0xf0] }
 0xba3   :  { %6379 = vmatpush.bf16.msra.mxu0 %v9093_v48  ;;  %v5312_v52 = vadd.f32 %v18181_v13, %v5243_v57  ;;  %v5313_v46 = vadd.f32 %v18179_v43, %v5244_v9  ;;  %v5314_v44 = vadd.f32 %v18181_v13, %v5245_v55  ;;  %6468 = vmatpush.bf16.msra.mxu1 %v9221_v28  ;;  %v9072_v43 = vld [vmem:[%s17127_s9 + $0x88] sm:$0xf]  ;;  %v9545_v13 = vld [vmem:[%s17127_s9 + $0x94] sm:$0xf0]  ;;  %v9539_v57 = vld [vmem:[%s17127_s9 + $0x6c] sm:$0xf] }
 0xba4   :  { %v5375_v27 = vmax.f32 %v5311_v26, 0.0  ;;  %v9073_v6 = vor.u32 %v9545_v13, %v9072_v43  ;;  %v9201_v18 = vor.u32 %v9577_v61, %v9200_v41  ;;  %v9077_v19 = vor.u32 %v9543_v15, %v9074_v29  ;;  %v9056_v3 = vld [vmem:[%s17127_s9 + $0x68] sm:$0xf]  ;;  %v9571_v9 = vld [vmem:[%s17127_s9 + $0x16c] sm:$0xf] }
 0xba5   :  { %v5376_v62 = vmax.f32 %v5312_v52, 0.0  ;;  %v5377_v17 = vmax.f32 %v5313_v46, 0.0  ;;  %v5378_v35 = vmax.f32 %v5314_v44, 0.0  ;;  %v9205_v2 = vor.u32 %v9575_v31, %v9202_v58  ;;  %v9184_v48 = vld [vmem:[%s17127_s9 + $0x168] sm:$0xf] }
 0xba6   :  { %6202 = vmatpush.bf16.msra.mxu2 %v9073_v6  ;;  %6291 = vmatpush.bf16.msra.mxu3 %v9201_v18  ;;  %v9057_v54 = vor.u32 %v9541_v0, %v9056_v3  ;;  %v9185_v59 = vor.u32 %v9573_v38, %v9184_v48  ;;  %v9061_v24 = vor.u32 %v9539_v57, %v9058_v32  ;;  %v9186_v55 = vld [vmem:[%s17127_s9 + $0x178] sm:$0xf0]  ;;  %v9569_v41 = vld [vmem:[%s17127_s9 + $0x154] sm:$0xf0]  ;;  %v9535_v31 = vld [vmem:[%s17127_s9 + $0x4c] sm:$0xf] }
 0xba7   :  { %v15374_v22 = vpack.c.bf16 %v5377_v17, %v5375_v27  ;;  %v15376_v34 = vpack.c.bf16 %v5378_v35, %v5376_v62  ;;  %6380 = vmatpush.bf16.msra.mxu0 %v9077_v19  ;;  %6469 = vmatpush.bf16.msra.mxu1 %v9205_v2  ;;  %v9189_v28 = vor.u32 %v9571_v9, %v9186_v55  ;;  %v9040_v62 = vld [vmem:[%s17127_s9 + $0x48] sm:$0xf]  ;;  %v9537_v17 = vld [vmem:[%s17127_s9 + $0x54] sm:$0xf0]  ;;  %v9042_v58 = vld [vmem:[%s17127_s9 + $0x58] sm:$0xf0] }
 0xba8   :  { %v9168_v35 = vld [vmem:[%s17127_s9 + $0x148] sm:$0xf]  ;;  %v9041_v13 = vor.u32 %v9537_v17, %v9040_v62  ;;  %v9567_v2 = vld [vmem:[%s17127_s9 + $0x14c] sm:$0xf]  ;;  %v9045_v0 = vor.u32 %v9535_v31, %v9042_v58  ;;  %v9170_v48 = vld [vmem:[%s17127_s9 + $0x158] sm:$0xf0] }
 0xba9   :  { %v9169_v6 = vor.u32 %v9569_v41, %v9168_v35  ;;  %v9565_v31 = vld [vmem:[%s17127_s9 + $0x134] sm:$0xf0] }
 0xbaa   :  { %6203 = vmatpush.bf16.msra.mxu2 %v9057_v54  ;;  %6292 = vmatpush.bf16.msra.mxu3 %v9185_v59  ;;  %v9173_v54 = vor.u32 %v9567_v2, %v9170_v48 }
 0xbab   :  { %6381 = vmatpush.bf16.msra.mxu0 %v9061_v24  ;;  %6470 = vmatpush.bf16.msra.mxu1 %v9189_v28 }
 0xbae   :  { %6204 = vmatpush.bf16.msra.mxu2 %v9041_v13  ;;  %6293 = vmatpush.bf16.msra.mxu3 %v9169_v6  ;;  %v9024_v6 = vld [vmem:[%s17127_s9 + $0x28] sm:$0xf] }
 0xbaf   :  { %6382 = vmatpush.bf16.msra.mxu0 %v9045_v0  ;;  %6471 = vmatpush.bf16.msra.mxu1 %v9173_v54 }
 0xbb0   :  { %5950 = vmatmul.bf16.gmra.mxu3 %v15332_v53 }
 0xbb1   :  { %5861 = vmatmul.bf16.gmra.mxu2 %v15330_v4  ;;  %6039 = vmatmul.bf16.gmra.mxu0 %v15330_v4 }
 0xbb2   :  { %6128 = vmatmul.bf16.gmra.mxu1 %v15332_v53 }
 0xbc0   :  { %5955 = vmatmul.bf16.gmra.mxu3 %v15376_v34 }
 0xbc1   :  { %5866 = vmatmul.bf16.gmra.mxu2 %v15374_v22  ;;  %6044 = vmatmul.bf16.gmra.mxu0 %v15374_v22 }
 0xbc2   :  { %6133 = vmatmul.bf16.gmra.mxu1 %v15376_v34 }
 0xbd0   :  { %5960 = vmatmul.bf16.gmra.mxu3 %v15145_v60 }
 0xbd1   :  { %5871 = vmatmul.bf16.gmra.mxu2 %v15139_v14  ;;  %6049 = vmatmul.bf16.gmra.mxu0 %v15139_v14 }
 0xbd2   :  { %6138 = vmatmul.bf16.gmra.mxu1 %v15145_v60 }
 0xbe0   :  { %5965 = vmatmul.bf16.gmra.mxu3 %v15158_v63 }
 0xbe1   :  { %5876 = vmatmul.bf16.gmra.mxu2 %v15151_v10  ;;  %6054 = vmatmul.bf16.gmra.mxu0 %v15151_v10 }
 0xbe2   :  { %6143 = vmatmul.bf16.gmra.mxu1 %v15158_v63 }
 0xbf0   :  { %5970 = vmatmul.bf16.gmra.mxu3 %v15170_v37 }
 0xbf1   :  { %5881 = vmatmul.bf16.gmra.mxu2 %v15164_v49  ;;  %6059 = vmatmul.bf16.gmra.mxu0 %v15164_v49 }
 0xbf2   :  { %6148 = vmatmul.bf16.gmra.mxu1 %v15170_v37 }
 0xc00   :  { %5975 = vmatmul.bf16.gmra.mxu3 %v15183_v12 }
 0xc01   :  { %5886 = vmatmul.bf16.gmra.mxu2 %v15177_v1  ;;  %6064 = vmatmul.bf16.gmra.mxu0 %v15177_v1 }
 0xc02   :  { %6153 = vmatmul.bf16.gmra.mxu1 %v15183_v12 }
 0xc0b   :  { %v6030_v26 = vpop.f32.mrf.mxu0 }
 0xc0f   :  { %v6119_v52 = vpop.f32.mrf.mxu1 }
 0xc10   :  { %v15446_v46 = vadd.f32 %v6119_v52, %v6030_v26  ;;  %5980 = vmatmul.bf16.gmra.mxu3 %v15196_v56 }
 0xc11   :  { %5891 = vmatmul.bf16.gmra.mxu2 %v15189_v40  ;;  %6069 = vmatmul.bf16.gmra.mxu0 %v15189_v40 }
 0xc12   :  { %18192 = vst [vmem:[#allocation64_spill] sm:$0xff] %v15446_v46  ;;  %6158 = vmatmul.bf16.gmra.mxu1 %v15196_v56  ;;  %v5941_v27 = vpop.f32.mrf.mxu3 }
 0xc13   :  { %v6032_v61 = vpop.f32.mrf.mxu0 }
 0xc14   :  { %v5852_v44 = vpop.f32.mrf.mxu2 }
 0xc15   :  { %v15461_v43 = vadd.f32 %v5941_v27, %v5852_v44 }
 0xc17   :  { %18193 = vst [vmem:[#allocation65_spill] sm:$0xff] %v15461_v43  ;;  %v6121_v15 = vpop.f32.mrf.mxu1 }
 0xc18   :  { %v15466_v29 = vadd.f32 %v6121_v15, %v6032_v61  ;;  %v9533_v61 = vld [vmem:[%s17127_s9 + $0x34] sm:$0xf0]  ;;  %v9152_v15 = vld [vmem:[%s17127_s9 + $0x128] sm:$0xf] }
 0xc19   :  { %v9153_v58 = vor.u32 %v9565_v31, %v9152_v15 }
 0xc1a   :  { %18194 = vst [vmem:[#allocation100_spill] sm:$0xff] %v15466_v29  ;;  %v5943_v19 = vpop.f32.mrf.mxu3 }
 0xc1b   :  { %6294 = vmatpush.bf16.msra.mxu3 %v9153_v58 }
 0xc1c   :  { %v5854_v18 = vpop.f32.mrf.mxu2 }
 0xc1d   :  { %v15477_v3 = vadd.f32 %v5943_v19, %v5854_v18  ;;  %v9025_v19 = vor.u32 %v9533_v61, %v9024_v6 }
 0xc1e   :  { %v6035_v38 = vpop.f32.mrf.mxu0 }
 0xc1f   :  { %18195 = vst [vmem:[#allocation15_spill] sm:$0xff] %v15477_v3  ;;  %v6124_v59 = vpop.f32.mrf.mxu1  ;;  %6205 = vmatpush.bf16.msra.mxu2 %v9025_v19 }
 0xc20   :  { %v15482_v57 = vadd.f32 %v6124_v59, %v6035_v38  ;;  %5985 = vmatmul.bf16.gmra.mxu3 %v15208_v5  ;;  %v9531_v59 = vld [vmem:[%s17127_s9 + $0x2c] sm:$0xf] }
 0xc21   :  { %5896 = vmatmul.bf16.gmra.mxu2 %v15202_v50  ;;  %6074 = vmatmul.bf16.gmra.mxu0 %v15202_v50 }
 0xc22   :  { %18196 = vst [vmem:[#allocation103_spill] sm:$0xff] %v15482_v57  ;;  %6163 = vmatmul.bf16.gmra.mxu1 %v15208_v5 }
 0xc23   :  { %v5946_v9 = vpop.f32.mrf.mxu3 }
 0xc24   :  { %v5857_v32 = vpop.f32.mrf.mxu2 }
 0xc25   :  { %v15488_v24 = vadd.f32 %v5946_v9, %v5857_v32  ;;  %v9026_v32 = vld [vmem:[%s17127_s9 + $0x38] sm:$0xf0]  ;;  %v9563_v9 = vld [vmem:[%s17127_s9 + $0x12c] sm:$0xf] }
 0xc26   :  { %v6037_v55 = vpop.f32.mrf.mxu0 }
 0xc27   :  { %18197 = vst [vmem:[#allocation13_spill] sm:$0xff] %v15488_v24  ;;  %v6126_v28 = vpop.f32.mrf.mxu1 }
 0xc28   :  { %v15490_v26 = vadd.f32 %v6126_v28, %v6037_v55  ;;  %v9029_v28 = vor.u32 %v9531_v59, %v9026_v32 }
 0xc2a   :  { %18198 = vst [vmem:[#allocation106_spill] sm:$0xff] %v15490_v26  ;;  %6383 = vmatpush.bf16.msra.mxu0 %v9029_v28  ;;  %v9008_v28 = vld [vmem:[%s17127_s9 + $0x8] sm:$0xf] }
 0xc2b   :  { %v5948_v44 = vpop.f32.mrf.mxu3 }
 0xc2c   :  { %v5859_v52 = vpop.f32.mrf.mxu2 }
 0xc2d   :  { %v15492_v27 = vadd.f32 %v5948_v44, %v5859_v52  ;;  %v9154_v52 = vld [vmem:[%s17127_s9 + $0x138] sm:$0xf0] }
 0xc2e   :  { %v6040_v62 = vpop.f32.mrf.mxu0  ;;  %v9157_v44 = vor.u32 %v9563_v9, %v9154_v52  ;;  %v9529_v52 = vld [vmem:[%s17127_s9 + $0x14] sm:$0xf0] }
 0xc2f   :  { %18199 = vst [vmem:[#allocation12_spill] sm:$0xff] %v15492_v27  ;;  %v6129_v17 = vpop.f32.mrf.mxu1 }
 0xc30   :  { %v15494_v35 = vadd.f32 %v6129_v17, %v6040_v62  ;;  %5990 = vmatmul.bf16.gmra.mxu3 %v15223_v45  ;;  %6472 = vmatpush.bf16.msra.mxu1 %v9157_v44  ;;  %v9136_v44 = vld [vmem:[%s17127_s9 + $0x108] sm:$0xf] }
 0xc31   :  { %5901 = vmatmul.bf16.gmra.mxu2 %v15217_v33  ;;  %6079 = vmatmul.bf16.gmra.mxu0 %v15217_v33 }
 0xc32   :  { %18200 = vst [vmem:[#allocation16_spill] sm:$0xff] %v15494_v35  ;;  %6168 = vmatmul.bf16.gmra.mxu1 %v15223_v45 }
 0xc33   :  { %v5951_v41 = vpop.f32.mrf.mxu3 }
 0xc34   :  { %v5862_v13 = vpop.f32.mrf.mxu2 }
 0xc35   :  { %v15509_v18 = vadd.f32 %v5951_v41, %v5862_v13 }
 0xc36   :  { %v6042_v2 = vpop.f32.mrf.mxu0 }
 0xc37   :  { %18201 = vst [vmem:[#allocation17_spill] sm:$0xff] %v15509_v18  ;;  %v6131_v0 = vpop.f32.mrf.mxu1 }
 0xc38   :  { %v15514_v48 = vadd.f32 %v6131_v0, %v6042_v2 }
 0xc3a   :  { %18202 = vst [vmem:[#allocation104_spill] sm:$0xff] %v15514_v48 }
 0xc3b   :  { %v5953_v38 = vpop.f32.mrf.mxu3 }
 0xc3c   :  { %v5864_v54 = vpop.f32.mrf.mxu2 }
 0xc3d   :  { %v15525_v55 = vadd.f32 %v5953_v38, %v5864_v54 }
 0xc3e   :  { %v6045_v62 = vpop.f32.mrf.mxu0 }
 0xc3f   :  { %18203 = vst [vmem:[#allocation18_spill] sm:$0xff] %v15525_v55  ;;  %v6134_v17 = vpop.f32.mrf.mxu1 }
 0xc40   :  { %v15530_v13 = vadd.f32 %v6134_v17, %v6045_v62  ;;  %5995 = vmatmul.bf16.gmra.mxu3 %v15246_v7  ;;  %v9009_v17 = vor.u32 %v9529_v52, %v9008_v28 }
 0xc41   :  { %5906 = vmatmul.bf16.gmra.mxu2 %v15229_v21  ;;  %6084 = vmatmul.bf16.gmra.mxu0 %v15229_v21 }
 0xc42   :  { %18204 = vst [vmem:[#allocation14_spill] sm:$0xff] %v15530_v13  ;;  %6173 = vmatmul.bf16.gmra.mxu1 %v15246_v7  ;;  %6206 = vmatpush.bf16.msra.mxu2 %v9009_v17 }
 0xc43   :  { %v5956_v6 = vpop.f32.mrf.mxu3 }
 0xc44   :  { %v5867_v41 = vpop.f32.mrf.mxu2 }
 0xc45   :  { %v15536_v61 = vadd.f32 %v5956_v6, %v5867_v41  ;;  %v9561_v41 = vld [vmem:[%s17127_s9 + $0x114] sm:$0xf0] }
 0xc46   :  { %v6047_v15 = vpop.f32.mrf.mxu0  ;;  %v9137_v6 = vor.u32 %v9561_v41, %v9136_v44  ;;  %v9138_v44 = vld [vmem:[%s17127_s9 + $0x118] sm:$0xf0] }
 0xc47   :  { %18205 = vst [vmem:[#allocation19_spill] sm:$0xff] %v15536_v61  ;;  %v6136_v19 = vpop.f32.mrf.mxu1 }
 0xc48   :  { %v15538_v31 = vadd.f32 %v6136_v19, %v6047_v15  ;;  %6295 = vmatpush.bf16.msra.mxu3 %v9137_v6 }
 0xc4a   :  { %18206 = vst [vmem:[#allocation108_spill] sm:$0xff] %v15538_v31 }
 0xc4b   :  { %v5958_v2 = vpop.f32.mrf.mxu3 }
 0xc4c   :  { %v5869_v58 = vpop.f32.mrf.mxu2 }
 0xc4d   :  { %v15540_v0 = vadd.f32 %v5958_v2, %v5869_v58 }
 0xc4e   :  { %v6050_v54 = vpop.f32.mrf.mxu0 }
 0xc4f   :  { %18207 = vst [vmem:[#allocation110_spill] sm:$0xff] %v15540_v0  ;;  %v6139_v38 = vpop.f32.mrf.mxu1 }
 0xc50   :  { %v15542_v59 = vadd.f32 %v6139_v38, %v6050_v54  ;;  %6000 = vmatmul.bf16.gmra.mxu3 %v15258_v16  ;;  %v9527_v38 = vld [vmem:[%s17127_s9 + $0xc] sm:$0xf] }
 0xc51   :  { %5911 = vmatmul.bf16.gmra.mxu2 %v15252_v11  ;;  %6089 = vmatmul.bf16.gmra.mxu0 %v15252_v11 }
 0xc52   :  { %18208 = vst [vmem:[#allocation113_spill] sm:$0xff] %v15542_v59  ;;  %6178 = vmatmul.bf16.gmra.mxu1 %v15258_v16 }
 0xc53   :  { %v5961_v9 = vpop.f32.mrf.mxu3 }
 0xc54   :  { %v5872_v32 = vpop.f32.mrf.mxu2 }
 0xc55   :  { %v15557_v62 = vadd.f32 %v5961_v9, %v5872_v32  ;;  %v9010_v32 = vld [vmem:[%s17127_s9 + $0x18] sm:$0xf0]  ;;  %v9559_v9 = vld [vmem:[%s17127_s9 + $0x10c] sm:$0xf] }
 0xc56   :  { %v6052_v15 = vpop.f32.mrf.mxu0  ;;  %v9013_v52 = vor.u32 %v9527_v38, %v9010_v32  ;;  %v9141_v17 = vor.u32 %v9559_v9, %v9138_v44 }
 0xc57   :  { %18209 = vst [vmem:[#allocation124_spill] sm:$0xff] %v15557_v62  ;;  %v6141_v19 = vpop.f32.mrf.mxu1 }
 0xc58   :  { %v15562_v58 = vadd.f32 %v6141_v19, %v6052_v15  ;;  %6384 = vmatpush.bf16.msra.mxu0 %v9013_v52  ;;  %6473 = vmatpush.bf16.msra.mxu1 %v9141_v17 }
 0xc5a   :  { %18210 = vst [vmem:[#allocation105_spill] sm:$0xff] %v15562_v58 }
 0xc5b   :  { %v5963_v54 = vpop.f32.mrf.mxu3 }
 0xc5c   :  { %v5874_v2 = vpop.f32.mrf.mxu2 }
 0xc5d   :  { %v15573_v28 = vadd.f32 %v5963_v54, %v5874_v2 }
 0xc5e   :  { %v6055_v41 = vpop.f32.mrf.mxu0 }
 0xc5f   :  { %18211 = vst [vmem:[#allocation127_spill] sm:$0xff] %v15573_v28  ;;  %v6144_v6 = vpop.f32.mrf.mxu1 }
 0xc60   :  { %v15578_v15 = vadd.f32 %v6144_v6, %v6055_v41  ;;  %6005 = vmatmul.bf16.gmra.mxu3 %v15279_v36 }
 0xc61   :  { %5916 = vmatmul.bf16.gmra.mxu2 %v15273_v30  ;;  %6094 = vmatmul.bf16.gmra.mxu0 %v15273_v30 }
 0xc62   :  { %18212 = vst [vmem:[#allocation112_spill] sm:$0xff] %v15578_v15  ;;  %6183 = vmatmul.bf16.gmra.mxu1 %v15279_v36 }
 0xc63   :  { %v5966_v2 = vpop.f32.mrf.mxu3 }
 0xc64   :  { %v5877_v19 = vpop.f32.mrf.mxu2 }
 0xc65   :  { %v15584_v54 = vadd.f32 %v5966_v2, %v5877_v19 }
 0xc66   :  { %v6057_v38 = vpop.f32.mrf.mxu0 }
 0xc67   :  { %18213 = vst [vmem:[#allocation123_spill] sm:$0xff] %v15584_v54  ;;  %v6146_v32 = vpop.f32.mrf.mxu1 }
 0xc68   :  { %v15586_v9 = vadd.f32 %v6146_v32, %v6057_v38 }
 0xc6a   :  { %18214 = vst [vmem:[#allocation128_spill] sm:$0xff] %v15586_v9 }
 0xc6b   :  { %v5968_v44 = vpop.f32.mrf.mxu3 }
 0xc6c   :  { %v5879_v52 = vpop.f32.mrf.mxu2 }
 0xc6d   :  { %v15588_v41 = vadd.f32 %v5968_v44, %v5879_v52 }
 0xc6e   :  { %v6060_v17 = vpop.f32.mrf.mxu0 }
 0xc6f   :  { %18215 = vst [vmem:[#allocation47_spill] sm:$0xff] %v15588_v41  ;;  %v6149_v6 = vpop.f32.mrf.mxu1 }
 0xc70   :  { %v15590_v28 = vadd.f32 %v6149_v6, %v6060_v17  ;;  %6010 = vmatmul.bf16.gmra.mxu3 %v15293_v25 }
 0xc71   :  { %5921 = vmatmul.bf16.gmra.mxu2 %v15289_v20  ;;  %6099 = vmatmul.bf16.gmra.mxu0 %v15289_v20 }
 0xc72   :  { %18216 = vst [vmem:[#allocation49_spill] sm:$0xff] %v15590_v28  ;;  %6188 = vmatmul.bf16.gmra.mxu1 %v15293_v25 }
 0xc73   :  { %v5971_v2 = vpop.f32.mrf.mxu3 }
 0xc74   :  { %v5882_v19 = vpop.f32.mrf.mxu2 }
 0xc75   :  { %v15596_v38 = vadd.f32 %v5971_v2, %v5882_v19 }
 0xc76   :  { %v6062_v32 = vpop.f32.mrf.mxu0 }
 0xc77   :  { %18217 = vst [vmem:[#allocation52_spill] sm:$0xff] %v15596_v38  ;;  %v6151_v54 = vpop.f32.mrf.mxu1 }
 0xc78   :  { %v15598_v52 = vadd.f32 %v6151_v54, %v6062_v32 }
 0xc7a   :  { %18218 = vst [vmem:[#allocation62_spill] sm:$0xff] %v15598_v52 }
 0xc7b   :  { %v5973_v41 = vpop.f32.mrf.mxu3 }
 0xc7c   :  { %v5884_v44 = vpop.f32.mrf.mxu2 }
 0xc7d   :  { %v15600_v17 = vadd.f32 %v5973_v41, %v5884_v44 }
 0xc7e   :  { %v6065_v6 = vpop.f32.mrf.mxu0 }
 0xc7f   :  { %18219 = vst [vmem:[#allocation71_spill] sm:$0xff] %v15600_v17  ;;  %v6154_v62 = vpop.f32.mrf.mxu1 }
 0xc80   :  { %v15602_v28 = vadd.f32 %v6154_v62, %v6065_v6  ;;  %6015 = vmatmul.bf16.gmra.mxu3 %v15301_v42 }
 0xc81   :  { %5926 = vmatmul.bf16.gmra.mxu2 %v15297_v8  ;;  %6104 = vmatmul.bf16.gmra.mxu0 %v15297_v8 }
 0xc82   :  { %18220 = vst [vmem:[#allocation70_spill] sm:$0xff] %v15602_v28  ;;  %6193 = vmatmul.bf16.gmra.mxu1 %v15301_v42 }
 0xc83   :  { %v5976_v2 = vpop.f32.mrf.mxu3 }
 0xc84   :  { %v5887_v19 = vpop.f32.mrf.mxu2 }
 0xc85   :  { %v15608_v54 = vadd.f32 %v5976_v2, %v5887_v19 }
 0xc86   :  { %v6067_v32 = vpop.f32.mrf.mxu0 }
 0xc87   :  { %18221 = vst [vmem:[#allocation66_spill] sm:$0xff] %v15608_v54  ;;  %v6156_v38 = vpop.f32.mrf.mxu1 }
 0xc88   :  { %v15610_v41 = vadd.f32 %v6156_v38, %v6067_v32 }
 0xc8a   :  { %18222 = vst [vmem:[#allocation68_spill] sm:$0xff] %v15610_v41 }
 0xc8b   :  { %v5978_v17 = vpop.f32.mrf.mxu3 }
 0xc8c   :  { %v5889_v44 = vpop.f32.mrf.mxu2 }
 0xc8d   :  { %v15612_v62 = vadd.f32 %v5978_v17, %v5889_v44 }
 0xc8e   :  { %v6070_v6 = vpop.f32.mrf.mxu0 }
 0xc8f   :  { %18223 = vst [vmem:[#allocation69_spill] sm:$0xff] %v15612_v62  ;;  %v6159_v28 = vpop.f32.mrf.mxu1 }
 0xc90   :  { %v15614_v52 = vadd.f32 %v6159_v28, %v6070_v6  ;;  %6296 = vmatmul.bf16.vlgmr.msra.gmra.mxu3 %v15133_v23 }
 0xc91   :  { %6207 = vmatmul.bf16.vlgmr.msra.gmra.mxu2 %v15127_v39  ;;  %6385 = vmatmul.bf16.vlgmr.msra.gmra.mxu0 %v15127_v39 }
 0xc92   :  { %18224 = vst [vmem:[#allocation111_spill] sm:$0xff] %v15614_v52  ;;  %6474 = vmatmul.bf16.vlgmr.msra.gmra.mxu1 %v15133_v23 }
 0xc93   :  { %v5981_v2 = vpop.f32.mrf.mxu3 }
 0xc94   :  { %v5892_v19 = vpop.f32.mrf.mxu2 }
 0xc95   :  { %v15620_v38 = vadd.f32 %v5981_v2, %v5892_v19 }
 0xc96   :  { %v6072_v32 = vpop.f32.mrf.mxu0 }
 0xc97   :  { %18225 = vst [vmem:[#allocation76_spill] sm:$0xff] %v15620_v38  ;;  %v6161_v54 = vpop.f32.mrf.mxu1 }
 0xc98   :  { %v15622_v17 = vadd.f32 %v6161_v54, %v6072_v32 }
 0xc9a   :  { %18226 = vst [vmem:[#allocation74_spill] sm:$0xff] %v15622_v17 }
 0xc9b   :  { %v5983_v62 = vpop.f32.mrf.mxu3 }
 0xc9c   :  { %v5894_v44 = vpop.f32.mrf.mxu2 }
 0xc9d   :  { %v15624_v28 = vadd.f32 %v5983_v62, %v5894_v44 }
 0xc9e   :  { %v6075_v6 = vpop.f32.mrf.mxu0 }
 0xc9f   :  { %18227 = vst [vmem:[#allocation81_spill] sm:$0xff] %v15624_v28  ;;  %v6164_v52 = vpop.f32.mrf.mxu1 }
 0xca0   :  { %v15626_v41 = vadd.f32 %v6164_v52, %v6075_v6  ;;  %6301 = vmatmul.bf16.gmra.mxu3 %v15312_v51 }
 0xca1   :  { %6212 = vmatmul.bf16.gmra.mxu2 %v15310_v47  ;;  %6390 = vmatmul.bf16.gmra.mxu0 %v15310_v47 }
 0xca2   :  { %18228 = vst [vmem:[#allocation78_spill] sm:$0xff] %v15626_v41  ;;  %6479 = vmatmul.bf16.gmra.mxu1 %v15312_v51 }
 0xca3   :  { %v5986_v23 = vpop.f32.mrf.mxu3 }
 0xca4   :  { %v5897_v39 = vpop.f32.mrf.mxu2 }
 0xca5   :  { %v15632_v54 = vadd.f32 %v5986_v23, %v5897_v39 }
 0xca6   :  { %v6077_v19 = vpop.f32.mrf.mxu0 }
 0xca7   :  { %18229 = vst [vmem:[#allocation72_spill] sm:$0xff] %v15632_v54  ;;  %v6166_v2 = vpop.f32.mrf.mxu1 }
 0xca8   :  { %v15634_v62 = vadd.f32 %v6166_v2, %v6077_v19 }
 0xcaa   :  { %18230 = vst [vmem:[#allocation85_spill] sm:$0xff] %v15634_v62 }
 0xcab   :  { %v5988_v44 = vpop.f32.mrf.mxu3 }
 0xcac   :  { %v5899_v32 = vpop.f32.mrf.mxu2 }
 0xcad   :  { %v15636_v52 = vadd.f32 %v5988_v44, %v5899_v32 }
 0xcae   :  { %v6080_v6 = vpop.f32.mrf.mxu0 }
 0xcaf   :  { %18231 = vst [vmem:[#allocation82_spill] sm:$0xff] %v15636_v52  ;;  %v6169_v28 = vpop.f32.mrf.mxu1 }
 0xcb0   :  { %v15638_v38 = vadd.f32 %v6169_v28, %v6080_v6  ;;  %6306 = vmatmul.bf16.gmra.mxu3 %v15332_v53 }
 0xcb1   :  { %6217 = vmatmul.bf16.gmra.mxu2 %v15330_v4  ;;  %6395 = vmatmul.bf16.gmra.mxu0 %v15330_v4 }
 0xcb2   :  { %18232 = vst [vmem:[#allocation89_spill] sm:$0xff] %v15638_v38  ;;  %6484 = vmatmul.bf16.gmra.mxu1 %v15332_v53 }
 0xcb3   :  { %v5991_v51 = vpop.f32.mrf.mxu3 }
 0xcb4   :  { %v5902_v47 = vpop.f32.mrf.mxu2 }
 0xcb5   :  { %v15644_v39 = vadd.f32 %v5991_v51, %v5902_v47 }
 0xcb6   :  { %v6082_v23 = vpop.f32.mrf.mxu0 }
 0xcb7   :  { %18233 = vst [vmem:[#allocation88_spill] sm:$0xff] %v15644_v39  ;;  %v6171_v19 = vpop.f32.mrf.mxu1 }
 0xcb8   :  { %v15646_v2 = vadd.f32 %v6171_v19, %v6082_v23 }
 0xcba   :  { %18234 = vst [vmem:[#allocation94_spill] sm:$0xff] %v15646_v2 }
 0xcbb   :  { %v5993_v44 = vpop.f32.mrf.mxu3 }
 0xcbc   :  { %v5904_v32 = vpop.f32.mrf.mxu2 }
 0xcbd   :  { %v15648_v28 = vadd.f32 %v5993_v44, %v5904_v32 }
 0xcbe   :  { %v6085_v6 = vpop.f32.mrf.mxu0 }
 0xcbf   :  { %18235 = vst [vmem:[#allocation92_spill] sm:$0xff] %v15648_v28  ;;  %v6174_v52 = vpop.f32.mrf.mxu1 }
 0xcc0   :  { %v15650_v54 = vadd.f32 %v6174_v52, %v6085_v6  ;;  %6311 = vmatmul.bf16.gmra.mxu3 %v15376_v34 }
 0xcc1   :  { %6222 = vmatmul.bf16.gmra.mxu2 %v15374_v22  ;;  %6400 = vmatmul.bf16.gmra.mxu0 %v15374_v22 }
 0xcc2   :  { %18236 = vst [vmem:[#allocation97_spill] sm:$0xff] %v15650_v54  ;;  %6489 = vmatmul.bf16.gmra.mxu1 %v15376_v34 }
 0xcc3   :  { %v5996_v53 = vpop.f32.mrf.mxu3 }
 0xcc4   :  { %v5907_v4 = vpop.f32.mrf.mxu2 }
 0xcc5   :  { %v15656_v47 = vadd.f32 %v5996_v53, %v5907_v4 }
 0xcc6   :  { %v6087_v51 = vpop.f32.mrf.mxu0 }
 0xcc7   :  { %18237 = vst [vmem:[#allocation96_spill] sm:$0xff] %v15656_v47  ;;  %v6176_v23 = vpop.f32.mrf.mxu1 }
 0xcc8   :  { %v15658_v19 = vadd.f32 %v6176_v23, %v6087_v51 }
 0xcca   :  { %18238 = vst [vmem:[#allocation99_spill] sm:$0xff] %v15658_v19 }
 0xccb   :  { %v5998_v44 = vpop.f32.mrf.mxu3 }
 0xccc   :  { %v5909_v32 = vpop.f32.mrf.mxu2 }
 0xccd   :  { %v15660_v52 = vadd.f32 %v5998_v44, %v5909_v32 }
 0xcce   :  { %v6090_v6 = vpop.f32.mrf.mxu0 }
 0xccf   :  { %18239 = vst [vmem:[#allocation98_spill] sm:$0xff] %v15660_v52  ;;  %v6179_v28 = vpop.f32.mrf.mxu1 }
 0xcd0   :  { %v15662_v39 = vadd.f32 %v6179_v28, %v6090_v6  ;;  %6316 = vmatmul.bf16.gmra.mxu3 %v15145_v60 }
 0xcd1   :  { %6227 = vmatmul.bf16.gmra.mxu2 %v15139_v14  ;;  %6405 = vmatmul.bf16.gmra.mxu0 %v15139_v14 }
 0xcd2   :  { %18240 = vst [vmem:[#allocation102_spill] sm:$0xff] %v15662_v39  ;;  %6494 = vmatmul.bf16.gmra.mxu1 %v15145_v60 }
 0xcd3   :  { %v6001_v34 = vpop.f32.mrf.mxu3 }
 0xcd4   :  { %v5912_v22 = vpop.f32.mrf.mxu2 }
 0xcd5   :  { %v15668_v4 = vadd.f32 %v6001_v34, %v5912_v22 }
 0xcd6   :  { %v6092_v53 = vpop.f32.mrf.mxu0 }
 0xcd7   :  { %18241 = vst [vmem:[#allocation101_spill] sm:$0xff] %v15668_v4  ;;  %v6181_v51 = vpop.f32.mrf.mxu1 }
 0xcd8   :  { %v15670_v23 = vadd.f32 %v6181_v51, %v6092_v53 }
 0xcda   :  { %18242 = vst [vmem:[#allocation107_spill] sm:$0xff] %v15670_v23 }
 0xcdb   :  { %v6003_v44 = vpop.f32.mrf.mxu3 }
 0xcdc   :  { %v5914_v32 = vpop.f32.mrf.mxu2 }
 0xcdd   :  { %v15672_v28 = vadd.f32 %v6003_v44, %v5914_v32 }
 0xcde   :  { %v6095_v6 = vpop.f32.mrf.mxu0 }
 0xcdf   :  { %18243 = vst [vmem:[#allocation121_spill] sm:$0xff] %v15672_v28  ;;  %v6184_v52 = vpop.f32.mrf.mxu1 }
 0xce0   :  { %v15674_v47 = vadd.f32 %v6184_v52, %v6095_v6  ;;  %6321 = vmatmul.bf16.gmra.mxu3 %v15158_v63 }
 0xce1   :  { %6232 = vmatmul.bf16.gmra.mxu2 %v15151_v10  ;;  %6410 = vmatmul.bf16.gmra.mxu0 %v15151_v10 }
 0xce2   :  { %18244 = vst [vmem:[#allocation117_spill] sm:$0xff] %v15674_v47  ;;  %6499 = vmatmul.bf16.gmra.mxu1 %v15158_v63 }
 0xce3   :  { %v6006_v60 = vpop.f32.mrf.mxu3 }
 0xce4   :  { %v5917_v14 = vpop.f32.mrf.mxu2 }
 0xce5   :  { %v15680_v22 = vadd.f32 %v6006_v60, %v5917_v14 }
 0xce6   :  { %v6097_v34 = vpop.f32.mrf.mxu0 }
 0xce7   :  { %18245 = vst [vmem:[#allocation24_spill] sm:$0xff] %v15680_v22  ;;  %v6186_v53 = vpop.f32.mrf.mxu1 }
 0xce8   :  { %v15682_v51 = vadd.f32 %v6186_v53, %v6097_v34 }
 0xcea   :  { %18246 = vst [vmem:[#allocation26_spill] sm:$0xff] %v15682_v51 }
 0xceb   :  { %v6008_v44 = vpop.f32.mrf.mxu3 }
 0xcec   :  { %v5919_v32 = vpop.f32.mrf.mxu2 }
 0xced   :  { %v15684_v52 = vadd.f32 %v6008_v44, %v5919_v32 }
 0xcee   :  { %v6100_v6 = vpop.f32.mrf.mxu0 }
 0xcef   :  { %18247 = vst [vmem:[#allocation25_spill] sm:$0xff] %v15684_v52  ;;  %v6189_v28 = vpop.f32.mrf.mxu1 }
 0xcf0   :  { %v15686_v4 = vadd.f32 %v6189_v28, %v6100_v6  ;;  %6326 = vmatmul.bf16.gmra.mxu3 %v15170_v37 }
 0xcf1   :  { %6237 = vmatmul.bf16.gmra.mxu2 %v15164_v49  ;;  %6415 = vmatmul.bf16.gmra.mxu0 %v15164_v49 }
 0xcf2   :  { %18248 = vst [vmem:[#allocation22_spill] sm:$0xff] %v15686_v4  ;;  %6504 = vmatmul.bf16.gmra.mxu1 %v15170_v37 }
 0xcf3   :  { %v6011_v63 = vpop.f32.mrf.mxu3 }
 0xcf4   :  { %v5922_v10 = vpop.f32.mrf.mxu2 }
 0xcf5   :  { %v15692_v14 = vadd.f32 %v6011_v63, %v5922_v10 }
 0xcf6   :  { %v6102_v60 = vpop.f32.mrf.mxu0 }
 0xcf7   :  { %18249 = vst [vmem:[#allocation56_spill] sm:$0xff] %v15692_v14  ;;  %v6191_v34 = vpop.f32.mrf.mxu1 }
 0xcf8   :  { %v15694_v53 = vadd.f32 %v6191_v34, %v6102_v60 }
 0xcfa   :  { %18250 = vst [vmem:[#allocation21_spill] sm:$0xff] %v15694_v53 }
 0xcfb   :  { %v6013_v44 = vpop.f32.mrf.mxu3 }
 0xcfc   :  { %v5924_v32 = vpop.f32.mrf.mxu2 }
 0xcfd   :  { %v15696_v28 = vadd.f32 %v6013_v44, %v5924_v32 }
 0xcfe   :  { %v6105_v6 = vpop.f32.mrf.mxu0 }
 0xcff   :  { %18251 = vst [vmem:[#allocation109_spill] sm:$0xff] %v15696_v28  ;;  %v6194_v52 = vpop.f32.mrf.mxu1 }
 0xd00   :  { %v15698_v22 = vadd.f32 %v6194_v52, %v6105_v6  ;;  %6331 = vmatmul.bf16.gmra.mxu3 %v15183_v12 }
 0xd01   :  { %6242 = vmatmul.bf16.gmra.mxu2 %v15177_v1  ;;  %6420 = vmatmul.bf16.gmra.mxu0 %v15177_v1 }
 0xd02   :  { %18252 = vst [vmem:[#allocation20_spill] sm:$0xff] %v15698_v22  ;;  %6509 = vmatmul.bf16.gmra.mxu1 %v15183_v12 }
 0xd03   :  { %v6016_v37 = vpop.f32.mrf.mxu3 }
 0xd04   :  { %v5927_v49 = vpop.f32.mrf.mxu2 }
 0xd05   :  { %v15704_v10 = vadd.f32 %v6016_v37, %v5927_v49 }
 0xd06   :  { %v6107_v63 = vpop.f32.mrf.mxu0 }
 0xd07   :  { %18253 = vst [vmem:[#allocation23_spill] sm:$0xff] %v15704_v10  ;;  %v6196_v60 = vpop.f32.mrf.mxu1 }
 0xd08   :  { %v15706_v34 = vadd.f32 %v6196_v60, %v6107_v63 }
 0xd0a   :  { %18254 = vst [vmem:[#allocation116_spill] sm:$0xff] %v15706_v34 }
 0xd0b   :  { %v6018_v44 = vpop.f32.mrf.mxu3 }
 0xd0c   :  { %v5929_v32 = vpop.f32.mrf.mxu2 }
 0xd0d   :  { %v15708_v52 = vadd.f32 %v6018_v44, %v5929_v32 }
 0xd0e   :  { %v6386_v6 = vpop.f32.mrf.mxu0 }
 0xd0f   :  { %18255 = vst [vmem:[#allocation77_spill] sm:$0xff] %v15708_v52  ;;  %v6475_v28 = vpop.f32.mrf.mxu1 }
 0xd10   :  { %v15710_v14 = vadd.f32 %v6475_v28, %v6386_v6  ;;  %6336 = vmatmul.bf16.gmra.mxu3 %v15196_v56 }
 0xd11   :  { %6247 = vmatmul.bf16.gmra.mxu2 %v15189_v40  ;;  %6425 = vmatmul.bf16.gmra.mxu0 %v15189_v40 }
 0xd12   :  { %18256 = vst [vmem:[#allocation75_spill] sm:$0xff] %v15710_v14  ;;  %6514 = vmatmul.bf16.gmra.mxu1 %v15196_v56 }
 0xd13   :  { %v6297_v12 = vpop.f32.mrf.mxu3 }
 0xd14   :  { %v6208_v1 = vpop.f32.mrf.mxu2 }
 0xd15   :  { %v15716_v49 = vadd.f32 %v6297_v12, %v6208_v1 }
 0xd16   :  { %v6388_v37 = vpop.f32.mrf.mxu0 }
 0xd17   :  { %18257 = vst [vmem:[#allocation79_spill] sm:$0xff] %v15716_v49  ;;  %v6477_v63 = vpop.f32.mrf.mxu1 }
 0xd18   :  { %v15718_v60 = vadd.f32 %v6477_v63, %v6388_v37 }
 0xd1a   :  { %18258 = vst [vmem:[#allocation36_spill] sm:$0xff] %v15718_v60 }
 0xd1b   :  { %v6299_v44 = vpop.f32.mrf.mxu3 }
 0xd1c   :  { %v6210_v32 = vpop.f32.mrf.mxu2 }
 0xd1d   :  { %v15720_v28 = vadd.f32 %v6299_v44, %v6210_v32 }
 0xd1e   :  { %v6391_v6 = vpop.f32.mrf.mxu0 }
 0xd1f   :  { %18259 = vst [vmem:[#allocation37_spill] sm:$0xff] %v15720_v28  ;;  %v6480_v14 = vpop.f32.mrf.mxu1 }
 0xd20   :  { %v15722_v52 = vadd.f32 %v6480_v14, %v6391_v6  ;;  %6341 = vmatmul.bf16.gmra.mxu3 %v15208_v5 }
 0xd21   :  { %6252 = vmatmul.bf16.gmra.mxu2 %v15202_v50  ;;  %6430 = vmatmul.bf16.gmra.mxu0 %v15202_v50 }
 0xd22   :  { %18260 = vst [vmem:[#allocation38_spill] sm:$0xff] %v15722_v52  ;;  %6519 = vmatmul.bf16.gmra.mxu1 %v15208_v5 }
 0xd23   :  { %v6302_v56 = vpop.f32.mrf.mxu3 }
 0xd24   :  { %v6213_v40 = vpop.f32.mrf.mxu2 }
 0xd25   :  { %v15728_v1 = vadd.f32 %v6302_v56, %v6213_v40  ;;  %v9597_v40 = vld [vmem:[%s17128_s10 + $0x38] sm:$0xff] }
 0xd26   :  { %v6393_v12 = vpop.f32.mrf.mxu0  ;;  %v9605_v56 = vld [vmem:[%s17128_s10 + $0x78] sm:$0xff]  ;;  %7799 = vmatpush.bf16.msrb.mxu2 %v9597_v40 }
 0xd27   :  { %18261 = vst [vmem:[#allocation39_spill] sm:$0xff] %v15728_v1  ;;  %v6482_v37 = vpop.f32.mrf.mxu1  ;;  %7888 = vmatpush.bf16.msrb.mxu3 %v9605_v56 }
 0xd28   :  { %v15730_v63 = vadd.f32 %v6482_v37, %v6393_v12 }
 0xd2a   :  { %18262 = vst [vmem:[#allocation80_spill] sm:$0xff] %v15730_v63 }
 0xd2b   :  { %v6304_v44 = vpop.f32.mrf.mxu3 }
 0xd2c   :  { %v6215_v32 = vpop.f32.mrf.mxu2 }
 0xd2d   :  { %v15732_v14 = vadd.f32 %v6304_v44, %v6215_v32  ;;  %v9613_v44 = vld [vmem:[%s17128_s10 + $0xb8] sm:$0xff] }
 0xd2e   :  { %v6396_v6 = vpop.f32.mrf.mxu0  ;;  %7977 = vmatpush.bf16.msrb.mxu0 %v9613_v44 }
 0xd2f   :  { %18263 = vst [vmem:[#allocation84_spill] sm:$0xff] %v15732_v14  ;;  %v6485_v49 = vpop.f32.mrf.mxu1 }
 0xd30   :  { %v15734_v28 = vadd.f32 %v6485_v49, %v6396_v6  ;;  %6346 = vmatmul.bf16.gmra.mxu3 %v15223_v45 }
 0xd31   :  { %6257 = vmatmul.bf16.gmra.mxu2 %v15217_v33  ;;  %6435 = vmatmul.bf16.gmra.mxu0 %v15217_v33 }
 0xd32   :  { %18264 = vst [vmem:[#allocation86_spill] sm:$0xff] %v15734_v28  ;;  %6524 = vmatmul.bf16.gmra.mxu1 %v15223_v45 }
 0xd33   :  { %v6307_v5 = vpop.f32.mrf.mxu3 }
 0xd34   :  { %v6218_v50 = vpop.f32.mrf.mxu2 }
 0xd35   :  { %v15746_v49 = vadd.f32 %v6307_v5, %v6218_v50  ;;  %v9621_v50 = vld [vmem:[%s17128_s10 + $0xf8] sm:$0xff] }
 0xd36   :  { %v6398_v12 = vpop.f32.mrf.mxu0  ;;  %8066 = vmatpush.bf16.msrb.mxu1 %v9621_v50  ;;  %v9596_v50 = vld [vmem:[%s17128_s10 + $0x30] sm:$0xff] }
 0xd37   :  { %18265 = vst [vmem:[#allocation83_spill] sm:$0xff] %v15746_v49  ;;  %v6487_v37 = vpop.f32.mrf.mxu1  ;;  %7800 = vmatpush.bf16.msrb.mxu2 %v9596_v50 }
 0xd38   :  { %v15748_v32 = vadd.f32 %v6487_v37, %v6398_v12 }
 0xd3a   :  { %18266 = vst [vmem:[#allocation40_spill] sm:$0xff] %v15748_v32 }
 0xd3b   :  { %v6309_v45 = vpop.f32.mrf.mxu3 }
 0xd3c   :  { %v6220_v33 = vpop.f32.mrf.mxu2 }
 0xd3d   :  { %v15753_v6 = vadd.f32 %v6309_v45, %v6220_v33 }
 0xd3e   :  { %v6401_v14 = vpop.f32.mrf.mxu0 }
 0xd3f   :  { %18267 = vst [vmem:[#allocation41_spill] sm:$0xff] %v15753_v6  ;;  %v6490_v1 = vpop.f32.mrf.mxu1 }
 0xd40   :  { %v15755_v28 = vadd.f32 %v6490_v1, %v6401_v14  ;;  %6351 = vmatmul.bf16.gmra.mxu3 %v15246_v7 }
 0xd41   :  { %6262 = vmatmul.bf16.gmra.mxu2 %v15229_v21  ;;  %6440 = vmatmul.bf16.gmra.mxu0 %v15229_v21 }
 0xd42   :  { %18268 = vst [vmem:[#allocation27_spill] sm:$0xff] %v15755_v28  ;;  %6529 = vmatmul.bf16.gmra.mxu1 %v15246_v7 }
 0xd43   :  { %v6312_v40 = vpop.f32.mrf.mxu3 }
 0xd44   :  { %v6223_v5 = vpop.f32.mrf.mxu2 }
 0xd45   :  { %v15764_v56 = vadd.f32 %v6312_v40, %v6223_v5  ;;  %v9604_v5 = vld [vmem:[%s17128_s10 + $0x70] sm:$0xff] }
 0xd46   :  { %v6403_v12 = vpop.f32.mrf.mxu0  ;;  %7889 = vmatpush.bf16.msrb.mxu3 %v9604_v5 }
 0xd47   :  { %18269 = vst [vmem:[#allocation50_spill] sm:$0xff] %v15764_v56  ;;  %v6492_v1 = vpop.f32.mrf.mxu1 }
 0xd48   :  { %v15766_v14 = vadd.f32 %v6492_v1, %v6403_v12  ;;  %v9612_v1 = vld [vmem:[%s17128_s10 + $0xb0] sm:$0xff] }
 0xd49   :  { %7978 = vmatpush.bf16.msrb.mxu0 %v9612_v1 }
 0xd4a   :  { %18270 = vst [vmem:[#allocation51_spill] sm:$0xff] %v15766_v14 }
 0xd4b   :  { %v6314_v33 = vpop.f32.mrf.mxu3 }
 0xd4c   :  { %v6225_v37 = vpop.f32.mrf.mxu2 }
 0xd4d   :  { %v15768_v45 = vadd.f32 %v6314_v33, %v6225_v37 }
 0xd4e   :  { %v6406_v44 = vpop.f32.mrf.mxu0 }
 0xd4f   :  { %18271 = vst [vmem:[#allocation28_spill] sm:$0xff] %v15768_v45  ;;  %v6495_v6 = vpop.f32.mrf.mxu1 }
 0xd50   :  { %v15770_v49 = vadd.f32 %v6495_v6, %v6406_v44  ;;  %6356 = vmatmul.bf16.gmra.mxu3 %v15258_v16 }
 0xd51   :  { %6267 = vmatmul.bf16.gmra.mxu2 %v15252_v11  ;;  %6445 = vmatmul.bf16.gmra.mxu0 %v15252_v11 }
 0xd52   :  { %18272 = vst [vmem:[#allocation29_spill] sm:$0xff] %v15770_v49  ;;  %6534 = vmatmul.bf16.gmra.mxu1 %v15258_v16 }
 0xd53   :  { %v6317_v7 = vpop.f32.mrf.mxu3 }
 0xd54   :  { %v6228_v21 = vpop.f32.mrf.mxu2 }
 0xd55   :  { %v15782_v6 = vadd.f32 %v6317_v7, %v6228_v21  ;;  %v9620_v21 = vld [vmem:[%s17128_s10 + $0xf0] sm:$0xff] }
 0xd56   :  { %v15784_v40 = vpop.f32.mrf.mxu0  ;;  %8067 = vmatpush.bf16.msrb.mxu1 %v9620_v21  ;;  %v9595_v21 = vld [vmem:[%s17128_s10 + $0x28] sm:$0xff] }
 0xd57   :  { %18273 = vst [vmem:[#allocation30_spill] sm:$0xff] %v15782_v6  ;;  %v15786_v12 = vpop.f32.mrf.mxu1  ;;  %7801 = vmatpush.bf16.msrb.mxu2 %v9595_v21 }
 0xd5b   :  { %v15790_v16 = vpop.f32.mrf.mxu3 }
 0xd5c   :  { %v15788_v11 = vpop.f32.mrf.mxu2  ;;  %18275 = vst [vmem:[#allocation118_spill] sm:$0xff] %v15790_v16 }
 0xd5d   :  { %18274 = vst [vmem:[#allocation31_spill] sm:$0xff] %v15788_v11 }
 0xd5e   :  { %v6411_v37 = vpop.f32.mrf.mxu0 }
 0xd5f   :  { %v6500_v33 = vpop.f32.mrf.mxu1 }
 0xd60   :  { %v15795_v44 = vadd.f32 %v6500_v33, %v6411_v37  ;;  %6361 = vmatmul.bf16.gmra.mxu3 %v15279_v36 }
 0xd61   :  { %6272 = vmatmul.bf16.gmra.mxu2 %v15273_v30  ;;  %6450 = vmatmul.bf16.gmra.mxu0 %v15273_v30 }
 0xd62   :  { %18276 = vst [vmem:[#allocation95_spill] sm:$0xff] %v15795_v44  ;;  %6539 = vmatmul.bf16.gmra.mxu1 %v15279_v36 }
 0xd63   :  { %v6322_v50 = vpop.f32.mrf.mxu3 }
 0xd64   :  { %v6233_v7 = vpop.f32.mrf.mxu2 }
 0xd65   :  { %v15804_v5 = vadd.f32 %v6322_v50, %v6233_v7  ;;  %v9603_v7 = vld [vmem:[%s17128_s10 + $0x68] sm:$0xff] }
 0xd66   :  { %v15806_v1 = vpop.f32.mrf.mxu0  ;;  %7890 = vmatpush.bf16.msrb.mxu3 %v9603_v7 }
 0xd67   :  { %18277 = vst [vmem:[#allocation122_spill] sm:$0xff] %v15804_v5  ;;  %v15808_v37 = vpop.f32.mrf.mxu1  ;;  %v9611_v5 = vld [vmem:[%s17128_s10 + $0xa8] sm:$0xff] }
 0xd68   :  { %7979 = vmatpush.bf16.msrb.mxu0 %v9611_v5 }
 0xd6b   :  { %v15812_v6 = vpop.f32.mrf.mxu3 }
 0xd6c   :  { %v15810_v33 = vpop.f32.mrf.mxu2  ;;  %18279 = vst [vmem:[#allocation119_spill] sm:$0xff] %v15812_v6 }
 0xd6d   :  { %18278 = vst [vmem:[#allocation58_spill] sm:$0xff] %v15810_v33 }
 0xd6e   :  { %v6416_v44 = vpop.f32.mrf.mxu0 }
 0xd6f   :  { %v6505_v16 = vpop.f32.mrf.mxu1 }
 0xd70   :  { %v15814_v11 = vadd.f32 %v6505_v16, %v6416_v44  ;;  %6366 = vmatmul.bf16.gmra.mxu3 %v15293_v25 }
 0xd71   :  { %6277 = vmatmul.bf16.gmra.mxu2 %v15289_v20  ;;  %6455 = vmatmul.bf16.gmra.mxu0 %v15289_v20 }
 0xd72   :  { %18280 = vst [vmem:[#allocation120_spill] sm:$0xff] %v15814_v11  ;;  %6544 = vmatmul.bf16.gmra.mxu1 %v15293_v25 }
 0xd73   :  { %v6327_v36 = vpop.f32.mrf.mxu3 }
 0xd74   :  { %v6238_v30 = vpop.f32.mrf.mxu2 }
 0xd75   :  { %v15826_v16 = vadd.f32 %v6327_v36, %v6238_v30  ;;  %v9619_v30 = vld [vmem:[%s17128_s10 + $0xe8] sm:$0xff] }
 0xd76   :  { %v15828_v44 = vpop.f32.mrf.mxu0  ;;  %8068 = vmatpush.bf16.msrb.mxu1 %v9619_v30 }
 0xd77   :  { %18281 = vst [vmem:[#allocation114_spill] sm:$0xff] %v15826_v16  ;;  %v15830_v50 = vpop.f32.mrf.mxu1  ;;  %v6714_v16 = vmul.f32 %v15466_v29, %v15466_v29 }
 0xd7b   :  { %v15834_v25 = vpop.f32.mrf.mxu3 }
 0xd7c   :  { %v15832_v20 = vpop.f32.mrf.mxu2  ;;  %18283 = vst [vmem:[#allocation126_spill] sm:$0xff] %v15834_v25  ;;  %v6722_v25 = vmul.f32 %v15490_v26, %v15490_v26 }
 0xd7d   :  { %18282 = vst [vmem:[#allocation125_spill] sm:$0xff] %v15832_v20 }
 0xd7e   :  { %v6421_v11 = vpop.f32.mrf.mxu0 }
 0xd7f   :  { %v6510_v6 = vpop.f32.mrf.mxu1 }
 0xd80   :  { %v15839_v33 = vadd.f32 %v6510_v6, %v6421_v11  ;;  %6371 = vmatmul.bf16.gmra.mxu3 %v15301_v42  ;;  %v6594_v11 = vadd.f32 %v15466_v29, %v15446_v46 }
 0xd81   :  { %6282 = vmatmul.bf16.gmra.mxu2 %v15297_v8  ;;  %6460 = vmatmul.bf16.gmra.mxu0 %v15297_v8  ;;  %v6710_v8 = vmul.f32 %v15446_v46, %v15446_v46  ;;  %v6726_v46 = vmul.f32 %v15494_v35, %v15494_v35 }
 0xd82   :  { %18284 = vst [vmem:[#allocation44_spill] sm:$0xff] %v15839_v33  ;;  %6549 = vmatmul.bf16.gmra.mxu1 %v15301_v42  ;;  %v6595_v33 = vadd.f32 %v6594_v11, %v15482_v57  ;;  %v6718_v42 = vmul.f32 %v15482_v57, %v15482_v57 }
 0xd83   :  { %v6332_v21 = vpop.f32.mrf.mxu3 }
 0xd84   :  { %v6243_v36 = vpop.f32.mrf.mxu2  ;;  %v6596_v30 = vadd.f32 %v6595_v33, %v15490_v26  ;;  %v6557_v33 = vadd.f32 %v15477_v3, %v15461_v43 }
 0xd85   :  { %v15848_v5 = vadd.f32 %v6332_v21, %v6243_v36 }
 0xd86   :  { %v15850_v7 = vpop.f32.mrf.mxu0  ;;  %v6597_v29 = vadd.f32 %v6596_v30, %v15494_v35  ;;  %v6713_v30 = vmul.f32 %v15477_v3, %v15477_v3  ;;  %v6721_v3 = vmul.f32 %v15492_v27, %v15492_v27 }
 0xd87   :  { %18285 = vst [vmem:[#allocation115_spill] sm:$0xff] %v15848_v5  ;;  %v15852_v6 = vpop.f32.mrf.mxu1  ;;  %v6874_v5 = vadd.f32 %v6714_v16, %v6710_v8  ;;  %v6730_v16 = vmul.f32 %v15514_v48, %v15514_v48 }
 0xd88   :  { %18286 = vst [vmem:[#allocation45_spill] sm:$0xff] %v15850_v7  ;;  %v6598_v57 = vadd.f32 %v6597_v29, %v15514_v48  ;;  %v6734_v29 = vmul.f32 %v15530_v13, %v15530_v13 }
 0xd89   :  { %18287 = vst [vmem:[#allocation48_spill] sm:$0xff] %v15852_v6  ;;  %v6875_v6 = vadd.f32 %v6874_v5, %v6718_v42  ;;  %v6558_v5 = vadd.f32 %v6557_v33, %v15488_v24 }
 0xd8a   :  { %v6599_v8 = vadd.f32 %v6598_v57, %v15530_v13  ;;  %v9602_v57 = vld [vmem:[%s17128_s10 + $0x60] sm:$0xff]  ;;  %v6738_v13 = vmul.f32 %v15538_v31, %v15538_v31 }
 0xd8b   :  { %v15866_v21 = vpop.f32.mrf.mxu3  ;;  %7891 = vmatpush.bf16.msrb.mxu3 %v9602_v57 }
 0xd8c   :  { %v15864_v36 = vpop.f32.mrf.mxu2  ;;  %18288 = vst [vmem:[#allocation53_spill] sm:$0xff] %v15866_v21  ;;  %v6876_v21 = vadd.f32 %v6875_v6, %v6722_v25  ;;  %v9594_v25 = vld [vmem:[%s17128_s10 + $0x20] sm:$0xff]  ;;  %v6709_v6 = vmul.f32 %v15461_v43, %v15461_v43 }
 0xd8d   :  { %7802 = vmatpush.bf16.msrb.mxu2 %v9594_v25  ;;  %v6746_v25 = vmul.f32 %v15562_v58, %v15562_v58 }
 0xd8e   :  { %v6426_v20 = vpop.f32.mrf.mxu0  ;;  %v6877_v42 = vadd.f32 %v6876_v21, %v6726_v46  ;;  %v6717_v46 = vmul.f32 %v15488_v24, %v15488_v24  ;;  %v6559_v21 = vadd.f32 %v6558_v5, %v15492_v27  ;;  %v6837_v26 = vadd.f32 %v6713_v30, %v6709_v6 }
 0xd8f   :  { %v6515_v11 = vpop.f32.mrf.mxu1 }
 0xd90   :  { %v15874_v7 = vadd.f32 %v6515_v11, %v6426_v20  ;;  %v6600_v20 = vadd.f32 %v6599_v8, %v15538_v31  ;;  %v6878_v8 = vadd.f32 %v6877_v42, %v6730_v16  ;;  %v6560_v43 = vadd.f32 %v6559_v21, %v15509_v18 }
 0xd91   :  { %v6742_v16 = vmul.f32 %v15542_v59, %v15542_v59  ;;  %v6838_v42 = vadd.f32 %v6837_v26, %v6717_v46  ;;  %v6750_v26 = vmul.f32 %v15578_v15, %v15578_v15 }
 0xd92   :  { %18289 = vst [vmem:[#allocation46_spill] sm:$0xff] %v15874_v7  ;;  %v6601_v48 = vadd.f32 %v6600_v20, %v15542_v59  ;;  %v6725_v20 = vmul.f32 %v15509_v18, %v15509_v18  ;;  %v6561_v30 = vadd.f32 %v6560_v43, %v15525_v55 }
 0xd93   :  { %v6337_v35 = vpop.f32.mrf.mxu3  ;;  %v6839_v6 = vadd.f32 %v6838_v42, %v6721_v3  ;;  %v6754_v42 = vmul.f32 %v15586_v9, %v15586_v9 }
 0xd94   :  { %v6248_v11 = vpop.f32.mrf.mxu2  ;;  %v6602_v5 = vadd.f32 %v6601_v48, %v15562_v58  ;;  %v6562_v21 = vadd.f32 %v6561_v30, %v15536_v61  ;;  %v18290_v30 = vld [vmem:[#allocation49_spill] sm:$0xff]  ;;  %v18291_v58 = vld [vmem:[#allocation124_spill] sm:$0xff] }
 0xd95   :  { %v15898_v33 = vadd.f32 %v6337_v35, %v6248_v11  ;;  %v6879_v35 = vadd.f32 %v6878_v8, %v6734_v29  ;;  %v6729_v29 = vmul.f32 %v15525_v55, %v15525_v55  ;;  %v6840_v3 = vadd.f32 %v6839_v6, %v6725_v20 }
 0xd96   :  { %v15906_v7 = vpop.f32.mrf.mxu0  ;;  %v6603_v57 = vadd.f32 %v6602_v5, %v15578_v15  ;;  %v6563_v5 = vadd.f32 %v6562_v21, %v15540_v0  ;;  %v6737_v15 = vmul.f32 %v15540_v0, %v15540_v0  ;;  %v18292_v21 = vld [vmem:[#allocation62_spill] sm:$0xff] }
 0xd97   :  { %v15908_v24 = vpop.f32.mrf.mxu1  ;;  %v6880_v11 = vadd.f32 %v6879_v35, %v6738_v13  ;;  %v9610_v13 = vld [vmem:[%s17128_s10 + $0xa0] sm:$0xff]  ;;  %v6733_v35 = vmul.f32 %v15536_v61, %v15536_v61  ;;  %v6758_v61 = vmul.f32 %v18290_v30, %v18290_v30 }
 0xd98   :  { %v6604_v48 = vadd.f32 %v6603_v57, %v15586_v9  ;;  %7980 = vmatpush.bf16.msrb.mxu0 %v9610_v13  ;;  %v6841_v57 = vadd.f32 %v6840_v3, %v6729_v29  ;;  %v6564_v59 = vadd.f32 %v6563_v5, %v18291_v58  ;;  %v18293_v29 = vld [vmem:[#allocation127_spill] sm:$0xff]  ;;  %v9618_v3 = vld [vmem:[%s17128_s10 + $0xe0] sm:$0xff] }
 0xd99   :  { %v6881_v8 = vadd.f32 %v6880_v11, %v6742_v16  ;;  %8069 = vmatpush.bf16.msrb.mxu1 %v9618_v3 }
 0xd9a   :  { %v6605_v11 = vadd.f32 %v6604_v48, %v18290_v30  ;;  %v6842_v9 = vadd.f32 %v6841_v57, %v6733_v35  ;;  %v6741_v48 = vmul.f32 %v18291_v58, %v18291_v58  ;;  %v6565_v13 = vadd.f32 %v6564_v59, %v18293_v29  ;;  %v18295_v35 = vld [vmem:[#allocation123_spill] sm:$0xff] }
 0xd9b   :  { %v15927_v43 = vpop.f32.mrf.mxu3  ;;  %v6882_v16 = vadd.f32 %v6881_v8, %v6746_v25 }
 0xd9c   :  { %v15925_v46 = vpop.f32.mrf.mxu2  ;;  %v6606_v25 = vadd.f32 %v6605_v11, %v18292_v21  ;;  %v6843_v0 = vadd.f32 %v6842_v9, %v6737_v15  ;;  %v6566_v11 = vadd.f32 %v6565_v13, %v18295_v35 }
 0xd9d   :  { %v6883_v6 = vadd.f32 %v6882_v16, %v6750_v26  ;;  %v6762_v26 = vmul.f32 %v18292_v21, %v18292_v21  ;;  %v18294_v16 = vld [vmem:[#allocation70_spill] sm:$0xff]  ;;  %v6749_v21 = vmul.f32 %v18295_v35, %v18295_v35 }
 0xd9e   :  { %v6431_v31 = vpop.f32.mrf.mxu0  ;;  %v6607_v30 = vadd.f32 %v6606_v25, %v18294_v16  ;;  %v6766_v59 = vmul.f32 %v18294_v16, %v18294_v16  ;;  %v18297_v25 = vld [vmem:[#allocation47_spill] sm:$0xff]  ;;  %v18299_v16 = vld [vmem:[#allocation52_spill] sm:$0xff] }
 0xd9f   :  { %v6520_v20 = vpop.f32.mrf.mxu1  ;;  %v6884_v5 = vadd.f32 %v6883_v6, %v6754_v42  ;;  %v6844_v6 = vadd.f32 %v6843_v0, %v6741_v48  ;;  %v6567_v15 = vadd.f32 %v6566_v11, %v18297_v25 }
 0xda0   :  { %v15944_v8 = vadd.f32 %v6520_v20, %v6431_v31  ;;  %v6745_v31 = vmul.f32 %v18293_v29, %v18293_v29  ;;  %v18296_v20 = vld [vmem:[#allocation68_spill] sm:$0xff] }
 0xda1   :  { %v6885_v57 = vadd.f32 %v6884_v5, %v6758_v61  ;;  %v6608_v58 = vadd.f32 %v6607_v30, %v18296_v20  ;;  %v6770_v13 = vmul.f32 %v18296_v20, %v18296_v20  ;;  %v18298_v61 = vld [vmem:[#allocation111_spill] sm:$0xff]  ;;  %v6753_v30 = vmul.f32 %v18297_v25, %v18297_v25 }
 0xda2   :  { %v6845_v5 = vadd.f32 %v6844_v6, %v6745_v31  ;;  %v6568_v18 = vadd.f32 %v6567_v15, %v18299_v16  ;;  %v18300_v31 = vld [vmem:[#allocation71_spill] sm:$0xff]  ;;  %v6778_v6 = vmul.f32 %v15622_v17, %v15622_v17 }
 0xda3   :  { %v6342_v42 = vpop.f32.mrf.mxu3  ;;  %v6886_v29 = vadd.f32 %v6885_v57, %v6762_v26  ;;  %v6609_v3 = vadd.f32 %v6608_v58, %v18298_v61  ;;  %v6757_v58 = vmul.f32 %v18299_v16, %v18299_v16 }
 0xda4   :  { %v6253_v55 = vpop.f32.mrf.mxu2  ;;  %v6846_v11 = vadd.f32 %v6845_v5, %v6749_v21  ;;  %v6569_v57 = vadd.f32 %v6568_v18, %v18300_v31  ;;  %v6782_v21 = vmul.f32 %v15626_v41, %v15626_v41 }
 0xda5   :  { %v15964_v9 = vadd.f32 %v6342_v42, %v6253_v55  ;;  %v6887_v35 = vadd.f32 %v6886_v29, %v6766_v59  ;;  %v6774_v55 = vmul.f32 %v18298_v61, %v18298_v61  ;;  %v6610_v26 = vadd.f32 %v6609_v3, %v15622_v17  ;;  %v18301_v59 = vld [vmem:[#allocation66_spill] sm:$0xff] }
 0xda6   :  { %v15972_v0 = vpop.f32.mrf.mxu0  ;;  %v6847_v20 = vadd.f32 %v6846_v11, %v6753_v30  ;;  %v6761_v29 = vmul.f32 %v18300_v31, %v18300_v31  ;;  %v6570_v61 = vadd.f32 %v6569_v57, %v18301_v59  ;;  %v18302_v30 = vld [vmem:[#allocation69_spill] sm:$0xff]  ;;  %v6786_v57 = vmul.f32 %v15634_v62, %v15634_v62 }
 0xda7   :  { %v15974_v48 = vpop.f32.mrf.mxu1  ;;  %v6888_v42 = vadd.f32 %v6887_v35, %v6770_v13  ;;  %v6611_v15 = vadd.f32 %v6610_v26, %v15626_v41  ;;  %v6765_v13 = vmul.f32 %v18301_v59, %v18301_v59  ;;  %v18303_v41 = vld [vmem:[#allocation76_spill] sm:$0xff] }
 0xda8   :  { %v6848_v35 = vadd.f32 %v6847_v20, %v6757_v58  ;;  %v6571_v26 = vadd.f32 %v6570_v61, %v18302_v30  ;;  %v6790_v58 = vmul.f32 %v15638_v38, %v15638_v38 }
 0xda9   :  { %v6889_v25 = vadd.f32 %v6888_v42, %v6774_v55  ;;  %v6612_v3 = vadd.f32 %v6611_v15, %v15634_v62  ;;  %v6769_v15 = vmul.f32 %v18302_v30, %v18302_v30 }
 0xdaa   :  { %v6849_v42 = vadd.f32 %v6848_v35, %v6761_v29  ;;  %v6572_v17 = vadd.f32 %v6571_v26, %v18303_v41  ;;  %v18304_v29 = vld [vmem:[#allocation81_spill] sm:$0xff]  ;;  %v6794_v26 = vmul.f32 %v15646_v2, %v15646_v2 }
 0xdab   :  { %v15993_v18 = vpop.f32.mrf.mxu3  ;;  %v6890_v11 = vadd.f32 %v6889_v25, %v6778_v6  ;;  %v6613_v55 = vadd.f32 %v6612_v3, %v15638_v38  ;;  %v6773_v3 = vmul.f32 %v18303_v41, %v18303_v41  ;;  %v18305_v38 = vld [vmem:[#allocation72_spill] sm:$0xff] }
 0xdac   :  { %v15991_v5 = vpop.f32.mrf.mxu2  ;;  %v6850_v6 = vadd.f32 %v6849_v42, %v6765_v13  ;;  %v6573_v35 = vadd.f32 %v6572_v17, %v18304_v29 }
 0xdad   :  { %v6891_v20 = vadd.f32 %v6890_v11, %v6782_v21  ;;  %v6614_v61 = vadd.f32 %v6613_v55, %v15646_v2  ;;  %v6777_v11 = vmul.f32 %v18304_v29, %v18304_v29 }
 0xdae   :  { %v6436_v31 = vpop.f32.mrf.mxu0  ;;  %v6851_v21 = vadd.f32 %v6850_v6, %v6769_v15  ;;  %v6574_v55 = vadd.f32 %v6573_v35, %v18305_v38  ;;  %v9601_v15 = vld [vmem:[%s17128_s10 + $0x58] sm:$0xff] }
 0xdaf   :  { %v6525_v16 = vpop.f32.mrf.mxu1  ;;  %v6892_v62 = vadd.f32 %v6891_v20, %v6786_v57  ;;  %v6615_v30 = vadd.f32 %v6614_v61, %v15650_v54  ;;  %v9593_v57 = vld [vmem:[%s17128_s10 + $0x18] sm:$0xff]  ;;  %v6781_v61 = vmul.f32 %v18305_v38, %v18305_v38  ;;  %7892 = vmatpush.bf16.msrb.mxu3 %v9601_v15  ;;  %v6810_v15 = vmul.f32 %v15670_v23, %v15670_v23 }
 0xdb0   :  { %v16007_v25 = vadd.f32 %v6525_v16, %v6436_v31  ;;  %v6798_v31 = vmul.f32 %v15650_v54, %v15650_v54  ;;  %v6852_v20 = vadd.f32 %v6851_v21, %v6773_v3  ;;  %7803 = vmatpush.bf16.msrb.mxu2 %v9593_v57  ;;  %v18307_v3 = vld [vmem:[#allocation88_spill] sm:$0xff] }
 0xdb1   :  { %v6893_v16 = vadd.f32 %v6892_v62, %v6790_v58  ;;  %v6616_v13 = vadd.f32 %v6615_v30, %v15658_v19  ;;  %v18306_v62 = vld [vmem:[#allocation82_spill] sm:$0xff]  ;;  %v6802_v30 = vmul.f32 %v15658_v19, %v15658_v19 }
 0xdb2   :  { %v6575_v58 = vadd.f32 %v6574_v55, %v18306_v62  ;;  %v6853_v2 = vadd.f32 %v6852_v20, %v6777_v11  ;;  %v6785_v29 = vmul.f32 %v18306_v62, %v18306_v62  ;;  %v18308_v11 = vld [vmem:[#allocation92_spill] sm:$0xff] }
 0xdb3   :  { %v6347_v17 = vpop.f32.mrf.mxu3  ;;  %v6894_v35 = vadd.f32 %v6893_v16, %v6794_v26  ;;  %v6617_v54 = vadd.f32 %v6616_v13, %v15662_v39  ;;  %v6806_v26 = vmul.f32 %v15662_v39, %v15662_v39  ;;  %v6789_v13 = vmul.f32 %v18307_v3, %v18307_v3 }
 0xdb4   :  { %v6258_v42 = vpop.f32.mrf.mxu2  ;;  %v6576_v21 = vadd.f32 %v6575_v58, %v18307_v3 }
 0xdb5   :  { %v16030_v6 = vadd.f32 %v6347_v17, %v6258_v42  ;;  %v6895_v55 = vadd.f32 %v6894_v35, %v6798_v31  ;;  %v6618_v16 = vadd.f32 %v6617_v54, %v15670_v23  ;;  %v6854_v42 = vadd.f32 %v6853_v2, %v6781_v61  ;;  %v18309_v35 = vld [vmem:[#allocation96_spill] sm:$0xff]  ;;  %v18311_v23 = vld [vmem:[#allocation101_spill] sm:$0xff] }
 0xdb6   :  { %v16038_v41 = vpop.f32.mrf.mxu0  ;;  %v6577_v17 = vadd.f32 %v6576_v21, %v18308_v11  ;;  %v6793_v31 = vmul.f32 %v18308_v11, %v18308_v11  ;;  %v6814_v54 = vmul.f32 %v15674_v47, %v15674_v47  ;;  %v9609_v21 = vld [vmem:[%s17128_s10 + $0x98] sm:$0xff] }
 0xdb7   :  { %v16040_v38 = vpop.f32.mrf.mxu1  ;;  %v6896_v57 = vadd.f32 %v6895_v55, %v6802_v30  ;;  %v6619_v20 = vadd.f32 %v6618_v16, %v15674_v47  ;;  %v6855_v58 = vadd.f32 %v6854_v42, %v6785_v29  ;;  %v6797_v55 = vmul.f32 %v18309_v35, %v18309_v35  ;;  %v18310_v16 = vld [vmem:[#allocation98_spill] sm:$0xff]  ;;  %7981 = vmatpush.bf16.msrb.mxu0 %v9609_v21 }
 0xdb8   :  { %v6578_v39 = vadd.f32 %v6577_v17, %v18309_v35  ;;  %v6818_v17 = vmul.f32 %v15682_v51, %v15682_v51  ;;  %v6801_v47 = vmul.f32 %v18310_v16, %v18310_v16 }
 0xdb9   :  { %v6897_v19 = vadd.f32 %v6896_v57, %v6806_v26  ;;  %v6620_v2 = vadd.f32 %v6619_v20, %v15682_v51  ;;  %v6856_v29 = vadd.f32 %v6855_v58, %v6789_v13  ;;  %v6826_v51 = vmul.f32 %v15694_v53, %v15694_v53 }
 0xdba   :  { %v6579_v42 = vadd.f32 %v6578_v39, %v18310_v16  ;;  %v6822_v39 = vmul.f32 %v15686_v4, %v15686_v4 }
 0xdbb   :  { %v16059_v30 = vpop.f32.mrf.mxu3  ;;  %v6898_v26 = vadd.f32 %v6897_v19, %v6810_v15  ;;  %v6621_v57 = vadd.f32 %v6620_v2, %v15686_v4  ;;  %v6857_v20 = vadd.f32 %v6856_v29, %v6793_v31  ;;  %v6805_v2 = vmul.f32 %v18311_v23, %v18311_v23  ;;  %v18312_v31 = vld [vmem:[#allocation121_spill] sm:$0xff]  ;;  %v9617_v29 = vld [vmem:[%s17128_s10 + $0xd8] sm:$0xff] }
 0xdbc   :  { %v16057_v61 = vpop.f32.mrf.mxu2  ;;  %v6580_v11 = vadd.f32 %v6579_v42, %v18311_v23  ;;  %8070 = vmatpush.bf16.msrb.mxu1 %v9617_v29 }
 0xdbd   :  { %v6899_v58 = vadd.f32 %v6898_v26, %v6814_v54  ;;  %v6622_v19 = vadd.f32 %v6621_v57, %v15694_v53  ;;  %v6858_v15 = vadd.f32 %v6857_v20, %v6797_v55  ;;  %v6809_v57 = vmul.f32 %v18312_v31, %v18312_v31  ;;  %v18313_v55 = vld [vmem:[#allocation24_spill] sm:$0xff] }
 0xdbe   :  { %v16073_v3 = vpop.f32.mrf.mxu0  ;;  %v6581_v21 = vadd.f32 %v6580_v11, %v18312_v31  ;;  %v6830_v11 = vmul.f32 %v15698_v22, %v15698_v22 }
 0xdbf   :  { %v16075_v13 = vpop.f32.mrf.mxu1  ;;  %v6900_v42 = vadd.f32 %v6899_v58, %v6818_v17  ;;  %v6623_v54 = vadd.f32 %v6622_v19, %v15698_v22  ;;  %v6859_v26 = vadd.f32 %v6858_v15, %v6801_v47  ;;  %v6813_v47 = vmul.f32 %v18313_v55, %v18313_v55  ;;  %v18316_v19 = vld [vmem:[#allocation25_spill] sm:$0xff] }
 0xdc0   :  { %v6582_v20 = vadd.f32 %v6581_v21, %v18313_v55  ;;  %v6834_v21 = vmul.f32 %v15706_v34, %v15706_v34  ;;  %v6817_v29 = vmul.f32 %v18316_v19, %v18316_v19 }
 0xdc1   :  { %v6901_v4 = vadd.f32 %v6900_v42, %v6822_v39  ;;  %v6624_v23 = vadd.f32 %v6623_v54, %v15706_v34  ;;  %v6860_v58 = vadd.f32 %v6859_v26, %v6805_v2  ;;  %v18317_v42 = vld [vmem:[#allocation56_spill] sm:$0xff] }
 0xdc2   :  { %v6583_v15 = vadd.f32 %v6582_v20, %v18316_v19  ;;  %v6821_v20 = vmul.f32 %v18317_v42, %v18317_v42  ;;  %v6716_v19 = vmul.f32 %v15718_v60, %v15718_v60 }
 0xdc3   :  { %v16097_v17 = vpop.f32.mrf.mxu3  ;;  %v6902_v53 = vadd.f32 %v6901_v4, %v6826_v51  ;;  %v6861_v39 = vadd.f32 %v6860_v58, %v6809_v57  ;;  %v6625_v26 = vrot.slane %v6624_v23, 4  ;;  %v18318_v4 = vld [vmem:[#allocation109_spill] sm:$0xff] }
 0xdc4   :  { %v16095_v16 = vpop.f32.mrf.mxu2  ;;  %18315 = vst [vmem:[#allocation55_spill] sm:$0xff] %v16097_v17  ;;  %v6584_v54 = vadd.f32 %v6583_v15, %v18317_v42  ;;  %v6825_v57 = vmul.f32 %v18318_v4, %v18318_v4  ;;  %v6724_v42 = vmul.f32 %v15730_v63, %v15730_v63 }
 0xdc5   :  { %18314 = vst [vmem:[#allocation54_spill] sm:$0xff] %v16095_v16  ;;  %v6903_v2 = vadd.f32 %v6902_v53, %v6830_v11  ;;  %v6862_v35 = vadd.f32 %v6861_v39, %v6813_v47  ;;  %v6626_v15 = vadd.f32 %v6625_v26, %v6624_v23  ;;  %v6829_v47 = vmul.f32 %v15704_v10, %v15704_v10  ;;  %v18321_v39 = vld [vmem:[#allocation77_spill] sm:$0xff]  ;;  %v18325_v16 = vld [vmem:[#allocation79_spill] sm:$0xff] }
 0xdc6   :  { %v16107_v22 = vpop.f32.mrf.mxu0  ;;  %v6585_v51 = vadd.f32 %v6584_v54, %v18318_v4 }
 0xdc7   :  { %v16109_v31 = vpop.f32.mrf.mxu1  ;;  %v6904_v55 = vadd.f32 %v6903_v2, %v6834_v21  ;;  %v6863_v34 = vadd.f32 %v6862_v35, %v6817_v29  ;;  %v18322_v29 = vld [vmem:[#allocation75_spill] sm:$0xff]  ;;  %v6720_v2 = vmul.f32 %v15722_v52, %v15722_v52 }
 0xdc8   :  { %v6586_v58 = vadd.f32 %v6585_v51, %v15704_v10  ;;  %v6712_v54 = vmul.f32 %v18322_v29, %v18322_v29  ;;  %v6668_v23 = vadd.f32 %v15718_v60, %v18322_v29  ;;  %v6833_v51 = vmul.f32 %v18321_v39, %v18321_v39  ;;  %v18323_v60 = vld [vmem:[#allocation37_spill] sm:$0xff] }
 0xdc9   :  { %v6864_v11 = vadd.f32 %v6863_v34, %v6821_v20  ;;  %v6905_v35 = vrot.slane %v6904_v55, 4  ;;  %v6627_v10 = vrot.slane %v6626_v15, 2  ;;  %v6715_v29 = vmul.f32 %v18323_v60, %v18323_v60 }
 0xdca   :  { %v6587_v21 = vadd.f32 %v6586_v58, %v18321_v39  ;;  %v6948_v58 = vadd.f32 %v6716_v19, %v6712_v54  ;;  %v6669_v4 = vadd.f32 %v6668_v23, %v15722_v52  ;;  %v6711_v19 = vmul.f32 %v18325_v16, %v18325_v16  ;;  %v18326_v23 = vld [vmem:[#allocation39_spill] sm:$0xff] }
 0xdcb   :  { %v16121_v53 = vpop.f32.mrf.mxu3  ;;  %v6865_v26 = vadd.f32 %v6864_v11, %v6825_v57  ;;  %v6906_v57 = vadd.f32 %v6905_v35, %v6904_v55  ;;  %v6631_v54 = vadd.f32 %v18323_v60, %v18325_v16  ;;  %v6736_v60 = vmul.f32 %v15755_v28, %v15755_v28 }
 0xdcc   :  { %v16119_v62 = vpop.f32.mrf.mxu2  ;;  %18320 = vst [vmem:[#allocation91_spill] sm:$0xff] %v16121_v53  ;;  %v6588_v27 = vrot.slane %v6587_v21, 4  ;;  %v6949_v11 = vadd.f32 %v6948_v58, %v6720_v2  ;;  %v6670_v39 = vadd.f32 %v6669_v4, %v15730_v63  ;;  %v18324_v53 = vld [vmem:[#allocation86_spill] sm:$0xff]  ;;  %v6732_v4 = vmul.f32 %v15748_v32, %v15748_v32 }
 0xdcd   :  { %18319 = vst [vmem:[#allocation43_spill] sm:$0xff] %v16119_v62  ;;  %v6866_v59 = vadd.f32 %v6865_v26, %v6829_v47  ;;  %v6728_v62 = vmul.f32 %v18324_v53, %v18324_v53  ;;  %v6719_v47 = vmul.f32 %v18326_v23, %v18326_v23  ;;  %v6628_v26 = vadd.f32 %v6627_v10, %v6626_v15  ;;  %v18328_v15 = vld [vmem:[#allocation84_spill] sm:$0xff] }
 0xdce   :  { %v16134_v34 = vpop.f32.mrf.mxu0  ;;  %v6950_v52 = vadd.f32 %v6949_v11, %v6724_v42  ;;  %v6671_v55 = vadd.f32 %v6670_v39, %v18324_v53  ;;  %v16165_v58 = vadd.f32 %v6588_v27, %v6587_v21  ;;  %v6911_v10 = vadd.f32 %v6715_v29, %v6711_v19  ;;  %v18329_v21 = vld [vmem:[#allocation83_spill] sm:$0xff] }
 0xdcf   :  { %v16136_v20 = vpop.f32.mrf.mxu1  ;;  %v6867_v17 = vadd.f32 %v6866_v59, %v6833_v51  ;;  %v9592_v59 = vld [vmem:[%s17128_s10 + $0x10] sm:$0xff]  ;;  %v6632_v42 = vadd.f32 %v6631_v54, %v18326_v23  ;;  %v6723_v39 = vmul.f32 %v18328_v15, %v18328_v15  ;;  %v6907_v11 = vrot.slane %v6906_v57, 2 }
 0xdd0   :  { %v9600_v51 = vld [vmem:[%s17128_s10 + $0x50] sm:$0xff]  ;;  %v6951_v53 = vadd.f32 %v6950_v52, %v6728_v62  ;;  %v6672_v63 = vadd.f32 %v6671_v55, %v15748_v32  ;;  %7804 = vmatpush.bf16.msrb.mxu2 %v9592_v59  ;;  %v6727_v29 = vmul.f32 %v18329_v21, %v18329_v21  ;;  %v6740_v62 = vmul.f32 %v15766_v14, %v15766_v14 }
 0xdd1   :  { %7893 = vmatpush.bf16.msrb.mxu3 %v9600_v51  ;;  %v6868_v16 = vrot.slane %v6867_v17, 4  ;;  %v6633_v27 = vadd.f32 %v6632_v42, %v18328_v15  ;;  %v16185_v55 = vadd.f32 %v15786_v12, %v15784_v40  ;;  %v16190_v32 = vadd.f32 %v6907_v11, %v6906_v57 }
 0xdd2   :  { %v6952_v23 = vadd.f32 %v6951_v53, %v6732_v4  ;;  %v6673_v52 = vadd.f32 %v6672_v63, %v15755_v28  ;;  %v6744_v63 = vmul.f32 %v15770_v49, %v15770_v49  ;;  %v6590_v4 = vrot.slane %v16165_v58, 2 }
 0xdd3   :  { %v16157_v2 = vpop.f32.mrf.mxu3  ;;  %18330 = vst [vmem:[#allocation93_spill] sm:$0xff] %v16185_v55  ;;  %v6634_v51 = vadd.f32 %v6633_v27, %v18329_v21  ;;  %v6735_v12 = vmul.f32 %v15764_v56, %v15764_v56  ;;  %v6748_v57 = vmul.f32 %v16185_v55, %v16185_v55  ;;  %v9608_v27 = vld [vmem:[%s17128_s10 + $0x90] sm:$0xff] }
 0xdd4   :  { %v16155_v35 = vpop.f32.mrf.mxu2  ;;  %18327 = vst [vmem:[#allocation63_spill] sm:$0xff] %v16157_v2  ;;  %v6912_v2 = vadd.f32 %v6911_v10, %v6719_v47  ;;  %v6629_v47 = vrot.slane %v6628_v26, 1  ;;  %v18331_v10 = vld [vmem:[#allocation41_spill] sm:$0xff]  ;;  %v6953_v15 = vadd.f32 %v6952_v23, %v6736_v60  ;;  %v6674_v53 = vadd.f32 %v6673_v52, %v15766_v14  ;;  %7982 = vmatpush.bf16.msrb.mxu0 %v9608_v27  ;;  %v18340_v27 = vld [vmem:[#allocation119_spill] sm:$0xff] }
 0xdd5   :  { %v6731_v42 = vmul.f32 %v18331_v10, %v18331_v10  ;;  %v6635_v40 = vadd.f32 %v6634_v51, %v18331_v10  ;;  %v16204_v60 = vadd.f32 %v15808_v37, %v15806_v1  ;;  %v6739_v52 = vmul.f32 %v15768_v45, %v15768_v45 }
 0xdd6   :  { %v16176_v19 = vpop.f32.mrf.mxu0  ;;  %v6913_v59 = vadd.f32 %v6912_v2, %v6723_v39  ;;  %v6954_v2 = vadd.f32 %v6953_v15, %v6740_v62  ;;  %v6675_v39 = vadd.f32 %v6674_v53, %v15770_v49  ;;  %v18333_v62 = vld [vmem:[#allocation31_spill] sm:$0xff]  ;;  %v16220_v1 = vadd.f32 %v6868_v16, %v6867_v17 }
 0xdd7   :  { %v16178_v54 = vpop.f32.mrf.mxu1  ;;  %18332 = vst [vmem:[#allocation60_spill] sm:$0xff] %v16204_v60  ;;  %v6636_v15 = vadd.f32 %v6635_v40, %v15764_v56  ;;  %v18336_v49 = vld [vmem:[#allocation95_spill] sm:$0xff]  ;;  %v6630_v10 = vadd.f32 %v6629_v47, %v6628_v26  ;;  %v18337_v40 = vld [vmem:[#allocation30_spill] sm:$0xff] }
 0xdd8   :  { %v6914_v28 = vadd.f32 %v6913_v59, %v6727_v29  ;;  %v18334_v59 = vld [vmem:[#allocation118_spill] sm:$0xff]  ;;  %v6955_v37 = vadd.f32 %v6954_v2, %v6744_v63  ;;  %v6676_v53 = vadd.f32 %v6675_v39, %v16185_v55  ;;  %v6752_v14 = vmul.f32 %v18336_v49, %v18336_v49 }
 0xdd9   :  { %v16218_v51 = vadd.f32 %v18334_v59, %v18333_v62  ;;  %v6743_v56 = vmul.f32 %v18337_v40, %v18337_v40  ;;  %v6756_v63 = vmul.f32 %v16204_v60, %v16204_v60  ;;  %v16237_v2 = vadd.f32 %v15830_v50, %v15828_v44  ;;  %v18339_v39 = vld [vmem:[#allocation58_spill] sm:$0xff]  ;;  %v18342_v50 = vld [vmem:[#allocation120_spill] sm:$0xff] }
 0xdda   :  { %v6915_v29 = vadd.f32 %v6914_v28, %v6731_v42  ;;  %v6637_v42 = vadd.f32 %v6636_v15, %v15768_v45  ;;  %v6956_v16 = vadd.f32 %v6955_v37, %v6748_v57  ;;  %v6677_v17 = vadd.f32 %v6676_v53, %v18336_v49  ;;  %v9616_v57 = vld [vmem:[%s17128_s10 + $0xd0] sm:$0xff] }
 0xddb   :  { %v16208_v11 = vpop.f32.mrf.mxu3  ;;  %18335 = vst [vmem:[#allocation90_spill] sm:$0xff] %v16218_v51  ;;  %v6909_v15 = vrot.slane %v16190_v32, 1  ;;  %v6591_v37 = vadd.f32 %v6590_v4, %v16165_v58  ;;  %8071 = vmatpush.bf16.msrb.mxu1 %v9616_v57 }
 0xddc   :  { %v16206_v23 = vpop.f32.mrf.mxu2  ;;  %v6916_v28 = vadd.f32 %v6915_v29, %v6735_v12  ;;  %18338 = vst [vmem:[#allocation67_spill] sm:$0xff] %v16237_v2  ;;  %v6638_v47 = vadd.f32 %v6637_v42, %v18337_v40  ;;  %v6747_v12 = vmul.f32 %v16218_v51, %v16218_v51  ;;  %v16244_v29 = vadd.f32 %v18340_v27, %v18339_v39  ;;  %v18343_v42 = vld [vmem:[#allocation122_spill] sm:$0xff] }
 0xddd   :  { %v6957_v59 = vadd.f32 %v6956_v16, %v6752_v14  ;;  %v6678_v44 = vadd.f32 %v6677_v17, %v16204_v60  ;;  %v6751_v39 = vmul.f32 %v18343_v42, %v18343_v42  ;;  %v6764_v14 = vmul.f32 %v16237_v2, %v16237_v2  ;;  %v18344_v16 = vld [vmem:[#allocation45_spill] sm:$0xff]  ;;  %v18345_v17 = vld [vmem:[#allocation48_spill] sm:$0xff] }
 0xdde   :  { %v16228_v21 = vpop.f32.mrf.mxu0  ;;  %v6917_v26 = vadd.f32 %v6916_v28, %v6739_v52  ;;  %18341 = vst [vmem:[#allocation59_spill] sm:$0xff] %v16244_v29  ;;  %v6760_v52 = vmul.f32 %v18342_v50, %v18342_v50  ;;  %v6639_v28 = vadd.f32 %v6638_v47, %v16218_v51  ;;  %v16262_v60 = vadd.f32 %v18345_v17, %v18344_v16  ;;  %v18347_v47 = vld [vmem:[#allocation126_spill] sm:$0xff]  ;;  %v18348_v17 = vld [vmem:[#allocation44_spill] sm:$0xff]  ;;  %v18349_v51 = vld [vmem:[#allocation87_spill] sm:$0xff] }
 0xddf   :  { %v16230_v62 = vpop.f32.mrf.mxu1  ;;  %v6958_v27 = vadd.f32 %v6957_v59, %v6756_v63  ;;  %v6679_v49 = vadd.f32 %v6678_v44, %v18342_v50  ;;  %v18346_v63 = vld [vmem:[#allocation125_spill] sm:$0xff]  ;;  %v6870_v59 = vrot.slane %v16220_v1, 2  ;;  %v6768_v50 = vmul.f32 %v18348_v17, %v18348_v17 }
 0xde0   :  { %v6918_v53 = vadd.f32 %v6917_v26, %v6743_v56  ;;  %v6640_v4 = vadd.f32 %v6639_v28, %v18343_v42  ;;  %v6755_v26 = vmul.f32 %v16244_v29, %v16244_v29  ;;  %v16273_v57 = vadd.f32 %v18347_v47, %v18346_v63  ;;  %v18350_v28 = vld [vmem:[#allocation114_spill] sm:$0xff] }
 0xde1   :  { %v6959_v44 = vadd.f32 %v6958_v27, %v6760_v52  ;;  %v6680_v16 = vadd.f32 %v6679_v49, %v16237_v2  ;;  %v16280_v40 = vmul.f32 %v6630_v10, %v18349_v51  ;;  %v6759_v42 = vmul.f32 %v18350_v28, %v18350_v28 }
 0xde2   :  { %v6919_v56 = vadd.f32 %v6918_v53, %v6747_v12  ;;  %v6641_v53 = vadd.f32 %v6640_v4, %v16244_v29  ;;  %v6772_v49 = vmul.f32 %v16262_v60, %v16262_v60  ;;  %v16294_v10 = vadd.f32 %v15908_v24, %v15906_v7  ;;  %v18351_v4 = vld [vmem:[#allocation53_spill] sm:$0xff] }
 0xde3   :  { %v16266_v58 = vpop.f32.mrf.mxu3  ;;  %v6960_v47 = vadd.f32 %v6959_v44, %v6764_v14  ;;  %v6681_v52 = vadd.f32 %v6680_v16, %v18348_v17  ;;  %v16301_v2 = vadd.f32 %v18351_v4, %v15864_v36  ;;  %v16304_v14 = vadd.f32 %v6909_v15, %v16190_v32  ;;  %v18352_v17 = vld [vmem:[#allocation46_spill] sm:$0xff] }
 0xde4   :  { %v16264_v55 = vpop.f32.mrf.mxu2  ;;  %v6920_v12 = vadd.f32 %v6919_v56, %v6751_v39  ;;  %v6642_v27 = vadd.f32 %v6641_v53, %v18350_v28  ;;  %v6763_v56 = vmul.f32 %v16273_v57, %v16273_v57  ;;  %v6776_v24 = vmul.f32 %v18352_v17, %v18352_v17  ;;  %v18353_v53 = vld [vmem:[#allocation115_spill] sm:$0xff] }
 0xde5   :  { %v6961_v44 = vadd.f32 %v6960_v47, %v6768_v50  ;;  %v6682_v16 = vadd.f32 %v6681_v52, %v16262_v60  ;;  %v6592_v7 = vrot.slane %v6591_v37, 1  ;;  %v6767_v28 = vmul.f32 %v18353_v53, %v18353_v53 }
 0xde6   :  { %v16285_v45 = vpop.f32.mrf.mxu0  ;;  %v6921_v39 = vadd.f32 %v6920_v12, %v6755_v26  ;;  %v6643_v12 = vadd.f32 %v6642_v27, %v16273_v57  ;;  %v6780_v32 = vmul.f32 %v16294_v10, %v16294_v10  ;;  %v16317_v15 = vadd.f32 %v15974_v48, %v15972_v0 }
 0xde7   :  { %v16287_v63 = vpop.f32.mrf.mxu1  ;;  %v6962_v29 = vadd.f32 %v6961_v44, %v6772_v49  ;;  %v6683_v36 = vadd.f32 %v6682_v16, %v18352_v17  ;;  %v16328_v49 = vadd.f32 %v15927_v43, %v15925_v46  ;;  %v16331_v27 = vadd.f32 %v6870_v59, %v16220_v1 }
 0xde8   :  { %v6922_v26 = vadd.f32 %v6921_v39, %v6759_v42  ;;  %v6644_v52 = vadd.f32 %v6643_v12, %v18353_v53  ;;  %v6771_v39 = vmul.f32 %v16301_v2, %v16301_v2  ;;  %v6784_v48 = vmul.f32 %v15944_v8, %v15944_v8 }
 0xde9   :  { %v6963_v4 = vadd.f32 %v6962_v29, %v6776_v24  ;;  %v6684_v0 = vadd.f32 %v6683_v36, %v16294_v10  ;;  %v16336_v44 = vadd.f32 %v6592_v7, %v6591_v37  ;;  %v6788_v29 = vmul.f32 %v16317_v15, %v16317_v15 }
 0xdea   :  { %v6923_v42 = vadd.f32 %v6922_v26, %v6763_v56  ;;  %v6645_v16 = vadd.f32 %v6644_v52, %v16301_v2  ;;  %v6775_v26 = vmul.f32 %v15898_v33, %v15898_v33  ;;  %v16350_v37 = vadd.f32 %v16040_v38, %v16038_v41 }
 0xdeb   :  { %v16321_v47 = vpop.f32.mrf.mxu3  ;;  %v6964_v43 = vadd.f32 %v6963_v4, %v6780_v32  ;;  %v6685_v1 = vadd.f32 %v6684_v0, %v15944_v8  ;;  %v6779_v24 = vmul.f32 %v16328_v49, %v16328_v49  ;;  %v16357_v7 = vadd.f32 %v15993_v18, %v15991_v5 }
 0xdec   :  { %v16319_v50 = vpop.f32.mrf.mxu2  ;;  %v6924_v56 = vadd.f32 %v6923_v42, %v6767_v28  ;;  %v6646_v28 = vadd.f32 %v6645_v16, %v15898_v33  ;;  %v6792_v42 = vmul.f32 %v16007_v25, %v16007_v25  ;;  %v16364_v41 = vadd.f32 %v16075_v13, %v16073_v3 }
 0xded   :  { %v6965_v36 = vadd.f32 %v6964_v43, %v6784_v48  ;;  %v6686_v32 = vadd.f32 %v6685_v1, %v16317_v15  ;;  %v6872_v38 = vrot.slane %v16331_v27, 1  ;;  %v6783_v4 = vmul.f32 %v15964_v9, %v15964_v9 }
 0xdee   :  { %v16341_v12 = vpop.f32.mrf.mxu0  ;;  %v6925_v59 = vadd.f32 %v6924_v56, %v6771_v39  ;;  %v6647_v39 = vadd.f32 %v6646_v28, %v16328_v49  ;;  %v6796_v0 = vmul.f32 %v16350_v37, %v16350_v37  ;;  %v16375_v48 = vadd.f32 %v16109_v31, %v16107_v22 }
 0xdef   :  { %v16343_v46 = vpop.f32.mrf.mxu1  ;;  %v6966_v5 = vadd.f32 %v6965_v36, %v6788_v29  ;;  %v6687_v18 = vadd.f32 %v6686_v32, %v16007_v25  ;;  %v16386_v43 = vadd.f32 %v16059_v30, %v16057_v61  ;;  %v6800_v22 = vmul.f32 %v16364_v41, %v16364_v41  ;;  %v18354_v36 = vld [vmem:[#allocation54_spill] sm:$0xff]  ;;  %v18355_v32 = vld [vmem:[#allocation55_spill] sm:$0xff] }
 0xdf0   :  { %v6926_v52 = vadd.f32 %v6925_v59, %v6775_v26  ;;  %v6648_v16 = vadd.f32 %v6647_v39, %v15964_v9  ;;  %v6787_v26 = vmul.f32 %v16357_v7, %v16357_v7  ;;  %v16393_v31 = vadd.f32 %v16136_v20, %v16134_v34 }
 0xdf1   :  { %v6967_v1 = vadd.f32 %v6966_v5, %v6792_v42  ;;  %v6688_v29 = vadd.f32 %v6687_v18, %v16350_v37  ;;  %v16400_v61 = vadd.f32 %v18355_v32, %v18354_v36  ;;  %v6804_v5 = vmul.f32 %v16375_v48, %v16375_v48 }
 0xdf2   :  { %v6927_v56 = vadd.f32 %v6926_v52, %v6779_v24  ;;  %v6649_v28 = vadd.f32 %v6648_v16, %v16357_v7  ;;  %v6791_v24 = vmul.f32 %v16030_v6, %v16030_v6  ;;  %v16407_v34 = vadd.f32 %v16178_v54, %v16176_v19  ;;  %v18357_v16 = vld [vmem:[#allocation91_spill] sm:$0xff] }
 0xdf3   :  { %v16379_v13 = vpop.f32.mrf.mxu3  ;;  %v6968_v52 = vadd.f32 %v6967_v1, %v6796_v0  ;;  %v6689_v39 = vadd.f32 %v6688_v29, %v16364_v41  ;;  %v6795_v18 = vmul.f32 %v16386_v43, %v16386_v43  ;;  %v6808_v29 = vmul.f32 %v16393_v31, %v16393_v31 }
 0xdf4   :  { %v16377_v3 = vpop.f32.mrf.mxu2  ;;  %v6928_v59 = vadd.f32 %v6927_v56, %v6783_v4  ;;  %v6650_v4 = vadd.f32 %v6649_v28, %v16030_v6  ;;  %v18356_v56 = vld [vmem:[#allocation43_spill] sm:$0xff]  ;;  %v16421_v19 = vadd.f32 %v16230_v62, %v16228_v21  ;;  %v16435_v21 = vadd.f32 %v16287_v63, %v16285_v45 }
 0xdf5   :  { %v16414_v36 = vadd.f32 %v18357_v16, %v18356_v56  ;;  %v6969_v0 = vadd.f32 %v6968_v52, %v6800_v22  ;;  %v6690_v1 = vadd.f32 %v6689_v39, %v16375_v48  ;;  %v18358_v28 = vld [vmem:[#allocation63_spill] sm:$0xff]  ;;  %v6812_v39 = vmul.f32 %v16407_v34, %v16407_v34 }
 0xdf6   :  { %v6458_v30 = vpop.f32.mrf.mxu0  ;;  %v6929_v20 = vadd.f32 %v6928_v59, %v6787_v26  ;;  %v6651_v26 = vadd.f32 %v6650_v4, %v16386_v43  ;;  %v6799_v59 = vmul.f32 %v16400_v61, %v16400_v61  ;;  %v16428_v32 = vadd.f32 %v18358_v28, %v16155_v35 }
 0xdf7   :  { %v6547_v42 = vpop.f32.mrf.mxu1  ;;  %v6970_v22 = vadd.f32 %v6969_v0, %v6804_v5  ;;  %v6691_v52 = vadd.f32 %v6690_v1, %v16393_v31  ;;  %v6803_v56 = vmul.f32 %v16414_v36, %v16414_v36  ;;  %v16442_v35 = vadd.f32 %v16208_v11, %v16206_v23 }
 0xdf8   :  { %v6930_v54 = vadd.f32 %v6929_v20, %v6791_v24  ;;  %v6652_v4 = vadd.f32 %v6651_v26, %v16400_v61  ;;  %v6816_v0 = vmul.f32 %v16421_v19, %v16421_v19  ;;  %v16449_v45 = vadd.f32 %v16343_v46, %v16341_v12 }
 0xdf9   :  { %v6971_v5 = vadd.f32 %v6970_v22, %v6808_v29  ;;  %v6692_v16 = vadd.f32 %v6691_v52, %v16407_v34  ;;  %v6807_v1 = vmul.f32 %v16428_v32, %v16428_v32  ;;  %v16456_v23 = vadd.f32 %v16266_v58, %v16264_v55 }
 0xdfa   :  { %v6931_v20 = vadd.f32 %v6930_v54, %v6795_v18  ;;  %18359 = vst [vmem:[#allocation42_spill] sm:$0xff] %v16449_v45  ;;  %v6653_v18 = vadd.f32 %v6652_v4, %v16414_v36  ;;  %v6820_v28 = vmul.f32 %v16435_v21, %v16435_v21  ;;  %v16461_v12 = vadd.f32 %v6547_v42, %v6458_v30 }
 0xdfb   :  { %v6369_v24 = vpop.f32.mrf.mxu3  ;;  %v6972_v54 = vadd.f32 %v6971_v5, %v6812_v39  ;;  %v6693_v26 = vadd.f32 %v6692_v16, %v16421_v19  ;;  %v6811_v22 = vmul.f32 %v16442_v35, %v16442_v35  ;;  %v16468_v55 = vadd.f32 %v16321_v47, %v16319_v50 }
 0xdfc   :  { %v6280_v62 = vpop.f32.mrf.mxu2  ;;  %v6932_v63 = vadd.f32 %v6931_v20, %v6799_v59  ;;  %18360 = vst [vmem:[#allocation57_spill] sm:$0xff] %v16461_v12  ;;  %v6654_v59 = vadd.f32 %v6653_v18, %v16428_v32  ;;  %v6824_v39 = vmul.f32 %v16449_v45, %v16449_v45  ;;  %v6815_v4 = vmul.f32 %v16456_v23, %v16456_v23 }
 0xdfd   :  { %v6973_v58 = vadd.f32 %v6972_v54, %v6816_v0  ;;  %v6694_v52 = vadd.f32 %v6693_v26, %v16435_v21  ;;  %v16484_v50 = vmul.f32 %v16336_v44, %v18349_v51  ;;  %v6828_v16 = vmul.f32 %v16461_v12, %v16461_v12 }
 0xdfe   :  { %v6461_v11 = vpop.f32.mrf.mxu0  ;;  %v6933_v46 = vadd.f32 %v6932_v63, %v6803_v56  ;;  %v6655_v42 = vadd.f32 %v6654_v59, %v16442_v35  ;;  %v16480_v56 = vadd.f32 %v16379_v13, %v16377_v3  ;;  %v16492_v3 = vadd.f32 %v6369_v24, %v6280_v62 }
 0xdff   :  { %v6550_v29 = vpop.f32.mrf.mxu1  ;;  %v6974_v47 = vadd.f32 %v6973_v58, %v6820_v28  ;;  %v6695_v5 = vadd.f32 %v6694_v52, %v16449_v45  ;;  %v6873_v44 = vadd.f32 %v6872_v38, %v16331_v27  ;;  %v6990_v52 = vmul.f32 %v16280_v40, %v16280_v40 }
 0xe00   :  { %v16473_v20 = vadd.f32 %v6550_v29, %v6461_v11  ;;  %v6934_v30 = vadd.f32 %v6933_v46, %v6807_v1  ;;  %v6656_v1 = vadd.f32 %v6655_v42, %v16456_v23  ;;  %v6819_v11 = vmul.f32 %v16468_v55, %v16468_v55  ;;  %18362 = vst [vmem:[#allocation32_spill] sm:$0xff] %v16492_v3 }
 0xe01   :  { %v6975_v13 = vadd.f32 %v6974_v47, %v6824_v39  ;;  %v6696_v29 = vadd.f32 %v6695_v5, %v16461_v12  ;;  %v6823_v46 = vmul.f32 %v16480_v56, %v16480_v56  ;;  %v6827_v42 = vmul.f32 %v16492_v3, %v16492_v3 }
 0xe02   :  { %18361 = vst [vmem:[#allocation61_spill] sm:$0xff] %v16473_v20  ;;  %v6935_v18 = vadd.f32 %v6934_v30, %v6811_v22  ;;  %v6832_v54 = vmul.f32 %v16473_v20, %v16473_v20  ;;  %v6657_v28 = vadd.f32 %v6656_v1, %v16468_v55  ;;  %v6986_v22 = vmul.f32 %v16304_v14, %v18349_v51 }
 0xe03   :  { %v6372_v63 = vpop.f32.mrf.mxu3  ;;  %v6976_v27 = vadd.f32 %v6975_v13, %v6828_v16  ;;  %v6697_v38 = vadd.f32 %v6696_v29, %v16473_v20  ;;  %v6989_v16 = vmul.f32 %v16484_v50, %v16484_v50 }
 0xe04   :  { %v6283_v0 = vpop.f32.mrf.mxu2  ;;  %v6936_v26 = vadd.f32 %v6935_v18, %v6815_v4  ;;  %v6658_v30 = vadd.f32 %v6657_v28, %v16480_v56  ;;  %v6985_v4 = vmul.f32 %v6873_v44, %v18349_v51  ;;  %v6994_v44 = vsub.f32 %v6986_v22, %v6990_v52 }
 0xe05   :  { %v16503_v59 = vadd.f32 %v6372_v63, %v6283_v0  ;;  %v6977_v47 = vadd.f32 %v6976_v27, %v6832_v54 }
 0xe06   :  { %v6463_v62 = vpop.f32.mrf.mxu0  ;;  %v6937_v39 = vadd.f32 %v6936_v26, %v6819_v11  ;;  %v6659_v63 = vadd.f32 %v6658_v30, %v16492_v3  ;;  %v6993_v27 = vsub.f32 %v6985_v4, %v6989_v16 }
 0xe07   :  { %v6552_v24 = vpop.f32.mrf.mxu1  ;;  %v6831_v18 = vmul.f32 %v16503_v59, %v16503_v59 }
 0xe08   :  { %v16508_v58 = vadd.f32 %v6552_v24, %v6463_v62  ;;  %v6938_v0 = vadd.f32 %v6937_v39, %v6823_v46  ;;  %v6660_v26 = vadd.f32 %v6659_v63, %v16503_v59 }
 0xe0a   :  { %18363 = vst [vmem:[#allocation33_spill] sm:$0xff] %v16508_v58  ;;  %v6698_v5 = vadd.f32 %v6697_v38, %v16508_v58  ;;  %v6836_v14 = vmul.f32 %v16508_v58, %v16508_v58  ;;  %v6939_v54 = vadd.f32 %v6938_v0, %v6827_v42  ;;  %v6997_v42 = vmax.f32 %v6993_v27, 0.0 }
 0xe0b   :  { %v6374_v29 = vpop.f32.mrf.mxu3 }
 0xe0c   :  { %v6699_v1 = vrot.slane %v6698_v5, 4  ;;  %v6978_v11 = vadd.f32 %v6977_v47, %v6836_v14  ;;  %v6285_v13 = vpop.f32.mrf.mxu2  ;;  %v6940_v38 = vadd.f32 %v6939_v54, %v6831_v18  ;;  %v6998_v47 = vmax.f32 %v6994_v44, 0.0 }
 0xe0d   :  { %v16525_v28 = vadd.f32 %v6374_v29, %v6285_v13  ;;  %v7001_v54 = vadd.f32 1e-05, %v6997_v42 }
 0xe0e   :  { %v6700_v62 = vadd.f32 %v6699_v1, %v6698_v5  ;;  %v6979_v24 = vrot.slane %v6978_v11, 4  ;;  %v7002_v1 = vadd.f32 1e-05, %v6998_v47 }
 0xe0f   :  { %v6661_v46 = vadd.f32 %v6660_v26, %v16525_v28  ;;  %v6835_v39 = vmul.f32 %v16525_v28, %v16525_v28  ;;  %vm7011_vm14 = vweird.f32 %v7001_v54 }
 0xe10   :  { %v6701_v30 = vrot.slane %v6700_v62, 2  ;;  %v6980_v58 = vadd.f32 %v6979_v24, %v6978_v11  ;;  %9735 = vrsqrt.f32 %v7002_v1  ;;  %vm7021_vm7 = vweird.f32 %v7002_v1 }
 0xe11   :  { %v6662_v14 = vrot.slane %v6661_v46, 4  ;;  %v6941_v20 = vadd.f32 %v6940_v38, %v6835_v39  ;;  %9737 = vrsqrt.f32 %v7001_v54 }
 0xe12   :  { %v6702_v22 = vadd.f32 %v6701_v30, %v6700_v62  ;;  %v6981_v52 = vrot.slane %v6980_v58, 2 }
 0xe13   :  { %v6663_v0 = vadd.f32 %v6662_v14, %v6661_v46  ;;  %v6942_v63 = vrot.slane %v6941_v20, 4 }
 0xe14   :  { %v6703_v13 = vrot.slane %v6702_v22, 1  ;;  %v6982_v5 = vadd.f32 %v6981_v52, %v6980_v58 }
 0xe15   :  { %v6664_v4 = vrot.slane %v6663_v0, 2  ;;  %v6943_v16 = vadd.f32 %v6942_v63, %v6941_v20 }
 0xe16   :  { %v6704_v18 = vadd.f32 %v6703_v13, %v6702_v22  ;;  %v6983_v29 = vrot.slane %v6982_v5, 1  ;;  %v9736_v14 = vpop.eup %9735 }
 0xe17   :  { %v6665_v26 = vadd.f32 %v6664_v4, %v6663_v0  ;;  %v6944_v12 = vrot.slane %v6943_v16, 2  ;;  %v9738_v42 = vpop.eup %9737  ;;  %v7016_v63 = vmul.f32 %v9736_v14, %v7002_v1  ;;  %vm7022_vm5 = vweird.f32 %v9736_v14  ;;  %v6555_v1 = vld [vmem:[#allocation2 + $0x15] sm:$0xf] }
 0xe18   :  { %v16531_v11 = vmul.f32 %v6704_v18, %v18349_v51  ;;  %v6984_v44 = vadd.f32 %v6983_v29, %v6982_v5  ;;  %v7006_v5 = vmul.f32 %v9738_v42, %v7001_v54  ;;  %vm7012_vm8 = vweird.f32 %v9738_v42  ;;  %vm7023_vm9 = vmor %vm7021_vm7, %vm7022_vm5 }
 0xe19   :  { %v6666_v62 = vrot.slane %v6665_v26, 1  ;;  %v6945_v24 = vadd.f32 %v6944_v12, %v6943_v16  ;;  %v7017_v16 = vmul.f32 %v9736_v14, %v7016_v63  ;;  %vm7013_vm1 = vmor %vm7011_vm14, %vm7012_vm8 }
 0xe1a   :  { %v6988_v27 = vmul.f32 %v6984_v44, %v18349_v51  ;;  %v6992_v58 = vmul.f32 %v16531_v11, %v16531_v11  ;;  %v7007_v29 = vmul.f32 %v9738_v42, %v7006_v5 }
 0xe1b   :  { %v6667_v38 = vadd.f32 %v6666_v62, %v6665_v26  ;;  %v6946_v20 = vrot.slane %v6945_v24, 1  ;;  %v7018_v44 = vmul.f32 0.5, %v7017_v16 }
 0xe1c   :  { %v6996_v46 = vsub.f32 %v6988_v27, %v6992_v58 }
 0xe1d   :  { %v16537_v39 = vmul.f32 %v6667_v38, %v18349_v51  ;;  %v6947_v30 = vadd.f32 %v6946_v20, %v6945_v24  ;;  %v7008_v24 = vmul.f32 0.5, %v7007_v29  ;;  %v7019_v58 = vsub.f32 1.5, %v7018_v44 }
 0xe1e   :  { %v7000_v47 = vmax.f32 %v6996_v46, 0.0 }
 0xe1f   :  { %v6987_v22 = vmul.f32 %v6947_v30, %v18349_v51  ;;  %v6991_v12 = vmul.f32 %v16537_v39, %v16537_v39  ;;  %v7009_v46 = vsub.f32 1.5, %v7008_v24 }
 0xe20   :  { %v7004_v52 = vadd.f32 1e-05, %v7000_v47  ;;  %v7020_v47 = vmul.f32 %v9736_v14, %v7019_v58 }
 0xe21   :  { %v6995_v0 = vsub.f32 %v6987_v22, %v6991_v12 }
 0xe22   :  { %9739 = vrsqrt.f32 %v7004_v52  ;;  %vm7041_vm10 = vweird.f32 %v7004_v52 }
 0xe23   :  { %v6999_v13 = vmax.f32 %v6995_v0, 0.0  ;;  %v7010_v0 = vmul.f32 %v9738_v42, %v7009_v46  ;;  %v9590_v46 = vld [vmem:[%s17128_s10] sm:$0xff] }
 0xe25   :  { %v7003_v4 = vadd.f32 1e-05, %v6999_v13  ;;  %v7024_v13 = vsel %vm7023_vm9, %v9736_v14, %v7020_v47  ;;  %v7014_v29 = vsel %vm7013_vm1, %v9738_v42, %v7010_v0  ;;  %v9606_v0 = vld [vmem:[%s17128_s10 + $0x80] sm:$0xff] }
 0xe26   :  { %v7049_v44 = vrot.slane %v7024_v13, 7 }
 0xe27   :  { %9741 = vrsqrt.f32 %v7003_v4  ;;  %vm7031_vm2 = vweird.f32 %v7003_v4 }
 0xe28   :  { %v9740_v18 = vpop.eup %9739 }
 0xe29   :  { %v7036_v26 = vmul.f32 %v9740_v18, %v7004_v52  ;;  %vm7042_vm6 = vweird.f32 %v9740_v18 }
 0xe2a   :  { %vm7043_vm0 = vmor %vm7041_vm10, %vm7042_vm6 }
 0xe2b   :  { %v7037_v62 = vmul.f32 %v9740_v18, %v7036_v26 }
 0xe2d   :  { %v9742_v51 = vpop.eup %9741  ;;  %v7038_v27 = vmul.f32 0.5, %v7037_v62 }
 0xe2e   :  { %v7026_v38 = vmul.f32 %v9742_v51, %v7003_v4  ;;  %vm7032_vm12 = vweird.f32 %v9742_v51 }
 0xe2f   :  { %v7039_v20 = vsub.f32 1.5, %v7038_v27  ;;  %vm7033_vm3 = vmor %vm7031_vm2, %vm7032_vm12  ;;  %v7052_v27 = vsel %vm1201_vm13, %v7014_v29, %v7049_v44 }
 0xe30   :  { %v7027_v30 = vmul.f32 %v9742_v51, %v7026_v38 }
 0xe31   :  { %v7040_v22 = vmul.f32 %v9740_v18, %v7039_v20  ;;  %v9607_v20 = vld [vmem:[%s17128_s10 + $0x88] sm:$0xff] }
 0xe32   :  { %v7028_v12 = vmul.f32 0.5, %v7027_v30  ;;  %v9598_v30 = vld [vmem:[%s17128_s10 + $0x40] sm:$0xff]  ;;  %7983 = vmatpush.bf16.msrb.mxu0 %v9607_v20 }
 0xe33   :  { %v7044_v5 = vsel %vm7043_vm0, %v9740_v18, %v7040_v22  ;;  %v9591_v18 = vld [vmem:[%s17128_s10 + $0x8] sm:$0xff] }
 0xe34   :  { %v7029_v63 = vsub.f32 1.5, %v7028_v12  ;;  %v7051_v62 = vrot.slane %v7044_v5, 5  ;;  %7805 = vmatpush.bf16.msrb.mxu2 %v9591_v18 }
 0xe36   :  { %v7030_v16 = vmul.f32 %v9742_v51, %v7029_v63  ;;  %v9614_v63 = vld [vmem:[%s17128_s10 + $0xc0] sm:$0xff]  ;;  %7984 = vmatpush.bf16.msrb.mxu0 %v9606_v0 }
 0xe37   :  { %v18370_v0 = vld [vmem:[#allocation37_spill] sm:$0xff] }
 0xe38   :  { %v7034_v26 = vsel %vm7033_vm3, %v9742_v51, %v7030_v16  ;;  %v9599_v51 = vld [vmem:[%s17128_s10 + $0x48] sm:$0xff]  ;;  %7806 = vmatpush.bf16.msrb.mxu2 %v9590_v46 }
 0xe39   :  { %v7050_v24 = vrot.slane %v7034_v26, 6  ;;  %7894 = vmatpush.bf16.msrb.mxu3 %v9599_v51  ;;  %v6556_v26 = vld [vmem:[#allocation2 + $0x19] sm:$0xf] }
 0xe3a   :  { %v18366_v51 = vld [vmem:[#allocation79_spill] sm:$0xff] }
 0xe3b   :  { %v7053_v52 = vsel %vm1203_vm11, %v7050_v24, %v7051_v62 }
 0xe3c   :  { %v7054_v58 = vsel %vm1205_vm15, %v7052_v27, %v7053_v52 }
 0xe3d   :  { %v7056_v54 = vmul.f32 %v7054_v58, %v6555_v1  ;;  %7895 = vmatpush.bf16.msrb.mxu3 %v9598_v30  ;;  %v18364_v58 = vld [vmem:[#allocation65_spill] sm:$0xff]  ;;  %v18368_v30 = vld [vmem:[#allocation15_spill] sm:$0xff] }
 0xe3f   :  { %v16545_v38 = vperm.slane %v7056_v54, 2  ;;  %v16551_v4 = vperm.slane %v7056_v54, 1  ;;  %v16553_v42 = vperm.slane %v7056_v54, 3  ;;  %v16585_v13 = vperm.slane %v7056_v54, 0 }
 0xe41   :  { %v16549_v14 = vmul.f32 %v16545_v38, %v16525_v28  ;;  %v9615_v28 = vld [vmem:[%s17128_s10 + $0xc8] sm:$0xff]  ;;  %v7067_v47 = vmul.f32 %v16551_v4, %v16280_v40  ;;  %v7068_v22 = vmul.f32 %v16545_v38, %v16537_v39  ;;  %v7069_v12 = vmul.f32 %v16553_v42, %v16531_v11 }
 0xe42   :  { %8072 = vmatpush.bf16.msrb.mxu1 %v9615_v28  ;;  %v7066_v11 = vmul.f32 %v16585_v13, %v16484_v50  ;;  %v7082_v54 = vmul.f32 %v16585_v13, %v18364_v58  ;;  %v18365_v50 = vld [vmem:[#allocation64_spill] sm:$0xff]  ;;  %v7084_v20 = vmul.f32 %v16545_v38, %v18366_v51  ;;  %v18367_v28 = vld [vmem:[#allocation75_spill] sm:$0xff] }
 0xe43   :  { %v7074_v40 = vrot.slane %v7067_v47, 7  ;;  %v7075_v5 = vrot.slane %v7068_v22, 6  ;;  %v7076_v39 = vrot.slane %v7069_v12, 5  ;;  %v7083_v18 = vmul.f32 %v16551_v4, %v18365_v50  ;;  %v18369_v22 = vld [vmem:[#allocation100_spill] sm:$0xff] }
 0xe44   :  { %v7085_v46 = vmul.f32 %v16553_v42, %v18367_v28  ;;  %v7086_v47 = vmul.f32 %v16585_v13, %v18368_v30  ;;  %v7087_v12 = vmul.f32 %v16551_v4, %v18369_v22 }
 0xe45   :  { %v7077_v16 = vsel %vm1201_vm13, %v7066_v11, %v7074_v40  ;;  %v7078_v29 = vsel %vm1203_vm11, %v7075_v5, %v7076_v39  ;;  %v18371_v40 = vld [vmem:[#allocation36_spill] sm:$0xff] }
 0xe46   :  { %8073 = vmatpush.bf16.msrb.mxu1 %v9614_v63  ;;  %v7079_v44 = vsel %vm1205_vm15, %v7077_v16, %v7078_v29  ;;  %v7088_v63 = vmul.f32 %v16545_v38, %v18370_v0  ;;  %v7089_v5 = vmul.f32 %v16553_v42, %v18371_v40 }
 0xe47   :  { %v7081_v62 = vsub.f32 %v6556_v26, %v7079_v44 }
 0xe49   :  { %v16592_v24 = vperm.slane %v7081_v62, 0  ;;  %v16594_v1 = vperm.slane %v7081_v62, 1  ;;  %v16596_v27 = vperm.slane %v7081_v62, 2  ;;  %v16598_v52 = vperm.slane %v7081_v62, 3 }
 0xe4b   :  { %v7219_v39 = vadd.f32 %v16592_v24, %v7082_v54  ;;  %v7220_v11 = vadd.f32 %v16594_v1, %v7083_v18  ;;  %v7221_v16 = vadd.f32 %v16596_v27, %v7084_v20  ;;  %v7222_v29 = vadd.f32 %v16598_v52, %v7085_v46 }
 0xe4c   :  { %v7223_v26 = vadd.f32 %v16592_v24, %v7086_v47  ;;  %v7224_v44 = vadd.f32 %v16594_v1, %v7087_v12  ;;  %v7225_v62 = vadd.f32 %v16596_v27, %v7088_v63  ;;  %v7226_v58 = vadd.f32 %v16598_v52, %v7089_v5  ;;  %v18372_v47 = vld [vmem:[#allocation13_spill] sm:$0xff]  ;;  %v18373_v63 = vld [vmem:[#allocation12_spill] sm:$0xff] }
 0xe4d   :  { %v7347_v50 = vmax.f32 %v7219_v39, 0.0  ;;  %v7348_v51 = vmax.f32 %v7220_v11, 0.0  ;;  %v7349_v28 = vmax.f32 %v7221_v16, 0.0  ;;  %v7350_v30 = vmax.f32 %v7222_v29, 0.0  ;;  %v18374_v39 = vld [vmem:[#allocation103_spill] sm:$0xff] }
 0xe4e   :  { %v7351_v22 = vmax.f32 %v7223_v26, 0.0  ;;  %v7352_v54 = vmax.f32 %v7224_v44, 0.0  ;;  %v7353_v0 = vmax.f32 %v7225_v62, 0.0  ;;  %v7354_v18 = vmax.f32 %v7226_v58, 0.0  ;;  %v18375_v16 = vld [vmem:[#allocation39_spill] sm:$0xff]  ;;  %v18376_v26 = vld [vmem:[#allocation106_spill] sm:$0xff] }
 0xe4f   :  { %v7090_v12 = vmul.f32 %v16585_v13, %v18372_v47  ;;  %v7094_v5 = vmul.f32 %v16585_v13, %v18373_v63  ;;  %v7091_v11 = vmul.f32 %v16551_v4, %v18374_v39  ;;  %v7092_v29 = vmul.f32 %v16545_v38, %v18375_v16  ;;  %v18377_v62 = vld [vmem:[#allocation84_spill] sm:$0xff] }
 0xe50   :  { %v7475_v40 = vpack.c.bf16 %v7351_v22, %v7347_v50  ;;  %v7476_v20 = vpack.c.bf16 %v7352_v54, %v7348_v51  ;;  %v7477_v3 = vpack.c.bf16 %v7353_v0, %v7349_v28  ;;  %v7478_v46 = vpack.c.bf16 %v7354_v18, %v7350_v30  ;;  %v18379_v51 = vld [vmem:[#allocation80_spill] sm:$0xff] }
 0xe51   :  { %v7095_v44 = vmul.f32 %v16551_v4, %v18376_v26  ;;  %v7096_v58 = vmul.f32 %v16545_v38, %v18377_v62  ;;  %v7097_v28 = vmul.f32 %v16553_v42, %v18379_v51  ;;  %v7227_v30 = vadd.f32 %v16592_v24, %v7090_v12 }
 0xe52   :  { %7807 = vmatmul.bf16.vlgmr.msrb.gmra.mxu2 %v7475_v40  ;;  %7896 = vmatmul.bf16.vlgmr.msrb.gmra.mxu3 %v7476_v20  ;;  %v7231_v22 = vadd.f32 %v16592_v24, %v7094_v5  ;;  %v7228_v54 = vadd.f32 %v16594_v1, %v7091_v11  ;;  %v7229_v18 = vadd.f32 %v16596_v27, %v7092_v29  ;;  %v18380_v29 = vld [vmem:[#allocation17_spill] sm:$0xff] }
 0xe53   :  { %7985 = vmatmul.bf16.vlgmr.msrb.gmra.mxu0 %v7477_v3  ;;  %8074 = vmatmul.bf16.vlgmr.msrb.gmra.mxu1 %v7478_v46  ;;  %v18378_v3 = vld [vmem:[#allocation38_spill] sm:$0xff]  ;;  %v7232_v0 = vadd.f32 %v16594_v1, %v7095_v44  ;;  %v7233_v40 = vadd.f32 %v16596_v27, %v7096_v58  ;;  %v7234_v46 = vadd.f32 %v16598_v52, %v7097_v28  ;;  %v7355_v47 = vmax.f32 %v7227_v30, 0.0  ;;  %v18382_v30 = vld [vmem:[#allocation16_spill] sm:$0xff] }
 0xe54   :  { %v7093_v50 = vmul.f32 %v16553_v42, %v18378_v3  ;;  %v7359_v63 = vmax.f32 %v7231_v22, 0.0  ;;  %v7356_v39 = vmax.f32 %v7228_v54, 0.0  ;;  %v7357_v26 = vmax.f32 %v7229_v18, 0.0  ;;  %v18383_v54 = vld [vmem:[#allocation83_spill] sm:$0xff]  ;;  %v18384_v18 = vld [vmem:[#allocation104_spill] sm:$0xff] }
 0xe55   :  { %v7360_v16 = vmax.f32 %v7232_v0, 0.0  ;;  %v7361_v12 = vmax.f32 %v7233_v40, 0.0  ;;  %v7362_v5 = vmax.f32 %v7234_v46, 0.0  ;;  %v7098_v58 = vmul.f32 %v16585_v13, %v18380_v29 }
 0xe56   :  { %v7230_v20 = vadd.f32 %v16598_v52, %v7093_v50  ;;  %v7479_v3 = vpack.c.bf16 %v7359_v63, %v7355_v47  ;;  %v18381_v50 = vld [vmem:[#allocation18_spill] sm:$0xff]  ;;  %v7099_v22 = vmul.f32 %v16551_v4, %v18382_v30  ;;  %v7100_v0 = vmul.f32 %v16545_v38, %v18383_v54 }
 0xe57   :  { %v7480_v11 = vpack.c.bf16 %v7360_v16, %v7356_v39  ;;  %v7481_v51 = vpack.c.bf16 %v7361_v12, %v7357_v26  ;;  %v7102_v28 = vmul.f32 %v16585_v13, %v18381_v50  ;;  %v7103_v40 = vmul.f32 %v16551_v4, %v18384_v18  ;;  %v18386_v47 = vld [vmem:[#allocation86_spill] sm:$0xff]  ;;  %v18387_v39 = vld [vmem:[#allocation40_spill] sm:$0xff] }
 0xe58   :  { %v7358_v62 = vmax.f32 %v7230_v20, 0.0  ;;  %v18385_v20 = vld [vmem:[#allocation41_spill] sm:$0xff]  ;;  %v7101_v63 = vmul.f32 %v16553_v42, %v18386_v47  ;;  %v7105_v16 = vmul.f32 %v16553_v42, %v18387_v39  ;;  %v7235_v26 = vadd.f32 %v16592_v24, %v7098_v58 }
 0xe59   :  { %v7104_v46 = vmul.f32 %v16545_v38, %v18385_v20  ;;  %v7239_v12 = vadd.f32 %v16592_v24, %v7102_v28 }
 0xe5a   :  { %v7482_v44 = vpack.c.bf16 %v7362_v5, %v7358_v62  ;;  %v7236_v62 = vadd.f32 %v16594_v1, %v7099_v22  ;;  %v7240_v5 = vadd.f32 %v16594_v1, %v7103_v40  ;;  %v7363_v29 = vmax.f32 %v7235_v26, 0.0  ;;  %v18390_v26 = vld [vmem:[#allocation14_spill] sm:$0xff] }
 0xe5b   :  { %v7367_v50 = vmax.f32 %v7239_v12, 0.0  ;;  %v7107_v12 = vmul.f32 %v16551_v4, %v18390_v26 }
 0xe5c   :  { %v7364_v30 = vmax.f32 %v7236_v62, 0.0  ;;  %v7368_v54 = vmax.f32 %v7240_v5, 0.0  ;;  %v18391_v62 = vld [vmem:[#allocation50_spill] sm:$0xff] }
 0xe5d   :  { %v7483_v47 = vpack.c.bf16 %v7367_v50, %v7363_v29  ;;  %v7108_v5 = vmul.f32 %v16545_v38, %v18391_v62  ;;  %v18394_v29 = vld [vmem:[#allocation27_spill] sm:$0xff] }
 0xe5e   :  { %v7484_v22 = vpack.c.bf16 %v7368_v54, %v7364_v30  ;;  %v7109_v50 = vmul.f32 %v16553_v42, %v18394_v29  ;;  %v18395_v30 = vld [vmem:[#allocation51_spill] sm:$0xff] }
 0xe5f   :  { %v7113_v54 = vmul.f32 %v16553_v42, %v18395_v30 }
 0xe62   :  { %7812 = vmatmul.bf16.gmra.mxu2 %v7479_v3  ;;  %7901 = vmatmul.bf16.gmra.mxu3 %v7480_v11  ;;  %v7237_v3 = vadd.f32 %v16596_v27, %v7100_v0  ;;  %v7241_v11 = vadd.f32 %v16596_v27, %v7104_v46  ;;  %v18388_v0 = vld [vmem:[#allocation19_spill] sm:$0xff] }
 0xe63   :  { %7990 = vmatmul.bf16.gmra.mxu0 %v7481_v51  ;;  %8079 = vmatmul.bf16.gmra.mxu1 %v7482_v44  ;;  %v7238_v51 = vadd.f32 %v16598_v52, %v7101_v63  ;;  %v7242_v44 = vadd.f32 %v16598_v52, %v7105_v16  ;;  %v7106_v46 = vmul.f32 %v16585_v13, %v18388_v0  ;;  %v18389_v63 = vld [vmem:[#allocation110_spill] sm:$0xff] }
 0xe64   :  { %v7365_v18 = vmax.f32 %v7237_v3, 0.0  ;;  %v7369_v58 = vmax.f32 %v7241_v11, 0.0  ;;  %v7110_v16 = vmul.f32 %v16585_v13, %v18389_v63  ;;  %v18392_v3 = vld [vmem:[#allocation108_spill] sm:$0xff] }
 0xe65   :  { %v7366_v20 = vmax.f32 %v7238_v51, 0.0  ;;  %v7370_v28 = vmax.f32 %v7242_v44, 0.0  ;;  %v7111_v11 = vmul.f32 %v16551_v4, %v18392_v3  ;;  %v18393_v51 = vld [vmem:[#allocation28_spill] sm:$0xff] }
 0xe66   :  { %v7485_v39 = vpack.c.bf16 %v7369_v58, %v7365_v18  ;;  %v7112_v44 = vmul.f32 %v16545_v38, %v18393_v51  ;;  %v7243_v18 = vadd.f32 %v16592_v24, %v7106_v46  ;;  %v7247_v58 = vadd.f32 %v16592_v24, %v7110_v16 }
 0xe67   :  { %v7486_v40 = vpack.c.bf16 %v7370_v28, %v7366_v20  ;;  %v7244_v20 = vadd.f32 %v16594_v1, %v7107_v12  ;;  %v7248_v28 = vadd.f32 %v16594_v1, %v7111_v11 }
 0xe68   :  { %v7371_v0 = vmax.f32 %v7243_v18, 0.0  ;;  %v7375_v63 = vmax.f32 %v7247_v58, 0.0  ;;  %v18398_v18 = vld [vmem:[#allocation113_spill] sm:$0xff] }
 0xe69   :  { %v7372_v26 = vmax.f32 %v7244_v20, 0.0  ;;  %v7376_v62 = vmax.f32 %v7248_v28, 0.0  ;;  %v7115_v58 = vmul.f32 %v16551_v4, %v18398_v18  ;;  %v18399_v20 = vld [vmem:[#allocation30_spill] sm:$0xff] }
 0xe6a   :  { %v7487_v29 = vpack.c.bf16 %v7375_v63, %v7371_v0  ;;  %v7116_v28 = vmul.f32 %v16545_v38, %v18399_v20  ;;  %v18402_v0 = vld [vmem:[#allocation29_spill] sm:$0xff] }
 0xe6b   :  { %v7488_v12 = vpack.c.bf16 %v7376_v62, %v7372_v26  ;;  %v7117_v63 = vmul.f32 %v16553_v42, %v18402_v0  ;;  %v18403_v26 = vld [vmem:[#allocation93_spill] sm:$0xff] }
 0xe6c   :  { %v7121_v62 = vmul.f32 %v16553_v42, %v18403_v26 }
 0xe72   :  { %7817 = vmatmul.bf16.gmra.mxu2 %v7483_v47  ;;  %7906 = vmatmul.bf16.gmra.mxu3 %v7484_v22  ;;  %v7245_v47 = vadd.f32 %v16596_v27, %v7108_v5  ;;  %v7249_v22 = vadd.f32 %v16596_v27, %v7112_v44  ;;  %v18396_v5 = vld [vmem:[#allocation124_spill] sm:$0xff] }
 0xe73   :  { %7995 = vmatmul.bf16.gmra.mxu0 %v7485_v39  ;;  %8084 = vmatmul.bf16.gmra.mxu1 %v7486_v40  ;;  %v7246_v39 = vadd.f32 %v16598_v52, %v7109_v50  ;;  %v7250_v40 = vadd.f32 %v16598_v52, %v7113_v54  ;;  %v7114_v44 = vmul.f32 %v16585_v13, %v18396_v5  ;;  %v18397_v50 = vld [vmem:[#allocation127_spill] sm:$0xff] }
 0xe74   :  { %v7373_v3 = vmax.f32 %v7245_v47, 0.0  ;;  %v7377_v46 = vmax.f32 %v7249_v22, 0.0  ;;  %v7118_v54 = vmul.f32 %v16585_v13, %v18397_v50  ;;  %v18400_v47 = vld [vmem:[#allocation105_spill] sm:$0xff] }
 0xe75   :  { %v7374_v51 = vmax.f32 %v7246_v39, 0.0  ;;  %v7378_v16 = vmax.f32 %v7250_v40, 0.0  ;;  %v7119_v22 = vmul.f32 %v16551_v4, %v18400_v47  ;;  %v18401_v39 = vld [vmem:[#allocation90_spill] sm:$0xff] }
 0xe76   :  { %v7489_v30 = vpack.c.bf16 %v7377_v46, %v7373_v3  ;;  %v7120_v40 = vmul.f32 %v16545_v38, %v18401_v39  ;;  %v7251_v3 = vadd.f32 %v16592_v24, %v7114_v44  ;;  %v7255_v46 = vadd.f32 %v16592_v24, %v7118_v54 }
 0xe77   :  { %v7490_v11 = vpack.c.bf16 %v7378_v16, %v7374_v51  ;;  %v7252_v51 = vadd.f32 %v16594_v1, %v7115_v58  ;;  %v7256_v16 = vadd.f32 %v16594_v1, %v7119_v22 }
 0xe78   :  { %v7379_v5 = vmax.f32 %v7251_v3, 0.0  ;;  %v7383_v50 = vmax.f32 %v7255_v46, 0.0  ;;  %v18406_v3 = vld [vmem:[#allocation122_spill] sm:$0xff] }
 0xe79   :  { %v7380_v18 = vmax.f32 %v7252_v51, 0.0  ;;  %v7384_v20 = vmax.f32 %v7256_v16, 0.0  ;;  %v7124_v46 = vmul.f32 %v16545_v38, %v18406_v3  ;;  %v18407_v51 = vld [vmem:[#allocation47_spill] sm:$0xff] }
 0xe7a   :  { %v7491_v0 = vpack.c.bf16 %v7383_v50, %v7379_v5  ;;  %v7126_v16 = vmul.f32 %v16585_v13, %v18407_v51  ;;  %v18410_v50 = vld [vmem:[#allocation59_spill] sm:$0xff] }
 0xe7b   :  { %v7492_v58 = vpack.c.bf16 %v7384_v20, %v7380_v18  ;;  %v7128_v18 = vmul.f32 %v16545_v38, %v18410_v50  ;;  %v18411_v20 = vld [vmem:[#allocation60_spill] sm:$0xff] }
 0xe82   :  { %7822 = vmatmul.bf16.gmra.mxu2 %v7487_v29  ;;  %7911 = vmatmul.bf16.gmra.mxu3 %v7488_v12  ;;  %v7253_v29 = vadd.f32 %v16596_v27, %v7116_v28  ;;  %v7257_v12 = vadd.f32 %v16596_v27, %v7120_v40  ;;  %v18404_v28 = vld [vmem:[#allocation123_spill] sm:$0xff] }
 0xe83   :  { %8000 = vmatmul.bf16.gmra.mxu0 %v7489_v30  ;;  %8089 = vmatmul.bf16.gmra.mxu1 %v7490_v11  ;;  %v7254_v30 = vadd.f32 %v16598_v52, %v7117_v63  ;;  %v7258_v11 = vadd.f32 %v16598_v52, %v7121_v62  ;;  %v7122_v40 = vmul.f32 %v16585_v13, %v18404_v28  ;;  %v18405_v63 = vld [vmem:[#allocation112_spill] sm:$0xff] }
 0xe84   :  { %v7381_v47 = vmax.f32 %v7253_v29, 0.0  ;;  %v7385_v44 = vmax.f32 %v7257_v12, 0.0  ;;  %v7123_v62 = vmul.f32 %v16551_v4, %v18405_v63  ;;  %v7204_v29 = vmul.f32 %v16545_v38, %v16503_v59  ;;  %v18408_v12 = vld [vmem:[#allocation95_spill] sm:$0xff] }
 0xe85   :  { %v7382_v39 = vmax.f32 %v7254_v30, 0.0  ;;  %v7386_v54 = vmax.f32 %v7258_v11, 0.0  ;;  %v7125_v30 = vmul.f32 %v16553_v42, %v18408_v12  ;;  %v18409_v11 = vld [vmem:[#allocation128_spill] sm:$0xff]  ;;  %v7345_v59 = vadd.f32 %v16596_v27, %v16549_v14 }
 0xe86   :  { %v7493_v26 = vpack.c.bf16 %v7385_v44, %v7381_v47  ;;  %v7127_v5 = vmul.f32 %v16551_v4, %v18409_v11  ;;  %v7129_v47 = vmul.f32 %v16553_v42, %v18411_v20  ;;  %v7259_v44 = vadd.f32 %v16592_v24, %v7122_v40 }
 0xe87   :  { %v7494_v22 = vpack.c.bf16 %v7386_v54, %v7382_v39  ;;  %v7263_v39 = vadd.f32 %v16592_v24, %v7126_v16  ;;  %v7341_v54 = vadd.f32 %v16596_v27, %v7204_v29  ;;  %v7262_v28 = vadd.f32 %v16598_v52, %v7125_v30  ;;  %v18412_v30 = vld [vmem:[#allocation52_spill] sm:$0xff] }
 0xe88   :  { %v7266_v63 = vadd.f32 %v16598_v52, %v7129_v47  ;;  %v7473_v3 = vmax.f32 %v7345_v59, 0.0  ;;  %v7387_v51 = vmax.f32 %v7259_v44, 0.0  ;;  %v7130_v47 = vmul.f32 %v16585_v13, %v18412_v30  ;;  %v18413_v44 = vld [vmem:[#allocation71_spill] sm:$0xff] }
 0xe89   :  { %v7469_v40 = vmax.f32 %v7341_v54, 0.0  ;;  %v7391_v16 = vmax.f32 %v7263_v39, 0.0  ;;  %v7390_v50 = vmax.f32 %v7262_v28, 0.0  ;;  %v7134_v39 = vmul.f32 %v16585_v13, %v18413_v44  ;;  %v18414_v54 = vld [vmem:[#allocation49_spill] sm:$0xff] }
 0xe8a   :  { %v7131_v59 = vmul.f32 %v16551_v4, %v18414_v54  ;;  %v7136_v28 = vmul.f32 %v16545_v38, %v16273_v57 }
 0xe8b   :  { %v16749_v29 = vpack.c.bf16 %v7473_v3, %v7469_v40  ;;  %v7495_v20 = vpack.c.bf16 %v7391_v16, %v7387_v51  ;;  %v18418_v40 = vld [vmem:[#allocation67_spill] sm:$0xff]  ;;  %v7267_v51 = vadd.f32 %v16592_v24, %v7130_v47  ;;  %v7271_v16 = vadd.f32 %v16592_v24, %v7134_v39 }
 0xe8c   :  { %v7137_v3 = vmul.f32 %v16553_v42, %v18418_v40 }
 0xe92   :  { %7827 = vmatmul.bf16.gmra.mxu2 %v7491_v0  ;;  %7916 = vmatmul.bf16.gmra.mxu3 %v7492_v58  ;;  %v7260_v0 = vadd.f32 %v16594_v1, %v7123_v62  ;;  %v7264_v58 = vadd.f32 %v16594_v1, %v7127_v5  ;;  %v7394_v5 = vmax.f32 %v7266_v63, 0.0 }
 0xe93   :  { %8005 = vmatmul.bf16.gmra.mxu0 %v7493_v26  ;;  %8094 = vmatmul.bf16.gmra.mxu1 %v7494_v22  ;;  %v7261_v26 = vadd.f32 %v16596_v27, %v7124_v46  ;;  %v7265_v22 = vadd.f32 %v16596_v27, %v7128_v18 }
 0xe94   :  { %v7388_v12 = vmax.f32 %v7260_v0, 0.0  ;;  %v7392_v14 = vmax.f32 %v7264_v58, 0.0  ;;  %v7498_v18 = vpack.c.bf16 %v7394_v5, %v7390_v50  ;;  %v18415_v0 = vld [vmem:[#allocation114_spill] sm:$0xff]  ;;  %v7274_v50 = vadd.f32 %v16598_v52, %v7137_v3 }
 0xe95   :  { %v7389_v11 = vmax.f32 %v7261_v26, 0.0  ;;  %v7393_v62 = vmax.f32 %v7265_v22, 0.0  ;;  %v7132_v58 = vmul.f32 %v16545_v38, %v18415_v0  ;;  %v18416_v26 = vld [vmem:[#allocation62_spill] sm:$0xff]  ;;  %v7395_v5 = vmax.f32 %v7267_v51, 0.0  ;;  %v18422_v51 = vld [vmem:[#allocation68_spill] sm:$0xff] }
 0xe96   :  { %v7496_v46 = vpack.c.bf16 %v7392_v14, %v7388_v12  ;;  %v7135_v22 = vmul.f32 %v16551_v4, %v18416_v26  ;;  %v7268_v12 = vadd.f32 %v16594_v1, %v7131_v59  ;;  %v7402_v39 = vmax.f32 %v7274_v50, 0.0 }
 0xe97   :  { %v7497_v45 = vpack.c.bf16 %v7393_v62, %v7389_v11  ;;  %v7269_v11 = vadd.f32 %v16596_v27, %v7132_v58  ;;  %v7273_v62 = vadd.f32 %v16596_v27, %v7136_v28  ;;  %v18419_v58 = vld [vmem:[#allocation66_spill] sm:$0xff]  ;;  %v18420_v28 = vld [vmem:[#allocation69_spill] sm:$0xff]  ;;  %v7140_v3 = vmul.f32 %v16545_v38, %v18353_v53 }
 0xe98   :  { %v7272_v14 = vadd.f32 %v16594_v1, %v7135_v22  ;;  %v7138_v22 = vmul.f32 %v16585_v13, %v18419_v58 }
 0xe99   :  { %v7397_v30 = vmax.f32 %v7269_v11, 0.0  ;;  %v7401_v47 = vmax.f32 %v7273_v62, 0.0  ;;  %v7145_v62 = vmul.f32 %v16553_v42, %v16262_v60 }
 0xe9b   :  { %v7501_v0 = vpack.c.bf16 %v7401_v47, %v7397_v30 }
 0xea2   :  { %7832 = vmatmul.bf16.gmra.mxu2 %v7495_v20  ;;  %7921 = vmatmul.bf16.gmra.mxu3 %v7496_v46  ;;  %v7399_v20 = vmax.f32 %v7271_v16, 0.0  ;;  %v7396_v46 = vmax.f32 %v7268_v12, 0.0  ;;  %v7143_v16 = vmul.f32 %v16551_v4, %v18422_v51  ;;  %v7144_v12 = vmul.f32 %v16545_v38, %v16301_v2  ;;  %v18426_v51 = vld [vmem:[#allocation111_spill] sm:$0xff] }
 0xea3   :  { %8010 = vmatmul.bf16.gmra.mxu0 %v7497_v45  ;;  %8099 = vmatmul.bf16.gmra.mxu1 %v7498_v18  ;;  %v18417_v45 = vld [vmem:[#allocation120_spill] sm:$0xff]  ;;  %v7400_v18 = vmax.f32 %v7272_v14, 0.0 }
 0xea4   :  { %v7133_v63 = vmul.f32 %v16553_v42, %v18417_v45  ;;  %v7499_v54 = vpack.c.bf16 %v7399_v20, %v7395_v5  ;;  %v7142_v45 = vmul.f32 %v16585_v13, %v18420_v28  ;;  %v18423_v14 = vld [vmem:[#allocation44_spill] sm:$0xff]  ;;  %v7280_v53 = vadd.f32 %v16594_v1, %v7143_v16 }
 0xea5   :  { %v7500_v59 = vpack.c.bf16 %v7400_v18, %v7396_v46  ;;  %v7141_v11 = vmul.f32 %v16553_v42, %v18423_v14  ;;  %v7277_v20 = vadd.f32 %v16596_v27, %v7140_v3  ;;  %v7281_v46 = vadd.f32 %v16596_v27, %v7144_v12  ;;  %v18427_v14 = vld [vmem:[#allocation74_spill] sm:$0xff] }
 0xea6   :  { %v7270_v57 = vadd.f32 %v16598_v52, %v7133_v63  ;;  %v18421_v63 = vld [vmem:[#allocation70_spill] sm:$0xff]  ;;  %v7279_v50 = vadd.f32 %v16592_v24, %v7142_v45  ;;  %v7282_v18 = vadd.f32 %v16598_v52, %v7145_v62  ;;  %v7408_v60 = vmax.f32 %v7280_v53, 0.0  ;;  %v18424_v45 = vld [vmem:[#allocation76_spill] sm:$0xff] }
 0xea7   :  { %v7139_v40 = vmul.f32 %v16551_v4, %v18421_v63  ;;  %v7278_v2 = vadd.f32 %v16598_v52, %v7141_v11  ;;  %v7146_v63 = vmul.f32 %v16585_v13, %v18424_v45  ;;  %v7147_v16 = vmul.f32 %v16551_v4, %v18426_v51  ;;  %v16823_v45 = vld [vmem:[#allocation2 + $0x1d] ss:$0 sm:$0xff]  ;;  %v18429_v51 = vld [vmem:[#allocation78_spill] sm:$0xff] }
 0xea8   :  { %v7398_v44 = vmax.f32 %v7270_v57, 0.0  ;;  %v7275_v57 = vadd.f32 %v16592_v24, %v7138_v22  ;;  %v7407_v47 = vmax.f32 %v7279_v50, 0.0  ;;  %v7148_v12 = vmul.f32 %v16545_v38, %v15898_v33 }
 0xea9   :  { %v7276_v5 = vadd.f32 %v16594_v1, %v7139_v40  ;;  %v18425_v40 = vld [vmem:[#allocation81_spill] sm:$0xff]  ;;  %v7151_v11 = vmul.f32 %v16551_v4, %v18427_v14  ;;  %v7152_v62 = vmul.f32 %v16545_v38, %v16328_v49  ;;  %v7153_v50 = vmul.f32 %v16553_v42, %v16294_v10 }
 0xeaa   :  { %v7502_v26 = vpack.c.bf16 %v7402_v39, %v7398_v44  ;;  %v7403_v30 = vmax.f32 %v7275_v57, 0.0  ;;  %v7405_v39 = vmax.f32 %v7277_v20, 0.0  ;;  %v7150_v3 = vmul.f32 %v16585_v13, %v18425_v40  ;;  %v18428_v40 = vld [vmem:[#allocation72_spill] sm:$0xff] }
 0xeab   :  { %v7404_v44 = vmax.f32 %v7276_v5, 0.0  ;;  %v7149_v57 = vmul.f32 %v16553_v42, %v18352_v17  ;;  %v7283_v5 = vadd.f32 %v16592_v24, %v7146_v63  ;;  %v7284_v20 = vadd.f32 %v16594_v1, %v7147_v16 }
 0xeac   :  { %v7287_v53 = vadd.f32 %v16592_v24, %v7150_v3  ;;  %v7288_v33 = vadd.f32 %v16594_v1, %v7151_v11  ;;  %v7154_v3 = vmul.f32 %v16585_v13, %v18428_v40  ;;  %v7155_v16 = vmul.f32 %v16551_v4, %v18429_v51 }
 0xead   :  { %v7504_v58 = vpack.c.bf16 %v7408_v60, %v7404_v44  ;;  %v7286_v49 = vadd.f32 %v16598_v52, %v7149_v57  ;;  %v7411_v17 = vmax.f32 %v7283_v5, 0.0  ;;  %v7156_v57 = vmul.f32 %v16545_v38, %v15964_v9  ;;  %v18431_v5 = vld [vmem:[#allocation85_spill] sm:$0xff] }
 0xeae   :  { %v7416_v10 = vmax.f32 %v7288_v33, 0.0  ;;  %v7161_v33 = vmul.f32 %v16553_v42, %v16317_v15  ;;  %v7292_v9 = vadd.f32 %v16594_v1, %v7155_v16 }
 0xeb0   :  { %v7298_v15 = vadd.f32 %v16598_v52, %v7161_v33 }
 0xeb2   :  { %7837 = vmatmul.bf16.gmra.mxu2 %v7499_v54  ;;  %7926 = vmatmul.bf16.gmra.mxu3 %v7500_v59  ;;  %v7409_v54 = vmax.f32 %v7281_v46, 0.0  ;;  %v7406_v59 = vmax.f32 %v7278_v2, 0.0  ;;  %v7285_v46 = vadd.f32 %v16596_v27, %v7148_v12  ;;  %v7289_v2 = vadd.f32 %v16596_v27, %v7152_v62  ;;  %v18430_v12 = vld [vmem:[#allocation82_spill] sm:$0xff] }
 0xeb3   :  { %8015 = vmatmul.bf16.gmra.mxu0 %v7501_v0  ;;  %8104 = vmatmul.bf16.gmra.mxu1 %v7502_v26  ;;  %v7410_v0 = vmax.f32 %v7282_v18, 0.0  ;;  %v7503_v26 = vpack.c.bf16 %v7407_v47, %v7403_v30  ;;  %v7290_v18 = vadd.f32 %v16598_v52, %v7153_v50  ;;  %v7415_v30 = vmax.f32 %v7287_v53, 0.0 }
 0xeb4   :  { %v7505_v22 = vpack.c.bf16 %v7409_v54, %v7405_v39  ;;  %v7412_v47 = vmax.f32 %v7284_v20, 0.0  ;;  %v7413_v44 = vmax.f32 %v7285_v46, 0.0  ;;  %v7417_v60 = vmax.f32 %v7289_v2, 0.0 }
 0xeb5   :  { %v7506_v28 = vpack.c.bf16 %v7410_v0, %v7406_v59  ;;  %v7414_v39 = vmax.f32 %v7286_v49, 0.0  ;;  %v7418_v54 = vmax.f32 %v7290_v18, 0.0  ;;  %v7507_v0 = vpack.c.bf16 %v7415_v30, %v7411_v17 }
 0xeb6   :  { %v7158_v14 = vmul.f32 %v16585_v13, %v18430_v12  ;;  %v7157_v50 = vmul.f32 %v16553_v42, %v15944_v8  ;;  %v7159_v53 = vmul.f32 %v16551_v4, %v18431_v5  ;;  %v7160_v20 = vmul.f32 %v16545_v38, %v16357_v7 }
 0xeb7   :  { %v7291_v49 = vadd.f32 %v16592_v24, %v7154_v3  ;;  %v7293_v30 = vadd.f32 %v16596_v27, %v7156_v57  ;;  %v7426_v16 = vmax.f32 %v7298_v15, 0.0 }
 0xeb8   :  { %v7295_v18 = vadd.f32 %v16592_v24, %v7158_v14  ;;  %v7296_v8 = vadd.f32 %v16594_v1, %v7159_v53  ;;  %v7294_v7 = vadd.f32 %v16598_v52, %v7157_v50 }
 0xeba   :  { %v7422_v51 = vmax.f32 %v7294_v7, 0.0  ;;  %v18435_v7 = vld [vmem:[#allocation94_spill] sm:$0xff] }
 0xebb   :  { %v7167_v15 = vmul.f32 %v16551_v4, %v18435_v7 }
 0xebc   :  { %v7514_v5 = vpack.c.bf16 %v7426_v16, %v7422_v51 }
 0xec2   :  { %7842 = vmatmul.bf16.gmra.mxu2 %v7503_v26  ;;  %7931 = vmatmul.bf16.gmra.mxu3 %v7504_v58  ;;  %v7508_v58 = vpack.c.bf16 %v7416_v10, %v7412_v47  ;;  %v7297_v47 = vadd.f32 %v16596_v27, %v7160_v20  ;;  %v18432_v20 = vld [vmem:[#allocation88_spill] sm:$0xff] }
 0xec3   :  { %8020 = vmatmul.bf16.gmra.mxu0 %v7505_v22  ;;  %8109 = vmatmul.bf16.gmra.mxu1 %v7506_v28  ;;  %v7509_v22 = vpack.c.bf16 %v7417_v60, %v7413_v44  ;;  %v7510_v28 = vpack.c.bf16 %v7418_v54, %v7414_v39  ;;  %v7419_v60 = vmax.f32 %v7291_v49, 0.0  ;;  %v7423_v39 = vmax.f32 %v7295_v18, 0.0 }
 0xec4   :  { %v7162_v33 = vmul.f32 %v16585_v13, %v18432_v20  ;;  %v7164_v18 = vmul.f32 %v16545_v38, %v16030_v6  ;;  %v7169_v6 = vmul.f32 %v16553_v42, %v16350_v37 }
 0xec6   :  { %v7306_v16 = vadd.f32 %v16598_v52, %v7169_v6 }
 0xed0   :  { %v7986_v59 = vpop.f32.mrf.mxu0  ;;  %v8075_v26 = vpop.f32.mrf.mxu1 }
 0xed2   :  { %7847 = vmatmul.bf16.gmra.mxu2 %v7507_v0  ;;  %7936 = vmatmul.bf16.gmra.mxu3 %v7508_v58  ;;  %v7420_v0 = vmax.f32 %v7292_v9, 0.0  ;;  %v7424_v58 = vmax.f32 %v7296_v8, 0.0  ;;  %v7165_v8 = vmul.f32 %v16553_v42, %v16007_v25 }
 0xed3   :  { %8025 = vmatmul.bf16.gmra.mxu0 %v7509_v22  ;;  %8114 = vmatmul.bf16.gmra.mxu1 %v7510_v28  ;;  %v7421_v22 = vmax.f32 %v7293_v30, 0.0  ;;  %v7425_v28 = vmax.f32 %v7297_v47, 0.0 }
 0xed4   :  { %v7512_v57 = vpack.c.bf16 %v7424_v58, %v7420_v0  ;;  %v7302_v51 = vadd.f32 %v16598_v52, %v7165_v8 }
 0xed5   :  { %v7808_v63 = vpop.f32.mrf.mxu2  ;;  %v7897_v62 = vpop.f32.mrf.mxu3 }
 0xed6   :  { %v7809_v11 = vadd.f32 %v16823_v45, %v7808_v63 }
 0xed8   :  { %v7898_v46 = vadd.f32 %v7897_v62, %v7809_v11  ;;  %v7988_v2 = vpop.f32.mrf.mxu0  ;;  %v8077_v17 = vpop.f32.mrf.mxu1  ;;  %v7511_v11 = vpack.c.bf16 %v7423_v39, %v7419_v60  ;;  %v7299_v60 = vadd.f32 %v16592_v24, %v7162_v33 }
 0xeda   :  { %v7987_v10 = vadd.f32 %v7986_v59, %v7898_v46  ;;  %v18433_v46 = vld [vmem:[#allocation89_spill] sm:$0xff] }
 0xedb   :  { %v7163_v49 = vmul.f32 %v16551_v4, %v18433_v46 }
 0xedc   :  { %v8076_v44 = vadd.f32 %v8075_v26, %v7987_v10  ;;  %v7513_v26 = vpack.c.bf16 %v7425_v28, %v7421_v22 }
 0xedd   :  { %v7810_v54 = vpop.f32.mrf.mxu2  ;;  %v7899_v3 = vpop.f32.mrf.mxu3  ;;  %v7300_v22 = vadd.f32 %v16594_v1, %v7163_v49  ;;  %v7430_v49 = vmax.f32 %v7302_v51, 0.0 }
 0xede   :  { %v8155_v63 = vsub.f32 0.0, %v8076_v44  ;;  %v7811_v40 = vadd.f32 %v16823_v45, %v7810_v54  ;;  %v7168_v44 = vmul.f32 %v16545_v38, %v16386_v43 }
 0xee0   :  { %v8187_v12 = vmul.f32 1.442695, %v8155_v63  ;;  %v7900_v59 = vadd.f32 %v7899_v3, %v7811_v40  ;;  %v7991_v14 = vpop.f32.mrf.mxu0  ;;  %v8080_v62 = vpop.f32.mrf.mxu1  ;;  %v7304_v40 = vadd.f32 %v16594_v1, %v7167_v15  ;;  %v7301_v3 = vadd.f32 %v16596_v27, %v7164_v18 }
 0xee1   :  { %v7305_v43 = vadd.f32 %v16596_v27, %v7168_v44  ;;  %v7434_v18 = vmax.f32 %v7306_v16, 0.0 }
 0xee2   :  { %9743 = vpow2.f32 %v8187_v12  ;;  %v7989_v50 = vadd.f32 %v7988_v2, %v7900_v59  ;;  %7852 = vmatmul.bf16.gmra.mxu2 %v7511_v11  ;;  %7941 = vmatmul.bf16.gmra.mxu3 %v7512_v57  ;;  %v18434_v2 = vld [vmem:[#allocation92_spill] sm:$0xff]  ;;  %v7427_v59 = vmax.f32 %v7299_v60, 0.0 }
 0xee3   :  { %8030 = vmatmul.bf16.gmra.mxu0 %v7513_v26  ;;  %8119 = vmatmul.bf16.gmra.mxu1 %v7514_v5  ;;  %v7166_v30 = vmul.f32 %v16585_v13, %v18434_v2  ;;  %v7428_v26 = vmax.f32 %v7300_v22, 0.0  ;;  %v7429_v5 = vmax.f32 %v7301_v3, 0.0  ;;  %v7518_v6 = vpack.c.bf16 %v7434_v18, %v7430_v49 }
 0xee4   :  { %v8078_v53 = vadd.f32 %v8077_v17, %v7989_v50  ;;  %v7432_v50 = vmax.f32 %v7304_v40, 0.0  ;;  %v18438_v40 = vld [vmem:[#allocation98_spill] sm:$0xff] }
 0xee5   :  { %v7813_v9 = vpop.f32.mrf.mxu2  ;;  %v7902_v10 = vpop.f32.mrf.mxu3  ;;  %v7303_v58 = vadd.f32 %v16592_v24, %v7166_v30 }
 0xee6   :  { %v8156_v47 = vsub.f32 0.0, %v8078_v53  ;;  %v7814_v17 = vadd.f32 %v16823_v45, %v7813_v9  ;;  %v7433_v53 = vmax.f32 %v7305_v43, 0.0  ;;  %v7173_v43 = vmul.f32 %v16553_v42, %v16364_v41 }
 0xee7   :  { %v7431_v11 = vmax.f32 %v7303_v58, 0.0  ;;  %v18437_v58 = vld [vmem:[#allocation97_spill] sm:$0xff] }
 0xee8   :  { %v9744_v39 = vpop.eup %9743  ;;  %v8189_v25 = vmul.f32 1.442695, %v8156_v47  ;;  %v7903_v54 = vadd.f32 %v7902_v10, %v7814_v17  ;;  %v7993_v0 = vpop.f32.mrf.mxu0  ;;  %v7516_v10 = vpack.c.bf16 %v7432_v50, %v7428_v26  ;;  %v7517_v7 = vpack.c.bf16 %v7433_v53, %v7429_v5 }
 0xee9   :  { %v8251_v28 = vadd.f32 1.0, %v9744_v39  ;;  %v8082_v63 = vpop.f32.mrf.mxu1  ;;  %v7515_v30 = vpack.c.bf16 %v7431_v11, %v7427_v59  ;;  %v7171_v22 = vmul.f32 %v16551_v4, %v18437_v58  ;;  %v7177_v59 = vmul.f32 %v16553_v42, %v16375_v48 }
 0xeea   :  { %9745 = vpow2.f32 %v8189_v25  ;;  %v7992_v37 = vadd.f32 %v7991_v14, %v7903_v54  ;;  %v18436_v25 = vld [vmem:[#allocation96_spill] sm:$0xff]  ;;  %v7310_v48 = vadd.f32 %v16598_v52, %v7173_v43 }
 0xeeb   :  { %9747 = vrcp.f32 %v8251_v28  ;;  %v7170_v54 = vmul.f32 %v16585_v13, %v18436_v25  ;;  %v7172_v28 = vmul.f32 %v16545_v38, %v16400_v61  ;;  %v7176_v61 = vmul.f32 %v16545_v38, %v16414_v36 }
 0xeec   :  { %v8081_v12 = vadd.f32 %v8080_v62, %v7992_v37  ;;  %v18439_v37 = vld [vmem:[#allocation99_spill] sm:$0xff]  ;;  %v7308_v53 = vadd.f32 %v16594_v1, %v7171_v22 }
 0xeed   :  { %v7815_v57 = vpop.f32.mrf.mxu2  ;;  %v7904_v46 = vpop.f32.mrf.mxu3  ;;  %v7307_v11 = vadd.f32 %v16592_v24, %v7170_v54  ;;  %v7309_v36 = vadd.f32 %v16596_v27, %v7172_v28  ;;  %v7313_v18 = vadd.f32 %v16596_v27, %v7176_v61  ;;  %v7438_v54 = vmax.f32 %v7310_v48, 0.0 }
 0xeee   :  { %v8157_v20 = vsub.f32 0.0, %v8081_v12  ;;  %v7816_v33 = vadd.f32 %v16823_v45, %v7815_v57 }
 0xef0   :  { %v9746_v14 = vpop.eup %9745  ;;  %v8191_v9 = vmul.f32 1.442695, %v8157_v20  ;;  %v7905_v8 = vadd.f32 %v7904_v46, %v7816_v33  ;;  %v7996_v2 = vpop.f32.mrf.mxu0 }
 0xef1   :  { %v9748_v47 = vpop.eup %9747  ;;  %v8252_v62 = vadd.f32 1.0, %v9746_v14  ;;  %v8085_v17 = vpop.f32.mrf.mxu1 }
 0xef2   :  { %v8315_v15 = vmax.f32 %v9748_v47, 0.0  ;;  %9749 = vpow2.f32 %v8191_v9  ;;  %v7994_v44 = vadd.f32 %v7993_v0, %v7905_v8  ;;  %7857 = vmatmul.bf16.gmra.mxu2 %v7515_v30  ;;  %7946 = vmatmul.bf16.gmra.mxu3 %v7516_v10  ;;  %v7174_v0 = vmul.f32 %v16585_v13, %v18438_v40 }
 0xef3   :  { %9751 = vrcp.f32 %v8252_v62  ;;  %8035 = vmatmul.bf16.gmra.mxu0 %v7517_v7  ;;  %8124 = vmatmul.bf16.gmra.mxu1 %v7518_v6  ;;  %v7314_v8 = vadd.f32 %v16598_v52, %v7177_v59  ;;  %v7435_v62 = vmax.f32 %v7307_v11, 0.0  ;;  %v7437_v6 = vmax.f32 %v7309_v36, 0.0  ;;  %v18443_v36 = vld [vmem:[#allocation107_spill] sm:$0xff] }
 0xef4   :  { %v8347_v60 = vmin.f32 %v8315_v15, 1.0  ;;  %v8083_v39 = vadd.f32 %v8082_v63, %v7994_v44  ;;  %v7175_v63 = vmul.f32 %v16551_v4, %v18439_v37  ;;  %v7311_v41 = vadd.f32 %v16592_v24, %v7174_v0 }
 0xef5   :  { %v7818_v3 = vpop.f32.mrf.mxu2  ;;  %v7907_v12 = vpop.f32.mrf.mxu3  ;;  %v7436_v15 = vmax.f32 %v7308_v53, 0.0  ;;  %v7442_v58 = vmax.f32 %v7314_v8, 0.0  ;;  %v7180_v53 = vmul.f32 %v16545_v38, %v16428_v32  ;;  %v7184_v32 = vmul.f32 %v16545_v38, %v16442_v35 }
 0xef6   :  { %8379 = vst [vmem:[%s17129_s11] sm:$0xff] %v8347_v60  ;;  %v8158_v51 = vsub.f32 0.0, %v8083_v39  ;;  %v7819_v16 = vadd.f32 %v16823_v45, %v7818_v3  ;;  %v7312_v20 = vadd.f32 %v16594_v1, %v7175_v63  ;;  %v7439_v10 = vmax.f32 %v7311_v41, 0.0  ;;  %v18440_v41 = vld [vmem:[#allocation101_spill] sm:$0xff] }
 0xef7   :  { %v7441_v60 = vmax.f32 %v7313_v18, 0.0  ;;  %v7522_v61 = vpack.c.bf16 %v7442_v58, %v7438_v54  ;;  %v7317_v35 = vadd.f32 %v16596_v27, %v7180_v53 }
 0xef8   :  { %v9750_v57 = vpop.eup %9749  ;;  %v8193_v26 = vmul.f32 1.442695, %v8158_v51  ;;  %v7908_v50 = vadd.f32 %v7907_v12, %v7819_v16  ;;  %v7998_v5 = vpop.f32.mrf.mxu0  ;;  %v7440_v44 = vmax.f32 %v7312_v20, 0.0  ;;  %v7519_v0 = vpack.c.bf16 %v7439_v10, %v7435_v62  ;;  %v18442_v20 = vld [vmem:[#allocation121_spill] sm:$0xff] }
 0xef9   :  { %v9752_v33 = vpop.eup %9751  ;;  %v8253_v46 = vadd.f32 1.0, %v9750_v57  ;;  %v8087_v49 = vpop.f32.mrf.mxu1  ;;  %v7521_v51 = vpack.c.bf16 %v7441_v60, %v7437_v6  ;;  %v7178_v57 = vmul.f32 %v16585_v13, %v18440_v41 }
 0xefa   :  { %v8316_v14 = vmax.f32 %v9752_v33, 0.0  ;;  %9753 = vpow2.f32 %v8193_v26  ;;  %v7997_v9 = vadd.f32 %v7996_v2, %v7908_v50  ;;  %v7520_v63 = vpack.c.bf16 %v7440_v44, %v7436_v15  ;;  %v18441_v26 = vld [vmem:[#allocation102_spill] sm:$0xff] }
 0xefb   :  { %9755 = vrcp.f32 %v8253_v46  ;;  %v7179_v50 = vmul.f32 %v16551_v4, %v18441_v26  ;;  %v7181_v46 = vmul.f32 %v16553_v42, %v16393_v31  ;;  %v7315_v8 = vadd.f32 %v16592_v24, %v7178_v57 }
 0xefc   :  { %v8348_v30 = vmin.f32 %v8316_v14, 1.0  ;;  %v8086_v47 = vadd.f32 %v8085_v17, %v7997_v9  ;;  %v7185_v9 = vmul.f32 %v16553_v42, %v16407_v34 }
 0xefd   :  { %v7820_v7 = vpop.f32.mrf.mxu2  ;;  %v7909_v2 = vpop.f32.mrf.mxu3  ;;  %v7318_v34 = vadd.f32 %v16598_v52, %v7181_v46 }
 0xefe   :  { %8380 = vst [vmem:[%s17129_s11 + $0x8] sm:$0xff] %v8348_v30  ;;  %v8159_v39 = vsub.f32 0.0, %v8086_v47  ;;  %v7821_v25 = vadd.f32 %v16823_v45, %v7820_v7  ;;  %v7316_v7 = vadd.f32 %v16594_v1, %v7179_v50  ;;  %v7322_v54 = vadd.f32 %v16598_v52, %v7185_v9  ;;  %v18445_v9 = vld [vmem:[#allocation117_spill] sm:$0xff] }
 0xf00   :  { %v9754_v22 = vpop.eup %9753  ;;  %v8195_v28 = vmul.f32 1.442695, %v8159_v39  ;;  %v7910_v17 = vadd.f32 %v7909_v2, %v7821_v25  ;;  %v8001_v40 = vpop.f32.mrf.mxu0  ;;  %v7321_v39 = vadd.f32 %v16596_v27, %v7184_v32 }
 0xf01   :  { %v9756_v3 = vpop.eup %9755  ;;  %v8254_v43 = vadd.f32 1.0, %v9754_v22  ;;  %v8090_v37 = vpop.f32.mrf.mxu1 }
 0xf02   :  { %v8317_v16 = vmax.f32 %v9756_v3, 0.0  ;;  %9757 = vpow2.f32 %v8195_v28  ;;  %v7999_v12 = vadd.f32 %v7998_v5, %v7910_v17  ;;  %7862 = vmatmul.bf16.gmra.mxu2 %v7519_v0  ;;  %7951 = vmatmul.bf16.gmra.mxu3 %v7520_v63  ;;  %v7182_v5 = vmul.f32 %v16585_v13, %v18442_v20 }
 0xf03   :  { %9759 = vrcp.f32 %v8254_v43  ;;  %8040 = vmatmul.bf16.gmra.mxu0 %v7521_v51  ;;  %8129 = vmatmul.bf16.gmra.mxu1 %v7522_v61  ;;  %v7443_v28 = vmax.f32 %v7315_v8, 0.0  ;;  %v7444_v3 = vmax.f32 %v7316_v7, 0.0  ;;  %v7445_v63 = vmax.f32 %v7317_v35, 0.0  ;;  %v18447_v7 = vld [vmem:[#allocation26_spill] sm:$0xff] }
 0xf04   :  { %v8349_v59 = vmin.f32 %v8317_v16, 1.0  ;;  %v8088_v11 = vadd.f32 %v8087_v49, %v7999_v12  ;;  %v7183_v49 = vmul.f32 %v16551_v4, %v18443_v36  ;;  %v7319_v31 = vadd.f32 %v16592_v24, %v7182_v5 }
 0xf05   :  { %v7823_v33 = vpop.f32.mrf.mxu2  ;;  %v7912_v14 = vpop.f32.mrf.mxu3  ;;  %v7449_v51 = vmax.f32 %v7321_v39, 0.0  ;;  %v7446_v61 = vmax.f32 %v7318_v34, 0.0  ;;  %v7187_v8 = vmul.f32 %v16551_v4, %v18445_v9  ;;  %v7193_v35 = vmul.f32 %v16553_v42, %v16435_v21 }
 0xf06   :  { %8381 = vst [vmem:[%s17129_s11 + $0x10] sm:$0xff] %v8349_v59  ;;  %v8160_v18 = vsub.f32 0.0, %v8088_v11  ;;  %v7824_v48 = vadd.f32 %v16823_v45, %v7823_v33  ;;  %v7320_v15 = vadd.f32 %v16594_v1, %v7183_v49  ;;  %v7447_v17 = vmax.f32 %v7319_v31, 0.0 }
 0xf07   :  { %v7450_v59 = vmax.f32 %v7322_v54, 0.0  ;;  %v7525_v33 = vpack.c.bf16 %v7449_v51, %v7445_v63  ;;  %v7188_v31 = vmul.f32 %v16545_v38, %v16456_v23  ;;  %v7192_v23 = vmul.f32 %v16545_v38, %v16468_v55 }
 0xf08   :  { %v9758_v30 = vpop.eup %9757  ;;  %v8197_v47 = vmul.f32 1.442695, %v8160_v18  ;;  %v7913_v62 = vadd.f32 %v7912_v14, %v7824_v48  ;;  %v8003_v10 = vpop.f32.mrf.mxu0  ;;  %v7448_v43 = vmax.f32 %v7320_v15, 0.0  ;;  %v7523_v26 = vpack.c.bf16 %v7447_v17, %v7443_v28  ;;  %v18444_v14 = vld [vmem:[#allocation24_spill] sm:$0xff] }
 0xf09   :  { %v9760_v44 = vpop.eup %9759  ;;  %v8255_v6 = vadd.f32 1.0, %v9758_v30  ;;  %v8092_v60 = vpop.f32.mrf.mxu1  ;;  %v7526_v49 = vpack.c.bf16 %v7450_v59, %v7446_v61  ;;  %v7186_v32 = vmul.f32 %v16585_v13, %v18444_v14  ;;  %v18446_v30 = vld [vmem:[#allocation25_spill] sm:$0xff]  ;;  %v7191_v15 = vmul.f32 %v16551_v4, %v18447_v7  ;;  %v18448_v7 = vld [vmem:[#allocation56_spill] sm:$0xff] }
 0xf0a   :  { %v8318_v25 = vmax.f32 %v9760_v44, 0.0  ;;  %9761 = vpow2.f32 %v8197_v47  ;;  %v8002_v2 = vadd.f32 %v8001_v40, %v7913_v62  ;;  %v7524_v5 = vpack.c.bf16 %v7448_v43, %v7444_v3 }
 0xf0b   :  { %9763 = vrcp.f32 %v8255_v6  ;;  %v7190_v47 = vmul.f32 %v16585_v13, %v18446_v30  ;;  %v7323_v39 = vadd.f32 %v16592_v24, %v7186_v32  ;;  %v7325_v55 = vadd.f32 %v16596_v27, %v7188_v31 }
 0xf0c   :  { %v8350_v58 = vmin.f32 %v8318_v25, 1.0  ;;  %v8091_v22 = vadd.f32 %v8090_v37, %v8002_v2  ;;  %v7329_v3 = vadd.f32 %v16596_v27, %v7192_v23  ;;  %v7330_v51 = vadd.f32 %v16598_v52, %v7193_v35  ;;  %v18450_v23 = vld [vmem:[#allocation109_spill] sm:$0xff] }
 0xf0d   :  { %v7825_v0 = vpop.f32.mrf.mxu2  ;;  %v7914_v40 = vpop.f32.mrf.mxu3  ;;  %v7198_v35 = vmul.f32 %v16585_v13, %v18450_v23 }
 0xf0e   :  { %8382 = vst [vmem:[%s17129_s11 + $0x18] sm:$0xff] %v8350_v58  ;;  %v8161_v16 = vsub.f32 0.0, %v8091_v22  ;;  %v7826_v12 = vadd.f32 %v16823_v45, %v7825_v0  ;;  %v7324_v58 = vadd.f32 %v16594_v1, %v7187_v8  ;;  %v7328_v22 = vadd.f32 %v16594_v1, %v7191_v15 }
 0xf0f   :  { %v7194_v15 = vmul.f32 %v16585_v13, %v18448_v7 }
 0xf10   :  { %v9762_v11 = vpop.eup %9761  ;;  %v8199_v41 = vmul.f32 1.442695, %v8161_v16  ;;  %v7915_v37 = vadd.f32 %v7914_v40, %v7826_v12  ;;  %v8006_v57 = vpop.f32.mrf.mxu0  ;;  %v7451_v40 = vmax.f32 %v7323_v39, 0.0 }
 0xf11   :  { %v9764_v50 = vpop.eup %9763  ;;  %v8256_v53 = vadd.f32 1.0, %v9762_v11  ;;  %v8095_v20 = vpop.f32.mrf.mxu1  ;;  %v7452_v11 = vmax.f32 %v7324_v58, 0.0 }
 0xf12   :  { %v8319_v46 = vmax.f32 %v9764_v50, 0.0  ;;  %9765 = vpow2.f32 %v8199_v41  ;;  %v8004_v36 = vadd.f32 %v8003_v10, %v7915_v37  ;;  %7867 = vmatmul.bf16.gmra.mxu2 %v7523_v26  ;;  %7956 = vmatmul.bf16.gmra.mxu3 %v7524_v5  ;;  %v7189_v10 = vmul.f32 %v16553_v42, %v16421_v19 }
 0xf13   :  { %9767 = vrcp.f32 %v8256_v53  ;;  %8045 = vmatmul.bf16.gmra.mxu0 %v7525_v33  ;;  %8134 = vmatmul.bf16.gmra.mxu1 %v7526_v49  ;;  %v7327_v19 = vadd.f32 %v16592_v24, %v7190_v47  ;;  %v7456_v41 = vmax.f32 %v7328_v22, 0.0  ;;  %v7453_v37 = vmax.f32 %v7325_v55, 0.0 }
 0xf14   :  { %v8351_v18 = vmin.f32 %v8319_v46, 1.0  ;;  %v8093_v48 = vadd.f32 %v8092_v60, %v8004_v36  ;;  %v7326_v21 = vadd.f32 %v16598_v52, %v7189_v10  ;;  %v7457_v26 = vmax.f32 %v7329_v3, 0.0 }
 0xf15   :  { %v7828_v62 = vpop.f32.mrf.mxu2  ;;  %v7917_v60 = vpop.f32.mrf.mxu3  ;;  %v7455_v61 = vmax.f32 %v7327_v19, 0.0  ;;  %v7458_v33 = vmax.f32 %v7330_v51, 0.0  ;;  %v7528_v9 = vpack.c.bf16 %v7456_v41, %v7452_v11  ;;  %v18451_v19 = vld [vmem:[#allocation42_spill] sm:$0xff]  ;;  %v7331_v55 = vadd.f32 %v16592_v24, %v7194_v15 }
 0xf16   :  { %8383 = vst [vmem:[%s17129_s11 + $0x20] sm:$0xff] %v8351_v18  ;;  %v8162_v44 = vsub.f32 0.0, %v8093_v48  ;;  %v7829_v6 = vadd.f32 %v16823_v45, %v7828_v62  ;;  %v7454_v5 = vmax.f32 %v7326_v21, 0.0  ;;  %v7529_v8 = vpack.c.bf16 %v7457_v26, %v7453_v37 }
 0xf17   :  { %v7527_v18 = vpack.c.bf16 %v7455_v61, %v7451_v40  ;;  %v7335_v3 = vadd.f32 %v16592_v24, %v7198_v35 }
 0xf18   :  { %v9766_v34 = vpop.eup %9765  ;;  %v8201_v25 = vmul.f32 1.442695, %v8162_v44  ;;  %v7918_v2 = vadd.f32 %v7917_v60, %v7829_v6  ;;  %v8008_v54 = vpop.f32.mrf.mxu0  ;;  %v7530_v47 = vpack.c.bf16 %v7458_v33, %v7454_v5  ;;  %v18449_v44 = vld [vmem:[#allocation22_spill] sm:$0xff]  ;;  %v7196_v60 = vmul.f32 %v16545_v38, %v16480_v56 }
 0xf19   :  { %v9768_v28 = vpop.eup %9767  ;;  %v8257_v17 = vadd.f32 1.0, %v9766_v34  ;;  %v8097_v0 = vpop.f32.mrf.mxu1  ;;  %v7195_v6 = vmul.f32 %v16551_v4, %v18449_v44  ;;  %v7197_v34 = vmul.f32 %v16553_v42, %v18451_v19  ;;  %v7459_v5 = vmax.f32 %v7331_v55, 0.0  ;;  %v18458_v55 = vld [vmem:[#allocation61_spill] sm:$0xff] }
 0xf1a   :  { %v8320_v43 = vmax.f32 %v9768_v28, 0.0  ;;  %9769 = vpow2.f32 %v8201_v25  ;;  %v8007_v63 = vadd.f32 %v8006_v57, %v7918_v2  ;;  %v18452_v25 = vld [vmem:[#allocation21_spill] sm:$0xff]  ;;  %v18453_v28 = vld [vmem:[#allocation32_spill] sm:$0xff]  ;;  %v7463_v33 = vmax.f32 %v7335_v3, 0.0 }
 0xf1b   :  { %9771 = vrcp.f32 %v8257_v17  ;;  %v7199_v2 = vmul.f32 %v16551_v4, %v18452_v25  ;;  %v7200_v56 = vmul.f32 %v16545_v38, %v18453_v28  ;;  %v18454_v17 = vld [vmem:[#allocation57_spill] sm:$0xff]  ;;  %v7333_v38 = vadd.f32 %v16596_v27, %v7196_v60  ;;  %v18455_v25 = vld [vmem:[#allocation23_spill] sm:$0xff] }
 0xf1c   :  { %v8352_v16 = vmin.f32 %v8320_v43, 1.0  ;;  %v8096_v12 = vadd.f32 %v8095_v20, %v8007_v63  ;;  %v7334_v41 = vadd.f32 %v16598_v52, %v7197_v34  ;;  %v7205_v3 = vmul.f32 %v16553_v42, %v18458_v55 }
 0xf1d   :  { %v7830_v59 = vpop.f32.mrf.mxu2  ;;  %v7919_v57 = vpop.f32.mrf.mxu3  ;;  %v7337_v11 = vadd.f32 %v16596_v27, %v7200_v56 }
 0xf1e   :  { %8384 = vst [vmem:[%s17129_s11 + $0x28] sm:$0xff] %v8352_v16  ;;  %v8163_v50 = vsub.f32 0.0, %v8096_v12  ;;  %v7831_v53 = vadd.f32 %v16823_v45, %v7830_v59  ;;  %v7332_v16 = vadd.f32 %v16594_v1, %v7195_v6  ;;  %v7336_v12 = vadd.f32 %v16594_v1, %v7199_v2 }
 0xf1f   :  { %v7202_v2 = vmul.f32 %v16585_v13, %v18455_v25 }
 0xf20   :  { %v9770_v46 = vpop.eup %9769  ;;  %v8203_v36 = vmul.f32 1.442695, %v8163_v50  ;;  %v7920_v20 = vadd.f32 %v7919_v57, %v7831_v53  ;;  %v8011_v49 = vpop.f32.mrf.mxu0 }
 0xf21   :  { %v9772_v48 = vpop.eup %9771  ;;  %v8258_v14 = vadd.f32 1.0, %v9770_v46  ;;  %v8100_v32 = vpop.f32.mrf.mxu1 }
 0xf22   :  { %v8321_v31 = vmax.f32 %v9772_v48, 0.0  ;;  %9773 = vpow2.f32 %v8203_v36  ;;  %v8009_v30 = vadd.f32 %v8008_v54, %v7920_v20  ;;  %7872 = vmatmul.bf16.gmra.mxu2 %v7527_v18  ;;  %7961 = vmatmul.bf16.gmra.mxu3 %v7528_v9  ;;  %v7460_v36 = vmax.f32 %v7332_v16, 0.0 }
 0xf23   :  { %9775 = vrcp.f32 %v8258_v14  ;;  %8050 = vmatmul.bf16.gmra.mxu0 %v7529_v8  ;;  %8139 = vmatmul.bf16.gmra.mxu1 %v7530_v47  ;;  %v7464_v20 = vmax.f32 %v7336_v12, 0.0  ;;  %v7461_v18 = vmax.f32 %v7333_v38, 0.0  ;;  %v7465_v48 = vmax.f32 %v7337_v11, 0.0 }
 0xf24   :  { %v8353_v62 = vmin.f32 %v8321_v31, 1.0  ;;  %v8098_v10 = vadd.f32 %v8097_v0, %v8009_v30  ;;  %v7201_v0 = vmul.f32 %v16553_v42, %v18454_v17  ;;  %v7462_v9 = vmax.f32 %v7334_v41, 0.0  ;;  %v18457_v17 = vld [vmem:[#allocation20_spill] sm:$0xff] }
 0xf25   :  { %v7833_v39 = vpop.f32.mrf.mxu2  ;;  %v7922_v22 = vpop.f32.mrf.mxu3  ;;  %v7532_v44 = vpack.c.bf16 %v7464_v20, %v7460_v36  ;;  %v7533_v6 = vpack.c.bf16 %v7465_v48, %v7461_v18 }
 0xf26   :  { %8385 = vst [vmem:[%s17129_s11 + $0x30] sm:$0xff] %v8353_v62  ;;  %v8164_v54 = vsub.f32 0.0, %v8098_v10  ;;  %v7834_v58 = vadd.f32 %v16823_v45, %v7833_v39  ;;  %v7338_v50 = vadd.f32 %v16598_v52, %v7201_v0  ;;  %v7531_v62 = vpack.c.bf16 %v7463_v33, %v7459_v5 }
 0xf27   :  { %v7203_v0 = vmul.f32 %v16551_v4, %v18457_v17 }
 0xf28   :  { %v9774_v21 = vpop.eup %9773  ;;  %v8205_v43 = vmul.f32 1.442695, %v8164_v54  ;;  %v7923_v63 = vadd.f32 %v7922_v22, %v7834_v58  ;;  %v8013_v51 = vpop.f32.mrf.mxu0  ;;  %v7466_v8 = vmax.f32 %v7338_v50, 0.0  ;;  %v18456_v54 = vld [vmem:[#allocation77_spill] sm:$0xff] }
 0xf29   :  { %v9776_v40 = vpop.eup %9775  ;;  %v8259_v61 = vadd.f32 1.0, %v9774_v21  ;;  %v8102_v59 = vpop.f32.mrf.mxu1  ;;  %v7206_v58 = vmul.f32 %v16585_v13, %v18456_v54  ;;  %v18459_v21 = vld [vmem:[#allocation116_spill] sm:$0xff] }
 0xf2a   :  { %v8322_v37 = vmax.f32 %v9776_v40, 0.0  ;;  %9777 = vpow2.f32 %v8205_v43  ;;  %v8012_v26 = vadd.f32 %v8011_v49, %v7923_v63  ;;  %v7534_v35 = vpack.c.bf16 %v7466_v8, %v7462_v9  ;;  %v18460_v63 = vld [vmem:[#allocation33_spill] sm:$0xff] }
 0xf2b   :  { %9779 = vrcp.f32 %v8259_v61  ;;  %v7207_v43 = vmul.f32 %v16551_v4, %v18459_v21  ;;  %v7209_v13 = vmul.f32 %v16553_v42, %v18460_v63  ;;  %v7339_v61 = vadd.f32 %v16592_v24, %v7202_v2 }
 0xf2c   :  { %v8354_v53 = vmin.f32 %v8322_v37, 1.0  ;;  %v8101_v57 = vadd.f32 %v8100_v32, %v8012_v26  ;;  %v7340_v37 = vadd.f32 %v16594_v1, %v7203_v0  ;;  %v7342_v4 = vadd.f32 %v16598_v52, %v7205_v3 }
 0xf2d   :  { %v7835_v46 = vpop.f32.mrf.mxu2  ;;  %v7924_v49 = vpop.f32.mrf.mxu3  ;;  %v7344_v26 = vadd.f32 %v16594_v1, %v7207_v43  ;;  %v7467_v33 = vmax.f32 %v7339_v61, 0.0 }
 0xf2e   :  { %8386 = vst [vmem:[%s17129_s11 + $0x38] sm:$0xff] %v8354_v53  ;;  %v8165_v27 = vsub.f32 0.0, %v8101_v57  ;;  %v7836_v14 = vadd.f32 %v16823_v45, %v7835_v46  ;;  %v7346_v53 = vadd.f32 %v16598_v52, %v7209_v13  ;;  %v7468_v36 = vmax.f32 %v7340_v37, 0.0 }
 0xf2f   :  { %v7472_v20 = vmax.f32 %v7344_v26, 0.0 }
 0xf30   :  { %v9778_v31 = vpop.eup %9777  ;;  %v8207_v30 = vmul.f32 1.442695, %v8165_v27  ;;  %v7925_v32 = vadd.f32 %v7924_v49, %v7836_v14  ;;  %v8016_v47 = vpop.f32.mrf.mxu0  ;;  %v7470_v27 = vmax.f32 %v7342_v4, 0.0  ;;  %v7474_v14 = vmax.f32 %v7346_v53, 0.0 }
 0xf31   :  { %v9780_v10 = vpop.eup %9779  ;;  %v8260_v7 = vadd.f32 1.0, %v9778_v31  ;;  %v8105_v15 = vpop.f32.mrf.mxu1 }
 0xf32   :  { %v8323_v60 = vmax.f32 %v9780_v10, 0.0  ;;  %9781 = vpow2.f32 %v8207_v30  ;;  %v8014_v23 = vadd.f32 %v8013_v51, %v7925_v32  ;;  %7877 = vmatmul.bf16.gmra.mxu2 %v7531_v62  ;;  %7966 = vmatmul.bf16.gmra.mxu3 %v7532_v44  ;;  %v7536_v62 = vpack.c.bf16 %v7472_v20, %v7468_v36 }
 0xf33   :  { %9783 = vrcp.f32 %v8260_v7  ;;  %8055 = vmatmul.bf16.gmra.mxu0 %v7533_v6  ;;  %8144 = vmatmul.bf16.gmra.mxu1 %v7534_v35 }
 0xf34   :  { %v8355_v39 = vmin.f32 %v8323_v60, 1.0  ;;  %v8103_v19 = vadd.f32 %v8102_v59, %v8014_v23  ;;  %v7343_v59 = vadd.f32 %v16592_v24, %v7206_v58 }
 0xf35   :  { %v7838_v34 = vpop.f32.mrf.mxu2  ;;  %v7927_v56 = vpop.f32.mrf.mxu3 }
 0xf36   :  { %8387 = vst [vmem:[%s17129_s11 + $0x40] sm:$0xff] %v8355_v39  ;;  %v8166_v22 = vsub.f32 0.0, %v8103_v19  ;;  %v7839_v28 = vadd.f32 %v16823_v45, %v7838_v34  ;;  %v7471_v46 = vmax.f32 %v7343_v59, 0.0 }
 0xf38   :  { %v9782_v51 = vpop.eup %9781  ;;  %v8209_v16 = vmul.f32 1.442695, %v8166_v22  ;;  %v7928_v12 = vadd.f32 %v7927_v56, %v7839_v28  ;;  %v8018_v40 = vpop.f32.mrf.mxu0  ;;  %v7535_v31 = vpack.c.bf16 %v7471_v46, %v7467_v33 }
 0xf39   :  { %v9784_v38 = vpop.eup %9783  ;;  %v8261_v11 = vadd.f32 1.0, %v9782_v51  ;;  %v8107_v41 = vpop.f32.mrf.mxu1 }
 0xf3a   :  { %v8324_v50 = vmax.f32 %v9784_v38, 0.0  ;;  %9785 = vpow2.f32 %v8209_v16  ;;  %v8017_v42 = vadd.f32 %v8016_v47, %v7928_v12 }
 0xf3b   :  { %9787 = vrcp.f32 %v8261_v11 }
 0xf3c   :  { %v8356_v57 = vmin.f32 %v8324_v50, 1.0  ;;  %v8106_v5 = vadd.f32 %v8105_v15, %v8017_v42  ;;  %v7538_v15 = vpack.c.bf16 %v7474_v14, %v7470_v27 }
 0xf3d   :  { %v7840_v24 = vpop.f32.mrf.mxu2  ;;  %v7929_v48 = vpop.f32.mrf.mxu3 }
 0xf3e   :  { %8388 = vst [vmem:[%s17129_s11 + $0x48] sm:$0xff] %v8356_v57  ;;  %v8167_v1 = vsub.f32 0.0, %v8106_v5  ;;  %v7841_v18 = vadd.f32 %v16823_v45, %v7840_v24 }
 0xf40   :  { %v9786_v49 = vpop.eup %9785  ;;  %v8211_v52 = vmul.f32 1.442695, %v8167_v1  ;;  %v7930_v9 = vadd.f32 %v7929_v48, %v7841_v18  ;;  %v8021_v8 = vpop.f32.mrf.mxu0 }
 0xf41   :  { %v9788_v30 = vpop.eup %9787  ;;  %v8262_v32 = vadd.f32 1.0, %v9786_v49  ;;  %v8110_v47 = vpop.f32.mrf.mxu1 }
 0xf42   :  { %v8325_v10 = vmax.f32 %v9788_v30, 0.0  ;;  %9789 = vpow2.f32 %v8211_v52  ;;  %v8019_v7 = vadd.f32 %v8018_v40, %v7930_v9  ;;  %7882 = vmatmul.bf16.gmra.mxu2 %v7535_v31  ;;  %7971 = vmatmul.bf16.gmra.mxu3 %v7536_v62 }
 0xf43   :  { %9791 = vrcp.f32 %v8262_v32  ;;  %8060 = vmatmul.bf16.gmra.mxu0 %v16749_v29  ;;  %8149 = vmatmul.bf16.gmra.mxu1 %v7538_v15 }
 0xf44   :  { %v8357_v44 = vmin.f32 %v8325_v10, 1.0  ;;  %v8108_v6 = vadd.f32 %v8107_v41, %v8019_v7 }
 0xf45   :  { %v7843_v60 = vpop.f32.mrf.mxu2  ;;  %v7932_v39 = vpop.f32.mrf.mxu3 }
 0xf46   :  { %8389 = vst [vmem:[%s17129_s11 + $0x50] sm:$0xff] %v8357_v44  ;;  %v8168_v23 = vsub.f32 0.0, %v8108_v6  ;;  %v7844_v35 = vadd.f32 %v16823_v45, %v7843_v60  ;;  %v17051_v44 = vld [vmem:[#allocation2 + $0x1d] ss:$0 sm:$0xff] }
 0xf48   :  { %v9790_v19 = vpop.eup %9789  ;;  %v8213_v34 = vmul.f32 1.442695, %v8168_v23  ;;  %v7933_v25 = vadd.f32 %v7932_v39, %v7844_v35  ;;  %v8023_v2 = vpop.f32.mrf.mxu0 }
 0xf49   :  { %v9792_v54 = vpop.eup %9791  ;;  %v8263_v58 = vadd.f32 1.0, %v9790_v19  ;;  %v8112_v22 = vpop.f32.mrf.mxu1 }
 0xf4a   :  { %v8326_v29 = vmax.f32 %v9792_v54, 0.0  ;;  %9793 = vpow2.f32 %v8213_v34  ;;  %v8022_v28 = vadd.f32 %v8021_v8, %v7933_v25 }
 0xf4b   :  { %9795 = vrcp.f32 %v8263_v58 }
 0xf4c   :  { %v8358_v56 = vmin.f32 %v8326_v29, 1.0  ;;  %v8111_v17 = vadd.f32 %v8110_v47, %v8022_v28 }
 0xf4d   :  { %v7845_v0 = vpop.f32.mrf.mxu2  ;;  %v7934_v21 = vpop.f32.mrf.mxu3 }
 0xf4e   :  { %8390 = vst [vmem:[%s17129_s11 + $0x58] sm:$0xff] %v8358_v56  ;;  %v8169_v55 = vsub.f32 0.0, %v8111_v17  ;;  %v7846_v3 = vadd.f32 %v16823_v45, %v7845_v0 }
 0xf50   :  { %v9794_v43 = vpop.eup %9793  ;;  %v8215_v63 = vmul.f32 1.442695, %v8169_v55  ;;  %v7935_v13 = vadd.f32 %v7934_v21, %v7846_v3  ;;  %v8026_v51 = vpop.f32.mrf.mxu0 }
 0xf51   :  { %v9796_v16 = vpop.eup %9795  ;;  %v8264_v12 = vadd.f32 1.0, %v9794_v43  ;;  %v8115_v40 = vpop.f32.mrf.mxu1 }
 0xf52   :  { %v8327_v61 = vmax.f32 %v9796_v16, 0.0  ;;  %9797 = vpow2.f32 %v8215_v63  ;;  %v8024_v59 = vadd.f32 %v8023_v2, %v7935_v13 }
 0xf53   :  { %9799 = vrcp.f32 %v8264_v12 }
 0xf54   :  { %v8359_v38 = vmin.f32 %v8327_v61, 1.0  ;;  %v8113_v11 = vadd.f32 %v8112_v22, %v8024_v59 }
 0xf55   :  { %v7848_v41 = vpop.f32.mrf.mxu2  ;;  %v7937_v4 = vpop.f32.mrf.mxu3 }
 0xf56   :  { %8391 = vst [vmem:[%s17129_s11 + $0x60] sm:$0xff] %v8359_v38  ;;  %v8170_v37 = vsub.f32 0.0, %v8113_v11  ;;  %v7849_v26 = vadd.f32 %v16823_v45, %v7848_v41 }
 0xf58   :  { %v9798_v50 = vpop.eup %9797  ;;  %v8217_v42 = vmul.f32 1.442695, %v8170_v37  ;;  %v7938_v53 = vadd.f32 %v7937_v4, %v7849_v26  ;;  %v8028_v57 = vpop.f32.mrf.mxu0 }
 0xf59   :  { %v9800_v5 = vpop.eup %9799  ;;  %v8265_v33 = vadd.f32 1.0, %v9798_v50  ;;  %v8117_v46 = vpop.f32.mrf.mxu1 }
 0xf5a   :  { %v8328_v24 = vmax.f32 %v9800_v5, 0.0  ;;  %9801 = vpow2.f32 %v8217_v42  ;;  %v8027_v36 = vadd.f32 %v8026_v51, %v7938_v53 }
 0xf5b   :  { %9803 = vrcp.f32 %v8265_v33 }
 0xf5c   :  { %v8360_v20 = vmin.f32 %v8328_v24, 1.0  ;;  %v8116_v1 = vadd.f32 %v8115_v40, %v8027_v36 }
 0xf5d   :  { %v7850_v18 = vpop.f32.mrf.mxu2  ;;  %v7939_v14 = vpop.f32.mrf.mxu3 }
 0xf5e   :  { %8392 = vst [vmem:[%s17129_s11 + $0x68] sm:$0xff] %v8360_v20  ;;  %v8171_v48 = vsub.f32 0.0, %v8116_v1  ;;  %v7851_v27 = vadd.f32 %v16823_v45, %v7850_v18 }
 0xf60   :  { %v9802_v49 = vpop.eup %9801  ;;  %v8219_v52 = vmul.f32 1.442695, %v8171_v48  ;;  %v7940_v9 = vadd.f32 %v7939_v14, %v7851_v27  ;;  %v8031_v8 = vpop.f32.mrf.mxu0 }
 0xf61   :  { %v9804_v31 = vpop.eup %9803  ;;  %v8266_v30 = vadd.f32 1.0, %v9802_v49  ;;  %v8120_v32 = vpop.f32.mrf.mxu1 }
 0xf62   :  { %v8329_v47 = vmax.f32 %v9804_v31, 0.0  ;;  %9805 = vpow2.f32 %v8219_v52  ;;  %v8029_v62 = vadd.f32 %v8028_v57, %v7940_v9 }
 0xf63   :  { %9807 = vrcp.f32 %v8266_v30 }
 0xf64   :  { %v8361_v10 = vmin.f32 %v8329_v47, 1.0  ;;  %v8118_v7 = vadd.f32 %v8117_v46, %v8029_v62 }
 0xf65   :  { %v7853_v15 = vpop.f32.mrf.mxu2  ;;  %v7942_v60 = vpop.f32.mrf.mxu3 }
 0xf66   :  { %8393 = vst [vmem:[%s17129_s11 + $0x70] sm:$0xff] %v8361_v10  ;;  %v8172_v45 = vsub.f32 0.0, %v8118_v7  ;;  %v7854_v6 = vadd.f32 %v17051_v44, %v7853_v15 }
 0xf68   :  { %v9806_v23 = vpop.eup %9805  ;;  %v8221_v35 = vmul.f32 1.442695, %v8172_v45  ;;  %v7943_v39 = vadd.f32 %v7942_v60, %v7854_v6  ;;  %v8033_v19 = vpop.f32.mrf.mxu0 }
 0xf69   :  { %v9808_v34 = vpop.eup %9807  ;;  %v8267_v25 = vadd.f32 1.0, %v9806_v23  ;;  %v8122_v2 = vpop.f32.mrf.mxu1 }
 0xf6a   :  { %v8330_v54 = vmax.f32 %v9808_v34, 0.0  ;;  %9809 = vpow2.f32 %v8221_v35  ;;  %v8032_v58 = vadd.f32 %v8031_v8, %v7943_v39 }
 0xf6b   :  { %9811 = vrcp.f32 %v8267_v25 }
 0xf6c   :  { %v8362_v22 = vmin.f32 %v8330_v54, 1.0  ;;  %v8121_v29 = vadd.f32 %v8120_v32, %v8032_v58 }
 0xf6d   :  { %v7855_v28 = vpop.f32.mrf.mxu2  ;;  %v7944_v0 = vpop.f32.mrf.mxu3 }
 0xf6e   :  { %8394 = vst [vmem:[%s17129_s11 + $0x78] sm:$0xff] %v8362_v22  ;;  %v8173_v56 = vsub.f32 0.0, %v8121_v29  ;;  %v7856_v17 = vadd.f32 %v17051_v44, %v7855_v28 }
 0xf70   :  { %v9810_v55 = vpop.eup %9809  ;;  %v8223_v3 = vmul.f32 1.442695, %v8173_v56  ;;  %v7945_v21 = vadd.f32 %v7944_v0, %v7856_v17  ;;  %v8036_v43 = vpop.f32.mrf.mxu0 }
 0xf71   :  { %v9812_v63 = vpop.eup %9811  ;;  %v8268_v13 = vadd.f32 1.0, %v9810_v55  ;;  %v8125_v51 = vpop.f32.mrf.mxu1 }
 0xf72   :  { %v8331_v16 = vmax.f32 %v9812_v63, 0.0  ;;  %9813 = vpow2.f32 %v8223_v3  ;;  %v8034_v12 = vadd.f32 %v8033_v19, %v7945_v21 }
 0xf73   :  { %9815 = vrcp.f32 %v8268_v13 }
 0xf74   :  { %v8363_v40 = vmin.f32 %v8331_v16, 1.0  ;;  %v8123_v61 = vadd.f32 %v8122_v2, %v8034_v12 }
 0xf75   :  { %v7858_v59 = vpop.f32.mrf.mxu2  ;;  %v7947_v41 = vpop.f32.mrf.mxu3 }
 0xf76   :  { %8395 = vst [vmem:[%s17129_s11 + $0x80] sm:$0xff] %v8363_v40  ;;  %v8174_v38 = vsub.f32 0.0, %v8123_v61  ;;  %v7859_v11 = vadd.f32 %v17051_v44, %v7858_v59 }
 0xf78   :  { %v9814_v37 = vpop.eup %9813  ;;  %v8225_v26 = vmul.f32 1.442695, %v8174_v38  ;;  %v7948_v4 = vadd.f32 %v7947_v41, %v7859_v11  ;;  %v8038_v50 = vpop.f32.mrf.mxu0 }
 0xf79   :  { %v9816_v42 = vpop.eup %9815  ;;  %v8269_v53 = vadd.f32 1.0, %v9814_v37  ;;  %v8127_v57 = vpop.f32.mrf.mxu1 }
 0xf7a   :  { %v8332_v5 = vmax.f32 %v9816_v42, 0.0  ;;  %9817 = vpow2.f32 %v8225_v26  ;;  %v8037_v33 = vadd.f32 %v8036_v43, %v7948_v4 }
 0xf7b   :  { %9819 = vrcp.f32 %v8269_v53 }
 0xf7c   :  { %v8364_v46 = vmin.f32 %v8332_v5, 1.0  ;;  %v8126_v24 = vadd.f32 %v8125_v51, %v8037_v33 }
 0xf7d   :  { %v7860_v36 = vpop.f32.mrf.mxu2  ;;  %v7949_v18 = vpop.f32.mrf.mxu3 }
 0xf7e   :  { %8396 = vst [vmem:[%s17129_s11 + $0x88] sm:$0xff] %v8364_v46  ;;  %v8175_v20 = vsub.f32 0.0, %v8126_v24  ;;  %v7861_v1 = vadd.f32 %v17051_v44, %v7860_v36 }
 0xf80   :  { %v9818_v48 = vpop.eup %9817  ;;  %v8227_v27 = vmul.f32 1.442695, %v8175_v20  ;;  %v7950_v14 = vadd.f32 %v7949_v18, %v7861_v1  ;;  %v8041_v49 = vpop.f32.mrf.mxu0 }
 0xf81   :  { %v9820_v52 = vpop.eup %9819  ;;  %v8270_v9 = vadd.f32 1.0, %v9818_v48  ;;  %v8130_v8 = vpop.f32.mrf.mxu1 }
 0xf82   :  { %v8333_v31 = vmax.f32 %v9820_v52, 0.0  ;;  %9821 = vpow2.f32 %v8227_v27  ;;  %v8039_v30 = vadd.f32 %v8038_v50, %v7950_v14 }
 0xf83   :  { %9823 = vrcp.f32 %v8270_v9 }
 0xf84   :  { %v8365_v32 = vmin.f32 %v8333_v31, 1.0  ;;  %v8128_v47 = vadd.f32 %v8127_v57, %v8039_v30 }
 0xf85   :  { %v7863_v62 = vpop.f32.mrf.mxu2  ;;  %v7952_v15 = vpop.f32.mrf.mxu3 }
 0xf86   :  { %8397 = vst [vmem:[%s17129_s11 + $0x90] sm:$0xff] %v8365_v32  ;;  %v8176_v10 = vsub.f32 0.0, %v8128_v47  ;;  %v7864_v7 = vadd.f32 %v17051_v44, %v7863_v62 }
 0xf88   :  { %v9822_v45 = vpop.eup %9821  ;;  %v8229_v6 = vmul.f32 1.442695, %v8176_v10  ;;  %v7953_v60 = vadd.f32 %v7952_v15, %v7864_v7  ;;  %v8043_v23 = vpop.f32.mrf.mxu0 }
 0xf89   :  { %v9824_v35 = vpop.eup %9823  ;;  %v8271_v39 = vadd.f32 1.0, %v9822_v45  ;;  %v8132_v19 = vpop.f32.mrf.mxu1 }
 0xf8a   :  { %v8334_v34 = vmax.f32 %v9824_v35, 0.0  ;;  %9825 = vpow2.f32 %v8229_v6  ;;  %v8042_v25 = vadd.f32 %v8041_v49, %v7953_v60 }
 0xf8b   :  { %9827 = vrcp.f32 %v8271_v39 }
 0xf8c   :  { %v8366_v2 = vmin.f32 %v8334_v34, 1.0  ;;  %v8131_v54 = vadd.f32 %v8130_v8, %v8042_v25 }
 0xf8d   :  { %v7865_v58 = vpop.f32.mrf.mxu2  ;;  %v7954_v28 = vpop.f32.mrf.mxu3 }
 0xf8e   :  { %8398 = vst [vmem:[%s17129_s11 + $0x98] sm:$0xff] %v8366_v2  ;;  %v8177_v22 = vsub.f32 0.0, %v8131_v54  ;;  %v7866_v29 = vadd.f32 %v17051_v44, %v7865_v58 }
 0xf90   :  { %v9826_v56 = vpop.eup %9825  ;;  %v8231_v17 = vmul.f32 1.442695, %v8177_v22  ;;  %v7955_v0 = vadd.f32 %v7954_v28, %v7866_v29  ;;  %v8046_v55 = vpop.f32.mrf.mxu0 }
 0xf91   :  { %v9828_v3 = vpop.eup %9827  ;;  %v8272_v21 = vadd.f32 1.0, %v9826_v56  ;;  %v8135_v43 = vpop.f32.mrf.mxu1 }
 0xf92   :  { %v8335_v63 = vmax.f32 %v9828_v3, 0.0  ;;  %9829 = vpow2.f32 %v8231_v17  ;;  %v8044_v13 = vadd.f32 %v8043_v23, %v7955_v0 }
 0xf93   :  { %9831 = vrcp.f32 %v8272_v21 }
 0xf94   :  { %v8367_v51 = vmin.f32 %v8335_v63, 1.0  ;;  %v8133_v16 = vadd.f32 %v8132_v19, %v8044_v13 }
 0xf95   :  { %v7868_v12 = vpop.f32.mrf.mxu2  ;;  %v7957_v59 = vpop.f32.mrf.mxu3 }
 0xf96   :  { %8399 = vst [vmem:[%s17129_s11 + $0xa0] sm:$0xff] %v8367_v51  ;;  %v8178_v40 = vsub.f32 0.0, %v8133_v16  ;;  %v7869_v61 = vadd.f32 %v17051_v44, %v7868_v12 }
 0xf98   :  { %v9830_v38 = vpop.eup %9829  ;;  %v8233_v11 = vmul.f32 1.442695, %v8178_v40  ;;  %v7958_v41 = vadd.f32 %v7957_v59, %v7869_v61  ;;  %v8048_v37 = vpop.f32.mrf.mxu0 }
 0xf99   :  { %v9832_v26 = vpop.eup %9831  ;;  %v8273_v4 = vadd.f32 1.0, %v9830_v38  ;;  %v8137_v50 = vpop.f32.mrf.mxu1 }
 0xf9a   :  { %v8336_v42 = vmax.f32 %v9832_v26, 0.0  ;;  %9833 = vpow2.f32 %v8233_v11  ;;  %v8047_v53 = vadd.f32 %v8046_v55, %v7958_v41 }
 0xf9b   :  { %9835 = vrcp.f32 %v8273_v4 }
 0xf9c   :  { %v8368_v57 = vmin.f32 %v8336_v42, 1.0  ;;  %v8136_v5 = vadd.f32 %v8135_v43, %v8047_v53 }
 0xf9d   :  { %v7870_v33 = vpop.f32.mrf.mxu2  ;;  %v7959_v36 = vpop.f32.mrf.mxu3 }
 0xf9e   :  { %8400 = vst [vmem:[%s17129_s11 + $0xa8] sm:$0xff] %v8368_v57  ;;  %v8179_v46 = vsub.f32 0.0, %v8136_v5  ;;  %v7871_v24 = vadd.f32 %v17051_v44, %v7870_v33 }
 0xfa0   :  { %v9834_v20 = vpop.eup %9833  ;;  %v8235_v1 = vmul.f32 1.442695, %v8179_v46  ;;  %v7960_v18 = vadd.f32 %v7959_v36, %v7871_v24  ;;  %v8051_v48 = vpop.f32.mrf.mxu0 }
 0xfa1   :  { %v9836_v27 = vpop.eup %9835  ;;  %v8274_v14 = vadd.f32 1.0, %v9834_v20  ;;  %v8140_v49 = vpop.f32.mrf.mxu1 }
 0xfa2   :  { %v8337_v52 = vmax.f32 %v9836_v27, 0.0  ;;  %9837 = vpow2.f32 %v8235_v1  ;;  %v8049_v9 = vadd.f32 %v8048_v37, %v7960_v18 }
 0xfa3   :  { %9839 = vrcp.f32 %v8274_v14 }
 0xfa4   :  { %v8369_v8 = vmin.f32 %v8337_v52, 1.0  ;;  %v8138_v31 = vadd.f32 %v8137_v50, %v8049_v9 }
 0xfa5   :  { %v7873_v30 = vpop.f32.mrf.mxu2  ;;  %v7962_v62 = vpop.f32.mrf.mxu3 }
 0xfa6   :  { %8401 = vst [vmem:[%s17129_s11 + $0xb0] sm:$0xff] %v8369_v8  ;;  %v8180_v32 = vsub.f32 0.0, %v8138_v31  ;;  %v7874_v47 = vadd.f32 %v17051_v44, %v7873_v30 }
 0xfa8   :  { %v9838_v10 = vpop.eup %9837  ;;  %v8237_v7 = vmul.f32 1.442695, %v8180_v32  ;;  %v7963_v15 = vadd.f32 %v7962_v62, %v7874_v47  ;;  %v8053_v60 = vpop.f32.mrf.mxu0 }
 0xfa9   :  { %v9840_v45 = vpop.eup %9839  ;;  %v8275_v6 = vadd.f32 1.0, %v9838_v10  ;;  %v8142_v39 = vpop.f32.mrf.mxu1 }
 0xfaa   :  { %v8338_v23 = vmax.f32 %v9840_v45, 0.0  ;;  %9841 = vpow2.f32 %v8237_v7  ;;  %v8052_v35 = vadd.f32 %v8051_v48, %v7963_v15 }
 0xfab   :  { %9843 = vrcp.f32 %v8275_v6 }
 0xfac   :  { %v8370_v19 = vmin.f32 %v8338_v23, 1.0  ;;  %v8141_v34 = vadd.f32 %v8140_v49, %v8052_v35 }
 0xfad   :  { %v7875_v25 = vpop.f32.mrf.mxu2  ;;  %v7964_v58 = vpop.f32.mrf.mxu3 }
 0xfae   :  { %8402 = vst [vmem:[%s17129_s11 + $0xb8] sm:$0xff] %v8370_v19  ;;  %v8181_v2 = vsub.f32 0.0, %v8141_v34  ;;  %v7876_v54 = vadd.f32 %v17051_v44, %v7875_v25 }
 0xfb0   :  { %v9842_v22 = vpop.eup %9841  ;;  %v8239_v29 = vmul.f32 1.442695, %v8181_v2  ;;  %v7965_v28 = vadd.f32 %v7964_v58, %v7876_v54  ;;  %v8056_v3 = vpop.f32.mrf.mxu0 }
 0xfb1   :  { %v9844_v56 = vpop.eup %9843  ;;  %v8276_v17 = vadd.f32 1.0, %v9842_v22  ;;  %v8145_v63 = vpop.f32.mrf.mxu1 }
 0xfb2   :  { %v8339_v0 = vmax.f32 %v9844_v56, 0.0  ;;  %9845 = vpow2.f32 %v8239_v29  ;;  %v8054_v55 = vadd.f32 %v8053_v60, %v7965_v28 }
 0xfb3   :  { %9847 = vrcp.f32 %v8276_v17 }
 0xfb4   :  { %v8371_v21 = vmin.f32 %v8339_v0, 1.0  ;;  %v8143_v43 = vadd.f32 %v8142_v39, %v8054_v55 }
 0xfb5   :  { %v7878_v13 = vpop.f32.mrf.mxu2  ;;  %v7967_v12 = vpop.f32.mrf.mxu3 }
 0xfb6   :  { %8403 = vst [vmem:[%s17129_s11 + $0xc0] sm:$0xff] %v8371_v21  ;;  %v8182_v51 = vsub.f32 0.0, %v8143_v43  ;;  %v7879_v16 = vadd.f32 %v17051_v44, %v7878_v13 }
 0xfb8   :  { %v9846_v40 = vpop.eup %9845  ;;  %v8241_v61 = vmul.f32 1.442695, %v8182_v51  ;;  %v7968_v59 = vadd.f32 %v7967_v12, %v7879_v16  ;;  %v8058_v50 = vpop.f32.mrf.mxu0 }
 0xfb9   :  { %v9848_v38 = vpop.eup %9847  ;;  %v8277_v11 = vadd.f32 1.0, %v9846_v40  ;;  %v8147_v33 = vpop.f32.mrf.mxu1 }
 0xfba   :  { %v8340_v41 = vmax.f32 %v9848_v38, 0.0  ;;  %9849 = vpow2.f32 %v8241_v61  ;;  %v8057_v37 = vadd.f32 %v8056_v3, %v7968_v59 }
 0xfbb   :  { %9851 = vrcp.f32 %v8277_v11 }
 0xfbc   :  { %v8372_v26 = vmin.f32 %v8340_v41, 1.0  ;;  %v8146_v4 = vadd.f32 %v8145_v63, %v8057_v37 }
 0xfbd   :  { %v7880_v42 = vpop.f32.mrf.mxu2  ;;  %v7969_v5 = vpop.f32.mrf.mxu3 }
 0xfbe   :  { %8404 = vst [vmem:[%s17129_s11 + $0xc8] sm:$0xff] %v8372_v26  ;;  %v8183_v53 = vsub.f32 0.0, %v8146_v4  ;;  %v7881_v57 = vadd.f32 %v17051_v44, %v7880_v42 }
 0xfc0   :  { %v9850_v46 = vpop.eup %9849  ;;  %v8243_v24 = vmul.f32 1.442695, %v8183_v53  ;;  %v7970_v36 = vadd.f32 %v7969_v5, %v7881_v57  ;;  %v8061_v31 = vpop.f32.mrf.mxu0 }
 0xfc1   :  { %v9852_v20 = vpop.eup %9851  ;;  %v8278_v1 = vadd.f32 1.0, %v9850_v46  ;;  %v8150_v7 = vpop.f32.mrf.mxu1 }
 0xfc2   :  { %v8341_v18 = vmax.f32 %v9852_v20, 0.0  ;;  %9853 = vpow2.f32 %v8243_v24  ;;  %v8059_v48 = vadd.f32 %v8058_v50, %v7970_v36 }
 0xfc3   :  { %9855 = vrcp.f32 %v8278_v1 }
 0xfc4   :  { %v8373_v27 = vmin.f32 %v8341_v18, 1.0  ;;  %v8148_v14 = vadd.f32 %v8147_v33, %v8059_v48 }
 0xfc5   :  { %v7883_v49 = vpop.f32.mrf.mxu2  ;;  %v7972_v8 = vpop.f32.mrf.mxu3 }
 0xfc6   :  { %8405 = vst [vmem:[%s17129_s11 + $0xd0] sm:$0xff] %v8373_v27  ;;  %v8184_v52 = vsub.f32 0.0, %v8148_v14  ;;  %v7884_v9 = vadd.f32 %v17051_v44, %v7883_v49 }
 0xfc8   :  { %v9854_v30 = vpop.eup %9853  ;;  %v8245_v32 = vmul.f32 1.442695, %v8184_v52  ;;  %v7973_v47 = vadd.f32 %v7972_v8, %v7884_v9  ;;  %v8063_v22 = vpop.f32.mrf.mxu0 }
 0xfc9   :  { %v9856_v62 = vpop.eup %9855  ;;  %v8279_v10 = vadd.f32 1.0, %v9854_v30  ;;  %v8152_v56 = vpop.f32.mrf.mxu1 }
 0xfca   :  { %v8342_v15 = vmax.f32 %v9856_v62, 0.0  ;;  %9857 = vpow2.f32 %v8245_v32  ;;  %v8062_v45 = vadd.f32 %v8061_v31, %v7973_v47 }
 0xfcb   :  { %9859 = vrcp.f32 %v8279_v10 }
 0xfcc   :  { %v8374_v6 = vmin.f32 %v8342_v15, 1.0  ;;  %v8151_v60 = vadd.f32 %v8150_v7, %v8062_v45 }
 0xfcd   :  { %v7885_v23 = vpop.f32.mrf.mxu2  ;;  %v7974_v19 = vpop.f32.mrf.mxu3 }
 0xfce   :  { %8406 = vst [vmem:[%s17129_s11 + $0xd8] sm:$0xff] %v8374_v6  ;;  %v8185_v35 = vsub.f32 0.0, %v8151_v60  ;;  %v7886_v39 = vadd.f32 %v17051_v44, %v7885_v23 }
 0xfd0   :  { %v9858_v34 = vpop.eup %9857  ;;  %v8247_v25 = vmul.f32 1.442695, %v8185_v35  ;;  %v7975_v2 = vadd.f32 %v7974_v19, %v7886_v39 }
 0xfd1   :  { %v9860_v54 = vpop.eup %9859  ;;  %v8280_v58 = vadd.f32 1.0, %v9858_v34 }
 0xfd2   :  { %v8343_v29 = vmax.f32 %v9860_v54, 0.0  ;;  %9861 = vpow2.f32 %v8247_v25  ;;  %v8064_v28 = vadd.f32 %v8063_v22, %v7975_v2 }
 0xfd3   :  { %9863 = vrcp.f32 %v8280_v58 }
 0xfd4   :  { %v8375_v17 = vmin.f32 %v8343_v29, 1.0  ;;  %v8153_v0 = vadd.f32 %v8152_v56, %v8064_v28 }
 0xfd6   :  { %8407 = vst [vmem:[%s17129_s11 + $0xe0] sm:$0xff] %v8375_v17  ;;  %v8186_v55 = vsub.f32 0.0, %v8153_v0 }
 0xfd8   :  { %v9862_v44 = vpop.eup %9861  ;;  %v8249_v3 = vmul.f32 1.442695, %v8186_v55 }
 0xfd9   :  { %v9864_v21 = vpop.eup %9863  ;;  %v8281_v43 = vadd.f32 1.0, %v9862_v44 }
 0xfda   :  { %v8344_v63 = vmax.f32 %v9864_v21, 0.0  ;;  %9865 = vpow2.f32 %v8249_v3 }
 0xfdb   :  { %9867 = vrcp.f32 %v8281_v43 }
 0xfdc   :  { %v8376_v13 = vmin.f32 %v8344_v63, 1.0 }
 0xfde   :  { %8408 = vst [vmem:[%s17129_s11 + $0xe8] sm:$0xff] %v8376_v13 }
 0xfe0   :  { %v9866_v51 = vpop.eup %9865 }
 0xfe1   :  { %v9868_v16 = vpop.eup %9867  ;;  %v8282_v12 = vadd.f32 1.0, %v9866_v51 }
 0xfe2   :  { %v8345_v40 = vmax.f32 %v9868_v16, 0.0 }
 0xfe3   :  { %9869 = vrcp.f32 %v8282_v12 }
 0xfe4   :  { %v8377_v61 = vmin.f32 %v8345_v40, 1.0 }
 0xfe6   :  { %8409 = vst [vmem:[%s17129_s11 + $0xf0] sm:$0xff] %v8377_v61 }
 0xfe9   :  { %v9870_v59 = vpop.eup %9869 }
 0xfea   :  { %v8346_v38 = vmax.f32 %v9870_v59, 0.0 }
 0xfec   :  { %v8378_v11 = vmin.f32 %v8346_v38, 1.0 }
 0xfee   :  { %8410 = vst [vmem:[%s17129_s11 + $0xf8] sm:$0xff] %v8378_v11 }
 0xfef   :  { %8419 = vsyncpa [#allocation3], 1 }
 0xff0   :  { %8420 = vsyncpa [#allocation5], 1 }
 0xff1   :  { %8421 = vsyncpa [#allocation8], 1 }

</bundles_post_ra>
